<compile_context>
chip_gen: v6e
topology: v6e:2x2x1
jax: 0.10.0
libtpu: 0.0.40
codegen_flags: <defaults>
</compile_context>

<pallas_src>
import functools

import jax
import jax.numpy as jnp
from jax.experimental import pallas as pl
from jax.experimental.pallas import tpu as pltpu


# ----------------------------------------------------------------------------
# Kernel A: GroupNorm statistics -> per-channel (scale, shift), tiled over S
# ----------------------------------------------------------------------------
def _gn_stats_kernel(S, C, G, eps, x_ref, g_ref, b_ref, m_ref, mt_ref,
                     ss_ref, acc_ref):
    s = pl.program_id(1)

    @pl.when(s == 0)
    def _():
        acc_ref[...] = jnp.zeros_like(acc_ref)

    x = x_ref[...]                                       # (TS, C) f32
    s1 = jnp.sum(x, axis=0, keepdims=True)               # (1, C)
    s2 = jnp.sum(x * x, axis=0, keepdims=True)           # (1, C)
    acc_ref[...] += jnp.concatenate([s1, s2], axis=0)    # (2, C)

    @pl.when(s == pl.num_programs(1) - 1)
    def _():
        cnt = jnp.float32(S * (C // G))
        tot = acc_ref[...]
        # per-group stats via one-hot membership matmuls (no cross-lane reshape)
        mean_g = jnp.dot(tot[0:1, :], m_ref[...],
                         preferred_element_type=jnp.float32) / cnt       # (1, G)
        ex2_g = jnp.dot(tot[1:2, :], m_ref[...],
                        preferred_element_type=jnp.float32) / cnt        # (1, G)
        var_g = jnp.maximum(ex2_g - mean_g * mean_g, 0.0)                # clamp
        mean_c = jnp.dot(mean_g, mt_ref[...], preferred_element_type=jnp.float32)
        var_c = jnp.dot(var_g, mt_ref[...], preferred_element_type=jnp.float32)
        inv = jax.lax.rsqrt(var_c + eps)
        scale = inv * g_ref[...]                  # gamma / sqrt(var + eps)
        shift = b_ref[...] - mean_c * scale       # beta - mean * scale
        ss_ref[...] = jnp.concatenate([scale, shift], axis=0)            # (2, C)


def gn_scale_shift(x_bsc, gamma, beta, M, MT, s_tile, eps=1e-6):
    B, S, C = x_bsc.shape
    G = M.shape[1]
    assert S % s_tile == 0
    nS = S // s_tile
    kernel = functools.partial(_gn_stats_kernel, S, C, G, eps)
    return pl.pallas_call(
        kernel,
        out_shape=jax.ShapeDtypeStruct((B, 2, C), jnp.float32),
        grid=(B, nS),
        in_specs=[
            pl.BlockSpec((None, s_tile, C), lambda b, s: (b, s, 0)),
            pl.BlockSpec((1, C), lambda b, s: (0, 0)),
            pl.BlockSpec((1, C), lambda b, s: (0, 0)),
            pl.BlockSpec((C, G), lambda b, s: (0, 0)),
            pl.BlockSpec((G, C), lambda b, s: (0, 0)),
        ],
        out_specs=pl.BlockSpec((None, 2, C), lambda b, s: (b, 0, 0)),
        scratch_shapes=[pltpu.VMEM((2, C), jnp.float32)],
        compiler_params=pltpu.CompilerParams(
            dimension_semantics=("parallel", "arbitrary"),
            vmem_limit_bytes=64 * 1024 * 1024),
    )(x_bsc, gamma.reshape(1, C), beta.reshape(1, C), M, MT)


# ----------------------------------------------------------------------------
# Kernel B: fused GN-apply + SiLU + replicate-pad + 3x3x3 conv (+ residual),
#           tiled over (batch, D slabs); bf16 MXU operands, f32 accumulation.
# ----------------------------------------------------------------------------
def _gn_silu_conv_kernel(TD, H, W, Cin, Cout, with_residual,
                         xlo_ref, xmid_ref, xhi_ref, ss_ref, w_ref, bias_ref,
                         *rest):
    if with_residual:
        res_ref, o_ref, acc_ref = rest
    else:
        o_ref, acc_ref = rest

    scale = ss_ref[0:1, :].reshape(1, 1, 1, Cin)
    shift = ss_ref[1:2, :].reshape(1, 1, 1, Cin)

    # (TD+2, H, W, Cin) f32. The two D-halo planes come from clamped BlockSpec
    # element indices, which implements replicate padding along D for free.
    x = jnp.concatenate([xlo_ref[...], xmid_ref[...], xhi_ref[...]], axis=0)

    # GroupNorm (precomputed per-channel affine) + SiLU, then cast to bf16
    y = x * scale + shift
    y = (y * jax.nn.sigmoid(y)).astype(jnp.bfloat16)

    # replicate pad H and W inside VMEM (no HBM pad copy)
    y = jnp.concatenate([y[:, 0:1], y, y[:, H - 1:H]], axis=1)           # (TD+2, H+2, W,   C)
    y = jnp.concatenate([y[:, :, 0:1], y, y[:, :, W - 1:W]], axis=2)     # (TD+2, H+2, W+2, C)

    # fold the kw tap into the contraction dim: (TD+2, H+2, W, 3*Cin)
    p3 = jnp.concatenate([y[:, :, 0:W], y[:, :, 1:W + 1], y[:, :, 2:W + 2]],
                         axis=3)

    acc_ref[...] = jnp.zeros_like(acc_ref)
    for kd in range(3):
        for kh in range(3):
            patch = p3[kd:kd + TD, kh:kh + H].reshape(TD * H * W, 3 * Cin)
            acc_ref[...] += jnp.dot(patch, w_ref[kd * 3 + kh],
                                    preferred_element_type=jnp.float32)

    out = acc_ref[...] + bias_ref[...]                                   # (SB, Cout)
    if with_residual:
        out = out + res_ref[...]
    o_ref[...] = out


def gn_silu_conv3d(x_bdhwc, ss, w9, bias, residual=None, d_tile=None):
    B, D, H, W, Cin = x_bdhwc.shape
    Cout = w9.shape[-1]
    if d_tile is None:
        d_tile = D
    assert D % d_tile == 0
    TD = d_tile
    nD = D // TD
    S = D * H * W
    SB = TD * H * W

    with_residual = residual is not None
    kernel = functools.partial(_gn_silu_conv_kernel, TD, H, W, Cin, Cout,
                               with_residual)

    in_specs = [
        # halo plane below / middle slab / halo plane above of the same array;
        # halo indices are element indices (block size 1 along D), clamped to
        # [0, D-1] which is exactly replicate padding at the volume boundary.
        pl.BlockSpec((None, 1, H, W, Cin),
                     lambda b, d: (b, jnp.maximum(d * TD - 1, 0), 0, 0, 0)),
        pl.BlockSpec((None, TD, H, W, Cin), lambda b, d: (b, d, 0, 0, 0)),
        pl.BlockSpec((None, 1, H, W, Cin),
                     lambda b, d: (b, jnp.minimum(d * TD + TD, D - 1), 0, 0, 0)),
        pl.BlockSpec((None, 2, Cin), lambda b, d: (b, 0, 0)),
        pl.BlockSpec((9, 3 * Cin, Cout), lambda b, d: (0, 0, 0)),
        pl.BlockSpec((1, Cout), lambda b, d: (0, 0)),
    ]
    args = [x_bdhwc, x_bdhwc, x_bdhwc, ss, w9, bias.reshape(1, Cout)]
    if with_residual:
        in_specs.append(pl.BlockSpec((None, SB, Cout), lambda b, d: (b, d, 0)))
        args.append(residual)

    return pl.pallas_call(
        kernel,
        out_shape=jax.ShapeDtypeStruct((B, S, Cout), jnp.float32),
        grid=(B, nD),
        in_specs=in_specs,
        out_specs=pl.BlockSpec((None, SB, Cout), lambda b, d: (b, d, 0)),
        scratch_shapes=[pltpu.VMEM((SB, Cout), jnp.float32)],
        compiler_params=pltpu.CompilerParams(
            dimension_semantics=("parallel", "parallel"),
            vmem_limit_bytes=64 * 1024 * 1024),
    )(*args)


# ----------------------------------------------------------------------------
# ResBlock forward (Pallas)
# ----------------------------------------------------------------------------
def res_block_forward(x_ncdhw, params, num_groups, d_tile=None, s_tile=None):
    # TODO(synk): conv_shortcut branch (in_channels != out_channels) not
    # implemented; the reference module's norm2 uses in_channels so it only
    # runs when in == out.  (Dropout is defined but never called in forward.)
    B, C, D, H, W = x_ncdhw.shape
    G = num_groups
    assert C % G == 0
    Cg = C // G
    S = D * H * W
    if s_tile is None:
        s_tile = S
    if d_tile is None:
        d_tile = D

    # one-hot group-membership matrix (and transpose) for GN stats matmuls
    M = (jnp.arange(C)[:, None] // Cg == jnp.arange(G)[None, :]).astype(jnp.float32)
    MT = M.T

    x = jnp.transpose(x_ncdhw, (0, 2, 3, 4, 1))          # (B, D, H, W, C)
    x_bsc = x.reshape(B, S, C)

    # stage 1: GN1 stats, then fused GN1+SiLU+pad+conv1
    ss1 = gn_scale_shift(x_bsc, params["g1"], params["b1"], M, MT, s_tile)
    h = gn_silu_conv3d(x, ss1, params["w1"], params["bias1"],
                       residual=None, d_tile=d_tile)                   # (B, S, C)

    # stage 2: GN2 stats, then fused GN2+SiLU+pad+conv2 + residual add
    ss2 = gn_scale_shift(h, params["g2"], params["b2"], M, MT, s_tile)
    out = gn_silu_conv3d(h.reshape(B, D, H, W, C), ss2,
                         params["w2"], params["bias2"],
                         residual=x_bsc, d_tile=d_tile)                # (B, S, C)

    return jnp.transpose(out.reshape(B, D, H, W, C), (0, 4, 1, 2, 3))  # NCDHW


def torch_weight_to_mxu(w_oidhw):
    # (Cout, Cin, kd, kh, kw) -> (9, 3*Cin, Cout) bf16, tap = kd*3 + kh,
    # contraction row = kw*Cin + cin  (matches the in-kernel kw folding).
    w = jnp.transpose(w_oidhw, (2, 3, 4, 1, 0))          # (kd, kh, kw, Cin, Cout)
    Cin, Cout = w.shape[3], w.shape[4]
    return w.reshape(9, 3 * Cin, Cout).astype(jnp.bfloat16)


# ----------------------------------------------------------------------------
# Pure-JAX f32 reference (mirrors the PyTorch module) for correctness check
# ----------------------------------------------------------------------------
def ref_res_block(x, params, num_groups, eps=1e-6):
    def gn(x, gamma, beta):
        B, C, D, H, W = x.shape
        g = x.reshape(B, num_groups, C // num_groups, D, H, W)
        mean = g.mean(axis=(2, 3, 4, 5), keepdims=True)
        var = g.var(axis=(2, 3, 4, 5), keepdims=True)
        g = (g - mean) / jnp.sqrt(var + eps)
        g = g.reshape(B, C, D, H, W)
        return g * gamma[None, :, None, None, None] + beta[None, :, None, None, None]

    def conv(x, w_oidhw, b):
        xp = jnp.pad(x, ((0, 0), (0, 0), (1, 1), (1, 1), (1, 1)), mode="edge")
        y = jax.lax.conv_general_dilated(
            xp, w_oidhw, (1, 1, 1), "VALID",
            dimension_numbers=("NCDHW", "OIDHW", "NCDHW"))
        return y + b[None, :, None, None, None]

    h = gn(x, params["g1"], params["b1"])
    h = h * jax.nn.sigmoid(h)
    h = conv(h, params["w1_t"], params["bias1"])
    h = gn(h, params["g2"], params["b2"])
    h = h * jax.nn.sigmoid(h)
    h = conv(h, params["w2_t"], params["bias2"])
    return x + h


if __name__ == "__main__":
    # small shapes: batch=2, channels=8 (= in = out), depth=4, H=W=8, groups=4
    B, C, D, H, W = 2, 8, 4, 8, 8
    NUM_GROUPS = 4

    key = jax.random.PRNGKey(0)
    ks = jax.random.split(key, 9)

    x = jax.random.normal(ks[0], (B, C, D, H, W), dtype=jnp.float32)

    w1_t = 0.1 * jax.random.normal(ks[1], (C, C, 3, 3, 3), dtype=jnp.float32)
    bias1 = 0.1 * jax.random.normal(ks[2], (C,), dtype=jnp.float32)
    w2_t = 0.1 * jax.random.normal(ks[3], (C, C, 3, 3, 3), dtype=jnp.float32)
    bias2 = 0.1 * jax.random.normal(ks[4], (C,), dtype=jnp.float32)
    g1 = 1.0 + 0.05 * jax.random.normal(ks[5], (C,), dtype=jnp.float32)
    b1 = 0.05 * jax.random.normal(ks[6], (C,), dtype=jnp.float32)
    g2 = 1.0 + 0.05 * jax.random.normal(ks[7], (C,), dtype=jnp.float32)
    b2 = 0.05 * jax.random.normal(ks[8], (C,), dtype=jnp.float32)

    params = {
        "g1": g1, "b1": b1, "g2": g2, "b2": b2,
        "w1": torch_weight_to_mxu(w1_t), "bias1": bias1,
        "w2": torch_weight_to_mxu(w2_t), "bias2": bias2,
        "w1_t": w1_t, "w2_t": w2_t,
    }

    # d_tile=2 / s_tile=128 exercise the halo'd D-slab tiling and the tiled
    # GroupNorm reduction at these toy shapes.
    fwd = jax.jit(lambda x: res_block_forward(x, params, NUM_GROUPS,
                                              d_tile=2, s_tile=128))
    out = jax.block_until_ready(fwd(x))

    ref = jax.block_until_ready(ref_res_block(x, params, NUM_GROUPS))
    assert out.shape == (B, C, D, H, W)
    max_err = float(jnp.max(jnp.abs(out - ref)))
    # bf16 MXU operands -> bf16-level tolerance vs. the pure-f32 reference
    assert jnp.allclose(out, ref, rtol=2e-2, atol=2e-2), max_err

    print("KERNEL_OK")
</pallas_src>

<mosaic_0001>
module attributes {stable_mosaic.version = 11 : i64} {
  func.func @_gn_silu_conv_kernel(%arg0: i32, %arg1: i32, %arg2: memref<1x1x8x8x8xf32, #tpu.memory_space<vmem>>, %arg3: memref<1x2x8x8x8xf32, #tpu.memory_space<vmem>>, %arg4: memref<1x1x8x8x8xf32, #tpu.memory_space<vmem>>, %arg5: memref<1x2x8xf32, #tpu.memory_space<vmem>>, %arg6: memref<9x24x8xbf16, #tpu.memory_space<vmem>>, %arg7: memref<1x8xf32, #tpu.memory_space<vmem>>, %arg8: memref<1x128x8xf32, #tpu.memory_space<vmem>>, %arg9: memref<1x128x8xf32, #tpu.memory_space<vmem>>, %arg10: memref<128x8xf32, #tpu.memory_space<vmem>>) attributes {dimension_semantics = [#tpu.dimension_semantics<parallel>, #tpu.dimension_semantics<parallel>], iteration_bounds = array<i64: 2, 2>, scalar_prefetch = 0 : i64, scratch_operands = 1 : i64, tpu.core_type = #tpu.core_type<tc>, window_params = [{transform_indices = @transform_0, window_bounds = array<i64: 1, 1, 8, 8, 8>}, {transform_indices = @transform_1, window_bounds = array<i64: 1, 2, 8, 8, 8>}, {transform_indices = @transform_2, window_bounds = array<i64: 1, 1, 8, 8, 8>}, {transform_indices = @transform_3, window_bounds = array<i64: 1, 2, 8>}, {pipeline_mode = #tpu.pipeline_mode<synchronous>, transform_indices = @transform_4, window_bounds = array<i64: 9, 24, 8>}, {pipeline_mode = #tpu.pipeline_mode<synchronous>, transform_indices = @transform_5, window_bounds = array<i64: 1, 8>}, {transform_indices = @transform_6, window_bounds = array<i64: 1, 128, 8>}, {transform_indices = @transform_7, window_bounds = array<i64: 1, 128, 8>}]} {
    %c0 = arith.constant 0 : index
    %c0_0 = arith.constant 0 : index
    %c0_1 = arith.constant 0 : index
    %0 = vector.load %arg5[%c0, %c0_0, %c0_1] : memref<1x2x8xf32, #tpu.memory_space<vmem>>, vector<1x1x8xf32>
    %1 = vector.shape_cast %0 : vector<1x1x8xf32> to vector<1x8xf32>
    %2 = vector.shape_cast %1 : vector<1x8xf32> to vector<1x1x1x8xf32>
    %c0_2 = arith.constant 0 : index
    %c1 = arith.constant 1 : index
    %c0_3 = arith.constant 0 : index
    %3 = vector.load %arg5[%c0_2, %c1, %c0_3] : memref<1x2x8xf32, #tpu.memory_space<vmem>>, vector<1x1x8xf32>
    %4 = vector.shape_cast %3 : vector<1x1x8xf32> to vector<1x8xf32>
    %5 = vector.shape_cast %4 : vector<1x8xf32> to vector<1x1x1x8xf32>
    %c0_4 = arith.constant 0 : index
    %c0_5 = arith.constant 0 : index
    %c0_6 = arith.constant 0 : index
    %c0_7 = arith.constant 0 : index
    %c0_8 = arith.constant 0 : index
    %6 = vector.load %arg2[%c0_4, %c0_5, %c0_6, %c0_7, %c0_8] : memref<1x1x8x8x8xf32, #tpu.memory_space<vmem>>, vector<1x1x8x8x8xf32>
    %7 = vector.shape_cast %6 : vector<1x1x8x8x8xf32> to vector<1x8x8x8xf32>
    %c0_9 = arith.constant 0 : index
    %c0_10 = arith.constant 0 : index
    %c0_11 = arith.constant 0 : index
    %c0_12 = arith.constant 0 : index
    %c0_13 = arith.constant 0 : index
    %8 = vector.load %arg3[%c0_9, %c0_10, %c0_11, %c0_12, %c0_13] : memref<1x2x8x8x8xf32, #tpu.memory_space<vmem>>, vector<1x2x8x8x8xf32>
    %9 = vector.shape_cast %8 : vector<1x2x8x8x8xf32> to vector<2x8x8x8xf32>
    %c0_14 = arith.constant 0 : index
    %c0_15 = arith.constant 0 : index
    %c0_16 = arith.constant 0 : index
    %c0_17 = arith.constant 0 : index
    %c0_18 = arith.constant 0 : index
    %10 = vector.load %arg4[%c0_14, %c0_15, %c0_16, %c0_17, %c0_18] : memref<1x1x8x8x8xf32, #tpu.memory_space<vmem>>, vector<1x1x8x8x8xf32>
    %11 = vector.shape_cast %10 : vector<1x1x8x8x8xf32> to vector<1x8x8x8xf32>
    %12 = tpu.concatenate %7, %9, %11 in 0 : vector<1x8x8x8xf32>, vector<2x8x8x8xf32>, vector<1x8x8x8xf32> -> vector<4x8x8x8xf32>
    %13 = vector.broadcast %2 : vector<1x1x1x8xf32> to vector<4x8x8x8xf32>
    %14 = arith.mulf %12, %13 : vector<4x8x8x8xf32>
    %15 = vector.broadcast %5 : vector<1x1x1x8xf32> to vector<4x8x8x8xf32>
    %16 = arith.addf %14, %15 : vector<4x8x8x8xf32>
    %17 = arith.negf %16 : vector<4x8x8x8xf32>
    %18 = math.exp %17 : vector<4x8x8x8xf32>
    %cst = arith.constant 1.000000e+00 : f32
    %19 = vector.broadcast %cst : f32 to vector<4x8x8x8xf32>
    %20 = arith.addf %19, %18 : vector<4x8x8x8xf32>
    %21 = arith.divf %19, %20 : vector<4x8x8x8xf32>
    %22 = arith.mulf %16, %21 : vector<4x8x8x8xf32>
    %23 = arith.truncf %22 : vector<4x8x8x8xf32> to vector<4x8x8x8xbf16>
    %24 = vector.extract_strided_slice %23 {offsets = [0, 0, 0, 0], sizes = [4, 1, 8, 8], strides = [1, 1, 1, 1]} : vector<4x8x8x8xbf16> to vector<4x1x8x8xbf16>
    %25 = vector.extract_strided_slice %23 {offsets = [0, 7, 0, 0], sizes = [4, 1, 8, 8], strides = [1, 1, 1, 1]} : vector<4x8x8x8xbf16> to vector<4x1x8x8xbf16>
    %26 = tpu.concatenate %24, %23, %25 in 1 : vector<4x1x8x8xbf16>, vector<4x8x8x8xbf16>, vector<4x1x8x8xbf16> -> vector<4x10x8x8xbf16>
    %27 = vector.extract_strided_slice %26 {offsets = [0, 0, 0, 0], sizes = [4, 10, 1, 8], strides = [1, 1, 1, 1]} : vector<4x10x8x8xbf16> to vector<4x10x1x8xbf16>
    %28 = vector.extract_strided_slice %26 {offsets = [0, 0, 7, 0], sizes = [4, 10, 1, 8], strides = [1, 1, 1, 1]} : vector<4x10x8x8xbf16> to vector<4x10x1x8xbf16>
    %29 = tpu.concatenate %27, %26, %28 in 2 : vector<4x10x1x8xbf16>, vector<4x10x8x8xbf16>, vector<4x10x1x8xbf16> -> vector<4x10x10x8xbf16>
    %30 = vector.extract_strided_slice %29 {offsets = [0, 0, 0, 0], sizes = [4, 10, 8, 8], strides = [1, 1, 1, 1]} : vector<4x10x10x8xbf16> to vector<4x10x8x8xbf16>
    %31 = vector.extract_strided_slice %29 {offsets = [0, 0, 1, 0], sizes = [4, 10, 8, 8], strides = [1, 1, 1, 1]} : vector<4x10x10x8xbf16> to vector<4x10x8x8xbf16>
    %32 = vector.extract_strided_slice %29 {offsets = [0, 0, 2, 0], sizes = [4, 10, 8, 8], strides = [1, 1, 1, 1]} : vector<4x10x10x8xbf16> to vector<4x10x8x8xbf16>
    %33 = tpu.concatenate %30, %31, %32 in 3 : vector<4x10x8x8xbf16>, vector<4x10x8x8xbf16>, vector<4x10x8x8xbf16> -> vector<4x10x8x24xbf16>
    %cst_19 = arith.constant 0.000000e+00 : f32
    %34 = vector.broadcast %cst_19 : f32 to vector<128x8xf32>
    %c0_20 = arith.constant 0 : index
    %c0_21 = arith.constant 0 : index
    %35 = vector.load %arg10[%c0_20, %c0_21] : memref<128x8xf32, #tpu.memory_space<vmem>>, vector<128x8xf32>
    tpu.vector_store %arg10[%c0_20, %c0_21], %34 {strides = array<i32>} : memref<128x8xf32, #tpu.memory_space<vmem>>, vector<128x8xf32>,
    %36 = vector.extract_strided_slice %33 {offsets = [0, 0, 0, 0], sizes = [2, 8, 8, 24], strides = [1, 1, 1, 1]} : vector<4x10x8x24xbf16> to vector<2x8x8x24xbf16>
    %37 = vector.shape_cast %36 : vector<2x8x8x24xbf16> to vector<128x24xbf16>
    %c0_22 = arith.constant 0 : index
    %c0_23 = arith.constant 0 : index
    %38 = vector.load %arg10[%c0_22, %c0_23] : memref<128x8xf32, #tpu.memory_space<vmem>>, vector<128x8xf32>
    %c0_24 = arith.constant 0 : index
    %c0_25 = arith.constant 0 : index
    %c0_26 = arith.constant 0 : index
    %39 = vector.load %arg6[%c0_24, %c0_25, %c0_26] : memref<9x24x8xbf16, #tpu.memory_space<vmem>>, vector<1x24x8xbf16>
    %40 = vector.shape_cast %39 : vector<1x24x8xbf16> to vector<24x8xbf16>
    %cst_27 = arith.constant dense<0.000000e+00> : vector<128x8xf32>
    %41 = tpu.matmul %37, %40, %cst_27 {dimension_numbers = #tpu.dot_dimension_numbers<[1], [0], [0], [1], [0, 0, 1, 1], [], []>} : vector<128x24xbf16>, vector<24x8xbf16>, vector<128x8xf32> -> vector<128x8xf32>
    %42 = arith.addf %38, %41 : vector<128x8xf32>
    %c0_28 = arith.constant 0 : index
    %c0_29 = arith.constant 0 : index
    %43 = vector.load %arg10[%c0_28, %c0_29] : memref<128x8xf32, #tpu.memory_space<vmem>>, vector<128x8xf32>
    tpu.vector_store %arg10[%c0_28, %c0_29], %42 {strides = array<i32>} : memref<128x8xf32, #tpu.memory_space<vmem>>, vector<128x8xf32>,
    %44 = vector.extract_strided_slice %33 {offsets = [0, 1, 0, 0], sizes = [2, 8, 8, 24], strides = [1, 1, 1, 1]} : vector<4x10x8x24xbf16> to vector<2x8x8x24xbf16>
    %45 = vector.shape_cast %44 : vector<2x8x8x24xbf16> to vector<128x24xbf16>
    %c0_30 = arith.constant 0 : index
    %c0_31 = arith.constant 0 : index
    %46 = vector.load %arg10[%c0_30, %c0_31] : memref<128x8xf32, #tpu.memory_space<vmem>>, vector<128x8xf32>
    %c1_32 = arith.constant 1 : index
    %c0_33 = arith.constant 0 : index
    %c0_34 = arith.constant 0 : index
    %47 = vector.load %arg6[%c1_32, %c0_33, %c0_34] : memref<9x24x8xbf16, #tpu.memory_space<vmem>>, vector<1x24x8xbf16>
    %48 = vector.shape_cast %47 : vector<1x24x8xbf16> to vector<24x8xbf16>
    %cst_35 = arith.constant dense<0.000000e+00> : vector<128x8xf32>
    %49 = tpu.matmul %45, %48, %cst_35 {dimension_numbers = #tpu.dot_dimension_numbers<[1], [0], [0], [1], [0, 0, 1, 1], [], []>} : vector<128x24xbf16>, vector<24x8xbf16>, vector<128x8xf32> -> vector<128x8xf32>
    %50 = arith.addf %46, %49 : vector<128x8xf32>
    %c0_36 = arith.constant 0 : index
    %c0_37 = arith.constant 0 : index
    %51 = vector.load %arg10[%c0_36, %c0_37] : memref<128x8xf32, #tpu.memory_space<vmem>>, vector<128x8xf32>
    tpu.vector_store %arg10[%c0_36, %c0_37], %50 {strides = array<i32>} : memref<128x8xf32, #tpu.memory_space<vmem>>, vector<128x8xf32>,
    %52 = vector.extract_strided_slice %33 {offsets = [0, 2, 0, 0], sizes = [2, 8, 8, 24], strides = [1, 1, 1, 1]} : vector<4x10x8x24xbf16> to vector<2x8x8x24xbf16>
    %53 = vector.shape_cast %52 : vector<2x8x8x24xbf16> to vector<128x24xbf16>
    %c0_38 = arith.constant 0 : index
    %c0_39 = arith.constant 0 : index
    %54 = vector.load %arg10[%c0_38, %c0_39] : memref<128x8xf32, #tpu.memory_space<vmem>>, vector<128x8xf32>
    %c2 = arith.constant 2 : index
    %c0_40 = arith.constant 0 : index
    %c0_41 = arith.constant 0 : index
    %55 = vector.load %arg6[%c2, %c0_40, %c0_41] : memref<9x24x8xbf16, #tpu.memory_space<vmem>>, vector<1x24x8xbf16>
    %56 = vector.shape_cast %55 : vector<1x24x8xbf16> to vector<24x8xbf16>
    %cst_42 = arith.constant dense<0.000000e+00> : vector<128x8xf32>
    %57 = tpu.matmul %53, %56, %cst_42 {dimension_numbers = #tpu.dot_dimension_numbers<[1], [0], [0], [1], [0, 0, 1, 1], [], []>} : vector<128x24xbf16>, vector<24x8xbf16>, vector<128x8xf32> -> vector<128x8xf32>
    %58 = arith.addf %54, %57 : vector<128x8xf32>
    %c0_43 = arith.constant 0 : index
    %c0_44 = arith.constant 0 : index
    %59 = vector.load %arg10[%c0_43, %c0_44] : memref<128x8xf32, #tpu.memory_space<vmem>>, vector<128x8xf32>
    tpu.vector_store %arg10[%c0_43, %c0_44], %58 {strides = array<i32>} : memref<128x8xf32, #tpu.memory_space<vmem>>, vector<128x8xf32>,
    %60 = vector.extract_strided_slice %33 {offsets = [1, 0, 0, 0], sizes = [2, 8, 8, 24], strides = [1, 1, 1, 1]} : vector<4x10x8x24xbf16> to vector<2x8x8x24xbf16>
    %61 = vector.shape_cast %60 : vector<2x8x8x24xbf16> to vector<128x24xbf16>
    %c0_45 = arith.constant 0 : index
    %c0_46 = arith.constant 0 : index
    %62 = vector.load %arg10[%c0_45, %c0_46] : memref<128x8xf32, #tpu.memory_space<vmem>>, vector<128x8xf32>
    %c3 = arith.constant 3 : index
    %c0_47 = arith.constant 0 : index
    %c0_48 = arith.constant 0 : index
    %63 = vector.load %arg6[%c3, %c0_47, %c0_48] : memref<9x24x8xbf16, #tpu.memory_space<vmem>>, vector<1x24x8xbf16>
    %64 = vector.shape_cast %63 : vector<1x24x8xbf16> to vector<24x8xbf16>
    %cst_49 = arith.constant dense<0.000000e+00> : vector<128x8xf32>
    %65 = tpu.matmul %61, %64, %cst_49 {dimension_numbers = #tpu.dot_dimension_numbers<[1], [0], [0], [1], [0, 0, 1, 1], [], []>} : vector<128x24xbf16>, vector<24x8xbf16>, vector<128x8xf32> -> vector<128x8xf32>
    %66 = arith.addf %62, %65 : vector<128x8xf32>
    %c0_50 = arith.constant 0 : index
    %c0_51 = arith.constant 0 : index
    %67 = vector.load %arg10[%c0_50, %c0_51] : memref<128x8xf32, #tpu.memory_space<vmem>>, vector<128x8xf32>
    tpu.vector_store %arg10[%c0_50, %c0_51], %66 {strides = array<i32>} : memref<128x8xf32, #tpu.memory_space<vmem>>, vector<128x8xf32>,
    %68 = vector.extract_strided_slice %33 {offsets = [1, 1, 0, 0], sizes = [2, 8, 8, 24], strides = [1, 1, 1, 1]} : vector<4x10x8x24xbf16> to vector<2x8x8x24xbf16>
    %69 = vector.shape_cast %68 : vector<2x8x8x24xbf16> to vector<128x24xbf16>
    %c0_52 = arith.constant 0 : index
    %c0_53 = arith.constant 0 : index
    %70 = vector.load %arg10[%c0_52, %c0_53] : memref<128x8xf32, #tpu.memory_space<vmem>>, vector<128x8xf32>
    %c4 = arith.constant 4 : index
    %c0_54 = arith.constant 0 : index
    %c0_55 = arith.constant 0 : index
    %71 = vector.load %arg6[%c4, %c0_54, %c0_55] : memref<9x24x8xbf16, #tpu.memory_space<vmem>>, vector<1x24x8xbf16>
    %72 = vector.shape_cast %71 : vector<1x24x8xbf16> to vector<24x8xbf16>
    %cst_56 = arith.constant dense<0.000000e+00> : vector<128x8xf32>
    %73 = tpu.matmul %69, %72, %cst_56 {dimension_numbers = #tpu.dot_dimension_numbers<[1], [0], [0], [1], [0, 0, 1, 1], [], []>} : vector<128x24xbf16>, vector<24x8xbf16>, vector<128x8xf32> -> vector<128x8xf32>
    %74 = arith.addf %70, %73 : vector<128x8xf32>
    %c0_57 = arith.constant 0 : index
    %c0_58 = arith.constant 0 : index
    %75 = vector.load %arg10[%c0_57, %c0_58] : memref<128x8xf32, #tpu.memory_space<vmem>>, vector<128x8xf32>
    tpu.vector_store %arg10[%c0_57, %c0_58], %74 {strides = array<i32>} : memref<128x8xf32, #tpu.memory_space<vmem>>, vector<128x8xf32>,
    %76 = vector.extract_strided_slice %33 {offsets = [1, 2, 0, 0], sizes = [2, 8, 8, 24], strides = [1, 1, 1, 1]} : vector<4x10x8x24xbf16> to vector<2x8x8x24xbf16>
    %77 = vector.shape_cast %76 : vector<2x8x8x24xbf16> to vector<128x24xbf16>
    %c0_59 = arith.constant 0 : index
    %c0_60 = arith.constant 0 : index
    %78 = vector.load %arg10[%c0_59, %c0_60] : memref<128x8xf32, #tpu.memory_space<vmem>>, vector<128x8xf32>
    %c5 = arith.constant 5 : index
    %c0_61 = arith.constant 0 : index
    %c0_62 = arith.constant 0 : index
    %79 = vector.load %arg6[%c5, %c0_61, %c0_62] : memref<9x24x8xbf16, #tpu.memory_space<vmem>>, vector<1x24x8xbf16>
    %80 = vector.shape_cast %79 : vector<1x24x8xbf16> to vector<24x8xbf16>
    %cst_63 = arith.constant dense<0.000000e+00> : vector<128x8xf32>
    %81 = tpu.matmul %77, %80, %cst_63 {dimension_numbers = #tpu.dot_dimension_numbers<[1], [0], [0], [1], [0, 0, 1, 1], [], []>} : vector<128x24xbf16>, vector<24x8xbf16>, vector<128x8xf32> -> vector<128x8xf32>
    %82 = arith.addf %78, %81 : vector<128x8xf32>
    %c0_64 = arith.constant 0 : index
    %c0_65 = arith.constant 0 : index
    %83 = vector.load %arg10[%c0_64, %c0_65] : memref<128x8xf32, #tpu.memory_space<vmem>>, vector<128x8xf32>
    tpu.vector_store %arg10[%c0_64, %c0_65], %82 {strides = array<i32>} : memref<128x8xf32, #tpu.memory_space<vmem>>, vector<128x8xf32>,
    %84 = vector.extract_strided_slice %33 {offsets = [2, 0, 0, 0], sizes = [2, 8, 8, 24], strides = [1, 1, 1, 1]} : vector<4x10x8x24xbf16> to vector<2x8x8x24xbf16>
    %85 = vector.shape_cast %84 : vector<2x8x8x24xbf16> to vector<128x24xbf16>
    %c0_66 = arith.constant 0 : index
    %c0_67 = arith.constant 0 : index
    %86 = vector.load %arg10[%c0_66, %c0_67] : memref<128x8xf32, #tpu.memory_space<vmem>>, vector<128x8xf32>
    %c6 = arith.constant 6 : index
    %c0_68 = arith.constant 0 : index
    %c0_69 = arith.constant 0 : index
    %87 = vector.load %arg6[%c6, %c0_68, %c0_69] : memref<9x24x8xbf16, #tpu.memory_space<vmem>>, vector<1x24x8xbf16>
    %88 = vector.shape_cast %87 : vector<1x24x8xbf16> to vector<24x8xbf16>
    %cst_70 = arith.constant dense<0.000000e+00> : vector<128x8xf32>
    %89 = tpu.matmul %85, %88, %cst_70 {dimension_numbers = #tpu.dot_dimension_numbers<[1], [0], [0], [1], [0, 0, 1, 1], [], []>} : vector<128x24xbf16>, vector<24x8xbf16>, vector<128x8xf32> -> vector<128x8xf32>
    %90 = arith.addf %86, %89 : vector<128x8xf32>
    %c0_71 = arith.constant 0 : index
    %c0_72 = arith.constant 0 : index
    %91 = vector.load %arg10[%c0_71, %c0_72] : memref<128x8xf32, #tpu.memory_space<vmem>>, vector<128x8xf32>
    tpu.vector_store %arg10[%c0_71, %c0_72], %90 {strides = array<i32>} : memref<128x8xf32, #tpu.memory_space<vmem>>, vector<128x8xf32>,
    %92 = vector.extract_strided_slice %33 {offsets = [2, 1, 0, 0], sizes = [2, 8, 8, 24], strides = [1, 1, 1, 1]} : vector<4x10x8x24xbf16> to vector<2x8x8x24xbf16>
    %93 = vector.shape_cast %92 : vector<2x8x8x24xbf16> to vector<128x24xbf16>
    %c0_73 = arith.constant 0 : index
    %c0_74 = arith.constant 0 : index
    %94 = vector.load %arg10[%c0_73, %c0_74] : memref<128x8xf32, #tpu.memory_space<vmem>>, vector<128x8xf32>
    %c7 = arith.constant 7 : index
    %c0_75 = arith.constant 0 : index
    %c0_76 = arith.constant 0 : index
    %95 = vector.load %arg6[%c7, %c0_75, %c0_76] : memref<9x24x8xbf16, #tpu.memory_space<vmem>>, vector<1x24x8xbf16>
    %96 = vector.shape_cast %95 : vector<1x24x8xbf16> to vector<24x8xbf16>
    %cst_77 = arith.constant dense<0.000000e+00> : vector<128x8xf32>
    %97 = tpu.matmul %93, %96, %cst_77 {dimension_numbers = #tpu.dot_dimension_numbers<[1], [0], [0], [1], [0, 0, 1, 1], [], []>} : vector<128x24xbf16>, vector<24x8xbf16>, vector<128x8xf32> -> vector<128x8xf32>
    %98 = arith.addf %94, %97 : vector<128x8xf32>
    %c0_78 = arith.constant 0 : index
    %c0_79 = arith.constant 0 : index
    %99 = vector.load %arg10[%c0_78, %c0_79] : memref<128x8xf32, #tpu.memory_space<vmem>>, vector<128x8xf32>
    tpu.vector_store %arg10[%c0_78, %c0_79], %98 {strides = array<i32>} : memref<128x8xf32, #tpu.memory_space<vmem>>, vector<128x8xf32>,
    %100 = vector.extract_strided_slice %33 {offsets = [2, 2, 0, 0], sizes = [2, 8, 8, 24], strides = [1, 1, 1, 1]} : vector<4x10x8x24xbf16> to vector<2x8x8x24xbf16>
    %101 = vector.shape_cast %100 : vector<2x8x8x24xbf16> to vector<128x24xbf16>
    %c0_80 = arith.constant 0 : index
    %c0_81 = arith.constant 0 : index
    %102 = vector.load %arg10[%c0_80, %c0_81] : memref<128x8xf32, #tpu.memory_space<vmem>>, vector<128x8xf32>
    %c8 = arith.constant 8 : index
    %c0_82 = arith.constant 0 : index
    %c0_83 = arith.constant 0 : index
    %103 = vector.load %arg6[%c8, %c0_82, %c0_83] : memref<9x24x8xbf16, #tpu.memory_space<vmem>>, vector<1x24x8xbf16>
    %104 = vector.shape_cast %103 : vector<1x24x8xbf16> to vector<24x8xbf16>
    %cst_84 = arith.constant dense<0.000000e+00> : vector<128x8xf32>
    %105 = tpu.matmul %101, %104, %cst_84 {dimension_numbers = #tpu.dot_dimension_numbers<[1], [0], [0], [1], [0, 0, 1, 1], [], []>} : vector<128x24xbf16>, vector<24x8xbf16>, vector<128x8xf32> -> vector<128x8xf32>
    %106 = arith.addf %102, %105 : vector<128x8xf32>
    %c0_85 = arith.constant 0 : index
    %c0_86 = arith.constant 0 : index
    %107 = vector.load %arg10[%c0_85, %c0_86] : memref<128x8xf32, #tpu.memory_space<vmem>>, vector<128x8xf32>
    tpu.vector_store %arg10[%c0_85, %c0_86], %106 {strides = array<i32>} : memref<128x8xf32, #tpu.memory_space<vmem>>, vector<128x8xf32>,
    %c0_87 = arith.constant 0 : index
    %c0_88 = arith.constant 0 : index
    %108 = vector.load %arg10[%c0_87, %c0_88] : memref<128x8xf32, #tpu.memory_space<vmem>>, vector<128x8xf32>
    %c0_89 = arith.constant 0 : index
    %c0_90 = arith.constant 0 : index
    %109 = vector.load %arg7[%c0_89, %c0_90] : memref<1x8xf32, #tpu.memory_space<vmem>>, vector<1x8xf32>
    %110 = vector.broadcast %109 : vector<1x8xf32> to vector<128x8xf32>
    %111 = arith.addf %108, %110 : vector<128x8xf32>
    %c0_91 = arith.constant 0 : index
    %c0_92 = arith.constant 0 : index
    %c0_93 = arith.constant 0 : index
    %112 = vector.load %arg8[%c0_91, %c0_92, %c0_93] : memref<1x128x8xf32, #tpu.memory_space<vmem>>, vector<1x128x8xf32>
    %113 = vector.shape_cast %112 : vector<1x128x8xf32> to vector<128x8xf32>
    %114 = arith.addf %111, %113 : vector<128x8xf32>
    %c0_94 = arith.constant 0 : index
    %c0_95 = arith.constant 0 : index
    %c0_96 = arith.constant 0 : index
    %115 = vector.load %arg9[%c0_94, %c0_95, %c0_96] : memref<1x128x8xf32, #tpu.memory_space<vmem>>, vector<1x128x8xf32>
    %116 = vector.shape_cast %115 : vector<1x128x8xf32> to vector<128x8xf32>
    %117 = vector.shape_cast %114 : vector<128x8xf32> to vector<1x128x8xf32>
    tpu.vector_store %arg9[%c0_94, %c0_95, %c0_96], %117 {strides = array<i32>} : memref<1x128x8xf32, #tpu.memory_space<vmem>>, vector<1x128x8xf32>,
    return
  }
  func.func @transform_0(%arg0: i32, %arg1: i32) -> (i32, i32, i32, i32, i32) {
    %c2_i32 = arith.constant 2 : i32
    %0 = arith.muli %arg1, %c2_i32 : i32
    %c1_i32 = arith.constant 1 : i32
    %1 = arith.subi %0, %c1_i32 : i32
    %c0_i32 = arith.constant 0 : i32
    %2 = arith.maxsi %1, %c0_i32 : i32
    %c0_i32_0 = arith.constant 0 : i32
    %c0_i32_1 = arith.constant 0 : i32
    %c0_i32_2 = arith.constant 0 : i32
    %c0_i32_3 = arith.constant 0 : i32
    return %arg0, %2, %c0_i32_0, %c0_i32_1, %c0_i32_2 : i32, i32, i32, i32, i32
  }
  func.func @transform_1(%arg0: i32, %arg1: i32) -> (i32, i32, i32, i32, i32) {
    %c0_i32 = arith.constant 0 : i32
    %c0_i32_0 = arith.constant 0 : i32
    %c0_i32_1 = arith.constant 0 : i32
    %c0_i32_2 = arith.constant 0 : i32
    return %arg0, %arg1, %c0_i32, %c0_i32_0, %c0_i32_1 : i32, i32, i32, i32, i32
  }
  func.func @transform_2(%arg0: i32, %arg1: i32) -> (i32, i32, i32, i32, i32) {
    %c2_i32 = arith.constant 2 : i32
    %0 = arith.muli %arg1, %c2_i32 : i32
    %c2_i32_0 = arith.constant 2 : i32
    %1 = arith.addi %0, %c2_i32_0 : i32
    %c3_i32 = arith.constant 3 : i32
    %2 = arith.minsi %1, %c3_i32 : i32
    %c0_i32 = arith.constant 0 : i32
    %c0_i32_1 = arith.constant 0 : i32
    %c0_i32_2 = arith.constant 0 : i32
    %c0_i32_3 = arith.constant 0 : i32
    return %arg0, %2, %c0_i32, %c0_i32_1, %c0_i32_2 : i32, i32, i32, i32, i32
  }
  func.func @transform_3(%arg0: i32, %arg1: i32) -> (i32, i32, i32) {
    %c0_i32 = arith.constant 0 : i32
    %c0_i32_0 = arith.constant 0 : i32
    %c0_i32_1 = arith.constant 0 : i32
    return %arg0, %c0_i32, %c0_i32_0 : i32, i32, i32
  }
  func.func @transform_4(%arg0: i32, %arg1: i32) -> (i32, i32, i32) {
    %c0_i32 = arith.constant 0 : i32
    %c0_i32_0 = arith.constant 0 : i32
    %c0_i32_1 = arith.constant 0 : i32
    %c0_i32_2 = arith.constant 0 : i32
    return %c0_i32, %c0_i32_0, %c0_i32_1 : i32, i32, i32
  }
  func.func @transform_5(%arg0: i32, %arg1: i32) -> (i32, i32) {
    %c0_i32 = arith.constant 0 : i32
    %c0_i32_0 = arith.constant 0 : i32
    %c0_i32_1 = arith.constant 0 : i32
    return %c0_i32, %c0_i32_0 : i32, i32
  }
  func.func @transform_6(%arg0: i32, %arg1: i32) -> (i32, i32, i32) {
    %c0_i32 = arith.constant 0 : i32
    %c0_i32_0 = arith.constant 0 : i32
    return %arg0, %arg1, %c0_i32 : i32, i32, i32
  }
  func.func @transform_7(%arg0: i32, %arg1: i32) -> (i32, i32, i32) {
    %c0_i32 = arith.constant 0 : i32
    %c0_i32_0 = arith.constant 0 : i32
    return %arg0, %arg1, %c0_i32 : i32, i32, i32
  }
}

module attributes {stable_mosaic.version = 11 : i64} {
  func.func @_gn_silu_conv_kernel(%arg0: i32, %arg1: i32, %arg2: memref<1x1x8x8x8xf32, #tpu.memory_space<vmem>>, %arg3: memref<1x2x8x8x8xf32, #tpu.memory_space<vmem>>, %arg4: memref<1x1x8x8x8xf32, #tpu.memory_space<vmem>>, %arg5: memref<1x2x8xf32, #tpu.memory_space<vmem>>, %arg6: memref<9x24x8xbf16, #tpu.memory_space<vmem>>, %arg7: memref<1x8xf32, #tpu.memory_space<vmem>>, %arg8: memref<1x128x8xf32, #tpu.memory_space<vmem>>, %arg9: memref<128x8xf32, #tpu.memory_space<vmem>>) attributes {dimension_semantics = [#tpu.dimension_semantics<parallel>, #tpu.dimension_semantics<parallel>], iteration_bounds = array<i64: 2, 2>, scalar_prefetch = 0 : i64, scratch_operands = 1 : i64, tpu.core_type = #tpu.core_type<tc>, window_params = [{transform_indices = @transform_0, window_bounds = array<i64: 1, 1, 8, 8, 8>}, {transform_indices = @transform_1, window_bounds = array<i64: 1, 2, 8, 8, 8>}, {transform_indices = @transform_2, window_bounds = array<i64: 1, 1, 8, 8, 8>}, {transform_indices = @transform_3, window_bounds = array<i64: 1, 2, 8>}, {pipeline_mode = #tpu.pipeline_mode<synchronous>, transform_indices = @transform_4, window_bounds = array<i64: 9, 24, 8>}, {pipeline_mode = #tpu.pipeline_mode<synchronous>, transform_indices = @transform_5, window_bounds = array<i64: 1, 8>}, {transform_indices = @transform_6, window_bounds = array<i64: 1, 128, 8>}]} {
    %c0 = arith.constant 0 : index
    %c0_0 = arith.constant 0 : index
    %c0_1 = arith.constant 0 : index
    %0 = vector.load %arg5[%c0, %c0_0, %c0_1] : memref<1x2x8xf32, #tpu.memory_space<vmem>>, vector<1x1x8xf32>
    %1 = vector.shape_cast %0 : vector<1x1x8xf32> to vector<1x8xf32>
    %2 = vector.shape_cast %1 : vector<1x8xf32> to vector<1x1x1x8xf32>
    %c0_2 = arith.constant 0 : index
    %c1 = arith.constant 1 : index
    %c0_3 = arith.constant 0 : index
    %3 = vector.load %arg5[%c0_2, %c1, %c0_3] : memref<1x2x8xf32, #tpu.memory_space<vmem>>, vector<1x1x8xf32>
    %4 = vector.shape_cast %3 : vector<1x1x8xf32> to vector<1x8xf32>
    %5 = vector.shape_cast %4 : vector<1x8xf32> to vector<1x1x1x8xf32>
    %c0_4 = arith.constant 0 : index
    %c0_5 = arith.constant 0 : index
    %c0_6 = arith.constant 0 : index
    %c0_7 = arith.constant 0 : index
    %c0_8 = arith.constant 0 : index
    %6 = vector.load %arg2[%c0_4, %c0_5, %c0_6, %c0_7, %c0_8] : memref<1x1x8x8x8xf32, #tpu.memory_space<vmem>>, vector<1x1x8x8x8xf32>
    %7 = vector.shape_cast %6 : vector<1x1x8x8x8xf32> to vector<1x8x8x8xf32>
    %c0_9 = arith.constant 0 : index
    %c0_10 = arith.constant 0 : index
    %c0_11 = arith.constant 0 : index
    %c0_12 = arith.constant 0 : index
    %c0_13 = arith.constant 0 : index
    %8 = vector.load %arg3[%c0_9, %c0_10, %c0_11, %c0_12, %c0_13] : memref<1x2x8x8x8xf32, #tpu.memory_space<vmem>>, vector<1x2x8x8x8xf32>
    %9 = vector.shape_cast %8 : vector<1x2x8x8x8xf32> to vector<2x8x8x8xf32>
    %c0_14 = arith.constant 0 : index
    %c0_15 = arith.constant 0 : index
    %c0_16 = arith.constant 0 : index
    %c0_17 = arith.constant 0 : index
    %c0_18 = arith.constant 0 : index
    %10 = vector.load %arg4[%c0_14, %c0_15, %c0_16, %c0_17, %c0_18] : memref<1x1x8x8x8xf32, #tpu.memory_space<vmem>>, vector<1x1x8x8x8xf32>
    %11 = vector.shape_cast %10 : vector<1x1x8x8x8xf32> to vector<1x8x8x8xf32>
    %12 = tpu.concatenate %7, %9, %11 in 0 : vector<1x8x8x8xf32>, vector<2x8x8x8xf32>, vector<1x8x8x8xf32> -> vector<4x8x8x8xf32>
    %13 = vector.broadcast %2 : vector<1x1x1x8xf32> to vector<4x8x8x8xf32>
    %14 = arith.mulf %12, %13 : vector<4x8x8x8xf32>
    %15 = vector.broadcast %5 : vector<1x1x1x8xf32> to vector<4x8x8x8xf32>
    %16 = arith.addf %14, %15 : vector<4x8x8x8xf32>
    %17 = arith.negf %16 : vector<4x8x8x8xf32>
    %18 = math.exp %17 : vector<4x8x8x8xf32>
    %cst = arith.constant 1.000000e+00 : f32
    %19 = vector.broadcast %cst : f32 to vector<4x8x8x8xf32>
    %20 = arith.addf %19, %18 : vector<4x8x8x8xf32>
    %21 = arith.divf %19, %20 : vector<4x8x8x8xf32>
    %22 = arith.mulf %16, %21 : vector<4x8x8x8xf32>
    %23 = arith.truncf %22 : vector<4x8x8x8xf32> to vector<4x8x8x8xbf16>
    %24 = vector.extract_strided_slice %23 {offsets = [0, 0, 0, 0], sizes = [4, 1, 8, 8], strides = [1, 1, 1, 1]} : vector<4x8x8x8xbf16> to vector<4x1x8x8xbf16>
    %25 = vector.extract_strided_slice %23 {offsets = [0, 7, 0, 0], sizes = [4, 1, 8, 8], strides = [1, 1, 1, 1]} : vector<4x8x8x8xbf16> to vector<4x1x8x8xbf16>
    %26 = tpu.concatenate %24, %23, %25 in 1 : vector<4x1x8x8xbf16>, vector<4x8x8x8xbf16>, vector<4x1x8x8xbf16> -> vector<4x10x8x8xbf16>
    %27 = vector.extract_strided_slice %26 {offsets = [0, 0, 0, 0], sizes = [4, 10, 1, 8], strides = [1, 1, 1, 1]} : vector<4x10x8x8xbf16> to vector<4x10x1x8xbf16>
    %28 = vector.extract_strided_slice %26 {offsets = [0, 0, 7, 0], sizes = [4, 10, 1, 8], strides = [1, 1, 1, 1]} : vector<4x10x8x8xbf16> to vector<4x10x1x8xbf16>
    %29 = tpu.concatenate %27, %26, %28 in 2 : vector<4x10x1x8xbf16>, vector<4x10x8x8xbf16>, vector<4x10x1x8xbf16> -> vector<4x10x10x8xbf16>
    %30 = vector.extract_strided_slice %29 {offsets = [0, 0, 0, 0], sizes = [4, 10, 8, 8], strides = [1, 1, 1, 1]} : vector<4x10x10x8xbf16> to vector<4x10x8x8xbf16>
    %31 = vector.extract_strided_slice %29 {offsets = [0, 0, 1, 0], sizes = [4, 10, 8, 8], strides = [1, 1, 1, 1]} : vector<4x10x10x8xbf16> to vector<4x10x8x8xbf16>
    %32 = vector.extract_strided_slice %29 {offsets = [0, 0, 2, 0], sizes = [4, 10, 8, 8], strides = [1, 1, 1, 1]} : vector<4x10x10x8xbf16> to vector<4x10x8x8xbf16>
    %33 = tpu.concatenate %30, %31, %32 in 3 : vector<4x10x8x8xbf16>, vector<4x10x8x8xbf16>, vector<4x10x8x8xbf16> -> vector<4x10x8x24xbf16>
    %cst_19 = arith.constant 0.000000e+00 : f32
    %34 = vector.broadcast %cst_19 : f32 to vector<128x8xf32>
    %c0_20 = arith.constant 0 : index
    %c0_21 = arith.constant 0 : index
    %35 = vector.load %arg9[%c0_20, %c0_21] : memref<128x8xf32, #tpu.memory_space<vmem>>, vector<128x8xf32>
    tpu.vector_store %arg9[%c0_20, %c0_21], %34 {strides = array<i32>} : memref<128x8xf32, #tpu.memory_space<vmem>>, vector<128x8xf32>,
    %36 = vector.extract_strided_slice %33 {offsets = [0, 0, 0, 0], sizes = [2, 8, 8, 24], strides = [1, 1, 1, 1]} : vector<4x10x8x24xbf16> to vector<2x8x8x24xbf16>
    %37 = vector.shape_cast %36 : vector<2x8x8x24xbf16> to vector<128x24xbf16>
    %c0_22 = arith.constant 0 : index
    %c0_23 = arith.constant 0 : index
    %38 = vector.load %arg9[%c0_22, %c0_23] : memref<128x8xf32, #tpu.memory_space<vmem>>, vector<128x8xf32>
    %c0_24 = arith.constant 0 : index
    %c0_25 = arith.constant 0 : index
    %c0_26 = arith.constant 0 : index
    %39 = vector.load %arg6[%c0_24, %c0_25, %c0_26] : memref<9x24x8xbf16, #tpu.memory_space<vmem>>, vector<1x24x8xbf16>
    %40 = vector.shape_cast %39 : vector<1x24x8xbf16> to vector<24x8xbf16>
    %cst_27 = arith.constant dense<0.000000e+00> : vector<128x8xf32>
    %41 = tpu.matmul %37, %40, %cst_27 {dimension_numbers = #tpu.dot_dimension_numbers<[1], [0], [0], [1], [0, 0, 1, 1], [], []>} : vector<128x24xbf16>, vector<24x8xbf16>, vector<128x8xf32> -> vector<128x8xf32>
    %42 = arith.addf %38, %41 : vector<128x8xf32>
    %c0_28 = arith.constant 0 : index
    %c0_29 = arith.constant 0 : index
    %43 = vector.load %arg9[%c0_28, %c0_29] : memref<128x8xf32, #tpu.memory_space<vmem>>, vector<128x8xf32>
    tpu.vector_store %arg9[%c0_28, %c0_29], %42 {strides = array<i32>} : memref<128x8xf32, #tpu.memory_space<vmem>>, vector<128x8xf32>,
    %44 = vector.extract_strided_slice %33 {offsets = [0, 1, 0, 0], sizes = [2, 8, 8, 24], strides = [1, 1, 1, 1]} : vector<4x10x8x24xbf16> to vector<2x8x8x24xbf16>
    %45 = vector.shape_cast %44 : vector<2x8x8x24xbf16> to vector<128x24xbf16>
    %c0_30 = arith.constant 0 : index
    %c0_31 = arith.constant 0 : index
    %46 = vector.load %arg9[%c0_30, %c0_31] : memref<128x8xf32, #tpu.memory_space<vmem>>, vector<128x8xf32>
    %c1_32 = arith.constant 1 : index
    %c0_33 = arith.constant 0 : index
    %c0_34 = arith.constant 0 : index
    %47 = vector.load %arg6[%c1_32, %c0_33, %c0_34] : memref<9x24x8xbf16, #tpu.memory_space<vmem>>, vector<1x24x8xbf16>
    %48 = vector.shape_cast %47 : vector<1x24x8xbf16> to vector<24x8xbf16>
    %cst_35 = arith.constant dense<0.000000e+00> : vector<128x8xf32>
    %49 = tpu.matmul %45, %48, %cst_35 {dimension_numbers = #tpu.dot_dimension_numbers<[1], [0], [0], [1], [0, 0, 1, 1], [], []>} : vector<128x24xbf16>, vector<24x8xbf16>, vector<128x8xf32> -> vector<128x8xf32>
    %50 = arith.addf %46, %49 : vector<128x8xf32>
    %c0_36 = arith.constant 0 : index
    %c0_37 = arith.constant 0 : index
    %51 = vector.load %arg9[%c0_36, %c0_37] : memref<128x8xf32, #tpu.memory_space<vmem>>, vector<128x8xf32>
    tpu.vector_store %arg9[%c0_36, %c0_37], %50 {strides = array<i32>} : memref<128x8xf32, #tpu.memory_space<vmem>>, vector<128x8xf32>,
    %52 = vector.extract_strided_slice %33 {offsets = [0, 2, 0, 0], sizes = [2, 8, 8, 24], strides = [1, 1, 1, 1]} : vector<4x10x8x24xbf16> to vector<2x8x8x24xbf16>
    %53 = vector.shape_cast %52 : vector<2x8x8x24xbf16> to vector<128x24xbf16>
    %c0_38 = arith.constant 0 : index
    %c0_39 = arith.constant 0 : index
    %54 = vector.load %arg9[%c0_38, %c0_39] : memref<128x8xf32, #tpu.memory_space<vmem>>, vector<128x8xf32>
    %c2 = arith.constant 2 : index
    %c0_40 = arith.constant 0 : index
    %c0_41 = arith.constant 0 : index
    %55 = vector.load %arg6[%c2, %c0_40, %c0_41] : memref<9x24x8xbf16, #tpu.memory_space<vmem>>, vector<1x24x8xbf16>
    %56 = vector.shape_cast %55 : vector<1x24x8xbf16> to vector<24x8xbf16>
    %cst_42 = arith.constant dense<0.000000e+00> : vector<128x8xf32>
    %57 = tpu.matmul %53, %56, %cst_42 {dimension_numbers = #tpu.dot_dimension_numbers<[1], [0], [0], [1], [0, 0, 1, 1], [], []>} : vector<128x24xbf16>, vector<24x8xbf16>, vector<128x8xf32> -> vector<128x8xf32>
    %58 = arith.addf %54, %57 : vector<128x8xf32>
    %c0_43 = arith.constant 0 : index
    %c0_44 = arith.constant 0 : index
    %59 = vector.load %arg9[%c0_43, %c0_44] : memref<128x8xf32, #tpu.memory_space<vmem>>, vector<128x8xf32>
    tpu.vector_store %arg9[%c0_43, %c0_44], %58 {strides = array<i32>} : memref<128x8xf32, #tpu.memory_space<vmem>>, vector<128x8xf32>,
    %60 = vector.extract_strided_slice %33 {offsets = [1, 0, 0, 0], sizes = [2, 8, 8, 24], strides = [1, 1, 1, 1]} : vector<4x10x8x24xbf16> to vector<2x8x8x24xbf16>
    %61 = vector.shape_cast %60 : vector<2x8x8x24xbf16> to vector<128x24xbf16>
    %c0_45 = arith.constant 0 : index
    %c0_46 = arith.constant 0 : index
    %62 = vector.load %arg9[%c0_45, %c0_46] : memref<128x8xf32, #tpu.memory_space<vmem>>, vector<128x8xf32>
    %c3 = arith.constant 3 : index
    %c0_47 = arith.constant 0 : index
    %c0_48 = arith.constant 0 : index
    %63 = vector.load %arg6[%c3, %c0_47, %c0_48] : memref<9x24x8xbf16, #tpu.memory_space<vmem>>, vector<1x24x8xbf16>
    %64 = vector.shape_cast %63 : vector<1x24x8xbf16> to vector<24x8xbf16>
    %cst_49 = arith.constant dense<0.000000e+00> : vector<128x8xf32>
    %65 = tpu.matmul %61, %64, %cst_49 {dimension_numbers = #tpu.dot_dimension_numbers<[1], [0], [0], [1], [0, 0, 1, 1], [], []>} : vector<128x24xbf16>, vector<24x8xbf16>, vector<128x8xf32> -> vector<128x8xf32>
    %66 = arith.addf %62, %65 : vector<128x8xf32>
    %c0_50 = arith.constant 0 : index
    %c0_51 = arith.constant 0 : index
    %67 = vector.load %arg9[%c0_50, %c0_51] : memref<128x8xf32, #tpu.memory_space<vmem>>, vector<128x8xf32>
    tpu.vector_store %arg9[%c0_50, %c0_51], %66 {strides = array<i32>} : memref<128x8xf32, #tpu.memory_space<vmem>>, vector<128x8xf32>,
    %68 = vector.extract_strided_slice %33 {offsets = [1, 1, 0, 0], sizes = [2, 8, 8, 24], strides = [1, 1, 1, 1]} : vector<4x10x8x24xbf16> to vector<2x8x8x24xbf16>
    %69 = vector.shape_cast %68 : vector<2x8x8x24xbf16> to vector<128x24xbf16>
    %c0_52 = arith.constant 0 : index
    %c0_53 = arith.constant 0 : index
    %70 = vector.load %arg9[%c0_52, %c0_53] : memref<128x8xf32, #tpu.memory_space<vmem>>, vector<128x8xf32>
    %c4 = arith.constant 4 : index
    %c0_54 = arith.constant 0 : index
    %c0_55 = arith.constant 0 : index
    %71 = vector.load %arg6[%c4, %c0_54, %c0_55] : memref<9x24x8xbf16, #tpu.memory_space<vmem>>, vector<1x24x8xbf16>
    %72 = vector.shape_cast %71 : vector<1x24x8xbf16> to vector<24x8xbf16>
    %cst_56 = arith.constant dense<0.000000e+00> : vector<128x8xf32>
    %73 = tpu.matmul %69, %72, %cst_56 {dimension_numbers = #tpu.dot_dimension_numbers<[1], [0], [0], [1], [0, 0, 1, 1], [], []>} : vector<128x24xbf16>, vector<24x8xbf16>, vector<128x8xf32> -> vector<128x8xf32>
    %74 = arith.addf %70, %73 : vector<128x8xf32>
    %c0_57 = arith.constant 0 : index
    %c0_58 = arith.constant 0 : index
    %75 = vector.load %arg9[%c0_57, %c0_58] : memref<128x8xf32, #tpu.memory_space<vmem>>, vector<128x8xf32>
    tpu.vector_store %arg9[%c0_57, %c0_58], %74 {strides = array<i32>} : memref<128x8xf32, #tpu.memory_space<vmem>>, vector<128x8xf32>,
    %76 = vector.extract_strided_slice %33 {offsets = [1, 2, 0, 0], sizes = [2, 8, 8, 24], strides = [1, 1, 1, 1]} : vector<4x10x8x24xbf16> to vector<2x8x8x24xbf16>
    %77 = vector.shape_cast %76 : vector<2x8x8x24xbf16> to vector<128x24xbf16>
    %c0_59 = arith.constant 0 : index
    %c0_60 = arith.constant 0 : index
    %78 = vector.load %arg9[%c0_59, %c0_60] : memref<128x8xf32, #tpu.memory_space<vmem>>, vector<128x8xf32>
    %c5 = arith.constant 5 : index
    %c0_61 = arith.constant 0 : index
    %c0_62 = arith.constant 0 : index
    %79 = vector.load %arg6[%c5, %c0_61, %c0_62] : memref<9x24x8xbf16, #tpu.memory_space<vmem>>, vector<1x24x8xbf16>
    %80 = vector.shape_cast %79 : vector<1x24x8xbf16> to vector<24x8xbf16>
    %cst_63 = arith.constant dense<0.000000e+00> : vector<128x8xf32>
    %81 = tpu.matmul %77, %80, %cst_63 {dimension_numbers = #tpu.dot_dimension_numbers<[1], [0], [0], [1], [0, 0, 1, 1], [], []>} : vector<128x24xbf16>, vector<24x8xbf16>, vector<128x8xf32> -> vector<128x8xf32>
    %82 = arith.addf %78, %81 : vector<128x8xf32>
    %c0_64 = arith.constant 0 : index
    %c0_65 = arith.constant 0 : index
    %83 = vector.load %arg9[%c0_64, %c0_65] : memref<128x8xf32, #tpu.memory_space<vmem>>, vector<128x8xf32>
    tpu.vector_store %arg9[%c0_64, %c0_65], %82 {strides = array<i32>} : memref<128x8xf32, #tpu.memory_space<vmem>>, vector<128x8xf32>,
    %84 = vector.extract_strided_slice %33 {offsets = [2, 0, 0, 0], sizes = [2, 8, 8, 24], strides = [1, 1, 1, 1]} : vector<4x10x8x24xbf16> to vector<2x8x8x24xbf16>
    %85 = vector.shape_cast %84 : vector<2x8x8x24xbf16> to vector<128x24xbf16>
    %c0_66 = arith.constant 0 : index
    %c0_67 = arith.constant 0 : index
    %86 = vector.load %arg9[%c0_66, %c0_67] : memref<128x8xf32, #tpu.memory_space<vmem>>, vector<128x8xf32>
    %c6 = arith.constant 6 : index
    %c0_68 = arith.constant 0 : index
    %c0_69 = arith.constant 0 : index
    %87 = vector.load %arg6[%c6, %c0_68, %c0_69] : memref<9x24x8xbf16, #tpu.memory_space<vmem>>, vector<1x24x8xbf16>
    %88 = vector.shape_cast %87 : vector<1x24x8xbf16> to vector<24x8xbf16>
    %cst_70 = arith.constant dense<0.000000e+00> : vector<128x8xf32>
    %89 = tpu.matmul %85, %88, %cst_70 {dimension_numbers = #tpu.dot_dimension_numbers<[1], [0], [0], [1], [0, 0, 1, 1], [], []>} : vector<128x24xbf16>, vector<24x8xbf16>, vector<128x8xf32> -> vector<128x8xf32>
    %90 = arith.addf %86, %89 : vector<128x8xf32>
    %c0_71 = arith.constant 0 : index
    %c0_72 = arith.constant 0 : index
    %91 = vector.load %arg9[%c0_71, %c0_72] : memref<128x8xf32, #tpu.memory_space<vmem>>, vector<128x8xf32>
    tpu.vector_store %arg9[%c0_71, %c0_72], %90 {strides = array<i32>} : memref<128x8xf32, #tpu.memory_space<vmem>>, vector<128x8xf32>,
    %92 = vector.extract_strided_slice %33 {offsets = [2, 1, 0, 0], sizes = [2, 8, 8, 24], strides = [1, 1, 1, 1]} : vector<4x10x8x24xbf16> to vector<2x8x8x24xbf16>
    %93 = vector.shape_cast %92 : vector<2x8x8x24xbf16> to vector<128x24xbf16>
    %c0_73 = arith.constant 0 : index
    %c0_74 = arith.constant 0 : index
    %94 = vector.load %arg9[%c0_73, %c0_74] : memref<128x8xf32, #tpu.memory_space<vmem>>, vector<128x8xf32>
    %c7 = arith.constant 7 : index
    %c0_75 = arith.constant 0 : index
    %c0_76 = arith.constant 0 : index
    %95 = vector.load %arg6[%c7, %c0_75, %c0_76] : memref<9x24x8xbf16, #tpu.memory_space<vmem>>, vector<1x24x8xbf16>
    %96 = vector.shape_cast %95 : vector<1x24x8xbf16> to vector<24x8xbf16>
    %cst_77 = arith.constant dense<0.000000e+00> : vector<128x8xf32>
    %97 = tpu.matmul %93, %96, %cst_77 {dimension_numbers = #tpu.dot_dimension_numbers<[1], [0], [0], [1], [0, 0, 1, 1], [], []>} : vector<128x24xbf16>, vector<24x8xbf16>, vector<128x8xf32> -> vector<128x8xf32>
    %98 = arith.addf %94, %97 : vector<128x8xf32>
    %c0_78 = arith.constant 0 : index
    %c0_79 = arith.constant 0 : index
    %99 = vector.load %arg9[%c0_78, %c0_79] : memref<128x8xf32, #tpu.memory_space<vmem>>, vector<128x8xf32>
    tpu.vector_store %arg9[%c0_78, %c0_79], %98 {strides = array<i32>} : memref<128x8xf32, #tpu.memory_space<vmem>>, vector<128x8xf32>,
    %100 = vector.extract_strided_slice %33 {offsets = [2, 2, 0, 0], sizes = [2, 8, 8, 24], strides = [1, 1, 1, 1]} : vector<4x10x8x24xbf16> to vector<2x8x8x24xbf16>
    %101 = vector.shape_cast %100 : vector<2x8x8x24xbf16> to vector<128x24xbf16>
    %c0_80 = arith.constant 0 : index
    %c0_81 = arith.constant 0 : index
    %102 = vector.load %arg9[%c0_80, %c0_81] : memref<128x8xf32, #tpu.memory_space<vmem>>, vector<128x8xf32>
    %c8 = arith.constant 8 : index
    %c0_82 = arith.constant 0 : index
    %c0_83 = arith.constant 0 : index
    %103 = vector.load %arg6[%c8, %c0_82, %c0_83] : memref<9x24x8xbf16, #tpu.memory_space<vmem>>, vector<1x24x8xbf16>
    %104 = vector.shape_cast %103 : vector<1x24x8xbf16> to vector<24x8xbf16>
    %cst_84 = arith.constant dense<0.000000e+00> : vector<128x8xf32>
    %105 = tpu.matmul %101, %104, %cst_84 {dimension_numbers = #tpu.dot_dimension_numbers<[1], [0], [0], [1], [0, 0, 1, 1], [], []>} : vector<128x24xbf16>, vector<24x8xbf16>, vector<128x8xf32> -> vector<128x8xf32>
    %106 = arith.addf %102, %105 : vector<128x8xf32>
    %c0_85 = arith.constant 0 : index
    %c0_86 = arith.constant 0 : index
    %107 = vector.load %arg9[%c0_85, %c0_86] : memref<128x8xf32, #tpu.memory_space<vmem>>, vector<128x8xf32>
    tpu.vector_store %arg9[%c0_85, %c0_86], %106 {strides = array<i32>} : memref<128x8xf32, #tpu.memory_space<vmem>>, vector<128x8xf32>,
    %c0_87 = arith.constant 0 : index
    %c0_88 = arith.constant 0 : index
    %108 = vector.load %arg9[%c0_87, %c0_88] : memref<128x8xf32, #tpu.memory_space<vmem>>, vector<128x8xf32>
    %c0_89 = arith.constant 0 : index
    %c0_90 = arith.constant 0 : index
    %109 = vector.load %arg7[%c0_89, %c0_90] : memref<1x8xf32, #tpu.memory_space<vmem>>, vector<1x8xf32>
    %110 = vector.broadcast %109 : vector<1x8xf32> to vector<128x8xf32>
    %111 = arith.addf %108, %110 : vector<128x8xf32>
    %c0_91 = arith.constant 0 : index
    %c0_92 = arith.constant 0 : index
    %c0_93 = arith.constant 0 : index
    %112 = vector.load %arg8[%c0_91, %c0_92, %c0_93] : memref<1x128x8xf32, #tpu.memory_space<vmem>>, vector<1x128x8xf32>
    %113 = vector.shape_cast %112 : vector<1x128x8xf32> to vector<128x8xf32>
    %114 = vector.shape_cast %111 : vector<128x8xf32> to vector<1x128x8xf32>
    tpu.vector_store %arg8[%c0_91, %c0_92, %c0_93], %114 {strides = array<i32>} : memref<1x128x8xf32, #tpu.memory_space<vmem>>, vector<1x128x8xf32>,
    return
  }
  func.func @transform_0(%arg0: i32, %arg1: i32) -> (i32, i32, i32, i32, i32) {
    %c2_i32 = arith.constant 2 : i32
    %0 = arith.muli %arg1, %c2_i32 : i32
    %c1_i32 = arith.constant 1 : i32
    %1 = arith.subi %0, %c1_i32 : i32
    %c0_i32 = arith.constant 0 : i32
    %2 = arith.maxsi %1, %c0_i32 : i32
    %c0_i32_0 = arith.constant 0 : i32
    %c0_i32_1 = arith.constant 0 : i32
    %c0_i32_2 = arith.constant 0 : i32
    %c0_i32_3 = arith.constant 0 : i32
    return %arg0, %2, %c0_i32_0, %c0_i32_1, %c0_i32_2 : i32, i32, i32, i32, i32
  }
  func.func @transform_1(%arg0: i32, %arg1: i32) -> (i32, i32, i32, i32, i32) {
    %c0_i32 = arith.constant 0 : i32
    %c0_i32_0 = arith.constant 0 : i32
    %c0_i32_1 = arith.constant 0 : i32
    %c0_i32_2 = arith.constant 0 : i32
    return %arg0, %arg1, %c0_i32, %c0_i32_0, %c0_i32_1 : i32, i32, i32, i32, i32
  }
  func.func @transform_2(%arg0: i32, %arg1: i32) -> (i32, i32, i32, i32, i32) {
    %c2_i32 = arith.constant 2 : i32
    %0 = arith.muli %arg1, %c2_i32 : i32
    %c2_i32_0 = arith.constant 2 : i32
    %1 = arith.addi %0, %c2_i32_0 : i32
    %c3_i32 = arith.constant 3 : i32
    %2 = arith.minsi %1, %c3_i32 : i32
    %c0_i32 = arith.constant 0 : i32
    %c0_i32_1 = arith.constant 0 : i32
    %c0_i32_2 = arith.constant 0 : i32
    %c0_i32_3 = arith.constant 0 : i32
    return %arg0, %2, %c0_i32, %c0_i32_1, %c0_i32_2 : i32, i32, i32, i32, i32
  }
  func.func @transform_3(%arg0: i32, %arg1: i32) -> (i32, i32, i32) {
    %c0_i32 = arith.constant 0 : i32
    %c0_i32_0 = arith.constant 0 : i32
    %c0_i32_1 = arith.constant 0 : i32
    return %arg0, %c0_i32, %c0_i32_0 : i32, i32, i32
  }
  func.func @transform_4(%arg0: i32, %arg1: i32) -> (i32, i32, i32) {
    %c0_i32 = arith.constant 0 : i32
    %c0_i32_0 = arith.constant 0 : i32
    %c0_i32_1 = arith.constant 0 : i32
    %c0_i32_2 = arith.constant 0 : i32
    return %c0_i32, %c0_i32_0, %c0_i32_1 : i32, i32, i32
  }
  func.func @transform_5(%arg0: i32, %arg1: i32) -> (i32, i32) {
    %c0_i32 = arith.constant 0 : i32
    %c0_i32_0 = arith.constant 0 : i32
    %c0_i32_1 = arith.constant 0 : i32
    return %c0_i32, %c0_i32_0 : i32, i32
  }
  func.func @transform_6(%arg0: i32, %arg1: i32) -> (i32, i32, i32) {
    %c0_i32 = arith.constant 0 : i32
    %c0_i32_0 = arith.constant 0 : i32
    return %arg0, %arg1, %c0_i32 : i32, i32, i32
  }
}

module attributes {stable_mosaic.version = 11 : i64} {
  func.func @_gn_stats_kernel(%arg0: i32, %arg1: i32, %arg2: memref<1x128x8xf32, #tpu.memory_space<vmem>>, %arg3: memref<1x8xf32, #tpu.memory_space<vmem>>, %arg4: memref<1x8xf32, #tpu.memory_space<vmem>>, %arg5: memref<8x4xf32, #tpu.memory_space<vmem>>, %arg6: memref<4x8xf32, #tpu.memory_space<vmem>>, %arg7: memref<1x2x8xf32, #tpu.memory_space<vmem>>, %arg8: memref<2x8xf32, #tpu.memory_space<vmem>>) attributes {dimension_semantics = [#tpu.dimension_semantics<parallel>, #tpu.dimension_semantics<arbitrary>], iteration_bounds = array<i64: 2, 2>, scalar_prefetch = 0 : i64, scratch_operands = 1 : i64, tpu.core_type = #tpu.core_type<tc>, window_params = [{transform_indices = @transform_0, window_bounds = array<i64: 1, 128, 8>}, {pipeline_mode = #tpu.pipeline_mode<synchronous>, transform_indices = @transform_1, window_bounds = array<i64: 1, 8>}, {pipeline_mode = #tpu.pipeline_mode<synchronous>, transform_indices = @transform_2, window_bounds = array<i64: 1, 8>}, {pipeline_mode = #tpu.pipeline_mode<synchronous>, transform_indices = @transform_3, window_bounds = array<i64: 8, 4>}, {pipeline_mode = #tpu.pipeline_mode<synchronous>, transform_indices = @transform_4, window_bounds = array<i64: 4, 8>}, {transform_indices = @transform_5, window_bounds = array<i64: 1, 2, 8>}]} {
    %c0_i32 = arith.constant 0 : i32
    %0 = arith.cmpi eq, %arg1, %c0_i32 : i32
    %1 = arith.extui %0 : i1 to i32
    %c0_i32_0 = arith.constant 0 : i32
    %2 = arith.cmpi ne, %1, %c0_i32_0 : i32
    scf.if %2 {
      %cst_9 = arith.constant 0.000000e+00 : f32
      %17 = vector.broadcast %cst_9 : f32 to vector<2x8xf32>
      %c0_10 = arith.constant 0 : index
      %c0_11 = arith.constant 0 : index
      %18 = vector.load %arg8[%c0_10, %c0_11] : memref<2x8xf32, #tpu.memory_space<vmem>>, vector<2x8xf32>
      tpu.vector_store %arg8[%c0_10, %c0_11], %17 {strides = array<i32>} : memref<2x8xf32, #tpu.memory_space<vmem>>, vector<2x8xf32>,
    } else {
    }
    %c0 = arith.constant 0 : index
    %c0_1 = arith.constant 0 : index
    %c0_2 = arith.constant 0 : index
    %3 = vector.load %arg2[%c0, %c0_1, %c0_2] : memref<1x128x8xf32, #tpu.memory_space<vmem>>, vector<1x128x8xf32>
    %4 = vector.shape_cast %3 : vector<1x128x8xf32> to vector<128x8xf32>
    %cst = arith.constant dense<0.000000e+00> : vector<8xf32>
    %5 = vector.multi_reduction <add>, %4, %cst [0] : vector<128x8xf32> to vector<8xf32>
    %6 = vector.shape_cast %5 : vector<8xf32> to vector<1x8xf32>
    %7 = arith.mulf %4, %4 : vector<128x8xf32>
    %cst_3 = arith.constant dense<0.000000e+00> : vector<8xf32>
    %8 = vector.multi_reduction <add>, %7, %cst_3 [0] : vector<128x8xf32> to vector<8xf32>
    %9 = vector.shape_cast %8 : vector<8xf32> to vector<1x8xf32>
    %c0_4 = arith.constant 0 : index
    %c0_5 = arith.constant 0 : index
    %10 = vector.load %arg8[%c0_4, %c0_5] : memref<2x8xf32, #tpu.memory_space<vmem>>, vector<2x8xf32>
    %11 = tpu.concatenate %6, %9 in 0 : vector<1x8xf32>, vector<1x8xf32> -> vector<2x8xf32>
    %12 = arith.addf %10, %11 : vector<2x8xf32>
    %c0_6 = arith.constant 0 : index
    %c0_7 = arith.constant 0 : index
    %13 = vector.load %arg8[%c0_6, %c0_7] : memref<2x8xf32, #tpu.memory_space<vmem>>, vector<2x8xf32>
    tpu.vector_store %arg8[%c0_6, %c0_7], %12 {strides = array<i32>} : memref<2x8xf32, #tpu.memory_space<vmem>>, vector<2x8xf32>,
    %c1_i32 = arith.constant 1 : i32
    %14 = arith.cmpi eq, %arg1, %c1_i32 : i32
    %15 = arith.extui %14 : i1 to i32
    %c0_i32_8 = arith.constant 0 : i32
    %16 = arith.cmpi ne, %15, %c0_i32_8 : i32
    scf.if %16 {
      %c0_9 = arith.constant 0 : index
      %c0_10 = arith.constant 0 : index
      %17 = vector.load %arg8[%c0_9, %c0_10] : memref<2x8xf32, #tpu.memory_space<vmem>>, vector<2x8xf32>
      %18 = vector.extract_strided_slice %17 {offsets = [0, 0], sizes = [1, 8], strides = [1, 1]} : vector<2x8xf32> to vector<1x8xf32>
      %c0_11 = arith.constant 0 : index
      %c0_12 = arith.constant 0 : index
      %19 = vector.load %arg5[%c0_11, %c0_12] : memref<8x4xf32, #tpu.memory_space<vmem>>, vector<8x4xf32>
      %cst_13 = arith.constant dense<0.000000e+00> : vector<1x4xf32>
      %20 = tpu.matmul %18, %19, %cst_13 {dimension_numbers = #tpu.dot_dimension_numbers<[1], [0], [0], [1], [0, 0, 1, 1], [], []>} : vector<1x8xf32>, vector<8x4xf32>, vector<1x4xf32> -> vector<1x4xf32>
      %cst_14 = arith.constant 5.120000e+02 : f32
      %21 = vector.broadcast %cst_14 : f32 to vector<1x4xf32>
      %22 = arith.divf %20, %21 : vector<1x4xf32>
      %23 = vector.extract_strided_slice %17 {offsets = [1, 0], sizes = [1, 8], strides = [1, 1]} : vector<2x8xf32> to vector<1x8xf32>
      %c0_15 = arith.constant 0 : index
      %c0_16 = arith.constant 0 : index
      %24 = vector.load %arg5[%c0_15, %c0_16] : memref<8x4xf32, #tpu.memory_space<vmem>>, vector<8x4xf32>
      %cst_17 = arith.constant dense<0.000000e+00> : vector<1x4xf32>
      %25 = tpu.matmul %23, %24, %cst_17 {dimension_numbers = #tpu.dot_dimension_numbers<[1], [0], [0], [1], [0, 0, 1, 1], [], []>} : vector<1x8xf32>, vector<8x4xf32>, vector<1x4xf32> -> vector<1x4xf32>
      %cst_18 = arith.constant 5.120000e+02 : f32
      %26 = vector.broadcast %cst_18 : f32 to vector<1x4xf32>
      %27 = arith.divf %25, %26 : vector<1x4xf32>
      %28 = arith.mulf %22, %22 : vector<1x4xf32>
      %29 = arith.subf %27, %28 : vector<1x4xf32>
      %cst_19 = arith.constant 0.000000e+00 : f32
      %30 = vector.broadcast %cst_19 : f32 to vector<1x4xf32>
      %31 = arith.maximumf %29, %30 : vector<1x4xf32>
      %c0_20 = arith.constant 0 : index
      %c0_21 = arith.constant 0 : index
      %32 = vector.load %arg6[%c0_20, %c0_21] : memref<4x8xf32, #tpu.memory_space<vmem>>, vector<4x8xf32>
      %cst_22 = arith.constant dense<0.000000e+00> : vector<1x8xf32>
      %33 = tpu.matmul %22, %32, %cst_22 {dimension_numbers = #tpu.dot_dimension_numbers<[1], [0], [0], [1], [0, 0, 1, 1], [], []>} : vector<1x4xf32>, vector<4x8xf32>, vector<1x8xf32> -> vector<1x8xf32>
      %c0_23 = arith.constant 0 : index
      %c0_24 = arith.constant 0 : index
      %34 = vector.load %arg6[%c0_23, %c0_24] : memref<4x8xf32, #tpu.memory_space<vmem>>, vector<4x8xf32>
      %cst_25 = arith.constant dense<0.000000e+00> : vector<1x8xf32>
      %35 = tpu.matmul %31, %34, %cst_25 {dimension_numbers = #tpu.dot_dimension_numbers<[1], [0], [0], [1], [0, 0, 1, 1], [], []>} : vector<1x4xf32>, vector<4x8xf32>, vector<1x8xf32> -> vector<1x8xf32>
      %cst_26 = arith.constant 9.99999997E-7 : f32
      %36 = vector.broadcast %cst_26 : f32 to vector<1x8xf32>
      %37 = arith.addf %35, %36 : vector<1x8xf32>
      %38 = math.rsqrt %37 : vector<1x8xf32>
      %c0_27 = arith.constant 0 : index
      %c0_28 = arith.constant 0 : index
      %39 = vector.load %arg3[%c0_27, %c0_28] : memref<1x8xf32, #tpu.memory_space<vmem>>, vector<1x8xf32>
      %40 = arith.mulf %38, %39 : vector<1x8xf32>
      %c0_29 = arith.constant 0 : index
      %c0_30 = arith.constant 0 : index
      %41 = vector.load %arg4[%c0_29, %c0_30] : memref<1x8xf32, #tpu.memory_space<vmem>>, vector<1x8xf32>
      %42 = arith.mulf %33, %40 : vector<1x8xf32>
      %43 = arith.subf %41, %42 : vector<1x8xf32>
      %44 = tpu.concatenate %40, %43 in 0 : vector<1x8xf32>, vector<1x8xf32> -> vector<2x8xf32>
      %c0_31 = arith.constant 0 : index
      %c0_32 = arith.constant 0 : index
      %c0_33 = arith.constant 0 : index
      %45 = vector.load %arg7[%c0_31, %c0_32, %c0_33] : memref<1x2x8xf32, #tpu.memory_space<vmem>>, vector<1x2x8xf32>
      %46 = vector.shape_cast %45 : vector<1x2x8xf32> to vector<2x8xf32>
      %47 = vector.shape_cast %44 : vector<2x8xf32> to vector<1x2x8xf32>
      tpu.vector_store %arg7[%c0_31, %c0_32, %c0_33], %47 {strides = array<i32>} : memref<1x2x8xf32, #tpu.memory_space<vmem>>, vector<1x2x8xf32>,
    } else {
    }
    return
  }
  func.func @transform_0(%arg0: i32, %arg1: i32) -> (i32, i32, i32) {
    %c0_i32 = arith.constant 0 : i32
    %c0_i32_0 = arith.constant 0 : i32
    return %arg0, %arg1, %c0_i32 : i32, i32, i32
  }
  func.func @transform_1(%arg0: i32, %arg1: i32) -> (i32, i32) {
    %c0_i32 = arith.constant 0 : i32
    %c0_i32_0 = arith.constant 0 : i32
    %c0_i32_1 = arith.constant 0 : i32
    return %c0_i32, %c0_i32_0 : i32, i32
  }
  func.func @transform_2(%arg0: i32, %arg1: i32) -> (i32, i32) {
    %c0_i32 = arith.constant 0 : i32
    %c0_i32_0 = arith.constant 0 : i32
    %c0_i32_1 = arith.constant 0 : i32
    return %c0_i32, %c0_i32_0 : i32, i32
  }
  func.func @transform_3(%arg0: i32, %arg1: i32) -> (i32, i32) {
    %c0_i32 = arith.constant 0 : i32
    %c0_i32_0 = arith.constant 0 : i32
    %c0_i32_1 = arith.constant 0 : i32
    return %c0_i32, %c0_i32_0 : i32, i32
  }
  func.func @transform_4(%arg0: i32, %arg1: i32) -> (i32, i32) {
    %c0_i32 = arith.constant 0 : i32
    %c0_i32_0 = arith.constant 0 : i32
    %c0_i32_1 = arith.constant 0 : i32
    return %c0_i32, %c0_i32_0 : i32, i32
  }
  func.func @transform_5(%arg0: i32, %arg1: i32) -> (i32, i32, i32) {
    %c0_i32 = arith.constant 0 : i32
    %c0_i32_0 = arith.constant 0 : i32
    %c0_i32_1 = arith.constant 0 : i32
    return %arg0, %c0_i32, %c0_i32_0 : i32, i32, i32
  }
}

</mosaic_0001>

<bundles_post_ra>
// kernel: _lambda_.4
= control target key start
LH: loop header
LB: loop body
LE: loop exit
PB: predicated region body
PF: predicated region fallthrough
CT: control target
= control target key end

     0   :  { %s929_s18 = smov 0   ;;  %s931_s19 = smov 0   ;;  %s1056_s0 = inlined_call_operand.vmem [shape: f32[2,256,8], index: 0, kind: input, shape index: {}]   ;;  %s1057_s1 = inlined_call_operand.vmem [shape: f32[1,8], index: 1, kind: input, shape index: {}]   ;;  %s1058_s2 = inlined_call_operand.vmem [shape: f32[1,8], index: 2, kind: input, shape index: {}]   ;;  %s1059_s3 = inlined_call_operand.vmem [shape: f32[8,4], index: 3, kind: input, shape index: {}]   ;;  %s1060_s4 = inlined_call_operand.vmem [shape: f32[4,8], index: 4, kind: input, shape index: {}]   ;;  %s1061_s5 = inlined_call_operand.vmem [shape: f32[2,2,8], index: 5, kind: output, shape index: {}]  }
   0x1   :  { %s933_s20 = smov 0   ;;  %s935_s21 = smov 0  }
   0x2   :  { %s937_s22 = smov 0  }
   0x3 LB: > { %s24_s23 = sadd.s32 1, %s886_s20  ;;  %s27_s24 = sadd.s32 1, %s890_s21  ;;  %s894_s22 = sphi %s937_s22, %s15_s22   ;;  %s890_s21 = sphi %s935_s21, %s1065_s21   ;;  %s886_s20 = sphi %s933_s20, %s1064_s20   ;;  %s882_s19 = sphi %s931_s19, %s1063_s19   ;;  %s878_s18 = sphi %s929_s18, %s1062_s18  }
   0x4   : > { %p25_p0 = scmp.ge.s32.totalorder %s24_s23, 2  ;;  %p768_p1 = scmp.ge.s32.totalorder %s894_s22, 1 }
   0x5   : > { %p206_p2 = scmp.lt.s32.totalorder %s894_s22, 5 }
   0x6   : > { %s1067_s23 = smov (%p25_p0, %s24_s23), 0  ;;  %s1069_s24 = smov (!%p25_p0, %s27_s24), %s890_s21 }
   0x7   : > { %p207_p3 = pnand %p768_p1, %p206_p2  ;;  %p29_p4 = scmp.ge.s32.totalorder %s1069_s24, 2 }
   0x8   : > { %s769_s25 = sshll.u32 (!%p207_p3), %s878_s18, 4  ;;  %p238_p5 = scmp.lt.s32.totalorder (!%p207_p3), %s882_s19, 1 }
   0x9   : > { %s1071_s24 = smov (%p29_p4, %s1069_s24), 0  ;;  %210 = sbr.rel (%p207_p3) target bundleno = 502 (0x1f6), region = 40 }
   0xa   : > { %p240_p6 = scmp.lt.s32.totalorder (!%p207_p3), %s769_s25, 31  ;;  %p773_p7 = scmp.ne.s32.totalorder (!%p207_p3), %s878_s18, 0 }
   0xe   : > { %s1073_s19 = smov (!%p238_p5, %s882_s19), 1  ;;  %s1075_s25 = smov (!%p240_p6, %s769_s25), 31 }
   0xf   : > { %s770_s26 = sshll.u32 %s1073_s19, 5  ;;  %s772_s27 = sshll.u32 %s1073_s19, 1 }
  0x10   : > { %s243_s28 = sadd.s32 %s770_s26, %s1075_s25  ;;  %s965_s6 = scalar_lea.vmem %s1061_s5, %s772_s27 }
  0x11   : > { %s771_s7 = sshll.u32 %s243_s28, 3  ;;  %254 = sbr.rel (%p773_p7) target bundleno = 24 (0x18), region = 44 }
  0x12   : > { %s970_s10 = scalar_lea.vmem %s1056_s0, %s771_s7 }
  0x16   : > { %vm255_vm0 = vcmask 58368   ;;  %v896_v0 = vmov 0.0  }
  0x17   : > { %256 = vst.msk [vmem:[#allocation2] sm:$0x3] %vm255_vm0, %v896_v0 }
  0x18 PF: > { %v257_v1 = vld [vmem:[%s970_s10] sm:$0xff]  ;;  %v258_v2 = vld [vmem:[%s970_s10 + $0x8] sm:$0xff]  ;;  %v259_v3 = vld [vmem:[%s970_s10 + $0x10] sm:$0xff]  ;;  %vm273_vm1 = vcmask 64512   ;;  %vm365_vm2 = vcmask 1040384   ;;  %vm368_vm3 = vcmask 58368  }
  0x19   : > { %v274_v4 = vsel %vm273_vm1, %v257_v1, 0.0  ;;  %v275_v5 = vsel %vm273_vm1, %v258_v2, 0.0  ;;  %v277_v6 = vsel %vm273_vm1, %v259_v3, 0.0  ;;  %v260_v7 = vld [vmem:[%s970_s10 + $0x18] sm:$0xff]  ;;  %v261_v10 = vld [vmem:[%s970_s10 + $0x20] sm:$0xff]  ;;  %v262_v13 = vld [vmem:[%s970_s10 + $0x28] sm:$0xff]  ;;  %v311_v15 = vmul.f32 %v257_v1, %v257_v1 }
  0x1a   : > { %v276_v8 = vadd.f32 %v275_v5, %v274_v4  ;;  %v279_v9 = vsel %vm273_vm1, %v260_v7, 0.0  ;;  %v281_v12 = vsel %vm273_vm1, %v261_v10, 0.0  ;;  %v312_v16 = vmul.f32 %v258_v2, %v258_v2  ;;  %v263_v19 = vld [vmem:[%s970_s10 + $0x30] sm:$0xff]  ;;  %v264_v24 = vld [vmem:[%s970_s10 + $0x38] sm:$0xff]  ;;  %v265_v31 = vld [vmem:[%s970_s10 + $0x40] sm:$0xff]  ;;  %p774_p8 = scmp.ne.s32.totalorder %s878_s18, 1 }
  0x1b   : > { %v313_v17 = vmul.f32 %v259_v3, %v259_v3  ;;  %v283_v18 = vsel %vm273_vm1, %v262_v13, 0.0  ;;  %v314_v21 = vmul.f32 %v260_v7, %v260_v7  ;;  %v285_v22 = vsel %vm273_vm1, %v263_v19, 0.0  ;;  %v266_v37 = vld [vmem:[%s970_s10 + $0x48] sm:$0xff]  ;;  %v267_v43 = vld [vmem:[%s970_s10 + $0x50] sm:$0xff]  ;;  %v268_v49 = vld [vmem:[%s970_s10 + $0x58] sm:$0xff] }
  0x1c   : > { %v278_v11 = vadd.f32 %v277_v6, %v276_v8  ;;  %v315_v23 = vmul.f32 %v261_v10, %v261_v10  ;;  %v327_v26 = vsel %vm273_vm1, %v311_v15, 0.0  ;;  %v328_v27 = vsel %vm273_vm1, %v312_v16, 0.0  ;;  %v269_v55 = vld [vmem:[%s970_s10 + $0x60] sm:$0xff]  ;;  %v270_v61 = vld [vmem:[%s970_s10 + $0x68] sm:$0xff]  ;;  %v271_v3 = vld [vmem:[%s970_s10 + $0x70] sm:$0xff] }
  0x1d   : > { %v330_v28 = vsel %vm273_vm1, %v313_v17, 0.0  ;;  %v287_v29 = vsel %vm273_vm1, %v264_v24, 0.0  ;;  %v329_v30 = vadd.f32 %v328_v27, %v327_v26  ;;  %v316_v33 = vmul.f32 %v262_v13, %v262_v13 }
  0x1e   : > { %v280_v14 = vadd.f32 %v279_v9, %v278_v11  ;;  %v332_v34 = vsel %vm273_vm1, %v314_v21, 0.0  ;;  %v289_v35 = vsel %vm273_vm1, %v265_v31, 0.0  ;;  %v317_v39 = vmul.f32 %v263_v19, %v263_v19  ;;  %v272_v9 = vld [vmem:[%s970_s10 + $0x78] sm:$0xff] }
  0x1f   : > { %v331_v36 = vadd.f32 %v330_v28, %v329_v30  ;;  %v334_v40 = vsel %vm273_vm1, %v315_v23, 0.0  ;;  %v291_v41 = vsel %vm273_vm1, %v266_v37, 0.0  ;;  %v318_v45 = vmul.f32 %v264_v24, %v264_v24 }
  0x20   : > { %v282_v20 = vadd.f32 %v281_v12, %v280_v14  ;;  %v336_v46 = vsel %vm273_vm1, %v316_v33, 0.0  ;;  %v293_v47 = vsel %vm273_vm1, %v267_v43, 0.0  ;;  %v319_v51 = vmul.f32 %v265_v31, %v265_v31 }
  0x21   : > { %v333_v42 = vadd.f32 %v332_v34, %v331_v36  ;;  %v338_v52 = vsel %vm273_vm1, %v317_v39, 0.0  ;;  %v295_v53 = vsel %vm273_vm1, %v268_v49, 0.0  ;;  %v320_v57 = vmul.f32 %v266_v37, %v266_v37 }
  0x22   : > { %v284_v25 = vadd.f32 %v283_v18, %v282_v20  ;;  %v340_v58 = vsel %vm273_vm1, %v318_v45, 0.0  ;;  %v297_v59 = vsel %vm273_vm1, %v269_v55, 0.0  ;;  %v321_v63 = vmul.f32 %v267_v43, %v267_v43  ;;  %v364_v43 = vld [vmem:[#allocation2] sm:$0x3] }
  0x23   : > { %v335_v48 = vadd.f32 %v334_v40, %v333_v42  ;;  %v342_v0 = vsel %vm273_vm1, %v319_v51, 0.0  ;;  %v299_v1 = vsel %vm273_vm1, %v270_v61, 0.0  ;;  %v322_v5 = vmul.f32 %v268_v49, %v268_v49 }
  0x24   : > { %v286_v32 = vadd.f32 %v285_v22, %v284_v25  ;;  %v344_v6 = vsel %vm273_vm1, %v320_v57, 0.0  ;;  %v301_v7 = vsel %vm273_vm1, %v271_v3, 0.0  ;;  %v323_v11 = vmul.f32 %v269_v55, %v269_v55 }
  0x25   : > { %v337_v54 = vadd.f32 %v336_v46, %v335_v48  ;;  %v346_v12 = vsel %vm273_vm1, %v321_v63, 0.0  ;;  %v303_v13 = vsel %vm273_vm1, %v272_v9, 0.0  ;;  %v324_v16 = vmul.f32 %v270_v61, %v270_v61 }
  0x26   : > { %v288_v38 = vadd.f32 %v287_v29, %v286_v32  ;;  %v348_v17 = vsel %vm273_vm1, %v322_v5, 0.0  ;;  %v325_v20 = vmul.f32 %v271_v3, %v271_v3  ;;  %v350_v21 = vsel %vm273_vm1, %v323_v11, 0.0 }
  0x27   : > { %v339_v60 = vadd.f32 %v338_v52, %v337_v54  ;;  %v326_v24 = vmul.f32 %v272_v9, %v272_v9  ;;  %v352_v25 = vsel %vm273_vm1, %v324_v16, 0.0 }
  0x28   : > { %v290_v44 = vadd.f32 %v289_v35, %v288_v38  ;;  %v354_v28 = vsel %vm273_vm1, %v325_v20, 0.0 }
  0x29   : > { %v341_v2 = vadd.f32 %v340_v58, %v339_v60  ;;  %v356_v30 = vsel %vm273_vm1, %v326_v24, 0.0 }
  0x2a   : > { %v292_v50 = vadd.f32 %v291_v41, %v290_v44 }
  0x2b   : > { %v343_v8 = vadd.f32 %v342_v0, %v341_v2 }
  0x2c   : > { %v294_v56 = vadd.f32 %v293_v47, %v292_v50 }
  0x2d   : > { %v345_v14 = vadd.f32 %v344_v6, %v343_v8 }
  0x2e   : > { %v296_v62 = vadd.f32 %v295_v53, %v294_v56 }
  0x2f   : > { %v347_v18 = vadd.f32 %v346_v12, %v345_v14 }
  0x30   : > { %v298_v4 = vadd.f32 %v297_v59, %v296_v62 }
  0x31   : > { %v349_v22 = vadd.f32 %v348_v17, %v347_v18 }
  0x32   : > { %v300_v10 = vadd.f32 %v299_v1, %v298_v4 }
  0x33   : > { %v351_v26 = vadd.f32 %v350_v21, %v349_v22 }
  0x34   : > { %v302_v15 = vadd.f32 %v301_v7, %v300_v10 }
  0x35   : > { %v353_v29 = vadd.f32 %v352_v25, %v351_v26 }
  0x36   : > { %v304_v19 = vadd.f32 %v303_v13, %v302_v15 }
  0x37   : > { %v355_v32 = vadd.f32 %v354_v28, %v353_v29 }
  0x38   : > { %v305_v23 = vrot.slane %v304_v19, 4 }
  0x39   : > { %v357_v33 = vadd.f32 %v356_v30, %v355_v32 }
  0x3a   : > { %v306_v27 = vadd.f32 %v305_v23, %v304_v19 }
  0x3b   : > { %v358_v35 = vrot.slane %v357_v33, 4 }
  0x3c   : > { %v307_v31 = vrot.slane %v306_v27, 2 }
  0x3d   : > { %v359_v36 = vadd.f32 %v358_v35, %v357_v33 }
  0x3e   : > { %v308_v34 = vadd.f32 %v307_v31, %v306_v27 }
  0x3f   : > { %v360_v38 = vrot.slane %v359_v36, 2 }
  0x40   : > { %v309_v37 = vrot.slane %v308_v34, 1 }
  0x41   : > { %v361_v39 = vadd.f32 %v360_v38, %v359_v36 }
  0x42   : > { %v310_v40 = vadd.f32 %v309_v37, %v308_v34 }
  0x43   : > { %v362_v41 = vrot.slane %v361_v39, 1 }
  0x45   : > { %v363_v42 = vadd.f32 %v362_v41, %v361_v39 }
  0x46   : > { %373 = sbr.rel (%p774_p8) target bundleno = 502 (0x1f6), region = 48 }
  0x47   : > { %v366_v44 = vsel %vm365_vm2, %v310_v40, %v363_v42 }
  0x48   : > { %v367_v45 = vadd.f32 %v366_v44, %v364_v43 }
  0x4a   : > { %369 = vst.msk [vmem:[#allocation2] sm:$0x3] %vm368_vm3, %v367_v45 }
  0x4b   : > { %v375_v46 = vld [vmem:[%s1059_s3] sm:$0xff]  ;;  %v897_v48 = vmov 0.0   ;;  %vm898_vm4 = vmmov 0   ;;  %vm533_vm5 = vcmask 1043456   ;;  %vm529_vm6 = vcmask 31744  }
  0x4c   : > { %791 = vmatprep.subr.mxu0 %v897_v48  ;;  %796 = vmatprep.subr.mxu1 %v897_v48  ;;  %v528_v50 = vld [vmem:[%s1060_s4] sm:$0xf]  ;;  %v687_v1 = vlaneseq }
  0x4d   : > { %792 = vmatpush3.msra.mxu0 %v375_v46  ;;  %793 = vmatprep.mubr.msk.f32.mxu0 %vm898_vm4, %v897_v48  ;;  %v681_v2 = vld [vmem:[%s1057_s1] sm:$0x1] }
  0x4e   : > { %797 = vmatpush3.msra.mxu1 %v375_v46  ;;  %798 = vmatprep.mubr.msk.f32.mxu1 %vm898_vm4, %v897_v48  ;;  %v688_v3 = vshrl.u32 %v687_v1, 7  ;;  %v683_v6 = vld [vmem:[%s1058_s2] sm:$0x1] }
  0x4f   : > { %801 = vmatprep.subr.mxu0 %v897_v48  ;;  %806 = vmatprep.subr.mxu1 %v897_v48 }
  0x50   : > { %v689_v8 = vsub.s32 0, %v688_v3 }
  0x51   : > { %v374_v47 = vld [vmem:[#allocation2] sm:$0x3] }
  0x52   : > { %v451_v49 = vrot.slane %v374_v47, 1  ;;  %794 = vmatmul.mubr.msk.f32.vlgmr.msra.gmra.mxu0 %vm273_vm1, %v374_v47 }
  0x53   : > { %803 = vmatprep.mubr.msk.f32.mxu0 %vm898_vm4, %v897_v48  ;;  %802 = vmatpush3.msk.msra.mxu0 %vm533_vm5, %v528_v50 }
  0x54   : > { %799 = vmatmul.mubr.msk.f32.vlgmr.msra.gmra.mxu1 %vm273_vm1, %v451_v49 }
  0x55   : > { %808 = vmatprep.mubr.msk.f32.mxu1 %vm898_vm4, %v897_v48  ;;  %807 = vmatpush3.msk.msra.mxu1 %vm533_vm5, %v528_v50 }
 0x112   : > { %v445_v51 = vpop.f32.mrf.mxu0 }
 0x113   : > { %v450_v53 = vmul.f32 0.001953125, %v445_v51 }
 0x114   : > { %v520_v52 = vpop.f32.mrf.mxu1  ;;  %v795_v55 = vpop.f32.mrf.mxu0 }
 0x115   : > { %v524_v54 = vmul.f32 0.001953125, %v520_v52  ;;  %v525_v57 = vmul.f32 %v450_v53, %v450_v53  ;;  %804 = vmatmul.mubr.msk.f32.vlgmr.msra.gmra.mxu0 %vm529_vm6, %v450_v53 }
 0x116   : > { %v800_v56 = vpop.f32.mrf.mxu1 }
 0x117   : > { %v526_v58 = vsub.f32 %v524_v54, %v525_v57 }
 0x119   : > { %v527_v59 = vmax.f32 %v526_v58, 0.0 }
 0x11b   : > { %809 = vmatmul.mubr.msk.f32.vlgmr.msra.gmra.mxu1 %vm529_vm6, %v527_v59 }
 0x1d5   : > { %v603_v60 = vpop.f32.mrf.mxu0 }
 0x1d7   : > { %v805_v61 = vpop.f32.mrf.mxu0 }
 0x1db   : > { %v676_v62 = vpop.f32.mrf.mxu1 }
 0x1dc   : > { %v677_v63 = vadd.f32 1e-06, %v676_v62 }
 0x1dd   : > { %v810_v0 = vpop.f32.mrf.mxu1 }
 0x1de   : > { %854 = vrsqrt.f32 %v677_v63 }
 0x1eb   : > { %v855_v4 = vpop.eup %854 }
 0x1ec   : > { %v682_v5 = vmul.f32 %v855_v4, %v681_v2 }
 0x1ee   : > { %v684_v7 = vmul.f32 %v682_v5, %v603_v60 }
 0x1f0   : > { %v685_v9 = vsub.f32 %v683_v6, %v684_v7 }
 0x1f2   : > { %v690_v10 = vrot.slane %v685_v9, %v689_v8 }
 0x1f4   : > { %v692_v11 = vsel %vm365_vm2, %v682_v5, %v690_v10 }
 0x1f5   : > { %693 = vst.msk [vmem:[%s965_s6] sm:$0x3] %vm368_vm3, %v692_v11 }
 0x1f6 PF: > { %s15_s22 = sadd.s32 1, %s894_s22   ;;  %s1062_s18 = smov %s886_s20 }
 0x1f7   : > { %p12_p9 = scmp.ge.s32.totalorder %s15_s22, 6   ;;  %s1063_s19 = smov %s890_s21 }
 0x1f8   : > { %s1064_s20 = smov %s1067_s23  ;;  %s1065_s21 = smov %s1071_s24 }
 0x1f9   :  { %14 = sbr.rel (!%p12_p9) target bundleno = 3 (0x3), region = 78 }

// kernel: _lambda_.5
= control target key start
LH: loop header
LB: loop body
LE: loop exit
PB: predicated region body
PF: predicated region fallthrough
CT: control target
= control target key end

     0   :  { %s4418_s21 = smov 0   ;;  %s4420_s22 = smov 0   ;;  %s5780_s0 = inlined_call_operand.vmem [shape: f32[2,4,8,8,8], index: 0, kind: input, shape index: {}, may-alias: {0,1,2}]   ;;  %s5781_s1 = inlined_call_operand.vmem [shape: f32[2,4,8,8,8], index: 1, kind: input, shape index: {}, may-alias: {0,1,2}]   ;;  %s5782_s2 = inlined_call_operand.vmem [shape: f32[2,4,8,8,8], index: 2, kind: input, shape index: {}, may-alias: {0,1,2}]   ;;  %s5783_s3 = inlined_call_operand.vmem [shape: f32[2,2,8], index: 3, kind: input, shape index: {}]   ;;  %s5784_s4 = inlined_call_operand.vmem [shape: bf16[9,24,8], index: 4, kind: input, shape index: {}]   ;;  %s5785_s5 = inlined_call_operand.vmem [shape: f32[1,8], index: 5, kind: input, shape index: {}]   ;;  %s5786_s6 = inlined_call_operand.vmem [shape: f32[2,256,8], index: 6, kind: output, shape index: {}]  }
   0x1   :  { %s4422_s23 = smov 0   ;;  %s4424_s24 = smov 0  }
   0x2   :  { %s4426_s25 = smov 0  }
   0x3 LB: > { %s25_s26 = sadd.s32 1, %s4370_s23  ;;  %s28_s27 = sadd.s32 1, %s4374_s24  ;;  %s4378_s25 = sphi %s4426_s25, %s16_s25   ;;  %s4374_s24 = sphi %s4424_s24, %s5823_s24   ;;  %s4370_s23 = sphi %s4422_s23, %s5822_s23   ;;  %s4366_s22 = sphi %s4420_s22, %s5821_s22   ;;  %s4362_s21 = sphi %s4418_s21, %s5820_s21  }
   0x4   : > { %p26_p0 = scmp.ge.s32.totalorder %s25_s26, 2  ;;  %p3652_p1 = scmp.ge.s32.totalorder %s4378_s25, 1 }
   0x5   : > { %p307_p2 = scmp.lt.s32.totalorder %s4378_s25, 5 }
   0x6   : > { %s5825_s26 = smov (%p26_p0, %s25_s26), 0  ;;  %s5827_s27 = smov (!%p26_p0, %s28_s27), %s4374_s24 }
   0x7   : > { %p308_p3 = pnand %p3652_p1, %p307_p2  ;;  %p30_p4 = scmp.ge.s32.totalorder %s5827_s27, 2 }
   0x9   : > { %s5829_s27 = smov (%p30_p4, %s5827_s27), 0  ;;  %311 = sbr.rel (%p308_p3) target bundleno = 601 (0x259), region = 44 }
   0xe   : > { %s4451_s28 = sshll.u32 %s4362_s21, 1  ;;  %p380_p5 = scmp.lt.s32.totalorder %s4366_s22, 1  ;;  %vm1150_vm0 = vcmask 1040384   ;;  %vm1151_vm1 = vsmask.f32 256  ;;  %vm1185_vm2 = vcmask 1044480  }
   0xf   : > { %p396_p6 = scmp.lt.s32.totalorder %s4451_s28, 3  ;;  %s4474_s17 = sadd.s32 4294967295, %s4451_s28  ;;  %vm1186_vm3 = vsmask.f32 4352  ;;  %vm4690_vm4 = vmand %vm1150_vm0, %vm1151_vm1  ;;  %vm1871_vm6 = vcmask 1043456   ;;  %vm1636_vm7 = vcmask 64512  }
  0x10   : > { %s5831_s22 = smov (!%p380_p5, %s4366_s22), 1  ;;  %p378_p7 = scmp.gt.s32.totalorder %s4474_s17, 0  ;;  %vm4696_vm5 = vmand %vm1185_vm2, %vm1186_vm3  ;;  %vm1701_vm8 = vcmask 130048   ;;  %vm1846_vm9 = vcmask 195584  }
  0x11   : > { %s397_s29 = scalar_select %p396_p6, %s4451_s28, 3 }
  0x12   : > { %s4455_s30 = sshll.u32 %s5831_s22, 5  ;;  %s3674_s7 = sshll.u32 %s5831_s22, 1 }
  0x13   : > { %s3664_s8 = sshll.u32 %s397_s29, 3  ;;  %s424_s11 = scalar_lea.vmem %s5783_s3, %s3674_s7 }
  0x14   : > { %s400_s12 = sadd.s32 %s3664_s8, %s4455_s30  ;;  %v4461_v0 = vld [vmem:[%s424_s11] ss:$0 sm:$0xff]  ;;  %v4468_v1 = vld [vmem:[%s424_s11 + $0x1] ss:$0 sm:$0xff]  ;;  %s405_s18 = sadd.s32 2, %s4451_s28 }
  0x15   : > { %s3666_s13 = sshll.u32 %s400_s12, 3  ;;  %p3655_p8 = scmp.lt.s32.totalorder %s4474_s17, 3 }
  0x16   : > { %s4466_s16 = scalar_lea.vmem %s5781_s1, %s3666_s13  ;;  %p4514_p9 = scmp.lt.s32.totalorder %s405_s18, 3 }
  0x17   : > { %v447_v2 = vld [vmem:[%s4466_s16 + $0x8] sm:$0xff]  ;;  %v446_v3 = vld [vmem:[%s4466_s16] sm:$0xff]  ;;  %v449_v4 = vld [vmem:[%s4466_s16 + $0x18] sm:$0xff]  ;;  %s379_s20 = scalar_select %p378_p7, %s4474_s17, 0 }
  0x18   : > { %v483_v5 = vmul.f32 %v4461_v0, %v447_v2  ;;  %v482_v6 = vmul.f32 %v4461_v0, %v446_v3  ;;  %v485_v7 = vmul.f32 %v4461_v0, %v449_v4  ;;  %v448_v8 = vld [vmem:[%s4466_s16 + $0x10] sm:$0xff]  ;;  %v450_v10 = vld [vmem:[%s4466_s16 + $0x20] sm:$0xff]  ;;  %v451_v14 = vld [vmem:[%s4466_s16 + $0x28] sm:$0xff]  ;;  %s5833_s18 = smov (!%p4514_p9, %s405_s18), 3  ;;  %s4381_s17 = smov 8  }
  0x19   : > { %v452_v9 = vld [vmem:[%s4466_s16 + $0x30] sm:$0xff]  ;;  %v484_v11 = vmul.f32 %v4461_v0, %v448_v8  ;;  %v486_v13 = vmul.f32 %v4461_v0, %v450_v10  ;;  %v453_v15 = vld [vmem:[%s4466_s16 + $0x38] sm:$0xff]  ;;  %v487_v19 = vmul.f32 %v4461_v0, %v451_v14  ;;  %v454_v20 = vld [vmem:[%s4466_s16 + $0x40] sm:$0xff]  ;;  %s5835_s20 = smov (!%p3655_p8, %s379_s20), 3  ;;  %s5837_s18 = smov (!%p4514_p9, %s5833_s18), 3 }
  0x1a   : > { %v488_v12 = vmul.f32 %v4461_v0, %v452_v9  ;;  %v4488_v16 = vadd.f32 %v4468_v1, %v483_v5  ;;  %v4491_v17 = vadd.f32 %v4468_v1, %v482_v6  ;;  %v4494_v18 = vadd.f32 %v4468_v1, %v485_v7  ;;  %v455_v25 = vld [vmem:[%s4466_s16 + $0x48] sm:$0xff]  ;;  %v456_v26 = vld [vmem:[%s4466_s16 + $0x50] sm:$0xff]  ;;  %v457_v27 = vld [vmem:[%s4466_s16 + $0x58] sm:$0xff]  ;;  %s3660_s22 = sshll.u32 %s5835_s20, 3  ;;  %s3671_s29 = sshll.u32 %s5837_s18, 3 }
  0x1b   : > { %v4501_v21 = vadd.f32 %v4468_v1, %v484_v11  ;;  %v4507_v23 = vadd.f32 %v4468_v1, %v486_v13  ;;  %v489_v24 = vmul.f32 %v4461_v0, %v453_v15  ;;  %v4522_v31 = vadd.f32 %v4468_v1, %v487_v19  ;;  %v458_v35 = vld [vmem:[%s4466_s16 + $0x60] sm:$0xff]  ;;  %v459_v39 = vld [vmem:[%s4466_s16 + $0x68] sm:$0xff]  ;;  %v460_v46 = vld [vmem:[%s4466_s16 + $0x70] sm:$0xff]  ;;  %s386_s28 = sadd.s32 %s4455_s30, %s3660_s22  ;;  %s414_s8 = sadd.s32 %s3671_s29, %s4455_s30 }
  0x1c   : > { %v4504_v22 = vadd.f32 %v4468_v1, %v488_v12  ;;  %v3689_v28 = vmul.f32 -1.442695, %v4488_v16  ;;  %v3688_v29 = vmul.f32 -1.442695, %v4491_v17  ;;  %v3691_v30 = vmul.f32 -1.442695, %v4494_v18 }
  0x1d   : > { %v3690_v32 = vmul.f32 -1.442695, %v4501_v21  ;;  %v4527_v34 = vadd.f32 %v4468_v1, %v489_v24  ;;  %v3692_v36 = vmul.f32 -1.442695, %v4507_v23  ;;  %v490_v37 = vmul.f32 %v4461_v0, %v454_v20  ;;  %v461_v50 = vld [vmem:[%s4466_s16 + $0x78] sm:$0xff]  ;;  %s3662_s7 = sshll.u32 %s386_s28, 3 }
  0x1e   : > { %v3694_v33 = vmul.f32 -1.442695, %v4504_v22  ;;  %4212 = vpow2.f32 %v3689_v28  ;;  %v491_v38 = vmul.f32 %v4461_v0, %v455_v25  ;;  %v3693_v40 = vmul.f32 -1.442695, %v4522_v31  ;;  %s4575_s11 = scalar_lea.vmem %s5780_s0, %s3662_s7  ;;  %s3673_s12 = sshll.u32 %s414_s8, 3 }
  0x1f   : > { %4214 = vpow2.f32 %v3688_v29  ;;  %v492_v41 = vmul.f32 %v4461_v0, %v456_v26  ;;  %v493_v42 = vmul.f32 %v4461_v0, %v457_v27  ;;  %v4545_v43 = vadd.f32 %v4468_v1, %v490_v37  ;;  %v439_v55 = vld [vmem:[%s4575_s11 + $0x8] sm:$0xff]  ;;  %v441_v56 = vld [vmem:[%s4575_s11 + $0x18] sm:$0xff]  ;;  %s4595_s15 = scalar_lea.vmem %s5782_s2, %s3673_s12  ;;  %v438_v2 = vld [vmem:[%s4575_s11] sm:$0xff]  ;;  %s4380_s16 = smov 16  }
  0x20   : > { %4216 = vpow2.f32 %v3691_v30  ;;  %v4548_v44 = vadd.f32 %v4468_v1, %v491_v38  ;;  %v494_v45 = vmul.f32 %v4461_v0, %v458_v35  ;;  %v495_v49 = vmul.f32 %v4461_v0, %v459_v39  ;;  %v445_v61 = vld [vmem:[%s4575_s11 + $0x38] sm:$0xff]  ;;  %v440_v7 = vld [vmem:[%s4575_s11 + $0x10] sm:$0xff]  ;;  %v442_v8 = vld [vmem:[%s4575_s11 + $0x20] sm:$0xff]  ;;  %s3675_s20 = sshll.u32 %s4362_s21, 4 }
  0x21   : > { %4218 = vpow2.f32 %v3690_v32  ;;  %v4553_v47 = vadd.f32 %v4468_v1, %v492_v41  ;;  %v4556_v48 = vadd.f32 %v4468_v1, %v493_v42  ;;  %v496_v53 = vmul.f32 %v4461_v0, %v460_v46  ;;  %v462_v12 = vld [vmem:[%s4595_s15] sm:$0xff]  ;;  %v463_v19 = vld [vmem:[%s4595_s15 + $0x8] sm:$0xff]  ;;  %v464_v20 = vld [vmem:[%s4595_s15 + $0x10] sm:$0xff]  ;;  %p5663_p10 = scmp.lt.s32.totalorder %s3675_s20, 31 }
  0x22   : > { %4220 = vpow2.f32 %v3694_v33  ;;  %v4563_v51 = vadd.f32 %v4468_v1, %v494_v45  ;;  %v4567_v52 = vadd.f32 %v4468_v1, %v495_v49  ;;  %v497_v54 = vmul.f32 %v4461_v0, %v461_v50  ;;  %v465_v28 = vld [vmem:[%s4595_s15 + $0x18] sm:$0xff]  ;;  %v443_v37 = vld [vmem:[%s4575_s11 + $0x28] sm:$0xff] }
  0x23   : > { %4222 = vpow2.f32 %v3692_v36  ;;  %v4580_v57 = vadd.f32 %v4468_v1, %v496_v53  ;;  %v475_v59 = vmul.f32 %v4461_v0, %v439_v55  ;;  %v477_v60 = vmul.f32 %v4461_v0, %v441_v56  ;;  %v466_v53 = vld [vmem:[%s4595_s15 + $0x20] sm:$0xff]  ;;  %v444_v56 = vld [vmem:[%s4575_s11 + $0x30] sm:$0xff]  ;;  %s5839_s20 = smov (!%p5663_p10, %s3675_s20), 31 }
  0x24   : > { %4224 = vpow2.f32 %v3693_v40  ;;  %v4583_v58 = vadd.f32 %v4468_v1, %v497_v54  ;;  %v3695_v62 = vmul.f32 -1.442695, %v4527_v34  ;;  %v481_v3 = vmul.f32 %v4461_v0, %v445_v61  ;;  %v468_v61 = vld [vmem:[%s4595_s15 + $0x30] sm:$0xff]  ;;  %s431_s21 = sadd.s32 %s4455_s30, %s5839_s20 }
  0x25   : > { %v4590_v63 = vadd.f32 %v4468_v1, %v475_v59  ;;  %v4601_v6 = vadd.f32 %v4468_v1, %v477_v60  ;;  %v474_v15 = vmul.f32 %v4461_v0, %v438_v2  ;;  %v476_v26 = vmul.f32 %v4461_v0, %v440_v7  ;;  %v467_v60 = vld [vmem:[%s4595_s15 + $0x28] sm:$0xff]  ;;  %s3677_s28 = sshll.u32 %s431_s21, 3 }
  0x26   : > { %v4606_v11 = vadd.f32 %v4468_v1, %v481_v3  ;;  %4226 = vpow2.f32 %v3695_v62  ;;  %v478_v27 = vmul.f32 %v4461_v0, %v442_v8  ;;  %v498_v33 = vmul.f32 %v4461_v0, %v462_v12  ;;  %v469_v3 = vld [vmem:[%s4595_s15 + $0x38] sm:$0xff]  ;;  %s5697_s9 = scalar_lea.vmem %s5786_s6, %s3677_s28 }
  0x27   : > { %v3681_v5 = vmul.f32 -1.442695, %v4590_v63  ;;  %v3683_v32 = vmul.f32 -1.442695, %v4601_v6  ;;  %v499_v38 = vmul.f32 %v4461_v0, %v463_v19  ;;  %v500_v39 = vmul.f32 %v4461_v0, %v464_v20 }
  0x28   : > { %v4621_v42 = vadd.f32 %v4468_v1, %v498_v33  ;;  %v501_v45 = vmul.f32 %v4461_v0, %v465_v28  ;;  %v4632_v54 = vadd.f32 %v4468_v1, %v474_v15  ;;  %v479_v55 = vmul.f32 %v4461_v0, %v443_v37 }
  0x29   : > { %4228 = vpow2.f32 %v3681_v5  ;;  %v4625_v49 = vadd.f32 %v4468_v1, %v499_v38  ;;  %v4628_v50 = vadd.f32 %v4468_v1, %v500_v39  ;;  %v4642_v62 = vadd.f32 %v4468_v1, %v476_v26 }
  0x2a   : > { %v4637_v59 = vadd.f32 %v4468_v1, %v501_v45  ;;  %v3696_v2 = vmul.f32 -1.442695, %v4545_v43  ;;  %v3698_v5 = vmul.f32 -1.442695, %v4553_v47  ;;  %v502_v7 = vmul.f32 %v4461_v0, %v466_v53 }
  0x2b   : > { %v4213_v4 = vpop.eup %4212  ;;  %5797 = vst [vmem:[#allocation3_spill] sm:$0xff] %v4625_v49  ;;  %5798 = vst [vmem:[#allocation4_spill] sm:$0xff] %v4628_v50  ;;  %v4650_v8 = vadd.f32 %v4468_v1, %v478_v27  ;;  %v504_v12 = vmul.f32 %v4461_v0, %v468_v61  ;;  %v505_v19 = vmul.f32 %v4461_v0, %v469_v3  ;;  %v3682_v20 = vmul.f32 -1.442695, %v4642_v62 }
  0x2c   : > { %v4215_v9 = vpop.eup %4214  ;;  %v647_v10 = vadd.f32 1.0, %v4213_v4  ;;  %v3697_v4 = vmul.f32 -1.442695, %v4548_v44  ;;  %v4660_v15 = vadd.f32 %v4468_v1, %v502_v7  ;;  %v4686_v53 = vmul.f32 -1.442695, %v4606_v11 }
  0x2d   : > { %v4217_v13 = vpop.eup %4216  ;;  %v646_v14 = vadd.f32 1.0, %v4215_v9  ;;  %v480_v9 = vmul.f32 %v4461_v0, %v444_v56  ;;  %v4673_v27 = vadd.f32 %v4468_v1, %v505_v19 }
  0x2e   : > { %v4219_v24 = vpop.eup %4218  ;;  %4230 = vrcp.f32 %v647_v10  ;;  %v649_v25 = vadd.f32 1.0, %v4217_v13  ;;  %v503_v10 = vmul.f32 %v4461_v0, %v467_v60  ;;  %v3680_v13 = vmul.f32 -1.442695, %v4632_v54 }
  0x2f   : > { %v4221_v29 = vpop.eup %4220  ;;  %4232 = vrcp.f32 %v646_v14  ;;  %v648_v30 = vadd.f32 1.0, %v4219_v24  ;;  %v4657_v14 = vadd.f32 %v4468_v1, %v479_v55  ;;  %5799 = vst [vmem:[#allocation5_spill] sm:$0xff] %v4673_v27  ;;  %v4677_v0 = vadd.f32 %v4468_v1, %v480_v9 }
  0x30   : > { %v4223_v35 = vpop.eup %4222  ;;  %4234 = vrcp.f32 %v649_v25  ;;  %v652_v36 = vadd.f32 1.0, %v4221_v29  ;;  %v4665_v24 = vadd.f32 %v4468_v1, %v503_v10  ;;  %v4668_v25 = vadd.f32 %v4468_v1, %v504_v12 }
  0x31   : > { %v4225_v40 = vpop.eup %4224  ;;  %4236 = vrcp.f32 %v648_v30  ;;  %v650_v41 = vadd.f32 1.0, %v4223_v35  ;;  %v3684_v29 = vmul.f32 -1.442695, %v4650_v8  ;;  %v3685_v33 = vmul.f32 -1.442695, %v4657_v14 }
  0x32   : > { %4238 = vrcp.f32 %v652_v36  ;;  %v651_v46 = vadd.f32 1.0, %v4225_v40 }
  0x33   : > { %4240 = vrcp.f32 %v650_v41  ;;  %v4670_v26 = vpop.eup %4226  ;;  %v3686_v41 = vmul.f32 -1.442695, %v4677_v0 }
  0x34   : > { %4242 = vrcp.f32 %v651_v46 }
  0x35   : > { %4244 = vpow2.f32 %v3683_v32 }
  0x36   : > { %4246 = vpow2.f32 %v3696_v2  ;;  %v4229_v28 = vpop.eup %4228 }
  0x37   : > { %4248 = vpow2.f32 %v3697_v4  ;;  %v639_v32 = vadd.f32 1.0, %v4229_v28 }
  0x38   : > { %4250 = vpow2.f32 %v3698_v5 }
  0x39   : > { %4252 = vpow2.f32 %v3680_v13 }
  0x3a   : > { %4254 = vpow2.f32 %v3682_v20 }
  0x3b   : > { %v4231_v30 = vpop.eup %4230  ;;  %4256 = vrcp.f32 %v639_v32 }
  0x3c   : > { %v4233_v35 = vpop.eup %4232  ;;  %v743_v36 = vmul.f32 %v4231_v30, %v4488_v16  ;;  %4258 = vpow2.f32 %v3684_v29 }
  0x3d   : > { %v4235_v37 = vpop.eup %4234  ;;  %v742_v38 = vmul.f32 %v4233_v35, %v4491_v17  ;;  %4260 = vpow2.f32 %v3685_v33 }
  0x3e   : > { %v4237_v1 = vpop.eup %4236  ;;  %v775_v39 = vpack.c.bf16 %v743_v36, %v743_v36  ;;  %v745_v40 = vmul.f32 %v4235_v37, %v4494_v18  ;;  %4262 = vpow2.f32 %v3686_v41 }
  0x3f   : > { %v4239_v45 = vpop.eup %4238  ;;  %v774_v46 = vpack.c.bf16 %v742_v38, %v742_v38  ;;  %v744_v16 = vmul.f32 %v4237_v1, %v4501_v21  ;;  %4264 = vpow2.f32 %v4686_v53 }
  0x40   : > { %v4241_v55 = vpop.eup %4240  ;;  %v862_v56 = vshrl.u32 %v775_v39, 16  ;;  %v865_v60 = vshll.u32 %v775_v39, 16  ;;  %v1095_v17 = vrot.slane %v775_v39, 7  ;;  %v777_v61 = vpack.c.bf16 %v745_v40, %v745_v40 }
  0x41   : > { %v4243_v2 = vpop.eup %4242  ;;  %v855_v3 = vshrl.u32 %v774_v46, 16  ;;  %v858_v4 = vshll.u32 %v774_v46, 16  ;;  %v1094_v18 = vrot.slane %v774_v46, 7  ;;  %v776_v5 = vpack.c.bf16 %v744_v16, %v744_v16 }
  0x42   : > { %v4245_v7 = vpop.eup %4244  ;;  %v864_v9 = vrot.slane %v862_v56, 7  ;;  %v876_v10 = vshrl.u32 %v777_v61, 16  ;;  %v879_v12 = vshll.u32 %v777_v61, 16  ;;  %v1097_v13 = vrot.slane %v777_v61, 7 }
  0x43   : > { %v857_v19 = vrot.slane %v855_v3, 7  ;;  %v869_v20 = vshrl.u32 %v776_v5, 16  ;;  %v872_v28 = vshll.u32 %v776_v5, 16  ;;  %v1096_v29 = vrot.slane %v776_v5, 7  ;;  %v4702_v37 = vpop.eup %4246 }
  0x44   : > { %v867_v30 = vor.u32 %v865_v60, %v864_v9  ;;  %v878_v33 = vrot.slane %v876_v10, 7  ;;  %v748_v35 = vmul.f32 %v4239_v45, %v4504_v22  ;;  %v746_v36 = vmul.f32 %v4241_v55, %v4507_v23  ;;  %v4705_v56 = vpop.eup %4248 }
  0x45   : > { %v860_v38 = vor.u32 %v858_v4, %v857_v19  ;;  %v871_v1 = vrot.slane %v869_v20, 7  ;;  %v747_v40 = vmul.f32 %v4243_v2, %v4522_v31  ;;  %v641_v16 = vadd.f32 1.0, %v4245_v7  ;;  %v4709_v10 = vpop.eup %4250 }
  0x46   : > { %v1162_v60 = vsel %vm4690_vm4, %v775_v39, %v867_v30  ;;  %v881_v3 = vor.u32 %v879_v12, %v878_v33  ;;  %v780_v9 = vpack.c.bf16 %v748_v35, %v748_v35  ;;  %v778_v27 = vpack.c.bf16 %v746_v36, %v746_v36  ;;  %v4253_v55 = vpop.eup %4252 }
  0x47   : > { %v4713_v22 = vsel %vm4696_vm5, %v1162_v60, %v1095_v17  ;;  %v1161_v23 = vsel %vm4690_vm4, %v774_v46, %v860_v38  ;;  %v874_v45 = vor.u32 %v872_v28, %v871_v1  ;;  %v779_v31 = vpack.c.bf16 %v747_v40, %v747_v40  ;;  %v4255_v12 = vpop.eup %4254 }
  0x48   : > { %5804 = vst [vmem:[#allocation6_spill] sm:$0xff] %v4713_v22  ;;  %v1549_v2 = vrot.slane %v4713_v22, 1  ;;  %v4720_v39 = vsel %vm4696_vm5, %v1161_v23, %v1094_v18  ;;  %v1164_v4 = vsel %vm4690_vm4, %v777_v61, %v881_v3  ;;  %v897_v7 = vshrl.u32 %v780_v9, 16  ;;  %v4257_v28 = vpop.eup %4256 }
  0x49   : > { %5805 = vst [vmem:[#allocation7_spill] sm:$0xff] %v4720_v39  ;;  %v1548_v17 = vrot.slane %v4720_v39, 1  ;;  %v4727_v19 = vsel %vm4696_vm5, %v1164_v4, %v1097_v13  ;;  %v1163_v46 = vsel %vm4690_vm4, %v776_v5, %v874_v45  ;;  %v900_v20 = vshll.u32 %v780_v9, 16  ;;  %v4259_v33 = vpop.eup %4258 }
  0x4a   : > { %5806 = vst [vmem:[#allocation8_spill] sm:$0xff] %v4727_v19  ;;  %1590 = vrot.lane.b32.xlu0 %v1549_v2, %s4380_s16  ;;  %v1551_v18 = vrot.slane %v4727_v19, 1  ;;  %v4735_v61 = vsel %vm4696_vm5, %v1163_v46, %v1096_v29  ;;  %v899_v30 = vrot.slane %v897_v7, 7  ;;  %v1100_v35 = vrot.slane %v780_v9, 7  ;;  %v4261_v38 = vpop.eup %4260 }
  0x4b   : > { %5807 = vst [vmem:[#allocation9_spill] sm:$0xff] %v4735_v61  ;;  %1588 = vrot.lane.b32.xlu1 %v1548_v17, %s4380_s16  ;;  %v1550_v13 = vrot.slane %v4735_v61, 1  ;;  %v883_v5 = vshrl.u32 %v778_v27, 16  ;;  %v886_v36 = vshll.u32 %v778_v27, 16  ;;  %v890_v40 = vshrl.u32 %v779_v31, 16 }
  0x4c   : > { %v902_v1 = vor.u32 %v900_v20, %v899_v30  ;;  %v893_v60 = vshll.u32 %v779_v31, 16  ;;  %v735_v29 = vmul.f32 %v4257_v28, %v4590_v63  ;;  %4266 = vrcp.f32 %v641_v16 }
  0x4d   : > { %v885_v3 = vrot.slane %v883_v5, 7  ;;  %v638_v23 = vadd.f32 1.0, %v4253_v55  ;;  %v1098_v45 = vrot.slane %v778_v27, 7  ;;  %v892_v2 = vrot.slane %v890_v40, 7 }
  0x4e   : > { %1594 = vrot.lane.b32.xlu0 %v1551_v18, %s4380_s16  ;;  %v1167_v41 = vsel %vm4690_vm4, %v780_v9, %v902_v1  ;;  %v1099_v4 = vrot.slane %v779_v31, 7  ;;  %v767_v17 = vpack.c.bf16 %v735_v29, %v735_v29  ;;  %v640_v55 = vadd.f32 1.0, %v4255_v12  ;;  %v4263_v1 = vpop.eup %4262 }
  0x4f   : > { %1592 = vrot.lane.b32.xlu1 %v1550_v13, %s4380_s16  ;;  %v4747_v7 = vsel %vm4696_vm5, %v1167_v41, %v1100_v35  ;;  %v888_v53 = vor.u32 %v886_v36, %v885_v3  ;;  %4268 = vrcp.f32 %v638_v23  ;;  %v895_v16 = vor.u32 %v893_v60, %v892_v2 }
  0x50   : > { %v1554_v63 = vrot.slane %v4747_v7, 1  ;;  %v806_v9 = vshrl.u32 %v767_v17, 16  ;;  %v809_v20 = vshll.u32 %v767_v17, 16  ;;  %v653_v28 = vadd.f32 1.0, %v4670_v26 }
  0x51   : > { %v1165_v46 = vsel %vm4690_vm4, %v778_v27, %v888_v53  ;;  %v1166_v30 = vsel %vm4690_vm4, %v779_v31, %v895_v16  ;;  %4270 = vrcp.f32 %v640_v55  ;;  %v1087_v35 = vrot.slane %v767_v17, 7 }
  0x52   : > { %1600 = vrot.lane.b32.xlu0 %v1554_v63, %s4380_s16  ;;  %v4756_v18 = vsel %vm4696_vm5, %v1165_v46, %v1098_v45  ;;  %v4763_v12 = vsel %vm4696_vm5, %v1166_v30, %v1099_v4  ;;  %v808_v27 = vrot.slane %v806_v9, 7  ;;  %v642_v5 = vadd.f32 1.0, %v4259_v33  ;;  %v4265_v33 = vpop.eup %4264 }
  0x53   : > { %5808 = vst [vmem:[#allocation10_spill] sm:$0xff] %v4756_v18  ;;  %v1552_v13 = vrot.slane %v4756_v18, 1  ;;  %5809 = vst [vmem:[#allocation11_spill] sm:$0xff] %v4763_v12  ;;  %v1553_v26 = vrot.slane %v4763_v12, 1  ;;  %4272 = vrcp.f32 %v653_v28  ;;  %v1279_v60 = vshll.u32 %v4720_v39, 16 }
  0x54   : > { %v811_v36 = vor.u32 %v809_v20, %v808_v27  ;;  %4274 = vrcp.f32 %v642_v5  ;;  %v654_v3 = vadd.f32 1.0, %v4702_v37  ;;  %v4778_v23 = vmul.f32 -1.442695, %v4556_v48 }
  0x55   : > { %1596 = vrot.lane.b32.xlu1 %v1552_v13, %s4380_s16  ;;  %v4781_v41 = vmul.f32 -1.442695, %v4563_v51  ;;  %v4784_v2 = vmul.f32 -1.442695, %v4567_v52  ;;  %v4787_v4 = vmul.f32 -1.442695, %v4580_v57 }
  0x56   : > { %v1154_v31 = vsel %vm4690_vm4, %v767_v17, %v811_v36  ;;  %v4790_v37 = vmul.f32 -1.442695, %v4583_v58  ;;  %v643_v17 = vadd.f32 1.0, %v4261_v38  ;;  %v644_v63 = vadd.f32 1.0, %v4263_v1 }
  0x57   : > { %v4771_v40 = vsel %vm4696_vm5, %v1154_v31, %v1087_v35  ;;  %v655_v16 = vadd.f32 1.0, %v4705_v56  ;;  %v1277_v46 = vshrl.u32 %v4720_v39, 16  ;;  %v1281_v9 = vrot.slane %v1279_v60, 1 }
  0x58   : > { %v1541_v29 = vrot.slane %v4771_v40, 1  ;;  %v645_v20 = vadd.f32 1.0, %v4265_v33  ;;  %4276 = vrcp.f32 %v654_v3  ;;  %v4798_v13 = vmul.f32 -1.442695, %v4621_v42 }
  0x59   : > { %1598 = vrot.lane.b32.xlu1 %v1553_v26, %s4380_s16  ;;  %v4267_v45 = vpop.eup %4266  ;;  %4278 = vrcp.f32 %v643_v17  ;;  %v4804_v38 = vmul.f32 -1.442695, %v4625_v49  ;;  %v4807_v56 = vmul.f32 -1.442695, %v4628_v50  ;;  %v1284_v1 = vshrl.u32 %v4713_v22, 16 }
  0x5a   : > { %1574 = vrot.lane.b32.xlu0 %v1541_v29, %s4380_s16  ;;  %v737_v53 = vmul.f32 %v4267_v45, %v4601_v6  ;;  %4280 = vrcp.f32 %v644_v63  ;;  %v4801_v6 = vadd.f32 1.0, %v4709_v10  ;;  %v1286_v3 = vshll.u32 %v4713_v22, 16 }
  0x5b   : > { %4282 = vrcp.f32 %v655_v16  ;;  %v1300_v17 = vshll.u32 %v4727_v19, 16  ;;  %v1314_v39 = vshll.u32 %v4763_v12, 16 }
  0x5c   : > { %v4269_v55 = vpop.eup %4268  ;;  %v769_v28 = vpack.c.bf16 %v737_v53, %v737_v53  ;;  %4284 = vrcp.f32 %v645_v20  ;;  %v1298_v53 = vshrl.u32 %v4727_v19, 16  ;;  %v1288_v22 = vrot.slane %v1286_v3, 1 }
  0x5d   : > { %v734_v30 = vmul.f32 %v4269_v55, %v4632_v54  ;;  %v1282_v54 = vor.u32 %v1281_v9, %v1277_v46  ;;  %v1293_v46 = vshll.u32 %v4735_v61, 16  ;;  %v1302_v50 = vrot.slane %v1300_v17, 1 }
  0x5e   : > { %v4271_v27 = vpop.eup %4270  ;;  %v820_v35 = vshrl.u32 %v769_v28, 16  ;;  %v823_v5 = vshll.u32 %v769_v28, 16  ;;  %v1089_v29 = vrot.slane %v769_v28, 7  ;;  %4286 = vrcp.f32 %v4801_v6 }
  0x5f   : > { %v766_v26 = vpack.c.bf16 %v734_v30, %v734_v30  ;;  %v736_v36 = vmul.f32 %v4271_v27, %v4642_v62  ;;  %v1291_v62 = vshrl.u32 %v4735_v61, 16  ;;  %4288 = vpow2.f32 %v4778_v23 }
  0x60   : > { %v822_v31 = vrot.slane %v820_v35, 7  ;;  %v4273_v33 = vpop.eup %4272  ;;  %4290 = vpow2.f32 %v4781_v41  ;;  %v4195_v41 = vld [vmem:[%s5784_s4] sm:$0xff]  }
  0x61   : > { %v799_v10 = vshrl.u32 %v766_v26, 16  ;;  %v802_v60 = vshll.u32 %v766_v26, 16  ;;  %v768_v45 = vpack.c.bf16 %v736_v36, %v736_v36  ;;  %v4275_v63 = vpop.eup %4274  ;;  %v1086_v9 = vrot.slane %v766_v26, 7 }
  0x62   : > { %v825_v16 = vor.u32 %v823_v5, %v822_v31  ;;  %v738_v27 = vmul.f32 %v4275_v63, %v4650_v8  ;;  %v749_v19 = vmul.f32 %v4273_v33, %v4527_v34  ;;  %v1295_v34 = vrot.slane %v1293_v46, 1 }
  0x63   : > { %v801_v55 = vrot.slane %v799_v10, 7  ;;  %v813_v20 = vshrl.u32 %v768_v45, 16  ;;  %v816_v30 = vshll.u32 %v768_v45, 16  ;;  %v1088_v63 = vrot.slane %v768_v45, 7 }
  0x64   : > { %v1156_v35 = vsel %vm4690_vm4, %v769_v28, %v825_v16  ;;  %v770_v10 = vpack.c.bf16 %v738_v27, %v738_v27  ;;  %v1312_v33 = vshrl.u32 %v4763_v12, 16  ;;  %v1289_v46 = vor.u32 %v1288_v22, %v1284_v1 }
  0x65   : > { %v804_v36 = vor.u32 %v802_v60, %v801_v55  ;;  %v4822_v5 = vsel %vm4696_vm5, %v1156_v35, %v1089_v29  ;;  %v815_v31 = vrot.slane %v813_v20, 7  ;;  %v4277_v29 = vpop.eup %4276  ;;  %v1305_v20 = vshrl.u32 %v4756_v18, 16 }
  0x66   : > { %v1543_v61 = vrot.slane %v4822_v5, 1  ;;  %v827_v3 = vshrl.u32 %v770_v10, 16  ;;  %v830_v16 = vshll.u32 %v770_v10, 16  ;;  %4292 = vpow2.f32 %v4784_v2 }
  0x67   : > { %v1153_v8 = vsel %vm4690_vm4, %v766_v26, %v804_v36  ;;  %v818_v60 = vor.u32 %v816_v30, %v815_v31  ;;  %v4279_v26 = vpop.eup %4278  ;;  %v4839_v30 = vpack.c.bf16 %v749_v19, %v749_v19  ;;  %v1090_v36 = vrot.slane %v770_v10, 7 }
  0x68   : > { %v4830_v28 = vsel %vm4696_vm5, %v1153_v8, %v1086_v9  ;;  %1578 = vrot.lane.b32.xlu0 %v1543_v61, %s4380_s16  ;;  %v829_v27 = vrot.slane %v827_v3, 7  ;;  %v1307_v9 = vshll.u32 %v4756_v18, 16  ;;  %v4281_v35 = vpop.eup %4280  ;;  %v739_v31 = vmul.f32 %v4279_v26, %v4657_v14 }
  0x69   : > { %v1540_v55 = vrot.slane %v4830_v28, 1  ;;  %v1155_v17 = vsel %vm4690_vm4, %v768_v45, %v818_v60  ;;  %v4283_v8 = vpop.eup %4282  ;;  %v1303_v60 = vor.u32 %v1302_v50, %v1298_v53  ;;  %v1316_v3 = vrot.slane %v1314_v39, 1 }
  0x6a   : > { %v4844_v61 = vsel %vm4696_vm5, %v1155_v17, %v1088_v63  ;;  %v832_v45 = vor.u32 %v830_v16, %v829_v27  ;;  %v4285_v18 = vpop.eup %4284  ;;  %v1296_v19 = vor.u32 %v1295_v34, %v1291_v62  ;;  %v4850_v49 = vpack.c.bf16 %v739_v31, %v739_v31 }
  0x6b   : > { %1572 = vrot.lane.b32.xlu1 %v1540_v55, %s4380_s16  ;;  %v1542_v12 = vrot.slane %v4844_v61, 1  ;;  %v1319_v55 = vshrl.u32 %v4747_v7, 16  ;;  %v740_v22 = vmul.f32 %v4281_v35, %v4677_v0  ;;  %v1309_v1 = vrot.slane %v1307_v9, 1 }
  0x6c   : > { %1460 = vrot.lane.b32.xlu0 %v1282_v54, %s4381_s17  ;;  %v1157_v14 = vsel %vm4690_vm4, %v770_v10, %v832_v45  ;;  %v741_v63 = vmul.f32 %v4285_v18, %v4606_v11  ;;  %v904_v50 = vshrl.u32 %v4839_v30, 16  ;;  %v1321_v54 = vshll.u32 %v4747_v7, 16 }
  0x6d   : > { %v4860_v39 = vsel %vm4696_vm5, %v1157_v14, %v1090_v36  ;;  %v1230_v53 = vshll.u32 %v4771_v40, 16  ;;  %v834_v0 = vshrl.u32 %v4850_v49, 16  ;;  %v1317_v10 = vor.u32 %v1316_v3, %v1312_v33 }
  0x6e   : > { %v1544_v62 = vrot.slane %v4860_v39, 1  ;;  %v1223_v16 = vshll.u32 %v4830_v28, 16  ;;  %v750_v11 = vmul.f32 %v4277_v29, %v4545_v43  ;;  %v772_v34 = vpack.c.bf16 %v740_v22, %v740_v22 }
  0x6f   : > { %1576 = vrot.lane.b32.xlu1 %v1542_v12, %s4380_s16  ;;  %v836_v18 = vrot.slane %v834_v0, 7  ;;  %v837_v12 = vshll.u32 %v4850_v49, 16  ;;  %v4870_v26 = vpack.c.bf16 %v741_v63, %v741_v63  ;;  %v1310_v17 = vor.u32 %v1309_v1, %v1305_v20 }
  0x70   : > { %1462 = vrot.lane.b32.xlu0 %v1289_v46, %s4381_s17  ;;  %v1228_v27 = vshrl.u32 %v4771_v40, 16  ;;  %v906_v9 = vrot.slane %v904_v50, 7  ;;  %v907_v35 = vshll.u32 %v4839_v30, 16  ;;  %v1323_v33 = vrot.slane %v1321_v54, 1 }
  0x71   : > { %v1232_v36 = vrot.slane %v1230_v53, 1  ;;  %v841_v31 = vshrl.u32 %v772_v34, 16  ;;  %v844_v43 = vshll.u32 %v772_v34, 16  ;;  %v1221_v29 = vshrl.u32 %v4830_v28, 16 }
  0x72   : > { %v1225_v46 = vrot.slane %v1223_v16, 1  ;;  %v848_v45 = vshrl.u32 %v4870_v26, 16  ;;  %v4877_v3 = vpack.c.bf16 %v750_v11, %v750_v11  ;;  %v1237_v20 = vshll.u32 %v4844_v61, 16 }
  0x73   : > { %1580 = vrot.lane.b32.xlu1 %v1544_v62, %s4380_s16  ;;  %v839_v22 = vor.u32 %v837_v12, %v836_v18  ;;  %v843_v14 = vrot.slane %v841_v31, 7  ;;  %v751_v1 = vmul.f32 %v4283_v8, %v4548_v44  ;;  %v1092_v63 = vrot.slane %v772_v34, 7 }
  0x74   : > { %1466 = vrot.lane.b32.xlu0 %v1303_v60, %s4381_s17  ;;  %v909_v50 = vor.u32 %v907_v35, %v906_v9  ;;  %v1101_v54 = vrot.slane %v4839_v30, 7  ;;  %v1244_v53 = vshll.u32 %v4822_v5, 16  ;;  %v850_v62 = vrot.slane %v848_v45, 7 }
  0x75   : > { %v846_v0 = vor.u32 %v844_v43, %v843_v14  ;;  %v851_v60 = vshll.u32 %v4870_v26, 16  ;;  %v1226_v16 = vor.u32 %v1225_v46, %v1221_v29  ;;  %v1235_v11 = vshrl.u32 %v4844_v61, 16 }
  0x76   : > { %v1091_v18 = vrot.slane %v4850_v49, 7  ;;  %v911_v44 = vshrl.u32 %v4877_v3, 16  ;;  %v1239_v8 = vrot.slane %v1237_v20, 1  ;;  %v1158_v6 = vsel %vm4690_vm4, %v4850_v49, %v839_v22 }
  0x77   : > { %1464 = vrot.lane.b32.xlu1 %v1296_v19, %s4381_s17  ;;  %v1159_v19 = vsel %vm4690_vm4, %v772_v34, %v846_v0  ;;  %v4896_v12 = vpack.c.bf16 %v751_v1, %v751_v1  ;;  %v1251_v9 = vshll.u32 %v4860_v39, 16  ;;  %v4907_v31 = vmul.f32 -1.442695, %v4637_v59 }
  0x78   : > { %1470 = vrot.lane.b32.xlu0 %v1317_v10, %s4381_s17  ;;  %v4901_v35 = vsel %vm4696_vm5, %v1159_v19, %v1092_v63  ;;  %v1168_v10 = vsel %vm4690_vm4, %v4839_v30, %v909_v50  ;;  %v1324_v49 = vor.u32 %v1323_v33, %v1319_v55  ;;  %v1242_v34 = vshrl.u32 %v4822_v5, 16 }
  0x79   : > { %v1246_v43 = vrot.slane %v1244_v53, 1  ;;  %v853_v29 = vor.u32 %v851_v60, %v850_v62  ;;  %v1233_v46 = vor.u32 %v1232_v36, %v1228_v27  ;;  %v4913_v45 = vsel %vm4696_vm5, %v1158_v6, %v1091_v18  ;;  %v4194_v27 = vld [vmem:[%s5784_s4 + $0x8] ss:$0 sps:$4 sm:$0xff]  }
  0x7a   : > { %v913_v20 = vrot.slane %v911_v44, 7  ;;  %v914_v22 = vshll.u32 %v4877_v3, 16  ;;  %v1240_v30 = vor.u32 %v1239_v8, %v1235_v11  ;;  %v1265_v14 = vshll.u32 %v4901_v35, 16  ;;  %4142 = vmatprep.subr.msk.bf16.mxu1 %vm1871_vm6, %v4194_v27  ;;  %4141 = vmatprep.subr.msk.bf16.mxu0 %vm1871_vm6, %v4194_v27  ;;  %v4287_v11 = vpop.eup %4286 }
  0x7b   : > { %1468 = vrot.lane.b32.xlu1 %v1310_v17, %s4381_s17  ;;  %v4920_v55 = vsel %vm4696_vm5, %v1168_v10, %v1101_v54  ;;  %v918_v17 = vshrl.u32 %v4896_v12, 16  ;;  %v1249_v33 = vshrl.u32 %v4860_v39, 16  ;;  %v1253_v36 = vrot.slane %v1251_v9, 1 }
  0x7c   : > { %1444 = vrot.lane.b32.xlu0 %v1226_v16, %s4381_s17  ;;  %v1093_v1 = vrot.slane %v4870_v26, 7  ;;  %v1247_v63 = vor.u32 %v1246_v43, %v1242_v34  ;;  %v1258_v50 = vshll.u32 %v4913_v45, 16  ;;  %v1160_v54 = vsel %vm4690_vm4, %v4870_v26, %v853_v29  ;;  %v4974_v34 = vld [vmem:[%s5784_s4 + $0x20] ss:$0 sps:$4 sm:$0xff]  }
  0x7d   : > { %v916_v53 = vor.u32 %v914_v22, %v913_v20  ;;  %v921_v0 = vshll.u32 %v4896_v12, 16  ;;  %v1263_v23 = vshrl.u32 %v4901_v35, 16  ;;  %v1267_v62 = vrot.slane %v1265_v14, 1  ;;  %v5810_v20 = vld [vmem:[#allocation5_spill] sm:$0xff] }
  0x7e   : > { %v920_v60 = vrot.slane %v918_v17, 7  ;;  %4294 = vpow2.f32 %v4787_v4  ;;  %v1254_v26 = vor.u32 %v1253_v36, %v1249_v33  ;;  %v4946_v16 = vsel %vm4696_vm5, %v1160_v54, %v1093_v1 }
  0x7f   : > { %1472 = vrot.lane.b32.xlu1 %v1324_v49, %s4381_s17  ;;  %v1102_v2 = vrot.slane %v4877_v3, 7  ;;  %4296 = vpow2.f32 %v4790_v37  ;;  %v1256_v4 = vshrl.u32 %v4913_v45, 16  ;;  %v1260_v18 = vrot.slane %v1258_v50, 1  ;;  %v4289_v50 = vpop.eup %4288 }
  0x80   : > { %1448 = vrot.lane.b32.xlu0 %v1240_v30, %s4381_s17  ;;  %4298 = vpow2.f32 %v4798_v13  ;;  %v1873_v44 = vsel %vm1871_vm6, %v4194_v27, 0  ;;  %v1169_v8 = vsel %vm4690_vm4, %v4877_v3, %v916_v53  ;;  %v752_v6 = vmul.f32 %v4287_v11, %v4553_v47  ;;  %v4967_v3 = vld [vmem:[%s5784_s4 + $0x14] ss:$0 sps:$4 sm:$0xff]  }
  0x81   : > { %4300 = vpow2.f32 %v4804_v38  ;;  %v3708_v37 = vmul.f32 -1.442695, %v4660_v15  ;;  %4139 = vmatpush3.bf16.msra.mxu1 %v1873_v44  ;;  %3958 = vmatpush3.bf16.msra.mxu0 %v1873_v44  ;;  %v1268_v19 = vor.u32 %v1267_v62, %v1263_v23  ;;  %v1272_v9 = vshll.u32 %v4946_v16, 16 }
  0x82   : > { %v923_v13 = vor.u32 %v921_v0, %v920_v60  ;;  %v3709_v10 = vmul.f32 -1.442695, %v4665_v24  ;;  %4138 = vmatprep.subr.bf16.mxu1 %v4195_v41  ;;  %v1328_v47 = vshll.u32 %v4920_v55, 16  ;;  %v784_v38 = vpack.c.bf16 %v752_v6, %v752_v6  ;;  %3959 = vmatprep.subr.bf16.mxu0 %v4195_v41 }
  0x83   : > { %1446 = vrot.lane.b32.xlu1 %v1233_v46, %s4381_s17  ;;  %v3710_v49 = vmul.f32 -1.442695, %v4668_v25  ;;  %v1261_v43 = vor.u32 %v1260_v18, %v1256_v4  ;;  %v1545_v29 = vrot.slane %v4913_v45, 1  ;;  %v4980_v46 = vsel %vm4696_vm5, %v1169_v8, %v1102_v2 }
  0x84   : > { %1450 = vrot.lane.b32.xlu0 %v1247_v63, %s4381_s17  ;;  %v3711_v22 = vmul.f32 -1.442695, %v5810_v20  ;;  %v1103_v30 = vrot.slane %v4896_v12, 7  ;;  %v925_v14 = vshrl.u32 %v784_v38, 16  ;;  %v928_v17 = vshll.u32 %v784_v38, 16 }
  0x85   : > { %4302 = vpow2.f32 %v4807_v56  ;;  %4140 = vmatpush3.bf16.msra.mxu1 %v4195_v41  ;;  %3960 = vmatpush3.bf16.msra.mxu0 %v4195_v41  ;;  %v1270_v27 = vshrl.u32 %v4946_v16, 16  ;;  %v1274_v33 = vrot.slane %v1272_v9, 1  ;;  %v1170_v36 = vsel %vm4690_vm4, %v4896_v12, %v923_v13 }
  0x86   : > { %4304 = vpow2.f32 %v4907_v31  ;;  %4143 = vmatprep.subr.msk.bf16.mxu1 %vm1871_vm6, %v4967_v3  ;;  %v1326_v1 = vshrl.u32 %v4920_v55, 16  ;;  %v1330_v63 = vrot.slane %v1328_v47, 1  ;;  %v927_v56 = vrot.slane %v925_v14, 7  ;;  %4144 = vmatprep.subr.msk.bf16.mxu0 %vm1871_vm6, %v4974_v34  ;;  %v4291_v31 = vpop.eup %4290 }
  0x87   : > { %1452 = vrot.lane.b32.xlu1 %v1254_v26, %s4381_s17  ;;  %4306 = vpow2.f32 %v3708_v37  ;;  %v1546_v54 = vrot.slane %v4901_v35, 1  ;;  %v1335_v12 = vshll.u32 %v4980_v46, 16  ;;  %v1104_v53 = vrot.slane %v784_v38, 7  ;;  %v4293_v60 = vpop.eup %4292 }
  0x88   : > { %1456 = vrot.lane.b32.xlu0 %v1268_v19, %s4381_s17  ;;  %4308 = vpow2.f32 %v3709_v10  ;;  %v5001_v0 = vsel %vm4696_vm5, %v1170_v36, %v1103_v30  ;;  %v930_v23 = vor.u32 %v928_v17, %v927_v56  ;;  %v657_v62 = vadd.f32 1.0, %v4289_v50 }
  0x89   : > { %4310 = vpow2.f32 %v3710_v49  ;;  %v1275_v41 = vor.u32 %v1274_v33, %v1270_v27  ;;  %v658_v26 = vadd.f32 1.0, %v4291_v31  ;;  %v1547_v11 = vrot.slane %v4946_v16, 1 }
  0x8a   : > { %4312 = vpow2.f32 %v3711_v22  ;;  %v1171_v4 = vsel %vm4690_vm4, %v784_v38, %v930_v23  ;;  %v659_v18 = vadd.f32 1.0, %v4293_v60  ;;  %v1342_v8 = vshll.u32 %v5001_v0, 16 }
  0x8b   : > { %1454 = vrot.lane.b32.xlu1 %v1261_v43, %s4381_s17  ;;  %v4295_v2 = vpop.eup %4294  ;;  %4314 = vrcp.f32 %v657_v62  ;;  %v5011_v6 = vsel %vm4696_vm5, %v1171_v4, %v1104_v53  ;;  %v1331_v9 = vor.u32 %v1330_v63, %v1326_v1  ;;  %v1333_v13 = vshrl.u32 %v4980_v46, 16 }
  0x8c   : > { %1582 = vrot.lane.b32.xlu0 %v1545_v29, %s4380_s16  ;;  %v4297_v44 = vpop.eup %4296  ;;  %4316 = vrcp.f32 %v658_v26  ;;  %v660_v37 = vadd.f32 1.0, %v4295_v2  ;;  %v1337_v10 = vrot.slane %v1335_v12, 1  ;;  %v1349_v38 = vshll.u32 %v5011_v6, 16 }
  0x8d   : > { %v4299_v19 = vpop.eup %4298  ;;  %4318 = vrcp.f32 %v659_v18  ;;  %v661_v49 = vadd.f32 1.0, %v4297_v44  ;;  %v1555_v22 = vrot.slane %v4920_v55, 1  ;;  %v1340_v30 = vshrl.u32 %v5001_v0, 16 }
  0x8e   : > { %v4301_v47 = vpop.eup %4300  ;;  %4320 = vrcp.f32 %v660_v37  ;;  %v662_v43 = vadd.f32 1.0, %v4299_v19  ;;  %v1344_v14 = vrot.slane %v1342_v8, 1  ;;  %v1338_v27 = vor.u32 %v1337_v10, %v1333_v13 }
  0x8f   : > { %1584 = vrot.lane.b32.xlu1 %v1546_v54, %s4380_s16  ;;  %v663_v29 = vadd.f32 1.0, %v4301_v47  ;;  %4322 = vrcp.f32 %v661_v49  ;;  %v1347_v33 = vshrl.u32 %v5011_v6, 16  ;;  %v1351_v36 = vrot.slane %v1349_v38, 1 }
  0x90   : > { %1458 = vrot.lane.b32.xlu0 %v1275_v41, %s4381_s17  ;;  %4324 = vrcp.f32 %v662_v43  ;;  %v1345_v56 = vor.u32 %v1344_v14, %v1340_v30  ;;  %v1556_v60 = vrot.slane %v4980_v46, 1  ;;  %v1557_v4 = vrot.slane %v5001_v0, 1 }
  0x91   : > { %4326 = vrcp.f32 %v663_v29  ;;  %v1352_v12 = vor.u32 %v1351_v36, %v1347_v33  ;;  %v1558_v37 = vrot.slane %v5011_v6, 1 }
  0x92   : > { %v4303_v17 = vpop.eup %4302 }
  0x93   : > { %1586 = vrot.lane.b32.xlu1 %v1547_v11, %s4380_s16  ;;  %v4305_v1 = vpop.eup %4304  ;;  %v664_v53 = vadd.f32 1.0, %v4303_v17 }
  0x94   : > { %1474 = vrot.lane.b32.xlu0 %v1331_v9, %s4381_s17  ;;  %v4307_v63 = vpop.eup %4306  ;;  %v665_v23 = vadd.f32 1.0, %v4305_v1 }
  0x95   : > { %v4309_v50 = vpop.eup %4308  ;;  %v666_v41 = vadd.f32 1.0, %v4307_v63  ;;  %4328 = vrcp.f32 %v664_v53 }
  0x96   : > { %v4311_v54 = vpop.eup %4310  ;;  %v667_v44 = vadd.f32 1.0, %v4309_v50  ;;  %4330 = vrcp.f32 %v665_v23 }
  0x97   : > { %1602 = vrot.lane.b32.xlu1 %v1555_v22, %s4380_s16  ;;  %v4313_v31 = vpop.eup %4312  ;;  %4332 = vrcp.f32 %v666_v41  ;;  %v668_v10 = vadd.f32 1.0, %v4311_v54 }
  0x98   : > { %1476 = vrot.lane.b32.xlu0 %v1338_v27, %s4381_s17  ;;  %v4315_v62 = vpop.eup %4314  ;;  %v669_v43 = vadd.f32 1.0, %v4313_v31  ;;  %4334 = vrcp.f32 %v667_v44 }
  0x99   : > { %v4317_v26 = vpop.eup %4316  ;;  %v753_v2 = vmul.f32 %v4315_v62, %v4556_v48  ;;  %4336 = vrcp.f32 %v668_v10 }
  0x9a   : > { %v4319_v11 = vpop.eup %4318  ;;  %v754_v18 = vmul.f32 %v4317_v26, %v4563_v51  ;;  %4338 = vrcp.f32 %v669_v43 }
  0x9b   : > { %1478 = vrot.lane.b32.xlu1 %v1345_v56, %s4381_s17  ;;  %v4321_v8 = vpop.eup %4320  ;;  %v785_v19 = vpack.c.bf16 %v753_v2, %v753_v2  ;;  %v755_v9 = vmul.f32 %v4319_v11, %v4567_v52  ;;  %v5811_v11 = vld [vmem:[#allocation3_spill] sm:$0xff] }
  0x9c   : > { %1480 = vrot.lane.b32.xlu0 %v1352_v12, %s4381_s17  ;;  %v786_v13 = vpack.c.bf16 %v754_v18, %v754_v18  ;;  %v756_v48 = vmul.f32 %v4321_v8, %v4580_v57  ;;  %v4323_v47 = vpop.eup %4322 }
  0x9d   : > { %v932_v38 = vshrl.u32 %v785_v19, 16  ;;  %v935_v49 = vshll.u32 %v785_v19, 16  ;;  %v787_v51 = vpack.c.bf16 %v755_v9, %v755_v9  ;;  %v4325_v29 = vpop.eup %4324  ;;  %v1105_v17 = vrot.slane %v785_v19, 7 }
  0x9e   : > { %v939_v22 = vshrl.u32 %v786_v13, 16  ;;  %v942_v30 = vshll.u32 %v786_v13, 16  ;;  %v788_v14 = vpack.c.bf16 %v756_v48, %v756_v48  ;;  %v4327_v36 = vpop.eup %4326  ;;  %v1106_v1 = vrot.slane %v786_v13, 7 }
  0x9f   : > { %1604 = vrot.lane.b32.xlu1 %v1556_v60, %s4380_s16  ;;  %v934_v52 = vrot.slane %v932_v38, 7  ;;  %v946_v27 = vshrl.u32 %v787_v51, 16  ;;  %v949_v33 = vshll.u32 %v787_v51, 16  ;;  %v757_v12 = vmul.f32 %v4323_v47, %v4583_v58 }
  0xa0   : > { %1606 = vrot.lane.b32.xlu0 %v1557_v4, %s4380_s16  ;;  %v941_v57 = vrot.slane %v939_v22, 7  ;;  %v953_v63 = vshrl.u32 %v788_v14, 16  ;;  %v956_v56 = vshll.u32 %v788_v14, 16  ;;  %v758_v53 = vmul.f32 %v4325_v29, %v4621_v42 }
  0xa1   : > { %v937_v50 = vor.u32 %v935_v49, %v934_v52  ;;  %v948_v54 = vrot.slane %v946_v27, 7  ;;  %v1107_v23 = vrot.slane %v787_v51, 7  ;;  %v1108_v60 = vrot.slane %v788_v14, 7 }
  0xa2   : > { %v944_v31 = vor.u32 %v942_v30, %v941_v57  ;;  %v955_v62 = vrot.slane %v953_v63, 7  ;;  %v5039_v2 = vpack.c.bf16 %v757_v12, %v757_v12  ;;  %v759_v4 = vmul.f32 %v4327_v36, %v5811_v11  ;;  %v4329_v49 = vpop.eup %4328 }
  0xa3   : > { %1608 = vrot.lane.b32.xlu1 %v1558_v37, %s4380_s16  ;;  %v1172_v41 = vsel %vm4690_vm4, %v785_v19, %v937_v50  ;;  %v951_v26 = vor.u32 %v949_v33, %v948_v54  ;;  %v5048_v44 = vpack.c.bf16 %v758_v53, %v758_v53  ;;  %v4331_v52 = vpop.eup %4330  ;;  %v5812_v54 = vld [vmem:[#allocation4_spill] sm:$0xff] }
  0xa4   : > { %v5044_v18 = vsel %vm4696_vm5, %v1172_v41, %v1105_v17  ;;  %v1173_v58 = vsel %vm4690_vm4, %v786_v13, %v944_v31  ;;  %v958_v42 = vor.u32 %v956_v56, %v955_v62  ;;  %v4333_v36 = vpop.eup %4332  ;;  %v960_v50 = vshrl.u32 %v5039_v2, 16 }
  0xa5   : > { %v1354_v8 = vshrl.u32 %v5044_v18, 16  ;;  %v1356_v37 = vshll.u32 %v5044_v18, 16  ;;  %v5054_v19 = vsel %vm4696_vm5, %v1173_v58, %v1106_v1  ;;  %v1174_v9 = vsel %vm4690_vm4, %v787_v51, %v951_v26  ;;  %v4335_v53 = vpop.eup %4334 }
  0xa6   : > { %v1361_v48 = vshrl.u32 %v5054_v19, 16  ;;  %v1363_v47 = vshll.u32 %v5054_v19, 16  ;;  %v5062_v13 = vsel %vm4696_vm5, %v1174_v9, %v1107_v23  ;;  %v1175_v38 = vsel %vm4690_vm4, %v788_v14, %v958_v42 }
  0xa7   : > { %v1358_v29 = vrot.slane %v1356_v37, 1  ;;  %v1368_v22 = vshrl.u32 %v5062_v13, 16  ;;  %v1370_v30 = vshll.u32 %v5062_v13, 16  ;;  %v5070_v51 = vsel %vm4696_vm5, %v1175_v38, %v1108_v60 }
  0xa8   : > { %v1365_v17 = vrot.slane %v1363_v47, 1  ;;  %v1375_v27 = vshrl.u32 %v5070_v51, 16  ;;  %v1377_v33 = vshll.u32 %v5070_v51, 16  ;;  %v791_v1 = vpack.c.bf16 %v759_v4, %v759_v4 }
  0xa9   : > { %v1359_v57 = vor.u32 %v1358_v29, %v1354_v8  ;;  %v1372_v14 = vrot.slane %v1370_v30, 1  ;;  %v760_v12 = vmul.f32 %v4329_v49, %v5812_v54  ;;  %v1559_v23 = vrot.slane %v5044_v18, 1 }
  0xaa   : > { %v1366_v63 = vor.u32 %v1365_v17, %v1361_v48  ;;  %v1379_v56 = vrot.slane %v1377_v33, 1  ;;  %v963_v62 = vshll.u32 %v5039_v2, 16  ;;  %v967_v10 = vshrl.u32 %v5048_v44, 16 }
  0xab   : > { %1482 = vrot.lane.b32.xlu0 %v1359_v57, %s4381_s17  ;;  %v1373_v31 = vor.u32 %v1372_v14, %v1368_v22  ;;  %v1560_v43 = vrot.slane %v5054_v19, 1  ;;  %v962_v41 = vrot.slane %v960_v50, 7  ;;  %v970_v26 = vshll.u32 %v5048_v44, 16 }
  0xac   : > { %1484 = vrot.lane.b32.xlu1 %v1366_v63, %s4381_s17  ;;  %v1380_v60 = vor.u32 %v1379_v56, %v1375_v27  ;;  %v1109_v11 = vrot.slane %v5039_v2, 7  ;;  %v969_v4 = vrot.slane %v967_v10, 7  ;;  %v974_v58 = vshrl.u32 %v791_v1, 16 }
  0xad   : > { %v977_v42 = vshll.u32 %v791_v1, 16  ;;  %v965_v8 = vor.u32 %v963_v62, %v962_v41  ;;  %v1110_v37 = vrot.slane %v5048_v44, 7  ;;  %v792_v9 = vpack.c.bf16 %v760_v12, %v760_v12 }
  0xae   : > { %v761_v48 = vmul.f32 %v4331_v52, %v4637_v59  ;;  %v1561_v47 = vrot.slane %v5062_v13, 1  ;;  %v1562_v38 = vrot.slane %v5070_v51, 1  ;;  %v972_v49 = vor.u32 %v970_v26, %v969_v4 }
  0xaf   : > { %1486 = vrot.lane.b32.xlu0 %v1373_v31, %s4381_s17  ;;  %v976_v29 = vrot.slane %v974_v58, 7  ;;  %v1176_v22 = vsel %vm4690_vm4, %v5039_v2, %v965_v8  ;;  %v1111_v30 = vrot.slane %v791_v1, 7  ;;  %v981_v17 = vshrl.u32 %v792_v9, 16 }
  0xb0   : > { %1488 = vrot.lane.b32.xlu1 %v1380_v60, %s4381_s17  ;;  %v984_v27 = vshll.u32 %v792_v9, 16  ;;  %v5095_v59 = vsel %vm4696_vm5, %v1176_v22, %v1109_v11  ;;  %v1177_v52 = vsel %vm4690_vm4, %v5048_v44, %v972_v49  ;;  %v793_v57 = vpack.c.bf16 %v761_v48, %v761_v48 }
  0xb1   : > { %v979_v33 = vor.u32 %v977_v42, %v976_v29  ;;  %v1384_v14 = vshll.u32 %v5095_v59, 16  ;;  %v5103_v63 = vsel %vm4696_vm5, %v1177_v52, %v1110_v37  ;;  %v762_v2 = vmul.f32 %v4333_v36, %v4660_v15 }
  0xb2   : > { %v763_v56 = vmul.f32 %v4335_v53, %v4665_v24  ;;  %v1382_v50 = vshrl.u32 %v5095_v59, 16  ;;  %v1391_v54 = vshll.u32 %v5103_v63, 16  ;;  %v983_v12 = vrot.slane %v981_v17, 7  ;;  %v4337_v24 = vpop.eup %4336 }
  0xb3   : > { %1610 = vrot.lane.b32.xlu0 %v1559_v23, %s4380_s16  ;;  %v1178_v44 = vsel %vm4690_vm4, %v791_v1, %v979_v33  ;;  %v1386_v31 = vrot.slane %v1384_v14, 1  ;;  %v1112_v15 = vrot.slane %v792_v9, 7  ;;  %v988_v36 = vshrl.u32 %v793_v57, 16  ;;  %v4339_v41 = vpop.eup %4338 }
  0xb4   : > { %1612 = vrot.lane.b32.xlu1 %v1560_v43, %s4380_s16  ;;  %v5115_v62 = vsel %vm4696_vm5, %v1178_v44, %v1111_v30  ;;  %v1389_v53 = vshrl.u32 %v5103_v63, 16  ;;  %v1393_v23 = vrot.slane %v1391_v54, 1  ;;  %v986_v60 = vor.u32 %v984_v27, %v983_v12 }
  0xb5   : > { %v1398_v10 = vshll.u32 %v5115_v62, 16  ;;  %v1563_v1 = vrot.slane %v5095_v59, 1  ;;  %v1396_v26 = vshrl.u32 %v5115_v62, 16  ;;  %v990_v43 = vrot.slane %v988_v36, 7 }
  0xb6   : > { %v991_v11 = vshll.u32 %v793_v57, 16  ;;  %v1387_v4 = vor.u32 %v1386_v31, %v1382_v50  ;;  %v1179_v42 = vsel %vm4690_vm4, %v792_v9, %v986_v60  ;;  %v1113_v8 = vrot.slane %v793_v57, 7 }
  0xb7   : > { %1614 = vrot.lane.b32.xlu0 %v1561_v47, %s4380_s16  ;;  %v1400_v58 = vrot.slane %v1398_v10, 1  ;;  %v5127_v37 = vsel %vm4696_vm5, %v1179_v42, %v1112_v15  ;;  %v794_v49 = vpack.c.bf16 %v762_v2, %v762_v2  ;;  %v795_v29 = vpack.c.bf16 %v763_v56, %v763_v56 }
  0xb8   : > { %1616 = vrot.lane.b32.xlu1 %v1562_v38, %s4380_s16  ;;  %v993_v48 = vor.u32 %v991_v11, %v990_v43  ;;  %v1394_v22 = vor.u32 %v1393_v23, %v1389_v53  ;;  %v1405_v30 = vshll.u32 %v5127_v37, 16  ;;  %v764_v47 = vmul.f32 %v4337_v24, %v4668_v25 }
  0xb9   : > { %v1403_v17 = vshrl.u32 %v5127_v37, 16  ;;  %v995_v27 = vshrl.u32 %v794_v49, 16  ;;  %v998_v52 = vshll.u32 %v794_v49, 16  ;;  %v1002_v14 = vshrl.u32 %v795_v29, 16 }
  0xba   : > { %v1180_v9 = vsel %vm4690_vm4, %v793_v57, %v993_v48  ;;  %v1407_v38 = vrot.slane %v1405_v30, 1  ;;  %v1005_v2 = vshll.u32 %v795_v29, 16  ;;  %v1401_v56 = vor.u32 %v1400_v58, %v1396_v26 }
  0xbb   : > { %1490 = vrot.lane.b32.xlu0 %v1387_v4, %s4381_s17  ;;  %v5137_v33 = vsel %vm4696_vm5, %v1180_v9, %v1113_v8  ;;  %v997_v25 = vrot.slane %v995_v27, 7  ;;  %v1114_v50 = vrot.slane %v794_v49, 7  ;;  %v1004_v54 = vrot.slane %v1002_v14, 7 }
  0xbc   : > { %1618 = vrot.lane.b32.xlu1 %v1563_v1, %s4380_s16  ;;  %v796_v44 = vpack.c.bf16 %v764_v47, %v764_v47  ;;  %v1412_v57 = vshll.u32 %v5137_v33, 16  ;;  %v1115_v31 = vrot.slane %v795_v29, 7  ;;  %v765_v15 = vmul.f32 %v4339_v41, %v5810_v20  ;;  %v5144_v10 = vpop.permute.xlu0 %1590 }
  0xbd   : > { %v1000_v12 = vor.u32 %v998_v52, %v997_v25  ;;  %v1408_v36 = vor.u32 %v1407_v38, %v1403_v17  ;;  %v1007_v24 = vor.u32 %v1005_v2, %v1004_v54  ;;  %v1564_v60 = vrot.slane %v5103_v63, 1  ;;  %v5156_v4 = vpop.permute.xlu1 %1588 }
  0xbe   : > { %v1009_v53 = vshrl.u32 %v796_v44, 16  ;;  %v1012_v23 = vshll.u32 %v796_v44, 16  ;;  %v797_v26 = vpack.c.bf16 %v765_v15, %v765_v15  ;;  %v1565_v43 = vrot.slane %v5115_v62, 1 }
  0xbf   : > { %1492 = vrot.lane.b32.xlu0 %v1394_v22, %s4381_s17  ;;  %v1181_v1 = vsel %vm4690_vm4, %v794_v49, %v1000_v12  ;;  %v1182_v41 = vsel %vm4690_vm4, %v795_v29, %v1007_v24  ;;  %v1566_v58 = vrot.slane %v5127_v37, 1  ;;  %v1116_v48 = vrot.slane %v796_v44, 7 }
  0xc0   : > { %1494 = vrot.lane.b32.xlu1 %v1401_v56, %s4381_s17  ;;  %v5152_v20 = vsel %vm4696_vm5, %v1181_v1, %v1114_v50  ;;  %v1011_v11 = vrot.slane %v1009_v53, 7  ;;  %v5162_v8 = vsel %vm4696_vm5, %v1182_v41, %v1115_v31  ;;  %v1410_v49 = vshrl.u32 %v5137_v33, 16  ;;  %v5171_v38 = vpop.permute.xlu0 %1594 }
  0xc1   : > { %v1419_v42 = vshll.u32 %v5152_v20, 16  ;;  %v1414_v22 = vrot.slane %v1412_v57, 1  ;;  %v1426_v30 = vshll.u32 %v5162_v8, 16  ;;  %v1417_v47 = vshrl.u32 %v5152_v20, 16  ;;  %v1593_v57 = vpop.permute.xlu1 %1592 }
  0xc2   : > { %v1014_v29 = vor.u32 %v1012_v23, %v1011_v11  ;;  %v1016_v9 = vshrl.u32 %v797_v26, 16  ;;  %v1019_v27 = vshll.u32 %v797_v26, 16  ;;  %v1424_v25 = vshrl.u32 %v5162_v8, 16 }
  0xc3   : > { %1496 = vrot.lane.b32.xlu0 %v1408_v36, %s4381_s17  ;;  %v1421_v17 = vrot.slane %v1419_v42, 1  ;;  %v1415_v56 = vor.u32 %v1414_v22, %v1410_v49  ;;  %v1428_v50 = vrot.slane %v1426_v30, 1  ;;  %v1117_v15 = vrot.slane %v797_v26, 7 }
  0xc4   : > { %1620 = vrot.lane.b32.xlu1 %v1564_v60, %s4380_s16  ;;  %v1183_v52 = vsel %vm4690_vm4, %v796_v44, %v1014_v29  ;;  %v1018_v2 = vrot.slane %v1016_v9, 7  ;;  %v5185_v23 = vpop.permute.xlu0 %1600  ;;  %v1567_v41 = vrot.slane %v5137_v33, 1  ;;  %v5813_v9 = vld [vmem:[#allocation7_spill] sm:$0xff] }
  0xc5   : > { %v5175_v14 = vsel %vm4696_vm5, %v1183_v52, %v1116_v48  ;;  %v1422_v12 = vor.u32 %v1421_v17, %v1417_v47  ;;  %v1429_v53 = vor.u32 %v1428_v50, %v1424_v25 }
  0xc6   : > { %v1433_v54 = vshll.u32 %v5175_v14, 16  ;;  %v1431_v44 = vshrl.u32 %v5175_v14, 16  ;;  %v1021_v31 = vor.u32 %v1019_v27, %v1018_v2  ;;  %v1570_v49 = vrot.slane %v5175_v14, 1 }
  0xc7   : > { %1622 = vrot.lane.b32.xlu0 %v1565_v43, %s4380_s16  ;;  %v1597_v43 = vpop.permute.xlu1 %1596 }
  0xc8   : > { %1624 = vrot.lane.b32.xlu1 %v1566_v58, %s4380_s16  ;;  %v1435_v36 = vrot.slane %v1433_v54, 1  ;;  %v1184_v24 = vsel %vm4690_vm4, %v797_v26, %v1021_v31  ;;  %v1568_v26 = vrot.slane %v5152_v20, 1  ;;  %v1569_v58 = vrot.slane %v5162_v8, 1 }
  0xc9   : > { %v5190_v1 = vsel %vm4696_vm5, %v1184_v24, %v1117_v15  ;;  %v5815_v15 = vld [vmem:[#allocation9_spill] sm:$0xff] }
  0xca   : > { %v1436_v60 = vor.u32 %v1435_v36, %v1431_v44  ;;  %v1440_v21 = vshll.u32 %v5190_v1, 16  ;;  %v1438_v32 = vshrl.u32 %v5190_v1, 16  ;;  %v1571_v29 = vrot.slane %v5190_v1, 1 }
  0xcb   : > { %1498 = vrot.lane.b32.xlu0 %v1415_v56, %s4381_s17  ;;  %v1599_v48 = vpop.permute.xlu1 %1598 }
  0xcc   : > { %1500 = vrot.lane.b32.xlu1 %v1422_v12, %s4381_s17  ;;  %v5197_v11 = vpop.permute.xlu0 %1574  ;;  %v1442_v42 = vrot.slane %v1440_v21, 1  ;;  %v5814_v12 = vld [vmem:[#allocation6_spill] sm:$0xff] }
  0xce   : > { %v1443_v22 = vor.u32 %v1442_v42, %v1438_v32  ;;  %v5817_v32 = vld [vmem:[#allocation10_spill] sm:$0xff] }
  0xcf   : > { %1502 = vrot.lane.b32.xlu0 %v1429_v53, %s4381_s17 }
  0xd0   : > { %1504 = vrot.lane.b32.xlu1 %v1436_v60, %s4381_s17  ;;  %v5816_v60 = vld [vmem:[#allocation8_spill] sm:$0xff] }
  0xd3   : > { %1626 = vrot.lane.b32.xlu0 %v1567_v41, %s4380_s16 }
  0xd4   : > { %1628 = vrot.lane.b32.xlu1 %v1568_v26, %s4380_s16  ;;  %v2070_v26 = vsel %vm1871_vm6, %v4967_v3, 0  ;;  %v5818_v3 = vld [vmem:[#allocation11_spill] sm:$0xff] }
  0xd7   : > { %1630 = vrot.lane.b32.xlu0 %v1569_v58, %s4380_s16  ;;  %v4197_v58 = vld [vmem:[%s5784_s4 + $0xc] sm:$0xff]  }
  0xd8   : > { %1632 = vrot.lane.b32.xlu1 %v1570_v49, %s4380_s16 }
  0xda   : > { %v5205_v30 = vpop.permute.xlu0 %1578 }
  0xdb   : > { %1506 = vrot.lane.b32.xlu0 %v1443_v22, %s4381_s17 }
  0xdc   : > { %1634 = vrot.lane.b32.xlu1 %v1571_v29, %s4380_s16 }
  0xdd   : > { %v1573_v47 = vpop.permute.xlu1 %1572 }
  0xde   : > { %v1461_v17 = vpop.permute.xlu0 %1460 }
  0xdf   : > { %v1654_v27 = vsel %vm1636_vm7, %v5813_v9, %v1461_v17 }
  0xe0   : > { %v5215_v2 = vsel %vm1701_vm8, %v1654_v27, %v5156_v4 }
  0xe1   : > { %v1577_v52 = vpop.permute.xlu1 %1576  ;;  %v5219_v56 = vcombine.low %v5215_v2, %v5215_v2 }
  0xe2   : > { %v1463_v25 = vpop.permute.xlu0 %1462 }
  0xe3   : > { %3969 = vmatprep.mubr.msk.bf16.mxu1 %vm1846_vm9, %v5219_v56  ;;  %v1656_v44 = vsel %vm1636_vm7, %v5814_v12, %v1463_v25 }
  0xe4   : > { %v5229_v4 = vsel %vm1701_vm8, %v1656_v44, %v5144_v10 }
  0xe5   : > { %v1581_v50 = vpop.permute.xlu1 %1580 }
  0xe6   : > { %v1467_v54 = vpop.permute.xlu0 %1466 }
  0xe7   : > { %v1660_v41 = vsel %vm1636_vm7, %v5816_v60, %v1467_v54 }
  0xe8   : > { %v5251_v42 = vsel %vm1701_vm8, %v1660_v41, %v5171_v38  ;;  %v4199_v38 = vld [vmem:[%s5784_s4 + $0x2c] ss:$0 sps:$4 sm:$0xff]   ;;  %v2239_v41 = vsel %vm1871_vm6, %v4974_v34, 0 }
  0xe9   : > { %v1465_v31 = vpop.permute.xlu1 %1464 }
  0xea   : > { %v1658_v36 = vsel %vm1636_vm7, %v5815_v15, %v1465_v31  ;;  %v1471_v53 = vpop.permute.xlu0 %1470 }
  0xeb   : > { %v5232_v24 = vsel %vm1701_vm8, %v1658_v36, %v1593_v57  ;;  %v1664_v29 = vsel %vm1636_vm7, %v5818_v3, %v1471_v53 }
  0xec   : > { %v5238_v21 = vcombine.low %v5229_v4, %v5232_v24  ;;  %v5273_v12 = vsel %vm1701_vm8, %v1664_v29, %v1599_v48  ;;  %v5324_v29 = vld [vmem:[%s5784_s4 + $0x44] ss:$0 sps:$4 sm:$0xff]  }
  0xed   : > { %v1469_v10 = vpop.permute.xlu1 %1468 }
  0xee   : > { %v1662_v57 = vsel %vm1636_vm7, %v5817_v32, %v1469_v10  ;;  %3970 = vmatmul.mubr.msk.bf16.vlgmr.msra.gmra.mxu1 %vm1846_vm9, %v5238_v21  ;;  %v1445_v22 = vpop.permute.xlu0 %1444  ;;  %v2430_v32 = vsel %vm1871_vm6, %v4199_v38, 0 }
  0xef   : > { %v5254_v49 = vsel %vm1701_vm8, %v1662_v57, %v1597_v43  ;;  %3978 = vmatpush3.bf16.msra.mxu1 %v2070_v26  ;;  %v1638_v9 = vsel %vm1636_vm7, %v4830_v28, %v1445_v22 }
  0xf0   : > { %v5260_v17 = vcombine.low %v5251_v42, %v5254_v49  ;;  %3979 = vmatprep.subr.bf16.mxu1 %v4197_v58  ;;  %v1703_v43 = vsel %vm1701_vm8, %v1638_v9, %v1573_v47 }
  0xf1   : > { %v1473_v27 = vpop.permute.xlu1 %1472  ;;  %v3712_v54 = vcombine.low %v1703_v43, %v1703_v43 }
  0xf2   : > { %v1666_v25 = vsel %vm1636_vm7, %v4747_v7, %v1473_v27  ;;  %3973 = vmatprep.mubr.msk.bf16.mxu1 %vm1846_vm9, %v5260_v17  ;;  %v1449_v44 = vpop.permute.xlu0 %1448 }
  0xf3   : > { %v5277_v28 = vsel %vm1701_vm8, %v1666_v25, %v5185_v23  ;;  %3980 = vmatpush3.bf16.msra.mxu1 %v4197_v58  ;;  %v1642_v7 = vsel %vm1636_vm7, %v4844_v61, %v1449_v44  ;;  %3961 = vmatprep.mubr.msk.bf16.mxu0 %vm1846_vm9, %v3712_v54 }
  0xf4   : > { %v5281_v31 = vcombine.low %v5273_v12, %v5277_v28  ;;  %4145 = vmatprep.subr.msk.bf16.mxu1 %vm1871_vm6, %v4199_v38  ;;  %v1707_v48 = vsel %vm1701_vm8, %v1642_v7, %v1577_v52  ;;  %v4200_v52 = vld [vmem:[%s5784_s4 + $0x18] sm:$0xff]   ;;  %v4382_v7 = vmov 0.0  }
  0xf5   : > { %v1447_v47 = vpop.permute.xlu1 %1446  ;;  %1776 = vst.msk [vmem:[#allocation2 + $0x50] sm:$0xff] %vm1636_vm7, %v4382_v7  ;;  %1766 = vst.msk [vmem:[#allocation2] sm:$0xff] %vm1636_vm7, %v4382_v7 }
  0xf6   : > { %v1640_v23 = vsel %vm1636_vm7, %v4771_v40, %v1447_v47  ;;  %3974 = vmatmul.mubr.msk.bf16.gmra.mxu1 %vm1846_vm9, %v5281_v31  ;;  %v1451_v36 = vpop.permute.xlu0 %1450  ;;  %1767 = vst.msk [vmem:[#allocation2 + $0x8] sm:$0xff] %vm1636_vm7, %v4382_v7  ;;  %1768 = vst.msk [vmem:[#allocation2 + $0x10] sm:$0xff] %vm1636_vm7, %v4382_v7  ;;  %v3737_v47 = vcombine.low %v5215_v2, %v5229_v4  ;;  %v3738_v2 = vcombine.low %v5232_v24, %v5251_v42 }
  0xf7   : > { %v1705_v15 = vsel %vm1701_vm8, %v1640_v23, %v5197_v11  ;;  %v1644_v61 = vsel %vm1636_vm7, %v4822_v5, %v1451_v36  ;;  %1769 = vst.msk [vmem:[#allocation2 + $0x18] sm:$0xff] %vm1636_vm7, %v4382_v7  ;;  %1770 = vst.msk [vmem:[#allocation2 + $0x20] sm:$0xff] %vm1636_vm7, %v4382_v7  ;;  %v4203_v36 = vld [vmem:[%s5784_s4 + $0x30] sm:$0xff]  }
  0xf8   : > { %v3713_v53 = vcombine.low %v1705_v15, %v1707_v48  ;;  %v3733_v60 = vcombine.low %v1703_v43, %v1705_v15  ;;  %v1709_v26 = vsel %vm1701_vm8, %v1644_v61, %v5205_v30  ;;  %v4201_v30 = vld [vmem:[%s5784_s4 + $0x38] ss:$0 sps:$4 sm:$0xff]   ;;  %1771 = vst.msk [vmem:[#allocation2 + $0x28] sm:$0xff] %vm1636_vm7, %v4382_v7  ;;  %1772 = vst.msk [vmem:[#allocation2 + $0x30] sm:$0xff] %vm1636_vm7, %v4382_v7 }
  0xf9   : > { %v1453_v40 = vpop.permute.xlu1 %1452  ;;  %v3734_v58 = vcombine.low %v1707_v48, %v1709_v26  ;;  %1773 = vst.msk [vmem:[#allocation2 + $0x38] sm:$0xff] %vm1636_vm7, %v4382_v7  ;;  %1774 = vst.msk [vmem:[#allocation2 + $0x40] sm:$0xff] %vm1636_vm7, %v4382_v7  ;;  %v2609_v15 = vsel %vm1871_vm6, %v4201_v30, 0  ;;  %v3739_v61 = vcombine.low %v5254_v49, %v5273_v12 }
  0xfa   : > { %v1646_v11 = vsel %vm1636_vm7, %v4860_v39, %v1453_v40  ;;  %3962 = vmatmul.mubr.msk.bf16.vlgmr.msra.gmra.mxu0 %vm1846_vm9, %v3713_v53  ;;  %3981 = vmatprep.mubr.msk.bf16.mxu1 %vm1846_vm9, %v3733_v60  ;;  %v1457_v34 = vpop.permute.xlu0 %1456  ;;  %v4202_v39 = vld [vmem:[%s5784_s4 + $0x24] sm:$0xff]   ;;  %1775 = vst.msk [vmem:[#allocation2 + $0x48] sm:$0xff] %vm1636_vm7, %v4382_v7  ;;  %1777 = vst.msk [vmem:[#allocation2 + $0x58] sm:$0xff] %vm1636_vm7, %v4382_v7  ;;  %v4205_v60 = vld [vmem:[%s5784_s4 + $0x50] ss:$0 sps:$4 sm:$0xff]  }
  0xfb   : > { %v1711_v5 = vsel %vm1701_vm8, %v1646_v11, %v1581_v50  ;;  %3998 = vmatpush3.bf16.msra.mxu0 %v2239_v41  ;;  %v1650_v9 = vsel %vm1636_vm7, %v4901_v35, %v1457_v34  ;;  %1778 = vst.msk [vmem:[#allocation2 + $0x60] sm:$0xff] %vm1636_vm7, %v4382_v7  ;;  %1779 = vst.msk [vmem:[#allocation2 + $0x68] sm:$0xff] %vm1636_vm7, %v4382_v7  ;;  %v4208_v34 = vld [vmem:[%s5784_s4 + $0x5c] ss:$0 sps:$4 sm:$0xff]  }
  0xfc   : > { %v3714_v10 = vcombine.low %v1709_v26, %v1711_v5  ;;  %3999 = vmatprep.subr.bf16.mxu0 %v4200_v52  ;;  %1780 = vst.msk [vmem:[#allocation2 + $0x70] sm:$0xff] %vm1636_vm7, %v4382_v7  ;;  %1781 = vst.msk [vmem:[#allocation2 + $0x78] sm:$0xff] %vm1636_vm7, %v4382_v7  ;;  %v2774_v26 = vsel %vm1871_vm6, %v5324_v29, 0 }
  0xfd   : > { %v1455_v57 = vpop.permute.xlu1 %1454 }
  0xfe   : > { %3965 = vmatprep.mubr.msk.bf16.mxu0 %vm1846_vm9, %v3714_v10  ;;  %3982 = vmatmul.mubr.msk.bf16.vlgmr.msra.gmra.mxu1 %vm1846_vm9, %v3734_v58  ;;  %v1648_v50 = vsel %vm1636_vm7, %v4913_v45, %v1455_v57  ;;  %v1583_v22 = vpop.permute.xlu0 %1582 }
  0xff   : > { %4018 = vmatpush3.bf16.msra.mxu1 %v2430_v32  ;;  %4000 = vmatpush3.bf16.msra.mxu0 %v4200_v52  ;;  %v1713_v3 = vsel %vm1701_vm8, %v1648_v50, %v1583_v22 }
 0x100   : > { %4146 = vmatprep.subr.msk.bf16.mxu0 %vm1871_vm6, %v4201_v30  ;;  %4019 = vmatprep.subr.bf16.mxu1 %v4202_v39  ;;  %v3735_v27 = vcombine.low %v1711_v5, %v1713_v3 }
 0x101   : > { %v1585_v38 = vpop.permute.xlu1 %1584 }
 0x102   : > { %v1715_v45 = vsel %vm1701_vm8, %v1650_v9, %v1585_v38  ;;  %3985 = vmatprep.mubr.msk.bf16.mxu1 %vm1846_vm9, %v3735_v27  ;;  %v1459_v25 = vpop.permute.xlu0 %1458 }
 0x103   : > { %v3715_v43 = vcombine.low %v1713_v3, %v1715_v45  ;;  %4020 = vmatpush3.bf16.msra.mxu1 %v4202_v39  ;;  %v1652_v54 = vsel %vm1636_vm7, %v4946_v16, %v1459_v25  ;;  %v2965_v3 = vsel %vm1871_vm6, %v4205_v60, 0 }
 0x104   : > { %4147 = vmatprep.subr.msk.bf16.mxu1 %vm1871_vm6, %v5324_v29  ;;  %v4207_v29 = vld [vmem:[%s5784_s4 + $0x48] sm:$0xff]  }
 0x105   : > { %3966 = vmatmul.mubr.msk.bf16.gmra.mxu0 %vm1846_vm9, %v3715_v43  ;;  %v1587_v44 = vpop.permute.xlu1 %1586 }
 0x106   : > { %v1717_v35 = vsel %vm1701_vm8, %v1652_v54, %v1587_v44  ;;  %4001 = vmatprep.mubr.msk.bf16.mxu0 %vm1846_vm9, %v3713_v53  ;;  %v1475_v48 = vpop.permute.xlu0 %1474 }
 0x107   : > { %v3736_v16 = vcombine.low %v1715_v45, %v1717_v35  ;;  %v1668_v41 = vsel %vm1636_vm7, %v4920_v55, %v1475_v48  ;;  %v3754_v52 = vcombine.low %v1717_v35, %v1717_v35 }
 0x109   : > { %3986 = vmatmul.mubr.msk.bf16.gmra.mxu1 %vm1846_vm9, %v3736_v16  ;;  %v1603_v23 = vpop.permute.xlu1 %1602 }
 0x10a   : > { %3989 = vmatprep.mubr.msk.bf16.mxu1 %vm1846_vm9, %v3737_v47  ;;  %v1477_v53 = vpop.permute.xlu0 %1476  ;;  %v1733_v24 = vsel %vm1701_vm8, %v1668_v41, %v1603_v23 }
 0x10b   : > { %v3740_v49 = vcombine.low %v5277_v28, %v1733_v24  ;;  %v4206_v28 = vld [vmem:[%s5784_s4 + $0x3c] sm:$0xff]   ;;  %v5398_v5 = vcombine.low %v1733_v24, %v1733_v24 }
 0x10d   : > { %4002 = vmatmul.mubr.msk.bf16.vlgmr.msra.gmra.mxu0 %vm1846_vm9, %v3714_v10  ;;  %v1479_v4 = vpop.permute.xlu1 %1478 }
 0x10e   : > { %4038 = vmatpush3.bf16.msra.mxu0 %v2609_v15  ;;  %4005 = vmatprep.mubr.msk.bf16.mxu0 %vm1846_vm9, %v3715_v43  ;;  %v1481_v42 = vpop.permute.xlu0 %1480  ;;  %v1672_v39 = vsel %vm1636_vm7, %v5001_v0, %v1479_v4  ;;  %v4209_v43 = vld [vmem:[%s5784_s4 + $0x68] ss:$0 sps:$4 sm:$0xff]   ;;  %v3144_v4 = vsel %vm1871_vm6, %v4208_v34, 0 }
 0x10f   : > { %4039 = vmatprep.subr.bf16.mxu0 %v4203_v36  ;;  %v1674_v57 = vsel %vm1636_vm7, %v5011_v6, %v1481_v42 }
 0x111   : > { %3990 = vmatmul.mubr.msk.bf16.gmra.mxu1 %vm1846_vm9, %v3738_v2  ;;  %v1605_v40 = vpop.permute.xlu1 %1604 }
 0x112   : > { %3993 = vmatprep.mubr.msk.bf16.mxu1 %vm1846_vm9, %v3739_v61  ;;  %4040 = vmatpush3.bf16.msra.mxu0 %v4203_v36  ;;  %v1607_v55 = vpop.permute.xlu0 %1606 }
 0x113   : > { %4148 = vmatprep.subr.msk.bf16.mxu0 %vm1871_vm6, %v4205_v60  ;;  %v1737_v0 = vsel %vm1701_vm8, %v1672_v39, %v1607_v55 }
 0x115   : > { %4006 = vmatmul.mubr.msk.bf16.gmra.mxu0 %vm1846_vm9, %v3754_v52  ;;  %v1609_v12 = vpop.permute.xlu1 %1608 }
 0x116   : > { %4009 = vmatprep.mubr.msk.bf16.mxu0 %vm1846_vm9, %v5238_v21  ;;  %v1739_v9 = vsel %vm1701_vm8, %v1674_v57, %v1609_v12 }
 0x119   : > { %3994 = vmatmul.mubr.msk.bf16.gmra.mxu1 %vm1846_vm9, %v3740_v49 }
 0x11a   : > { %4021 = vmatprep.mubr.msk.bf16.mxu1 %vm1846_vm9, %v5219_v56  ;;  %v1670_v56 = vsel %vm1636_vm7, %v4980_v46, %v1477_v53 }
 0x11b   : > { %v1735_v10 = vsel %vm1701_vm8, %v1670_v56, %v1605_v40 }
 0x11c   : > { %v3769_v46 = vcombine.low %v1735_v10, %v1735_v10  ;;  %v5445_v7 = vcombine.low %v1735_v10, %v1737_v0 }
 0x11d   : > { %4010 = vmatmul.mubr.msk.bf16.gmra.mxu0 %vm1846_vm9, %v5260_v17  ;;  %v1483_v11 = vpop.permute.xlu0 %1482 }
 0x11e   : > { %4013 = vmatprep.mubr.msk.bf16.mxu0 %vm1846_vm9, %v5281_v31  ;;  %v1485_v58 = vpop.permute.xlu1 %1484  ;;  %v1676_v6 = vsel %vm1636_vm7, %v5044_v18, %v1483_v11 }
 0x11f   : > { %v1678_v50 = vsel %vm1636_vm7, %v5054_v19, %v1485_v58  ;;  %v5428_v19 = vcombine.low %v1737_v0, %v1739_v9 }
 0x121   : > { %4022 = vmatmul.mubr.msk.bf16.vlgmr.msra.gmra.mxu1 %vm1846_vm9, %v5238_v21  ;;  %v1487_v30 = vpop.permute.xlu0 %1486 }
 0x122   : > { %4025 = vmatprep.mubr.msk.bf16.mxu1 %vm1846_vm9, %v5260_v17  ;;  %4058 = vmatpush3.bf16.msra.mxu1 %v2774_v26  ;;  %v1489_v32 = vpop.permute.xlu1 %1488  ;;  %v1680_v35 = vsel %vm1636_vm7, %v5062_v13, %v1487_v30 }
 0x123   : > { %4059 = vmatprep.subr.bf16.mxu1 %v4206_v28  ;;  %v1682_v44 = vsel %vm1636_vm7, %v5070_v51, %v1489_v32 }
 0x125   : > { %4014 = vmatmul.mubr.msk.bf16.gmra.mxu0 %vm1846_vm9, %v5398_v5  ;;  %v1611_v38 = vpop.permute.xlu0 %1610 }
 0x126   : > { %4041 = vmatprep.mubr.msk.bf16.mxu0 %vm1846_vm9, %v3737_v47  ;;  %4060 = vmatpush3.bf16.msra.mxu1 %v4206_v28  ;;  %v1613_v22 = vpop.permute.xlu1 %1612  ;;  %v1741_v45 = vsel %vm1701_vm8, %v1676_v6, %v1611_v38 }
 0x127   : > { %4149 = vmatprep.subr.msk.bf16.mxu1 %vm1871_vm6, %v4208_v34  ;;  %v1743_v27 = vsel %vm1701_vm8, %v1678_v50, %v1613_v22  ;;  %v5458_v36 = vcombine.low %v1739_v9, %v1741_v45 }
 0x128   : > { %v5434_v25 = vcombine.low %v1741_v45, %v1743_v27 }
 0x129   : > { %4026 = vmatmul.mubr.msk.bf16.gmra.mxu1 %vm1846_vm9, %v5281_v31  ;;  %v1615_v18 = vpop.permute.xlu0 %1614 }
 0x12a   : > { %4029 = vmatprep.mubr.msk.bf16.mxu1 %vm1846_vm9, %v3769_v46  ;;  %v1617_v54 = vpop.permute.xlu1 %1616  ;;  %v1745_v51 = vsel %vm1701_vm8, %v1680_v35, %v1615_v18 }
 0x12b   : > { %v1747_v16 = vsel %vm1701_vm8, %v1682_v44, %v1617_v54  ;;  %v5460_v53 = vcombine.low %v1743_v27, %v1745_v51  ;;  %v1793_v44 = vld [vmem:[#allocation2 + $0x58] sm:$0xff] }
 0x12c   : > { %v5452_v23 = vcombine.low %v1745_v51, %v1747_v16 }
 0x12d   : > { %4042 = vmatmul.mubr.msk.bf16.vlgmr.msra.gmra.mxu0 %vm1846_vm9, %v3738_v2  ;;  %v1491_v47 = vpop.permute.xlu0 %1490 }
 0x12e   : > { %4078 = vmatpush3.bf16.msra.mxu0 %v2965_v3  ;;  %4045 = vmatprep.mubr.msk.bf16.mxu0 %vm1846_vm9, %v3739_v61  ;;  %v1619_v48 = vpop.permute.xlu1 %1618  ;;  %v1684_v2 = vsel %vm1636_vm7, %v5095_v59, %v1491_v47 }
 0x12f   : > { %4079 = vmatprep.subr.bf16.mxu0 %v4207_v29  ;;  %v1749_v60 = vsel %vm1701_vm8, %v1684_v2, %v1619_v48  ;;  %v1796_v48 = vld [vmem:[#allocation2 + $0x70] sm:$0xff] }
 0x130   : > { %v3789_v59 = vcombine.low %v1747_v16, %v1749_v60  ;;  %v3803_v56 = vcombine.low %v1749_v60, %v1749_v60  ;;  %v1791_v16 = vld [vmem:[#allocation2 + $0x48] sm:$0xff]  ;;  %v1784_v2 = vld [vmem:[#allocation2 + $0x10] sm:$0xff] }
 0x131   : > { %4030 = vmatmul.mubr.msk.bf16.gmra.mxu1 %vm1846_vm9, %v5428_v19  ;;  %v1493_v13 = vpop.permute.xlu0 %1492 }
 0x132   : > { %4033 = vmatprep.mubr.msk.bf16.mxu1 %vm1846_vm9, %v5434_v25  ;;  %4080 = vmatpush3.bf16.msra.mxu0 %v4207_v29  ;;  %v1495_v15 = vpop.permute.xlu1 %1494 }
 0x133   : > { %4150 = vmatprep.subr.msk.bf16.mxu0 %vm1871_vm6, %v4209_v43 }
 0x135   : > { %4046 = vmatmul.mubr.msk.bf16.gmra.mxu0 %vm1846_vm9, %v3740_v49  ;;  %v1497_v61 = vpop.permute.xlu0 %1496  ;;  %v1686_v49 = vsel %vm1636_vm7, %v5103_v63, %v1493_v13  ;;  %v1688_v63 = vsel %vm1636_vm7, %v5115_v62, %v1495_v15  ;;  %v1794_v15 = vld [vmem:[#allocation2 + $0x60] sm:$0xff] }
 0x136   : > { %4049 = vmatprep.mubr.msk.bf16.mxu0 %vm1846_vm9, %v5445_v7  ;;  %v1621_v41 = vpop.permute.xlu1 %1620  ;;  %v1690_v11 = vsel %vm1636_vm7, %v5127_v37, %v1497_v61 }
 0x137   : > { %v1751_v55 = vsel %vm1701_vm8, %v1686_v49, %v1621_v41  ;;  %v1782_v41 = vld [vmem:[#allocation2] sm:$0xff] }
 0x138   : > { %v3817_v28 = vcombine.low %v1751_v55, %v1751_v55 }
 0x139   : > { %4034 = vmatmul.mubr.msk.bf16.gmra.mxu1 %vm1846_vm9, %v5452_v23  ;;  %v1623_v52 = vpop.permute.xlu0 %1622 }
 0x13a   : > { %4061 = vmatprep.mubr.msk.bf16.mxu1 %vm1846_vm9, %v5238_v21  ;;  %v4210_v21 = vld [vmem:[%s5784_s4 + $0x54] sm:$0xff]   ;;  %v1625_v24 = vpop.permute.xlu1 %1624 }
 0x13b   : > { %v1755_v34 = vsel %vm1701_vm8, %v1690_v11, %v1625_v24 }
 0x13d   : > { %4050 = vmatmul.mubr.msk.bf16.gmra.mxu0 %vm1846_vm9, %v5458_v36  ;;  %v1499_v42 = vpop.permute.xlu0 %1498 }
 0x13e   : > { %4053 = vmatprep.mubr.msk.bf16.mxu0 %vm1846_vm9, %v5460_v53  ;;  %v1501_v40 = vpop.permute.xlu1 %1500  ;;  %v1692_v10 = vsel %vm1636_vm7, %v5137_v33, %v1499_v42  ;;  %v1785_v42 = vld [vmem:[#allocation2 + $0x18] sm:$0xff] }
 0x13f   : > { %v1694_v58 = vsel %vm1636_vm7, %v5152_v20, %v1501_v40 }
 0x141   : > { %4062 = vmatmul.mubr.msk.bf16.vlgmr.msra.gmra.mxu1 %vm1846_vm9, %v5260_v17  ;;  %v3309_v17 = vsel %vm1871_vm6, %v4209_v43, 0  ;;  %v1503_v12 = vpop.permute.xlu0 %1502 }
 0x142   : > { %4065 = vmatprep.mubr.msk.bf16.mxu1 %vm1846_vm9, %v5281_v31  ;;  %4098 = vmatpush3.bf16.msra.mxu1 %v3144_v4  ;;  %v4211_v31 = vld [vmem:[%s5784_s4 + $0x60] sm:$0xff]   ;;  %v1505_v26 = vpop.permute.xlu1 %1504  ;;  %v1696_v33 = vsel %vm1636_vm7, %v5162_v8, %v1503_v12  ;;  %v1797_v4 = vld [vmem:[#allocation2 + $0x78] sm:$0xff] }
 0x143   : > { %4099 = vmatprep.subr.bf16.mxu1 %v4210_v21  ;;  %v1698_v39 = vsel %vm1636_vm7, %v5175_v14, %v1505_v26  ;;  %v1783_v26 = vld [vmem:[#allocation2 + $0x8] sm:$0xff] }
 0x145   : > { %4054 = vmatmul.mubr.msk.bf16.gmra.mxu0 %vm1846_vm9, %v3789_v59  ;;  %v1627_v62 = vpop.permute.xlu0 %1626 }
 0x146   : > { %4081 = vmatprep.mubr.msk.bf16.mxu0 %vm1846_vm9, %v3769_v46  ;;  %4100 = vmatpush3.bf16.msra.mxu1 %v4210_v21  ;;  %v1629_v32 = vpop.permute.xlu1 %1628  ;;  %v1757_v30 = vsel %vm1701_vm8, %v1692_v10, %v1627_v62 }
 0x147   : > { %v1759_v37 = vsel %vm1701_vm8, %v1694_v58, %v1629_v32  ;;  %v3835_v0 = vcombine.low %v1755_v34, %v1757_v30  ;;  %v1786_v32 = vld [vmem:[#allocation2 + $0x20] sm:$0xff] }
 0x148   : > { %v3819_v46 = vcombine.low %v1757_v30, %v1759_v37 }
 0x149   : > { %4066 = vmatmul.mubr.msk.bf16.gmra.mxu1 %vm1846_vm9, %v5398_v5  ;;  %v1753_v5 = vsel %vm1701_vm8, %v1688_v63, %v1623_v52  ;;  %v1631_v57 = vpop.permute.xlu0 %1630 }
 0x14a   : > { %4069 = vmatprep.mubr.msk.bf16.mxu1 %vm1846_vm9, %v5428_v19  ;;  %v3818_v20 = vcombine.low %v1753_v5, %v1755_v34  ;;  %v1633_v50 = vpop.permute.xlu1 %1632  ;;  %v1761_v3 = vsel %vm1701_vm8, %v1696_v33, %v1631_v57  ;;  %v3834_v29 = vcombine.low %v1751_v55, %v1753_v5  ;;  %v1788_v5 = vld [vmem:[#allocation2 + $0x30] sm:$0xff]  ;;  %v1789_v33 = vld [vmem:[#allocation2 + $0x38] sm:$0xff] }
 0x14b   : > { %v1763_v22 = vsel %vm1701_vm8, %v1698_v39, %v1633_v50  ;;  %v3836_v9 = vcombine.low %v1759_v37, %v1761_v3 }
 0x14c   : > { %v3820_v14 = vcombine.low %v1761_v3, %v1763_v22 }
 0x14d   : > { %4082 = vmatmul.mubr.msk.bf16.vlgmr.msra.gmra.mxu0 %vm1846_vm9, %v5428_v19  ;;  %v1507_v8 = vpop.permute.xlu0 %1506 }
 0x14e   : > { %4118 = vmatpush3.bf16.msra.mxu0 %v3309_v17  ;;  %4085 = vmatprep.mubr.msk.bf16.mxu0 %vm1846_vm9, %v5434_v25  ;;  %v1700_v6 = vsel %vm1636_vm7, %v5190_v1, %v1507_v8  ;;  %v1635_v38 = vpop.permute.xlu1 %1634  ;;  %v1792_v1 = vld [vmem:[#allocation2 + $0x50] sm:$0xff] }
 0x14f   : > { %4119 = vmatprep.subr.bf16.mxu0 %v4211_v31  ;;  %v1765_v27 = vsel %vm1701_vm8, %v1700_v6, %v1635_v38 }
 0x150   : > { %v3851_v45 = vcombine.low %v1765_v27, %v1765_v27 }
 0x151   : > { %4070 = vmatmul.mubr.msk.bf16.gmra.mxu1 %vm1846_vm9, %v5434_v25 }
 0x152   : > { %4073 = vmatprep.mubr.msk.bf16.mxu1 %vm1846_vm9, %v5452_v23  ;;  %4120 = vmatpush3.bf16.msra.mxu0 %v4211_v31 }
 0x155   : > { %4086 = vmatmul.mubr.msk.bf16.gmra.mxu0 %vm1846_vm9, %v5452_v23 }
 0x156   : > { %4089 = vmatprep.mubr.msk.bf16.mxu0 %vm1846_vm9, %v3817_v28 }
 0x159   : > { %4074 = vmatmul.mubr.msk.bf16.gmra.mxu1 %vm1846_vm9, %v3803_v56 }
 0x15a   : > { %4101 = vmatprep.mubr.msk.bf16.mxu1 %vm1846_vm9, %v5445_v7 }
 0x15d   : > { %4090 = vmatmul.mubr.msk.bf16.gmra.mxu0 %vm1846_vm9, %v3818_v20 }
 0x15e   : > { %4093 = vmatprep.mubr.msk.bf16.mxu0 %vm1846_vm9, %v3819_v46 }
 0x161   : > { %4102 = vmatmul.mubr.msk.bf16.vlgmr.msra.gmra.mxu1 %vm1846_vm9, %v5458_v36 }
 0x162   : > { %4105 = vmatprep.mubr.msk.bf16.mxu1 %vm1846_vm9, %v5460_v53 }
 0x165   : > { %4094 = vmatmul.mubr.msk.bf16.gmra.mxu0 %vm1846_vm9, %v3820_v14 }
 0x166   : > { %4121 = vmatprep.mubr.msk.bf16.mxu0 %vm1846_vm9, %v5428_v19  ;;  %v3837_v19 = vcombine.low %v1763_v22, %v1765_v27 }
 0x169   : > { %4106 = vmatmul.mubr.msk.bf16.gmra.mxu1 %vm1846_vm9, %v3789_v59  ;;  %v1795_v59 = vld [vmem:[#allocation2 + $0x68] sm:$0xff] }
 0x16a   : > { %4109 = vmatprep.mubr.msk.bf16.mxu1 %vm1846_vm9, %v3834_v29  ;;  %v1787_v29 = vld [vmem:[#allocation2 + $0x28] sm:$0xff] }
 0x16d   : > { %4122 = vmatmul.mubr.msk.bf16.vlgmr.msra.gmra.mxu0 %vm1846_vm9, %v5434_v25  ;;  %v1790_v25 = vld [vmem:[#allocation2 + $0x40] sm:$0xff] }
 0x16e   : > { %4125 = vmatprep.mubr.msk.bf16.mxu0 %vm1846_vm9, %v5452_v23 }
 0x171   : > { %4110 = vmatmul.mubr.msk.bf16.gmra.mxu1 %vm1846_vm9, %v3835_v0 }
 0x172   : > { %4113 = vmatprep.mubr.msk.bf16.mxu1 %vm1846_vm9, %v3836_v9 }
 0x175   : > { %4126 = vmatmul.mubr.msk.bf16.gmra.mxu0 %vm1846_vm9, %v3803_v56 }
 0x176   : > { %4129 = vmatprep.mubr.msk.bf16.mxu0 %vm1846_vm9, %v3818_v20 }
 0x179   : > { %4114 = vmatmul.mubr.msk.bf16.gmra.mxu1 %vm1846_vm9, %v3837_v19 }
 0x17d   : > { %4130 = vmatmul.mubr.msk.bf16.gmra.mxu0 %vm1846_vm9, %v3819_v46 }
 0x17e   : > { %4133 = vmatprep.mubr.msk.bf16.mxu0 %vm1846_vm9, %v3820_v14 }
 0x185   : > { %4134 = vmatmul.mubr.msk.bf16.gmra.mxu0 %vm1846_vm9, %v3851_v45 }
 0x1ae   : > { %v3971_v43 = vpop.f32.mrf.mxu1 }
 0x1af   : > { %v1982_v18 = vadd.f32 %v3971_v43, %v1792_v1 }
 0x1b0   : > { %v1941_v54 = vpop.f32.mrf.mxu1 }
 0x1b1   : > { %1998 = vst.msk [vmem:[#allocation2 + $0x50] sm:$0xff] %vm1636_vm7, %v1982_v18  ;;  %v1980_v35 = vadd.f32 %v1941_v54, %v1790_v25 }
 0x1b2   : > { %v3972_v7 = vpop.f32.mrf.mxu1 }
 0x1b3   : > { %1996 = vst.msk [vmem:[#allocation2 + $0x40] sm:$0xff] %vm1636_vm7, %v1980_v35  ;;  %v1983_v51 = vadd.f32 %v3972_v7, %v1793_v44 }
 0x1b4   : > { %v1944_v47 = vpop.f32.mrf.mxu1 }
 0x1b5   : > { %1999 = vst.msk [vmem:[#allocation2 + $0x58] sm:$0xff] %vm1636_vm7, %v1983_v51  ;;  %v1981_v23 = vadd.f32 %v1944_v47, %v1791_v16 }
 0x1b6   : > { %v3975_v13 = vpop.f32.mrf.mxu1 }
 0x1b7   : > { %1997 = vst.msk [vmem:[#allocation2 + $0x48] sm:$0xff] %vm1636_vm7, %v1981_v23  ;;  %v1986_v36 = vadd.f32 %v3975_v13, %v1796_v48 }
 0x1b8   : > { %v1957_v53 = vpop.f32.mrf.mxu1  ;;  %v2014_v47 = vld [vmem:[#allocation2 + $0x50] sm:$0xff] }
 0x1b9   : > { %2002 = vst.msk [vmem:[#allocation2 + $0x70] sm:$0xff] %vm1636_vm7, %v1986_v36  ;;  %v1984_v21 = vadd.f32 %v1957_v53, %v1794_v15 }
 0x1ba   : > { %v3963_v60 = vpop.f32.mrf.mxu0  ;;  %v3976_v61 = vpop.f32.mrf.mxu1 }
 0x1bb   : > { %2000 = vst.msk [vmem:[#allocation2 + $0x60] sm:$0xff] %vm1636_vm7, %v1984_v21  ;;  %v1974_v52 = vadd.f32 %v3963_v60, %v1784_v2  ;;  %v1987_v24 = vadd.f32 %v3976_v61, %v1797_v4  ;;  %v2012_v4 = vld [vmem:[#allocation2 + $0x40] sm:$0xff] }
 0x1bc   : > { %v1909_v17 = vpop.f32.mrf.mxu0  ;;  %v1960_v31 = vpop.f32.mrf.mxu1 }
 0x1bd   : > { %1990 = vst.msk [vmem:[#allocation2 + $0x10] sm:$0xff] %vm1636_vm7, %v1974_v52  ;;  %2003 = vst.msk [vmem:[#allocation2 + $0x78] sm:$0xff] %vm1636_vm7, %v1987_v24  ;;  %v1972_v40 = vadd.f32 %v1909_v17, %v1782_v41  ;;  %v1985_v49 = vadd.f32 %v1960_v31, %v1795_v59  ;;  %v2015_v17 = vld [vmem:[#allocation2 + $0x58] sm:$0xff] }
 0x1be   : > { %v3964_v55 = vpop.f32.mrf.mxu0  ;;  %v3983_v12 = vpop.f32.mrf.mxu1 }
 0x1bf   : > { %1988 = vst.msk [vmem:[#allocation2] sm:$0xff] %vm1636_vm7, %v1972_v40  ;;  %2001 = vst.msk [vmem:[#allocation2 + $0x68] sm:$0xff] %vm1636_vm7, %v1985_v49  ;;  %v1975_v28 = vadd.f32 %v3964_v55, %v1785_v42  ;;  %v2013_v55 = vld [vmem:[#allocation2 + $0x48] sm:$0xff] }
 0x1c0   : > { %v1912_v63 = vpop.f32.mrf.mxu0  ;;  %v2106_v11 = vpop.f32.mrf.mxu1 }
 0x1c1   : > { %1991 = vst.msk [vmem:[#allocation2 + $0x18] sm:$0xff] %vm1636_vm7, %v1975_v28  ;;  %v1973_v58 = vadd.f32 %v1912_v63, %v1783_v26 }
 0x1c2   : > { %v3984_v56 = vpop.f32.mrf.mxu1 }
 0x1c3   : > { %1989 = vst.msk [vmem:[#allocation2 + $0x8] sm:$0xff] %vm1636_vm7, %v1973_v58 }
 0x1c4   : > { %v2006_v34 = vld [vmem:[#allocation2 + $0x10] sm:$0xff]  ;;  %v2109_v46 = vpop.f32.mrf.mxu1 }
 0x1c5   : > { %v2171_v10 = vadd.f32 %v3983_v12, %v2006_v34  ;;  %v3967_v62 = vpop.f32.mrf.mxu0 }
 0x1c6   : > { %v2004_v37 = vld [vmem:[#allocation2] sm:$0xff]  ;;  %v1978_v20 = vadd.f32 %v3967_v62, %v1788_v5 }
 0x1c7   : > { %2187 = vst.msk [vmem:[#allocation2 + $0x10] sm:$0xff] %vm1636_vm7, %v2171_v10  ;;  %v2169_v30 = vadd.f32 %v2106_v11, %v2004_v37  ;;  %v1925_v39 = vpop.f32.mrf.mxu0  ;;  %v2018_v11 = vld [vmem:[#allocation2 + $0x70] sm:$0xff]  ;;  %v2016_v62 = vld [vmem:[#allocation2 + $0x60] sm:$0xff] }
 0x1c8   : > { %v2007_v57 = vld [vmem:[#allocation2 + $0x18] sm:$0xff]  ;;  %1994 = vst.msk [vmem:[#allocation2 + $0x30] sm:$0xff] %vm1636_vm7, %v1978_v20  ;;  %v1976_v50 = vadd.f32 %v1925_v39, %v1786_v32 }
 0x1c9   : > { %2185 = vst.msk [vmem:[#allocation2] sm:$0xff] %vm1636_vm7, %v2169_v30  ;;  %v2172_v22 = vadd.f32 %v3984_v56, %v2007_v57  ;;  %v3968_v3 = vpop.f32.mrf.mxu0  ;;  %v3987_v14 = vpop.f32.mrf.mxu1 }
 0x1ca   : > { %v2005_v8 = vld [vmem:[#allocation2 + $0x8] sm:$0xff]  ;;  %1992 = vst.msk [vmem:[#allocation2 + $0x20] sm:$0xff] %vm1636_vm7, %v1976_v50  ;;  %v1979_v0 = vadd.f32 %v3968_v3, %v1789_v33  ;;  %v2019_v33 = vld [vmem:[#allocation2 + $0x78] sm:$0xff] }
 0x1cb   : > { %2188 = vst.msk [vmem:[#allocation2 + $0x18] sm:$0xff] %vm1636_vm7, %v2172_v22  ;;  %v2170_v9 = vadd.f32 %v2109_v46, %v2005_v8  ;;  %v1928_v6 = vpop.f32.mrf.mxu0  ;;  %v2122_v38 = vpop.f32.mrf.mxu1 }
 0x1cc   : > { %1995 = vst.msk [vmem:[#allocation2 + $0x38] sm:$0xff] %vm1636_vm7, %v1979_v0  ;;  %v1977_v27 = vadd.f32 %v1928_v6, %v1787_v29  ;;  %v2017_v0 = vld [vmem:[#allocation2 + $0x68] sm:$0xff] }
 0x1cd   : > { %2186 = vst.msk [vmem:[#allocation2 + $0x8] sm:$0xff] %vm1636_vm7, %v2170_v9  ;;  %v4003_v19 = vpop.f32.mrf.mxu0  ;;  %v3988_v45 = vpop.f32.mrf.mxu1 }
 0x1ce   : > { %1993 = vst.msk [vmem:[#allocation2 + $0x28] sm:$0xff] %vm1636_vm7, %v1977_v27  ;;  %v2203_v1 = vld [vmem:[#allocation2 + $0x10] sm:$0xff] }
 0x1cf   : > { %v2010_v43 = vld [vmem:[#allocation2 + $0x30] sm:$0xff]  ;;  %v2340_v25 = vadd.f32 %v4003_v19, %v2203_v1  ;;  %v2275_v18 = vpop.f32.mrf.mxu0  ;;  %v2125_v54 = vpop.f32.mrf.mxu1 }
 0x1d0   : > { %v2175_v44 = vadd.f32 %v3987_v14, %v2010_v43  ;;  %v2201_v35 = vld [vmem:[#allocation2] sm:$0xff] }
 0x1d1   : > { %v2008_v7 = vld [vmem:[#allocation2 + $0x20] sm:$0xff]  ;;  %2356 = vst.msk [vmem:[#allocation2 + $0x10] sm:$0xff] %vm1636_vm7, %v2340_v25  ;;  %v2338_v16 = vadd.f32 %v2275_v18, %v2201_v35  ;;  %v4004_v51 = vpop.f32.mrf.mxu0  ;;  %v3991_v48 = vpop.f32.mrf.mxu1 }
 0x1d2   : > { %2191 = vst.msk [vmem:[#allocation2 + $0x30] sm:$0xff] %vm1636_vm7, %v2175_v44  ;;  %v2173_v23 = vadd.f32 %v2122_v38, %v2008_v7  ;;  %v2204_v13 = vld [vmem:[#allocation2 + $0x18] sm:$0xff]  ;;  %v2179_v15 = vadd.f32 %v3991_v48, %v2014_v47 }
 0x1d3   : > { %v2011_v36 = vld [vmem:[#allocation2 + $0x38] sm:$0xff]  ;;  %2354 = vst.msk [vmem:[#allocation2] sm:$0xff] %vm1636_vm7, %v2338_v16  ;;  %v2341_v53 = vadd.f32 %v4004_v51, %v2204_v13  ;;  %v2278_v2 = vpop.f32.mrf.mxu0  ;;  %v2138_v21 = vpop.f32.mrf.mxu1 }
 0x1d4   : > { %2189 = vst.msk [vmem:[#allocation2 + $0x20] sm:$0xff] %vm1636_vm7, %v2173_v23  ;;  %v2176_v60 = vadd.f32 %v3988_v45, %v2011_v36  ;;  %2195 = vst.msk [vmem:[#allocation2 + $0x50] sm:$0xff] %vm1636_vm7, %v2179_v15  ;;  %v2202_v61 = vld [vmem:[#allocation2 + $0x8] sm:$0xff]  ;;  %v2177_v41 = vadd.f32 %v2138_v21, %v2012_v4 }
 0x1d5   : > { %v2009_v59 = vld [vmem:[#allocation2 + $0x28] sm:$0xff]  ;;  %2357 = vst.msk [vmem:[#allocation2 + $0x18] sm:$0xff] %vm1636_vm7, %v2341_v53  ;;  %v2339_v52 = vadd.f32 %v2278_v2, %v2202_v61  ;;  %v4007_v24 = vpop.f32.mrf.mxu0  ;;  %v3992_v31 = vpop.f32.mrf.mxu1 }
 0x1d6   : > { %2192 = vst.msk [vmem:[#allocation2 + $0x38] sm:$0xff] %vm1636_vm7, %v2176_v60  ;;  %v2174_v42 = vadd.f32 %v2125_v54, %v2009_v59  ;;  %2193 = vst.msk [vmem:[#allocation2 + $0x40] sm:$0xff] %vm1636_vm7, %v2177_v41  ;;  %v2180_v40 = vadd.f32 %v3992_v31, %v2015_v17 }
 0x1d7   : > { %2355 = vst.msk [vmem:[#allocation2 + $0x8] sm:$0xff] %vm1636_vm7, %v2339_v52  ;;  %v2291_v49 = vpop.f32.mrf.mxu0  ;;  %v2141_v12 = vpop.f32.mrf.mxu1 }
 0x1d8   : > { %2190 = vst.msk [vmem:[#allocation2 + $0x28] sm:$0xff] %vm1636_vm7, %v2174_v42  ;;  %2196 = vst.msk [vmem:[#allocation2 + $0x58] sm:$0xff] %vm1636_vm7, %v2180_v40  ;;  %v2178_v26 = vadd.f32 %v2141_v12, %v2013_v55  ;;  %v2372_v1 = vld [vmem:[#allocation2 + $0x10] sm:$0xff] }
 0x1d9   : > { %v2207_v28 = vld [vmem:[#allocation2 + $0x30] sm:$0xff]  ;;  %v4008_v63 = vpop.f32.mrf.mxu0  ;;  %v3995_v58 = vpop.f32.mrf.mxu1 }
 0x1da   : > { %v2344_v56 = vadd.f32 %v4007_v24, %v2207_v28  ;;  %2194 = vst.msk [vmem:[#allocation2 + $0x48] sm:$0xff] %vm1636_vm7, %v2178_v26  ;;  %v2183_v5 = vadd.f32 %v3995_v58, %v2018_v11  ;;  %v2370_v35 = vld [vmem:[#allocation2] sm:$0xff] }
 0x1db   : > { %v2205_v34 = vld [vmem:[#allocation2 + $0x20] sm:$0xff]  ;;  %v2294_v10 = vpop.f32.mrf.mxu0  ;;  %v2154_v32 = vpop.f32.mrf.mxu1  ;;  %v2211_v37 = vld [vmem:[#allocation2 + $0x50] sm:$0xff] }
 0x1dc   : > { %2360 = vst.msk [vmem:[#allocation2 + $0x30] sm:$0xff] %vm1636_vm7, %v2344_v56  ;;  %v2342_v20 = vadd.f32 %v2291_v49, %v2205_v34  ;;  %2199 = vst.msk [vmem:[#allocation2 + $0x70] sm:$0xff] %vm1636_vm7, %v2183_v5  ;;  %v2181_v30 = vadd.f32 %v2154_v32, %v2016_v62  ;;  %v2373_v23 = vld [vmem:[#allocation2 + $0x18] sm:$0xff] }
 0x1dd   : > { %v2208_v46 = vld [vmem:[#allocation2 + $0x38] sm:$0xff]  ;;  %v4011_v39 = vpop.f32.mrf.mxu0  ;;  %v3996_v57 = vpop.f32.mrf.mxu1  ;;  %v2209_v50 = vld [vmem:[#allocation2 + $0x40] sm:$0xff] }
 0x1de   : > { %2358 = vst.msk [vmem:[#allocation2 + $0x20] sm:$0xff] %vm1636_vm7, %v2342_v20  ;;  %v2345_v22 = vadd.f32 %v4008_v63, %v2208_v46  ;;  %2197 = vst.msk [vmem:[#allocation2 + $0x60] sm:$0xff] %vm1636_vm7, %v2181_v30  ;;  %v2348_v3 = vadd.f32 %v4011_v39, %v2211_v37  ;;  %v2184_v14 = vadd.f32 %v3996_v57, %v2019_v33  ;;  %v2371_v4 = vld [vmem:[#allocation2 + $0x8] sm:$0xff] }
 0x1df   : > { %v2206_v29 = vld [vmem:[#allocation2 + $0x28] sm:$0xff]  ;;  %v2307_v8 = vpop.f32.mrf.mxu0  ;;  %v2157_v9 = vpop.f32.mrf.mxu1  ;;  %v2212_v6 = vld [vmem:[#allocation2 + $0x58] sm:$0xff] }
 0x1e0   : > { %2361 = vst.msk [vmem:[#allocation2 + $0x38] sm:$0xff] %vm1636_vm7, %v2345_v22  ;;  %v2343_v38 = vadd.f32 %v2294_v10, %v2206_v29  ;;  %2364 = vst.msk [vmem:[#allocation2 + $0x50] sm:$0xff] %vm1636_vm7, %v2348_v3  ;;  %v2346_v27 = vadd.f32 %v2307_v8, %v2209_v50  ;;  %v2182_v19 = vadd.f32 %v2157_v9, %v2017_v0 }
 0x1e1   : > { %2200 = vst.msk [vmem:[#allocation2 + $0x78] sm:$0xff] %vm1636_vm7, %v2184_v14  ;;  %v4012_v45 = vpop.f32.mrf.mxu0  ;;  %v4023_v43 = vpop.f32.mrf.mxu1  ;;  %v2210_v25 = vld [vmem:[#allocation2 + $0x48] sm:$0xff] }
 0x1e2   : > { %2359 = vst.msk [vmem:[#allocation2 + $0x28] sm:$0xff] %vm1636_vm7, %v2343_v38  ;;  %2362 = vst.msk [vmem:[#allocation2 + $0x40] sm:$0xff] %vm1636_vm7, %v2346_v27  ;;  %v2349_v18 = vadd.f32 %v4012_v45, %v2212_v6  ;;  %v2531_v54 = vadd.f32 %v4023_v43, %v2372_v1 }
 0x1e3   : > { %2198 = vst.msk [vmem:[#allocation2 + $0x68] sm:$0xff] %vm1636_vm7, %v2182_v19  ;;  %v2310_v44 = vpop.f32.mrf.mxu0  ;;  %v2466_v7 = vpop.f32.mrf.mxu1  ;;  %v2215_v16 = vld [vmem:[#allocation2 + $0x70] sm:$0xff] }
 0x1e4   : > { %2365 = vst.msk [vmem:[#allocation2 + $0x58] sm:$0xff] %vm1636_vm7, %v2349_v18  ;;  %2547 = vst.msk [vmem:[#allocation2 + $0x10] sm:$0xff] %vm1636_vm7, %v2531_v54  ;;  %v2347_v51 = vadd.f32 %v2310_v44, %v2210_v25  ;;  %v2529_v47 = vadd.f32 %v2466_v7, %v2370_v35  ;;  %v2376_v52 = vld [vmem:[#allocation2 + $0x30] sm:$0xff] }
 0x1e5   : > { %v4015_v48 = vpop.f32.mrf.mxu0  ;;  %v4024_v13 = vpop.f32.mrf.mxu1  ;;  %v2213_v15 = vld [vmem:[#allocation2 + $0x60] sm:$0xff] }
 0x1e6   : > { %2363 = vst.msk [vmem:[#allocation2 + $0x48] sm:$0xff] %vm1636_vm7, %v2347_v51  ;;  %2545 = vst.msk [vmem:[#allocation2] sm:$0xff] %vm1636_vm7, %v2529_v47  ;;  %v2352_v36 = vadd.f32 %v4015_v48, %v2215_v16  ;;  %v2532_v53 = vadd.f32 %v4024_v13, %v2373_v23  ;;  %v2374_v49 = vld [vmem:[#allocation2 + $0x20] sm:$0xff] }
 0x1e7   : > { %v2323_v2 = vpop.f32.mrf.mxu0  ;;  %v2469_v21 = vpop.f32.mrf.mxu1  ;;  %v2377_v11 = vld [vmem:[#allocation2 + $0x38] sm:$0xff]  ;;  %v2380_v39 = vld [vmem:[#allocation2 + $0x50] sm:$0xff] }
 0x1e8   : > { %v2216_v60 = vld [vmem:[#allocation2 + $0x78] sm:$0xff]  ;;  %2368 = vst.msk [vmem:[#allocation2 + $0x70] sm:$0xff] %vm1636_vm7, %v2352_v36  ;;  %2548 = vst.msk [vmem:[#allocation2 + $0x18] sm:$0xff] %vm1636_vm7, %v2532_v53  ;;  %v2350_v61 = vadd.f32 %v2323_v2, %v2213_v15  ;;  %v2530_v41 = vadd.f32 %v2469_v21, %v2371_v4 }
 0x1e9   : > { %v4016_v59 = vpop.f32.mrf.mxu0  ;;  %v4027_v24 = vpop.f32.mrf.mxu1  ;;  %v2375_v62 = vld [vmem:[#allocation2 + $0x28] sm:$0xff]  ;;  %v2378_v14 = vld [vmem:[#allocation2 + $0x40] sm:$0xff] }
 0x1ea   : > { %v2214_v17 = vld [vmem:[#allocation2 + $0x68] sm:$0xff]  ;;  %2366 = vst.msk [vmem:[#allocation2 + $0x60] sm:$0xff] %vm1636_vm7, %v2350_v61  ;;  %2546 = vst.msk [vmem:[#allocation2 + $0x8] sm:$0xff] %vm1636_vm7, %v2530_v41  ;;  %v2353_v31 = vadd.f32 %v4016_v59, %v2216_v60  ;;  %v2535_v42 = vadd.f32 %v4027_v24, %v2376_v52 }
 0x1eb   : > { %v2326_v40 = vpop.f32.mrf.mxu0  ;;  %v2482_v55 = vpop.f32.mrf.mxu1  ;;  %v2563_v12 = vld [vmem:[#allocation2 + $0x10] sm:$0xff]  ;;  %v2381_v38 = vld [vmem:[#allocation2 + $0x58] sm:$0xff] }
 0x1ec   : > { %2369 = vst.msk [vmem:[#allocation2 + $0x78] sm:$0xff] %vm1636_vm7, %v2353_v31  ;;  %2551 = vst.msk [vmem:[#allocation2 + $0x30] sm:$0xff] %vm1636_vm7, %v2535_v42  ;;  %v2351_v26 = vadd.f32 %v2326_v40, %v2214_v17  ;;  %v2533_v28 = vadd.f32 %v2482_v55, %v2374_v49 }
 0x1ed   : > { %v4043_v63 = vpop.f32.mrf.mxu0  ;;  %v4028_v58 = vpop.f32.mrf.mxu1  ;;  %v2561_v56 = vld [vmem:[#allocation2] sm:$0xff]  ;;  %v2379_v25 = vld [vmem:[#allocation2 + $0x48] sm:$0xff] }
 0x1ee   : > { %2367 = vst.msk [vmem:[#allocation2 + $0x68] sm:$0xff] %vm1636_vm7, %v2351_v26  ;;  %2549 = vst.msk [vmem:[#allocation2 + $0x20] sm:$0xff] %vm1636_vm7, %v2533_v28  ;;  %v2710_v5 = vadd.f32 %v4043_v63, %v2563_v12  ;;  %v2536_v34 = vadd.f32 %v4028_v58, %v2377_v11 }
 0x1ef   : > { %v2645_v10 = vpop.f32.mrf.mxu0  ;;  %v2485_v32 = vpop.f32.mrf.mxu1  ;;  %v2564_v37 = vld [vmem:[#allocation2 + $0x18] sm:$0xff]  ;;  %v2384_v16 = vld [vmem:[#allocation2 + $0x70] sm:$0xff] }
 0x1f0   : > { %2726 = vst.msk [vmem:[#allocation2 + $0x10] sm:$0xff] %vm1636_vm7, %v2710_v5  ;;  %2552 = vst.msk [vmem:[#allocation2 + $0x38] sm:$0xff] %vm1636_vm7, %v2536_v34  ;;  %v2708_v20 = vadd.f32 %v2645_v10, %v2561_v56  ;;  %v2534_v30 = vadd.f32 %v2485_v32, %v2375_v62 }
 0x1f1   : > { %v4044_v46 = vpop.f32.mrf.mxu0  ;;  %v4031_v33 = vpop.f32.mrf.mxu1  ;;  %v2562_v57 = vld [vmem:[#allocation2 + $0x8] sm:$0xff]  ;;  %v2382_v15 = vld [vmem:[#allocation2 + $0x60] sm:$0xff] }
 0x1f2   : > { %2724 = vst.msk [vmem:[#allocation2] sm:$0xff] %vm1636_vm7, %v2708_v20  ;;  %2550 = vst.msk [vmem:[#allocation2 + $0x28] sm:$0xff] %vm1636_vm7, %v2534_v30  ;;  %v2711_v50 = vadd.f32 %v4044_v46, %v2564_v37  ;;  %v2539_v22 = vadd.f32 %v4031_v33, %v2380_v39 }
 0x1f3   : > { %v2648_v3 = vpop.f32.mrf.mxu0  ;;  %v2498_v29 = vpop.f32.mrf.mxu1  ;;  %v2567_v8 = vld [vmem:[#allocation2 + $0x30] sm:$0xff]  ;;  %v2385_v60 = vld [vmem:[#allocation2 + $0x78] sm:$0xff] }
 0x1f4   : > { %2727 = vst.msk [vmem:[#allocation2 + $0x18] sm:$0xff] %vm1636_vm7, %v2711_v50  ;;  %2555 = vst.msk [vmem:[#allocation2 + $0x50] sm:$0xff] %vm1636_vm7, %v2539_v22  ;;  %v2709_v0 = vadd.f32 %v2648_v3, %v2562_v57  ;;  %v2537_v9 = vadd.f32 %v2498_v29, %v2378_v14 }
 0x1f5   : > { %v4047_v6 = vpop.f32.mrf.mxu0  ;;  %v4032_v27 = vpop.f32.mrf.mxu1  ;;  %v2565_v19 = vld [vmem:[#allocation2 + $0x20] sm:$0xff]  ;;  %v2383_v17 = vld [vmem:[#allocation2 + $0x68] sm:$0xff] }
 0x1f6   : > { %2725 = vst.msk [vmem:[#allocation2 + $0x8] sm:$0xff] %vm1636_vm7, %v2709_v0  ;;  %2553 = vst.msk [vmem:[#allocation2 + $0x40] sm:$0xff] %vm1636_vm7, %v2537_v9  ;;  %v2714_v45 = vadd.f32 %v4047_v6, %v2567_v8  ;;  %v2540_v1 = vadd.f32 %v4032_v27, %v2381_v38 }
 0x1f7   : > { %v2661_v43 = vpop.f32.mrf.mxu0  ;;  %v2501_v18 = vpop.f32.mrf.mxu1  ;;  %v2568_v54 = vld [vmem:[#allocation2 + $0x38] sm:$0xff]  ;;  %v2742_v12 = vld [vmem:[#allocation2 + $0x10] sm:$0xff] }
 0x1f8   : > { %2730 = vst.msk [vmem:[#allocation2 + $0x30] sm:$0xff] %vm1636_vm7, %v2714_v45  ;;  %2556 = vst.msk [vmem:[#allocation2 + $0x58] sm:$0xff] %vm1636_vm7, %v2540_v1  ;;  %v2712_v44 = vadd.f32 %v2661_v43, %v2565_v19  ;;  %v2538_v35 = vadd.f32 %v2501_v18, %v2379_v25 }
 0x1f9   : > { %v4048_v7 = vpop.f32.mrf.mxu0  ;;  %v4035_v51 = vpop.f32.mrf.mxu1  ;;  %v2566_v47 = vld [vmem:[#allocation2 + $0x28] sm:$0xff]  ;;  %v2740_v56 = vld [vmem:[#allocation2] sm:$0xff] }
 0x1fa   : > { %2728 = vst.msk [vmem:[#allocation2 + $0x20] sm:$0xff] %vm1636_vm7, %v2712_v44  ;;  %2554 = vst.msk [vmem:[#allocation2 + $0x48] sm:$0xff] %vm1636_vm7, %v2538_v35  ;;  %v2715_v48 = vadd.f32 %v4048_v7, %v2568_v54  ;;  %v2543_v23 = vadd.f32 %v4035_v51, %v2384_v16 }
 0x1fb   : > { %v2664_v13 = vpop.f32.mrf.mxu0  ;;  %v2514_v36 = vpop.f32.mrf.mxu1  ;;  %v2571_v53 = vld [vmem:[#allocation2 + $0x50] sm:$0xff]  ;;  %v2743_v37 = vld [vmem:[#allocation2 + $0x18] sm:$0xff] }
 0x1fc   : > { %2731 = vst.msk [vmem:[#allocation2 + $0x38] sm:$0xff] %vm1636_vm7, %v2715_v48  ;;  %2559 = vst.msk [vmem:[#allocation2 + $0x70] sm:$0xff] %vm1636_vm7, %v2543_v23  ;;  %v2713_v2 = vadd.f32 %v2664_v13, %v2566_v47  ;;  %v2541_v4 = vadd.f32 %v2514_v36, %v2382_v15 }
 0x1fd   : > { %v4051_v21 = vpop.f32.mrf.mxu0  ;;  %v4036_v61 = vpop.f32.mrf.mxu1  ;;  %v2569_v41 = vld [vmem:[#allocation2 + $0x40] sm:$0xff]  ;;  %v2741_v57 = vld [vmem:[#allocation2 + $0x8] sm:$0xff] }
 0x1fe   : > { %2729 = vst.msk [vmem:[#allocation2 + $0x28] sm:$0xff] %vm1636_vm7, %v2713_v2  ;;  %2557 = vst.msk [vmem:[#allocation2 + $0x60] sm:$0xff] %vm1636_vm7, %v2541_v4  ;;  %v2718_v59 = vadd.f32 %v4051_v21, %v2571_v53  ;;  %v2544_v52 = vadd.f32 %v4036_v61, %v2385_v60 }
 0x1ff   : > { %v2677_v24 = vpop.f32.mrf.mxu0  ;;  %v2517_v31 = vpop.f32.mrf.mxu1  ;;  %v2572_v42 = vld [vmem:[#allocation2 + $0x58] sm:$0xff]  ;;  %v2746_v8 = vld [vmem:[#allocation2 + $0x30] sm:$0xff] }
 0x200   : > { %2734 = vst.msk [vmem:[#allocation2 + $0x50] sm:$0xff] %vm1636_vm7, %v2718_v59  ;;  %2560 = vst.msk [vmem:[#allocation2 + $0x78] sm:$0xff] %vm1636_vm7, %v2544_v52  ;;  %v2716_v40 = vadd.f32 %v2677_v24, %v2569_v41  ;;  %v2542_v49 = vadd.f32 %v2517_v31, %v2383_v17 }
 0x201   : > { %v4052_v55 = vpop.f32.mrf.mxu0  ;;  %v4063_v26 = vpop.f32.mrf.mxu1  ;;  %v2570_v28 = vld [vmem:[#allocation2 + $0x48] sm:$0xff]  ;;  %v2744_v19 = vld [vmem:[#allocation2 + $0x20] sm:$0xff] }
 0x202   : > { %2732 = vst.msk [vmem:[#allocation2 + $0x40] sm:$0xff] %vm1636_vm7, %v2716_v40  ;;  %2558 = vst.msk [vmem:[#allocation2 + $0x68] sm:$0xff] %vm1636_vm7, %v2542_v49  ;;  %v2719_v63 = vadd.f32 %v4052_v55, %v2572_v42  ;;  %v2875_v11 = vadd.f32 %v4063_v26, %v2742_v12 }
 0x203   : > { %v2680_v58 = vpop.f32.mrf.mxu0  ;;  %v2810_v5 = vpop.f32.mrf.mxu1  ;;  %v2575_v34 = vld [vmem:[#allocation2 + $0x70] sm:$0xff]  ;;  %v2747_v54 = vld [vmem:[#allocation2 + $0x38] sm:$0xff] }
 0x204   : > { %2735 = vst.msk [vmem:[#allocation2 + $0x58] sm:$0xff] %vm1636_vm7, %v2719_v63  ;;  %2891 = vst.msk [vmem:[#allocation2 + $0x10] sm:$0xff] %vm1636_vm7, %v2875_v11  ;;  %v2717_v10 = vadd.f32 %v2680_v58, %v2570_v28  ;;  %v2873_v62 = vadd.f32 %v2810_v5, %v2740_v56 }
 0x205   : > { %v4055_v32 = vpop.f32.mrf.mxu0  ;;  %v4064_v20 = vpop.f32.mrf.mxu1  ;;  %v2573_v30 = vld [vmem:[#allocation2 + $0x60] sm:$0xff]  ;;  %v2745_v47 = vld [vmem:[#allocation2 + $0x28] sm:$0xff] }
 0x206   : > { %2733 = vst.msk [vmem:[#allocation2 + $0x48] sm:$0xff] %vm1636_vm7, %v2717_v10  ;;  %2889 = vst.msk [vmem:[#allocation2] sm:$0xff] %vm1636_vm7, %v2873_v62  ;;  %v2722_v46 = vadd.f32 %v4055_v32, %v2575_v34  ;;  %v2876_v39 = vadd.f32 %v4064_v20, %v2743_v37 }
 0x207   : > { %v2693_v33 = vpop.f32.mrf.mxu0  ;;  %v2813_v50 = vpop.f32.mrf.mxu1  ;;  %v2576_v22 = vld [vmem:[#allocation2 + $0x78] sm:$0xff]  ;;  %v2750_v53 = vld [vmem:[#allocation2 + $0x50] sm:$0xff] }
 0x208   : > { %2738 = vst.msk [vmem:[#allocation2 + $0x70] sm:$0xff] %vm1636_vm7, %v2722_v46  ;;  %2892 = vst.msk [vmem:[#allocation2 + $0x18] sm:$0xff] %vm1636_vm7, %v2876_v39  ;;  %v2720_v3 = vadd.f32 %v2693_v33, %v2573_v30  ;;  %v2874_v14 = vadd.f32 %v2813_v50, %v2741_v57 }
 0x209   : > { %v4056_v29 = vpop.f32.mrf.mxu0  ;;  %v4067_v0 = vpop.f32.mrf.mxu1  ;;  %v2574_v9 = vld [vmem:[#allocation2 + $0x68] sm:$0xff]  ;;  %v2748_v41 = vld [vmem:[#allocation2 + $0x40] sm:$0xff] }
 0x20a   : > { %2736 = vst.msk [vmem:[#allocation2 + $0x60] sm:$0xff] %vm1636_vm7, %v2720_v3  ;;  %2890 = vst.msk [vmem:[#allocation2 + $0x8] sm:$0xff] %vm1636_vm7, %v2874_v14  ;;  %v2723_v6 = vadd.f32 %v4056_v29, %v2576_v22  ;;  %v2879_v38 = vadd.f32 %v4067_v0, %v2746_v8 }
 0x20b   : > { %v2696_v27 = vpop.f32.mrf.mxu0  ;;  %v2826_v45 = vpop.f32.mrf.mxu1  ;;  %v2907_v1 = vld [vmem:[#allocation2 + $0x10] sm:$0xff]  ;;  %v2751_v42 = vld [vmem:[#allocation2 + $0x58] sm:$0xff] }
 0x20c   : > { %2739 = vst.msk [vmem:[#allocation2 + $0x78] sm:$0xff] %vm1636_vm7, %v2723_v6  ;;  %2895 = vst.msk [vmem:[#allocation2 + $0x30] sm:$0xff] %vm1636_vm7, %v2879_v38  ;;  %v2721_v43 = vadd.f32 %v2696_v27, %v2574_v9  ;;  %v2877_v25 = vadd.f32 %v2826_v45, %v2744_v19 }
 0x20d   : > { %v4083_v18 = vpop.f32.mrf.mxu0  ;;  %v4068_v44 = vpop.f32.mrf.mxu1  ;;  %v2905_v35 = vld [vmem:[#allocation2] sm:$0xff]  ;;  %v2749_v28 = vld [vmem:[#allocation2 + $0x48] sm:$0xff] }
 0x20e   : > { %2737 = vst.msk [vmem:[#allocation2 + $0x68] sm:$0xff] %vm1636_vm7, %v2721_v43  ;;  %2893 = vst.msk [vmem:[#allocation2 + $0x20] sm:$0xff] %vm1636_vm7, %v2877_v25  ;;  %v3066_v7 = vadd.f32 %v4083_v18, %v2907_v1  ;;  %v2880_v16 = vadd.f32 %v4068_v44, %v2747_v54 }
 0x20f   : > { %v3001_v51 = vpop.f32.mrf.mxu0  ;;  %v2829_v48 = vpop.f32.mrf.mxu1  ;;  %v2908_v23 = vld [vmem:[#allocation2 + $0x18] sm:$0xff]  ;;  %v2754_v34 = vld [vmem:[#allocation2 + $0x70] sm:$0xff] }
 0x210   : > { %3082 = vst.msk [vmem:[#allocation2 + $0x10] sm:$0xff] %vm1636_vm7, %v3066_v7  ;;  %2896 = vst.msk [vmem:[#allocation2 + $0x38] sm:$0xff] %vm1636_vm7, %v2880_v16  ;;  %v3064_v13 = vadd.f32 %v3001_v51, %v2905_v35  ;;  %v2878_v15 = vadd.f32 %v2829_v48, %v2745_v47 }
 0x211   : > { %v4084_v36 = vpop.f32.mrf.mxu0  ;;  %v4071_v2 = vpop.f32.mrf.mxu1  ;;  %v2906_v4 = vld [vmem:[#allocation2 + $0x8] sm:$0xff]  ;;  %v2752_v30 = vld [vmem:[#allocation2 + $0x60] sm:$0xff] }
 0x212   : > { %3080 = vst.msk [vmem:[#allocation2] sm:$0xff] %vm1636_vm7, %v3064_v13  ;;  %2894 = vst.msk [vmem:[#allocation2 + $0x28] sm:$0xff] %vm1636_vm7, %v2878_v15  ;;  %v3067_v21 = vadd.f32 %v4084_v36, %v2908_v23  ;;  %v2883_v60 = vadd.f32 %v4071_v2, %v2750_v53 }
 0x213   : > { %v3004_v61 = vpop.f32.mrf.mxu0  ;;  %v2842_v59 = vpop.f32.mrf.mxu1  ;;  %v2911_v52 = vld [vmem:[#allocation2 + $0x30] sm:$0xff]  ;;  %v2755_v22 = vld [vmem:[#allocation2 + $0x78] sm:$0xff] }
 0x214   : > { %3083 = vst.msk [vmem:[#allocation2 + $0x18] sm:$0xff] %vm1636_vm7, %v3067_v21  ;;  %2899 = vst.msk [vmem:[#allocation2 + $0x50] sm:$0xff] %vm1636_vm7, %v2883_v60  ;;  %v3065_v24 = vadd.f32 %v3004_v61, %v2906_v4  ;;  %v2881_v17 = vadd.f32 %v2842_v59, %v2748_v41 }
 0x215   : > { %v4087_v31 = vpop.f32.mrf.mxu0  ;;  %v4072_v40 = vpop.f32.mrf.mxu1  ;;  %v2909_v49 = vld [vmem:[#allocation2 + $0x20] sm:$0xff]  ;;  %v2753_v9 = vld [vmem:[#allocation2 + $0x68] sm:$0xff] }
 0x216   : > { %3081 = vst.msk [vmem:[#allocation2 + $0x8] sm:$0xff] %vm1636_vm7, %v3065_v24  ;;  %2897 = vst.msk [vmem:[#allocation2 + $0x40] sm:$0xff] %vm1636_vm7, %v2881_v17  ;;  %v3070_v55 = vadd.f32 %v4087_v31, %v2911_v52  ;;  %v2884_v12 = vadd.f32 %v4072_v40, %v2751_v42 }
 0x217   : > { %v3017_v26 = vpop.f32.mrf.mxu0  ;;  %v2845_v63 = vpop.f32.mrf.mxu1  ;;  %v2912_v11 = vld [vmem:[#allocation2 + $0x38] sm:$0xff]  ;;  %v3098_v1 = vld [vmem:[#allocation2 + $0x10] sm:$0xff] }
 0x218   : > { %3086 = vst.msk [vmem:[#allocation2 + $0x30] sm:$0xff] %vm1636_vm7, %v3070_v55  ;;  %2900 = vst.msk [vmem:[#allocation2 + $0x58] sm:$0xff] %vm1636_vm7, %v2884_v12  ;;  %v3068_v58 = vadd.f32 %v3017_v26, %v2909_v49  ;;  %v2882_v56 = vadd.f32 %v2845_v63, %v2749_v28 }
 0x219   : > { %v4088_v5 = vpop.f32.mrf.mxu0  ;;  %v4075_v10 = vpop.f32.mrf.mxu1  ;;  %v2910_v62 = vld [vmem:[#allocation2 + $0x28] sm:$0xff]  ;;  %v3096_v35 = vld [vmem:[#allocation2] sm:$0xff] }
 0x21a   : > { %3084 = vst.msk [vmem:[#allocation2 + $0x20] sm:$0xff] %vm1636_vm7, %v3068_v58  ;;  %2898 = vst.msk [vmem:[#allocation2 + $0x48] sm:$0xff] %vm1636_vm7, %v2882_v56  ;;  %v3071_v32 = vadd.f32 %v4088_v5, %v2912_v11  ;;  %v2887_v37 = vadd.f32 %v4075_v10, %v2754_v34 }
 0x21b   : > { %v3020_v20 = vpop.f32.mrf.mxu0  ;;  %v2858_v46 = vpop.f32.mrf.mxu1  ;;  %v2915_v39 = vld [vmem:[#allocation2 + $0x50] sm:$0xff]  ;;  %v3099_v23 = vld [vmem:[#allocation2 + $0x18] sm:$0xff] }
 0x21c   : > { %3087 = vst.msk [vmem:[#allocation2 + $0x38] sm:$0xff] %vm1636_vm7, %v3071_v32  ;;  %2903 = vst.msk [vmem:[#allocation2 + $0x70] sm:$0xff] %vm1636_vm7, %v2887_v37  ;;  %v3069_v33 = vadd.f32 %v3020_v20, %v2910_v62  ;;  %v2885_v57 = vadd.f32 %v2858_v46, %v2752_v30 }
 0x21d   : > { %v4091_v50 = vpop.f32.mrf.mxu0  ;;  %v4076_v3 = vpop.f32.mrf.mxu1  ;;  %v2913_v14 = vld [vmem:[#allocation2 + $0x40] sm:$0xff]  ;;  %v3097_v4 = vld [vmem:[#allocation2 + $0x8] sm:$0xff] }
 0x21e   : > { %3085 = vst.msk [vmem:[#allocation2 + $0x28] sm:$0xff] %vm1636_vm7, %v3069_v33  ;;  %2901 = vst.msk [vmem:[#allocation2 + $0x60] sm:$0xff] %vm1636_vm7, %v2885_v57  ;;  %v3074_v29 = vadd.f32 %v4091_v50, %v2915_v39  ;;  %v2888_v8 = vadd.f32 %v4076_v3, %v2755_v22 }
 0x21f   : > { %v3033_v0 = vpop.f32.mrf.mxu0  ;;  %v2861_v6 = vpop.f32.mrf.mxu1  ;;  %v2916_v38 = vld [vmem:[#allocation2 + $0x58] sm:$0xff]  ;;  %v3102_v52 = vld [vmem:[#allocation2 + $0x30] sm:$0xff] }
 0x220   : > { %3090 = vst.msk [vmem:[#allocation2 + $0x50] sm:$0xff] %vm1636_vm7, %v3074_v29  ;;  %2904 = vst.msk [vmem:[#allocation2 + $0x78] sm:$0xff] %vm1636_vm7, %v2888_v8  ;;  %v3072_v27 = vadd.f32 %v3033_v0, %v2913_v14  ;;  %v2886_v19 = vadd.f32 %v2861_v6, %v2753_v9  ;;  %v5690_v6 = vld [vmem:[%s5785_s5] ss:$0 sm:$0xff] }
 0x221   : > { %v4092_v45 = vpop.f32.mrf.mxu0  ;;  %v4103_v43 = vpop.f32.mrf.mxu1  ;;  %v2914_v25 = vld [vmem:[#allocation2 + $0x48] sm:$0xff]  ;;  %v3100_v49 = vld [vmem:[#allocation2 + $0x20] sm:$0xff] }
 0x222   : > { %3088 = vst.msk [vmem:[#allocation2 + $0x40] sm:$0xff] %vm1636_vm7, %v3072_v27  ;;  %2902 = vst.msk [vmem:[#allocation2 + $0x68] sm:$0xff] %vm1636_vm7, %v2886_v19  ;;  %v3075_v18 = vadd.f32 %v4092_v45, %v2916_v38  ;;  %v3245_v54 = vadd.f32 %v4103_v43, %v3098_v1 }
 0x223   : > { %v3036_v44 = vpop.f32.mrf.mxu0  ;;  %v3180_v7 = vpop.f32.mrf.mxu1  ;;  %v2919_v16 = vld [vmem:[#allocation2 + $0x70] sm:$0xff]  ;;  %v3103_v11 = vld [vmem:[#allocation2 + $0x38] sm:$0xff] }
 0x224   : > { %3091 = vst.msk [vmem:[#allocation2 + $0x58] sm:$0xff] %vm1636_vm7, %v3075_v18  ;;  %3261 = vst.msk [vmem:[#allocation2 + $0x10] sm:$0xff] %vm1636_vm7, %v3245_v54  ;;  %v3073_v51 = vadd.f32 %v3036_v44, %v2914_v25  ;;  %v3243_v47 = vadd.f32 %v3180_v7, %v3096_v35 }
 0x225   : > { %v4095_v48 = vpop.f32.mrf.mxu0  ;;  %v4104_v13 = vpop.f32.mrf.mxu1  ;;  %v2917_v15 = vld [vmem:[#allocation2 + $0x60] sm:$0xff]  ;;  %v3101_v62 = vld [vmem:[#allocation2 + $0x28] sm:$0xff] }
 0x226   : > { %3089 = vst.msk [vmem:[#allocation2 + $0x48] sm:$0xff] %vm1636_vm7, %v3073_v51  ;;  %3259 = vst.msk [vmem:[#allocation2] sm:$0xff] %vm1636_vm7, %v3243_v47  ;;  %v3078_v36 = vadd.f32 %v4095_v48, %v2919_v16  ;;  %v3246_v53 = vadd.f32 %v4104_v13, %v3099_v23 }
 0x227   : > { %v3049_v2 = vpop.f32.mrf.mxu0  ;;  %v3183_v21 = vpop.f32.mrf.mxu1  ;;  %v2920_v60 = vld [vmem:[#allocation2 + $0x78] sm:$0xff]  ;;  %v3106_v39 = vld [vmem:[#allocation2 + $0x50] sm:$0xff] }
 0x228   : > { %3094 = vst.msk [vmem:[#allocation2 + $0x70] sm:$0xff] %vm1636_vm7, %v3078_v36  ;;  %3262 = vst.msk [vmem:[#allocation2 + $0x18] sm:$0xff] %vm1636_vm7, %v3246_v53  ;;  %v3076_v61 = vadd.f32 %v3049_v2, %v2917_v15  ;;  %v3244_v41 = vadd.f32 %v3183_v21, %v3097_v4 }
 0x229   : > { %v4096_v59 = vpop.f32.mrf.mxu0  ;;  %v4107_v24 = vpop.f32.mrf.mxu1  ;;  %v2918_v17 = vld [vmem:[#allocation2 + $0x68] sm:$0xff]  ;;  %v3104_v14 = vld [vmem:[#allocation2 + $0x40] sm:$0xff] }
 0x22a   : > { %3092 = vst.msk [vmem:[#allocation2 + $0x60] sm:$0xff] %vm1636_vm7, %v3076_v61  ;;  %3260 = vst.msk [vmem:[#allocation2 + $0x8] sm:$0xff] %vm1636_vm7, %v3244_v41  ;;  %v3079_v31 = vadd.f32 %v4096_v59, %v2920_v60  ;;  %v3249_v42 = vadd.f32 %v4107_v24, %v3102_v52 }
 0x22b   : > { %v3052_v40 = vpop.f32.mrf.mxu0  ;;  %v3196_v55 = vpop.f32.mrf.mxu1  ;;  %v3277_v12 = vld [vmem:[#allocation2 + $0x10] sm:$0xff]  ;;  %v3107_v27 = vld [vmem:[#allocation2 + $0x58] sm:$0xff] }
 0x22c   : > { %3095 = vst.msk [vmem:[#allocation2 + $0x78] sm:$0xff] %vm1636_vm7, %v3079_v31  ;;  %3265 = vst.msk [vmem:[#allocation2 + $0x30] sm:$0xff] %vm1636_vm7, %v3249_v42  ;;  %v3077_v26 = vadd.f32 %v3052_v40, %v2918_v17  ;;  %v3247_v28 = vadd.f32 %v3196_v55, %v3100_v49 }
 0x22d   : > { %v4123_v63 = vpop.f32.mrf.mxu0  ;;  %v4108_v58 = vpop.f32.mrf.mxu1  ;;  %v3275_v56 = vld [vmem:[#allocation2] sm:$0xff]  ;;  %v3105_v54 = vld [vmem:[#allocation2 + $0x48] sm:$0xff] }
 0x22e   : > { %3093 = vst.msk [vmem:[#allocation2 + $0x68] sm:$0xff] %vm1636_vm7, %v3077_v26  ;;  %3263 = vst.msk [vmem:[#allocation2 + $0x20] sm:$0xff] %vm1636_vm7, %v3247_v28  ;;  %v3410_v5 = vadd.f32 %v4123_v63, %v3277_v12  ;;  %v3250_v34 = vadd.f32 %v4108_v58, %v3103_v11 }
 0x22f   : > { %v3345_v10 = vpop.f32.mrf.mxu0  ;;  %v3199_v32 = vpop.f32.mrf.mxu1  ;;  %v3278_v37 = vld [vmem:[#allocation2 + $0x18] sm:$0xff]  ;;  %v3110_v23 = vld [vmem:[#allocation2 + $0x70] sm:$0xff] }
 0x230   : > { %3426 = vst.msk [vmem:[#allocation2 + $0x10] sm:$0xff] %vm1636_vm7, %v3410_v5  ;;  %3266 = vst.msk [vmem:[#allocation2 + $0x38] sm:$0xff] %vm1636_vm7, %v3250_v34  ;;  %v3408_v20 = vadd.f32 %v3345_v10, %v3275_v56  ;;  %v3248_v30 = vadd.f32 %v3199_v32, %v3101_v62 }
 0x231   : > { %v4124_v46 = vpop.f32.mrf.mxu0  ;;  %v4111_v33 = vpop.f32.mrf.mxu1  ;;  %v3276_v57 = vld [vmem:[#allocation2 + $0x8] sm:$0xff]  ;;  %v3108_v60 = vld [vmem:[#allocation2 + $0x60] sm:$0xff] }
 0x232   : > { %3424 = vst.msk [vmem:[#allocation2] sm:$0xff] %vm1636_vm7, %v3408_v20  ;;  %3264 = vst.msk [vmem:[#allocation2 + $0x28] sm:$0xff] %vm1636_vm7, %v3248_v30  ;;  %v3411_v50 = vadd.f32 %v4124_v46, %v3278_v37  ;;  %v3253_v22 = vadd.f32 %v4111_v33, %v3106_v39 }
 0x233   : > { %v3348_v3 = vpop.f32.mrf.mxu0  ;;  %v3212_v29 = vpop.f32.mrf.mxu1  ;;  %v3281_v8 = vld [vmem:[#allocation2 + $0x30] sm:$0xff]  ;;  %v3111_v42 = vld [vmem:[#allocation2 + $0x78] sm:$0xff] }
 0x234   : > { %3427 = vst.msk [vmem:[#allocation2 + $0x18] sm:$0xff] %vm1636_vm7, %v3411_v50  ;;  %3269 = vst.msk [vmem:[#allocation2 + $0x50] sm:$0xff] %vm1636_vm7, %v3253_v22  ;;  %v3409_v0 = vadd.f32 %v3348_v3, %v3276_v57  ;;  %v3251_v9 = vadd.f32 %v3212_v29, %v3104_v14 }
 0x235   : > { %v4127_v38 = vpop.f32.mrf.mxu0  ;;  %v4112_v19 = vpop.f32.mrf.mxu1  ;;  %v3279_v45 = vld [vmem:[#allocation2 + $0x20] sm:$0xff]  ;;  %v3109_v11 = vld [vmem:[#allocation2 + $0x68] sm:$0xff] }
 0x236   : > { %3425 = vst.msk [vmem:[#allocation2 + $0x8] sm:$0xff] %vm1636_vm7, %v3409_v0  ;;  %3267 = vst.msk [vmem:[#allocation2 + $0x40] sm:$0xff] %vm1636_vm7, %v3251_v9  ;;  %v3414_v1 = vadd.f32 %v4127_v38, %v3281_v8  ;;  %v3254_v43 = vadd.f32 %v4112_v19, %v3107_v27 }
 0x237   : > { %v3442_v25 = vld [vmem:[#allocation2 + $0x10] sm:$0xff]  ;;  %v3361_v18 = vpop.f32.mrf.mxu0  ;;  %v3215_v44 = vpop.f32.mrf.mxu1  ;;  %v3282_v35 = vld [vmem:[#allocation2 + $0x38] sm:$0xff] }
 0x238   : > { %v3465_v7 = vadd.f32 %v5690_v6, %v3442_v25  ;;  %3430 = vst.msk [vmem:[#allocation2 + $0x30] sm:$0xff] %vm1636_vm7, %v3414_v1  ;;  %3270 = vst.msk [vmem:[#allocation2 + $0x58] sm:$0xff] %vm1636_vm7, %v3254_v43  ;;  %v3412_v16 = vadd.f32 %v3361_v18, %v3279_v45  ;;  %v3252_v51 = vadd.f32 %v3215_v44, %v3105_v54 }
 0x239   : > { %v3440_v47 = vld [vmem:[#allocation2] sm:$0xff]  ;;  %v4128_v48 = vpop.f32.mrf.mxu0  ;;  %v4115_v13 = vpop.f32.mrf.mxu1  ;;  %v3280_v15 = vld [vmem:[#allocation2 + $0x28] sm:$0xff] }
 0x23a   : > { %3481 = vst.msk [vmem:[%s5697_s9 + $0x10] sm:$0xff] %vm1636_vm7, %v3465_v7  ;;  %v3463_v36 = vadd.f32 %v5690_v6, %v3440_v47  ;;  %3428 = vst.msk [vmem:[#allocation2 + $0x20] sm:$0xff] %vm1636_vm7, %v3412_v16  ;;  %v3415_v53 = vadd.f32 %v4128_v48, %v3282_v35  ;;  %v3257_v2 = vadd.f32 %v4115_v13, %v3110_v23 }
 0x23b   : > { %3268 = vst.msk [vmem:[#allocation2 + $0x48] sm:$0xff] %vm1636_vm7, %v3252_v51  ;;  %v3443_v4 = vld [vmem:[#allocation2 + $0x18] sm:$0xff]  ;;  %v3364_v21 = vpop.f32.mrf.mxu0  ;;  %v3228_v61 = vpop.f32.mrf.mxu1  ;;  %v3285_v41 = vld [vmem:[#allocation2 + $0x50] sm:$0xff] }
 0x23c   : > { %3479 = vst.msk [vmem:[%s5697_s9] sm:$0xff] %vm1636_vm7, %v3463_v36  ;;  %v3466_v59 = vadd.f32 %v5690_v6, %v3443_v4  ;;  %3431 = vst.msk [vmem:[#allocation2 + $0x38] sm:$0xff] %vm1636_vm7, %v3415_v53  ;;  %v3413_v52 = vadd.f32 %v3364_v21, %v3280_v15  ;;  %v3255_v24 = vadd.f32 %v3228_v61, %v3108_v60 }
 0x23d   : > { %3273 = vst.msk [vmem:[#allocation2 + $0x70] sm:$0xff] %vm1636_vm7, %v3257_v2  ;;  %v3441_v17 = vld [vmem:[#allocation2 + $0x8] sm:$0xff]  ;;  %v4131_v31 = vpop.f32.mrf.mxu0  ;;  %v4116_v40 = vpop.f32.mrf.mxu1  ;;  %v3283_v49 = vld [vmem:[#allocation2 + $0x40] sm:$0xff] }
 0x23e   : > { %3482 = vst.msk [vmem:[%s5697_s9 + $0x18] sm:$0xff] %vm1636_vm7, %v3466_v59  ;;  %v3464_v55 = vadd.f32 %v5690_v6, %v3441_v17  ;;  %3429 = vst.msk [vmem:[#allocation2 + $0x28] sm:$0xff] %vm1636_vm7, %v3413_v52  ;;  %v3418_v12 = vadd.f32 %v4131_v31, %v3285_v41  ;;  %v3258_v26 = vadd.f32 %v4116_v40, %v3111_v42 }
 0x23f   : > { %3271 = vst.msk [vmem:[#allocation2 + $0x60] sm:$0xff] %vm1636_vm7, %v3255_v24  ;;  %v3446_v28 = vld [vmem:[#allocation2 + $0x30] sm:$0xff]  ;;  %v3377_v63 = vpop.f32.mrf.mxu0  ;;  %v3231_v58 = vpop.f32.mrf.mxu1  ;;  %v3286_v56 = vld [vmem:[#allocation2 + $0x58] sm:$0xff] }
 0x240   : > { %3480 = vst.msk [vmem:[%s5697_s9 + $0x8] sm:$0xff] %vm1636_vm7, %v3464_v55  ;;  %v3469_v5 = vadd.f32 %v5690_v6, %v3446_v28  ;;  %3434 = vst.msk [vmem:[#allocation2 + $0x50] sm:$0xff] %vm1636_vm7, %v3418_v12  ;;  %v3416_v34 = vadd.f32 %v3377_v63, %v3283_v49  ;;  %v3256_v10 = vadd.f32 %v3231_v58, %v3109_v11 }
 0x241   : > { %3274 = vst.msk [vmem:[#allocation2 + $0x78] sm:$0xff] %vm1636_vm7, %v3258_v26  ;;  %v3444_v62 = vld [vmem:[#allocation2 + $0x20] sm:$0xff]  ;;  %v4132_v32 = vpop.f32.mrf.mxu0 }
 0x242   : > { %v3284_v37 = vld [vmem:[#allocation2 + $0x48] sm:$0xff]  ;;  %3485 = vst.msk [vmem:[%s5697_s9 + $0x30] sm:$0xff] %vm1636_vm7, %v3469_v5  ;;  %v3467_v20 = vadd.f32 %v5690_v6, %v3444_v62  ;;  %3432 = vst.msk [vmem:[#allocation2 + $0x40] sm:$0xff] %vm1636_vm7, %v3416_v34  ;;  %v3419_v30 = vadd.f32 %v4132_v32, %v3286_v56 }
 0x243   : > { %3272 = vst.msk [vmem:[#allocation2 + $0x68] sm:$0xff] %vm1636_vm7, %v3256_v10  ;;  %v3447_v46 = vld [vmem:[#allocation2 + $0x38] sm:$0xff]  ;;  %v3380_v39 = vpop.f32.mrf.mxu0 }
 0x244   : > { %v3289_v33 = vld [vmem:[#allocation2 + $0x70] sm:$0xff]  ;;  %3483 = vst.msk [vmem:[%s5697_s9 + $0x20] sm:$0xff] %vm1636_vm7, %v3467_v20  ;;  %v3470_v57 = vadd.f32 %v5690_v6, %v3447_v46  ;;  %3435 = vst.msk [vmem:[#allocation2 + $0x58] sm:$0xff] %vm1636_vm7, %v3419_v30  ;;  %v3417_v50 = vadd.f32 %v3380_v39, %v3284_v37 }
 0x245   : > { %v3445_v22 = vld [vmem:[#allocation2 + $0x28] sm:$0xff]  ;;  %v4135_v3 = vpop.f32.mrf.mxu0 }
 0x246   : > { %v3287_v14 = vld [vmem:[#allocation2 + $0x60] sm:$0xff]  ;;  %3486 = vst.msk [vmem:[%s5697_s9 + $0x38] sm:$0xff] %vm1636_vm7, %v3470_v57  ;;  %v3468_v29 = vadd.f32 %v5690_v6, %v3445_v22  ;;  %3433 = vst.msk [vmem:[#allocation2 + $0x48] sm:$0xff] %vm1636_vm7, %v3417_v50  ;;  %v3422_v8 = vadd.f32 %v4135_v3, %v3289_v33 }
 0x247   : > { %v3450_v0 = vld [vmem:[#allocation2 + $0x50] sm:$0xff]  ;;  %v3393_v9 = vpop.f32.mrf.mxu0 }
 0x248   : > { %v3290_v38 = vld [vmem:[#allocation2 + $0x78] sm:$0xff]  ;;  %3484 = vst.msk [vmem:[%s5697_s9 + $0x28] sm:$0xff] %vm1636_vm7, %v3468_v29  ;;  %v3473_v27 = vadd.f32 %v5690_v6, %v3450_v0  ;;  %3438 = vst.msk [vmem:[#allocation2 + $0x70] sm:$0xff] %vm1636_vm7, %v3422_v8  ;;  %v3420_v19 = vadd.f32 %v3393_v9, %v3287_v14 }
 0x249   : > { %v3448_v45 = vld [vmem:[#allocation2 + $0x40] sm:$0xff]  ;;  %v4136_v1 = vpop.f32.mrf.mxu0 }
 0x24a   : > { %v3288_v43 = vld [vmem:[#allocation2 + $0x68] sm:$0xff]  ;;  %3489 = vst.msk [vmem:[%s5697_s9 + $0x50] sm:$0xff] %vm1636_vm7, %v3473_v27  ;;  %v3471_v25 = vadd.f32 %v5690_v6, %v3448_v45  ;;  %3436 = vst.msk [vmem:[#allocation2 + $0x60] sm:$0xff] %vm1636_vm7, %v3420_v19  ;;  %v3423_v18 = vadd.f32 %v4136_v1, %v3290_v38 }
 0x24b   : > { %v3451_v54 = vld [vmem:[#allocation2 + $0x58] sm:$0xff]  ;;  %v3396_v44 = vpop.f32.mrf.mxu0 }
 0x24c   : > { %3487 = vst.msk [vmem:[%s5697_s9 + $0x40] sm:$0xff] %vm1636_vm7, %v3471_v25  ;;  %v3474_v35 = vadd.f32 %v5690_v6, %v3451_v54  ;;  %3439 = vst.msk [vmem:[#allocation2 + $0x78] sm:$0xff] %vm1636_vm7, %v3423_v18  ;;  %v3421_v7 = vadd.f32 %v3396_v44, %v3288_v43 }
 0x24d   : > { %v3449_v16 = vld [vmem:[#allocation2 + $0x48] sm:$0xff] }
 0x24e   : > { %3490 = vst.msk [vmem:[%s5697_s9 + $0x58] sm:$0xff] %vm1636_vm7, %v3474_v35  ;;  %v3472_v51 = vadd.f32 %v5690_v6, %v3449_v16  ;;  %3437 = vst.msk [vmem:[#allocation2 + $0x68] sm:$0xff] %vm1636_vm7, %v3421_v7 }
 0x24f   : > { %v3454_v47 = vld [vmem:[#allocation2 + $0x70] sm:$0xff] }
 0x250   : > { %3488 = vst.msk [vmem:[%s5697_s9 + $0x48] sm:$0xff] %vm1636_vm7, %v3472_v51  ;;  %v3477_v48 = vadd.f32 %v5690_v6, %v3454_v47 }
 0x251   : > { %v3452_v23 = vld [vmem:[#allocation2 + $0x60] sm:$0xff] }
 0x252   : > { %3493 = vst.msk [vmem:[%s5697_s9 + $0x70] sm:$0xff] %vm1636_vm7, %v3477_v48  ;;  %v3475_v13 = vadd.f32 %v5690_v6, %v3452_v23 }
 0x253   : > { %v3455_v15 = vld [vmem:[#allocation2 + $0x78] sm:$0xff] }
 0x254   : > { %3491 = vst.msk [vmem:[%s5697_s9 + $0x60] sm:$0xff] %vm1636_vm7, %v3475_v13  ;;  %v3478_v36 = vadd.f32 %v5690_v6, %v3455_v15 }
 0x255   : > { %v3453_v53 = vld [vmem:[#allocation2 + $0x68] sm:$0xff] }
 0x256   : > { %3494 = vst.msk [vmem:[%s5697_s9 + $0x78] sm:$0xff] %vm1636_vm7, %v3478_v36  ;;  %v3476_v2 = vadd.f32 %v5690_v6, %v3453_v53 }
 0x258   : > { %3492 = vst.msk [vmem:[%s5697_s9 + $0x68] sm:$0xff] %vm1636_vm7, %v3476_v2 }
 0x259 PF: > { %s16_s25 = sadd.s32 1, %s4378_s25   ;;  %s5820_s21 = smov %s4370_s23 }
 0x25a   : > { %p13_p11 = scmp.ge.s32.totalorder %s16_s25, 6   ;;  %s5821_s22 = smov %s4374_s24 }
 0x25b   : > { %s5822_s23 = smov %s5825_s26  ;;  %s5823_s24 = smov %s5829_s27 }
 0x25c   :  { %15 = sbr.rel (!%p13_p11) target bundleno = 3 (0x3), region = 91 }

// kernel: _lambda_.7
= control target key start
LH: loop header
LB: loop body
LE: loop exit
PB: predicated region body
PF: predicated region fallthrough
CT: control target
= control target key end

     0   :  { %s4539_s24 = smov 0   ;;  %s4541_s25 = smov 0   ;;  %s5930_s0 = inlined_call_operand.vmem [shape: f32[2,4,8,8,8], index: 0, kind: input, shape index: {}, may-alias: {0,1,2}]   ;;  %s5931_s1 = inlined_call_operand.vmem [shape: f32[2,4,8,8,8], index: 1, kind: input, shape index: {}, may-alias: {0,1,2}]   ;;  %s5932_s2 = inlined_call_operand.vmem [shape: f32[2,4,8,8,8], index: 2, kind: input, shape index: {}, may-alias: {0,1,2}]   ;;  %s5933_s3 = inlined_call_operand.vmem [shape: f32[2,2,8], index: 3, kind: input, shape index: {}]   ;;  %s5934_s4 = inlined_call_operand.vmem [shape: bf16[9,24,8], index: 4, kind: input, shape index: {}]   ;;  %s5935_s5 = inlined_call_operand.vmem [shape: f32[1,8], index: 5, kind: input, shape index: {}]   ;;  %s5936_s6 = inlined_call_operand.vmem [shape: f32[2,256,8], index: 6, kind: input, shape index: {}]   ;;  %s5937_s7 = inlined_call_operand.vmem [shape: f32[2,256,8], index: 7, kind: output, shape index: {}]  }
   0x1   :  { %s4543_s26 = smov 0   ;;  %s4545_s27 = smov 0  }
   0x2   :  { %s4547_s28 = smov 0  }
   0x3 LB: > { %s26_s29 = sadd.s32 1, %s4486_s26  ;;  %s29_s30 = sadd.s32 1, %s4490_s27  ;;  %s4494_s28 = sphi %s4547_s28, %s17_s28   ;;  %s4490_s27 = sphi %s4545_s27, %s5974_s27   ;;  %s4486_s26 = sphi %s4543_s26, %s5973_s26   ;;  %s4482_s25 = sphi %s4541_s25, %s5972_s25   ;;  %s4478_s24 = sphi %s4539_s24, %s5971_s24  }
   0x4   : > { %p27_p0 = scmp.ge.s32.totalorder %s26_s29, 2  ;;  %p3765_p1 = scmp.ge.s32.totalorder %s4494_s28, 1 }
   0x5   : > { %p349_p2 = scmp.lt.s32.totalorder %s4494_s28, 5 }
   0x6   : > { %s5976_s29 = smov (%p27_p0, %s26_s29), 0  ;;  %s5978_s30 = smov (!%p27_p0, %s29_s30), %s4490_s27 }
   0x7   : > { %p350_p3 = pnand %p3765_p1, %p349_p2  ;;  %p31_p4 = scmp.ge.s32.totalorder %s5978_s30, 2 }
   0x9   : > { %s5980_s30 = smov (%p31_p4, %s5978_s30), 0  ;;  %353 = sbr.rel (%p350_p3) target bundleno = 603 (0x25b), region = 48 }
   0xe   : > { %s4572_s8 = sshll.u32 %s4478_s24, 1  ;;  %p433_p5 = scmp.lt.s32.totalorder %s4482_s25, 1  ;;  %vm1213_vm0 = vcmask 1040384   ;;  %vm1214_vm1 = vsmask.f32 256  ;;  %vm1248_vm2 = vcmask 1044480  }
   0xf   : > { %p449_p6 = scmp.lt.s32.totalorder %s4572_s8, 3  ;;  %s4595_s21 = sadd.s32 4294967295, %s4572_s8  ;;  %vm1249_vm3 = vsmask.f32 4352  ;;  %vm4815_vm4 = vmand %vm1213_vm0, %vm1214_vm1  ;;  %vm1934_vm6 = vcmask 1043456   ;;  %vm1699_vm7 = vcmask 64512  }
  0x10   : > { %s5982_s25 = smov (!%p433_p5, %s4482_s25), 1  ;;  %p431_p7 = scmp.gt.s32.totalorder %s4595_s21, 0  ;;  %vm4821_vm5 = vmand %vm1248_vm2, %vm1249_vm3  ;;  %vm1764_vm8 = vcmask 130048   ;;  %vm1909_vm9 = vcmask 195584  }
  0x11   : > { %s450_s9 = scalar_select %p449_p6, %s4572_s8, 3 }
  0x12   : > { %s4576_s10 = sshll.u32 %s5982_s25, 5  ;;  %s3787_s11 = sshll.u32 %s5982_s25, 1 }
  0x13   : > { %s3777_s12 = sshll.u32 %s450_s9, 3  ;;  %s477_s15 = scalar_lea.vmem %s5933_s3, %s3787_s11 }
  0x14   : > { %s453_s16 = sadd.s32 %s3777_s12, %s4576_s10  ;;  %v4582_v0 = vld [vmem:[%s477_s15] ss:$0 sm:$0xff]  ;;  %v4589_v1 = vld [vmem:[%s477_s15 + $0x1] ss:$0 sm:$0xff]  ;;  %p3768_p8 = scmp.lt.s32.totalorder %s4595_s21, 3 }
  0x15   : > { %s3779_s17 = sshll.u32 %s453_s16, 3  ;;  %s458_s22 = sadd.s32 2, %s4572_s8 }
  0x16   : > { %s4587_s20 = scalar_lea.vmem %s5931_s1, %s3779_s17  ;;  %p4659_p9 = scmp.lt.s32.totalorder %s458_s22, 3 }
  0x17   : > { %v510_v2 = vld [vmem:[%s4587_s20 + $0x8] sm:$0xff]  ;;  %v509_v3 = vld [vmem:[%s4587_s20] sm:$0xff]  ;;  %v512_v4 = vld [vmem:[%s4587_s20 + $0x18] sm:$0xff]  ;;  %s432_s23 = scalar_select %p431_p7, %s4595_s21, 0 }
  0x18   : > { %v546_v5 = vmul.f32 %v4582_v0, %v510_v2  ;;  %v545_v6 = vmul.f32 %v4582_v0, %v509_v3  ;;  %v548_v7 = vmul.f32 %v4582_v0, %v512_v4  ;;  %v511_v8 = vld [vmem:[%s4587_s20 + $0x10] sm:$0xff]  ;;  %v513_v10 = vld [vmem:[%s4587_s20 + $0x20] sm:$0xff]  ;;  %v514_v14 = vld [vmem:[%s4587_s20 + $0x28] sm:$0xff]  ;;  %s5986_s22 = smov (!%p4659_p9, %s458_s22), 3  ;;  %s4496_s21 = smov 16  }
  0x19   : > { %v515_v9 = vld [vmem:[%s4587_s20 + $0x30] sm:$0xff]  ;;  %v547_v11 = vmul.f32 %v4582_v0, %v511_v8  ;;  %v549_v13 = vmul.f32 %v4582_v0, %v513_v10  ;;  %v516_v15 = vld [vmem:[%s4587_s20 + $0x38] sm:$0xff]  ;;  %v550_v19 = vmul.f32 %v4582_v0, %v514_v14  ;;  %v517_v20 = vld [vmem:[%s4587_s20 + $0x40] sm:$0xff]  ;;  %s5984_s23 = smov (!%p3768_p8, %s432_s23), 3  ;;  %s5988_s22 = smov (!%p4659_p9, %s5986_s22), 3 }
  0x1a   : > { %v551_v12 = vmul.f32 %v4582_v0, %v515_v9  ;;  %v4609_v16 = vadd.f32 %v4589_v1, %v546_v5  ;;  %v4612_v17 = vadd.f32 %v4589_v1, %v545_v6  ;;  %v4615_v18 = vadd.f32 %v4589_v1, %v548_v7  ;;  %v518_v25 = vld [vmem:[%s4587_s20 + $0x48] sm:$0xff]  ;;  %v519_v26 = vld [vmem:[%s4587_s20 + $0x50] sm:$0xff]  ;;  %v520_v27 = vld [vmem:[%s4587_s20 + $0x58] sm:$0xff]  ;;  %s3773_s9 = sshll.u32 %s5984_s23, 3  ;;  %s3784_s15 = sshll.u32 %s5988_s22, 3 }
  0x1b   : > { %v4621_v21 = vadd.f32 %v4589_v1, %v547_v11  ;;  %v4627_v23 = vadd.f32 %v4589_v1, %v549_v13  ;;  %v552_v24 = vmul.f32 %v4582_v0, %v516_v15  ;;  %v4639_v31 = vadd.f32 %v4589_v1, %v550_v19  ;;  %v521_v35 = vld [vmem:[%s4587_s20 + $0x60] sm:$0xff]  ;;  %v522_v39 = vld [vmem:[%s4587_s20 + $0x68] sm:$0xff]  ;;  %v523_v46 = vld [vmem:[%s4587_s20 + $0x70] sm:$0xff]  ;;  %s439_s11 = sadd.s32 %s4576_s10, %s3773_s9  ;;  %s467_s16 = sadd.s32 %s3784_s15, %s4576_s10 }
  0x1c   : > { %v4624_v22 = vadd.f32 %v4589_v1, %v551_v12  ;;  %v3805_v28 = vmul.f32 -1.442695, %v4609_v16  ;;  %v3804_v29 = vmul.f32 -1.442695, %v4612_v17  ;;  %v3807_v30 = vmul.f32 -1.442695, %v4615_v18 }
  0x1d   : > { %v3806_v32 = vmul.f32 -1.442695, %v4621_v21  ;;  %v4644_v34 = vadd.f32 %v4589_v1, %v552_v24  ;;  %v3808_v36 = vmul.f32 -1.442695, %v4627_v23  ;;  %v553_v37 = vmul.f32 %v4582_v0, %v517_v20  ;;  %v524_v50 = vld [vmem:[%s4587_s20 + $0x78] sm:$0xff]  ;;  %s3775_s12 = sshll.u32 %s439_s11, 3 }
  0x1e   : > { %v3810_v33 = vmul.f32 -1.442695, %v4624_v22  ;;  %4328 = vpow2.f32 %v3805_v28  ;;  %v554_v38 = vmul.f32 %v4582_v0, %v518_v25  ;;  %v3809_v40 = vmul.f32 -1.442695, %v4639_v31  ;;  %s4697_s14 = scalar_lea.vmem %s5930_s0, %s3775_s12  ;;  %s3786_s17 = sshll.u32 %s467_s16, 3 }
  0x1f   : > { %4330 = vpow2.f32 %v3804_v29  ;;  %v555_v41 = vmul.f32 %v4582_v0, %v519_v26  ;;  %v556_v42 = vmul.f32 %v4582_v0, %v520_v27  ;;  %v4666_v43 = vadd.f32 %v4589_v1, %v553_v37  ;;  %v502_v55 = vld [vmem:[%s4697_s14 + $0x8] sm:$0xff]  ;;  %v504_v56 = vld [vmem:[%s4697_s14 + $0x18] sm:$0xff]  ;;  %v501_v2 = vld [vmem:[%s4697_s14] sm:$0xff]  ;;  %s4728_s20 = scalar_lea.vmem %s5932_s2, %s3786_s17  ;;  %s4497_s22 = smov 8  }
  0x20   : > { %4332 = vpow2.f32 %v3807_v30  ;;  %v4669_v44 = vadd.f32 %v4589_v1, %v554_v38  ;;  %v557_v45 = vmul.f32 %v4582_v0, %v521_v35  ;;  %v558_v49 = vmul.f32 %v4582_v0, %v522_v39  ;;  %v508_v61 = vld [vmem:[%s4697_s14 + $0x38] sm:$0xff]  ;;  %v503_v7 = vld [vmem:[%s4697_s14 + $0x10] sm:$0xff]  ;;  %v505_v8 = vld [vmem:[%s4697_s14 + $0x20] sm:$0xff]  ;;  %s3788_s12 = sshll.u32 %s4478_s24, 4 }
  0x21   : > { %4334 = vpow2.f32 %v3806_v32  ;;  %v4674_v47 = vadd.f32 %v4589_v1, %v555_v41  ;;  %v4677_v48 = vadd.f32 %v4589_v1, %v556_v42  ;;  %v559_v53 = vmul.f32 %v4582_v0, %v523_v46  ;;  %v525_v12 = vld [vmem:[%s4728_s20] sm:$0xff]  ;;  %v526_v19 = vld [vmem:[%s4728_s20 + $0x8] sm:$0xff]  ;;  %v527_v27 = vld [vmem:[%s4728_s20 + $0x10] sm:$0xff]  ;;  %p5784_p10 = scmp.lt.s32.totalorder %s3788_s12, 31 }
  0x22   : > { %4336 = vpow2.f32 %v3810_v33  ;;  %v4686_v51 = vadd.f32 %v4589_v1, %v557_v45  ;;  %v4690_v52 = vadd.f32 %v4589_v1, %v558_v49  ;;  %v560_v54 = vmul.f32 %v4582_v0, %v524_v50  ;;  %v528_v33 = vld [vmem:[%s4728_s20 + $0x18] sm:$0xff]  ;;  %v506_v37 = vld [vmem:[%s4697_s14 + $0x28] sm:$0xff] }
  0x23   : > { %4338 = vpow2.f32 %v3808_v36  ;;  %v4702_v57 = vadd.f32 %v4589_v1, %v559_v53  ;;  %v538_v59 = vmul.f32 %v4582_v0, %v502_v55  ;;  %v540_v60 = vmul.f32 %v4582_v0, %v504_v56  ;;  %v529_v53 = vld [vmem:[%s4728_s20 + $0x20] sm:$0xff]  ;;  %v507_v56 = vld [vmem:[%s4697_s14 + $0x30] sm:$0xff]  ;;  %s5990_s12 = smov (!%p5784_p10, %s3788_s12), 31 }
  0x24   : > { %4340 = vpow2.f32 %v3809_v40  ;;  %v4705_v58 = vadd.f32 %v4589_v1, %v560_v54  ;;  %v3811_v62 = vmul.f32 -1.442695, %v4644_v34  ;;  %v544_v3 = vmul.f32 %v4582_v0, %v508_v61  ;;  %v531_v61 = vld [vmem:[%s4728_s20 + $0x30] sm:$0xff]  ;;  %s484_s24 = sadd.s32 %s4576_s10, %s5990_s12 }
  0x25   : > { %v4714_v63 = vadd.f32 %v4589_v1, %v538_v59  ;;  %v4721_v6 = vadd.f32 %v4589_v1, %v540_v60  ;;  %v537_v15 = vmul.f32 %v4582_v0, %v501_v2  ;;  %v539_v25 = vmul.f32 %v4582_v0, %v503_v7  ;;  %v530_v60 = vld [vmem:[%s4728_s20 + $0x28] sm:$0xff]  ;;  %s5806_s13 = sshll.u32 %s484_s24, 3 }
  0x26   : > { %v4731_v11 = vadd.f32 %v4589_v1, %v544_v3  ;;  %4342 = vpow2.f32 %v3811_v62  ;;  %v541_v26 = vmul.f32 %v4582_v0, %v505_v8  ;;  %v561_v32 = vmul.f32 %v4582_v0, %v525_v12  ;;  %v532_v3 = vld [vmem:[%s4728_s20 + $0x38] sm:$0xff]  ;;  %s5816_s15 = scalar_lea.vmem %s5936_s6, %s5806_s13  ;;  %s5836_s20 = scalar_lea.vmem %s5937_s7, %s5806_s13 }
  0x27   : > { %v3797_v5 = vmul.f32 -1.442695, %v4714_v63  ;;  %v3799_v30 = vmul.f32 -1.442695, %v4721_v6  ;;  %v562_v38 = vmul.f32 %v4582_v0, %v526_v19  ;;  %v563_v39 = vmul.f32 %v4582_v0, %v527_v27 }
  0x28   : > { %v4746_v42 = vadd.f32 %v4589_v1, %v561_v32  ;;  %v564_v45 = vmul.f32 %v4582_v0, %v528_v33  ;;  %v4757_v54 = vadd.f32 %v4589_v1, %v537_v15  ;;  %v542_v55 = vmul.f32 %v4582_v0, %v506_v37 }
  0x29   : > { %4344 = vpow2.f32 %v3797_v5  ;;  %v4750_v49 = vadd.f32 %v4589_v1, %v562_v38  ;;  %v4753_v50 = vadd.f32 %v4589_v1, %v563_v39  ;;  %v4767_v62 = vadd.f32 %v4589_v1, %v539_v25 }
  0x2a   : > { %v4762_v59 = vadd.f32 %v4589_v1, %v564_v45  ;;  %v3812_v2 = vmul.f32 -1.442695, %v4666_v43  ;;  %v3814_v5 = vmul.f32 -1.442695, %v4674_v47  ;;  %v565_v7 = vmul.f32 %v4582_v0, %v529_v53 }
  0x2b   : > { %v4329_v4 = vpop.eup %4328  ;;  %5948 = vst [vmem:[#allocation3_spill] sm:$0xff] %v4750_v49  ;;  %5949 = vst [vmem:[#allocation4_spill] sm:$0xff] %v4753_v50  ;;  %v4775_v8 = vadd.f32 %v4589_v1, %v541_v26  ;;  %v567_v12 = vmul.f32 %v4582_v0, %v531_v61  ;;  %v568_v19 = vmul.f32 %v4582_v0, %v532_v3  ;;  %v4811_v53 = vmul.f32 -1.442695, %v4731_v11 }
  0x2c   : > { %v4331_v9 = vpop.eup %4330  ;;  %v710_v10 = vadd.f32 1.0, %v4329_v4  ;;  %v3813_v4 = vmul.f32 -1.442695, %v4669_v44  ;;  %v4785_v15 = vadd.f32 %v4589_v1, %v565_v7 }
  0x2d   : > { %v4333_v13 = vpop.eup %4332  ;;  %v709_v14 = vadd.f32 1.0, %v4331_v9  ;;  %v543_v9 = vmul.f32 %v4582_v0, %v507_v56  ;;  %v4793_v25 = vadd.f32 %v4589_v1, %v567_v12  ;;  %v4798_v27 = vadd.f32 %v4589_v1, %v568_v19 }
  0x2e   : > { %v4335_v20 = vpop.eup %4334  ;;  %4346 = vrcp.f32 %v710_v10  ;;  %v712_v24 = vadd.f32 1.0, %v4333_v13  ;;  %v566_v10 = vmul.f32 %v4582_v0, %v530_v60  ;;  %v3796_v13 = vmul.f32 -1.442695, %v4757_v54 }
  0x2f   : > { %v4337_v28 = vpop.eup %4336  ;;  %4348 = vrcp.f32 %v709_v14  ;;  %v711_v29 = vadd.f32 1.0, %v4335_v20  ;;  %v4782_v14 = vadd.f32 %v4589_v1, %v542_v55  ;;  %v3798_v20 = vmul.f32 -1.442695, %v4767_v62  ;;  %5950 = vst [vmem:[#allocation5_spill] sm:$0xff] %v4798_v27 }
  0x30   : > { %v4339_v35 = vpop.eup %4338  ;;  %4350 = vrcp.f32 %v712_v24  ;;  %v715_v36 = vadd.f32 1.0, %v4337_v28  ;;  %v4790_v24 = vadd.f32 %v4589_v1, %v566_v10  ;;  %v4802_v0 = vadd.f32 %v4589_v1, %v543_v9 }
  0x31   : > { %v4341_v40 = vpop.eup %4340  ;;  %4352 = vrcp.f32 %v711_v29  ;;  %v713_v41 = vadd.f32 1.0, %v4339_v35  ;;  %v3800_v29 = vmul.f32 -1.442695, %v4775_v8  ;;  %v3801_v33 = vmul.f32 -1.442695, %v4782_v14 }
  0x32   : > { %4354 = vrcp.f32 %v715_v36  ;;  %v714_v46 = vadd.f32 1.0, %v4341_v40 }
  0x33   : > { %4356 = vrcp.f32 %v713_v41  ;;  %v4795_v26 = vpop.eup %4342  ;;  %v3802_v41 = vmul.f32 -1.442695, %v4802_v0 }
  0x34   : > { %4358 = vrcp.f32 %v714_v46 }
  0x35   : > { %4360 = vpow2.f32 %v3799_v30 }
  0x36   : > { %4362 = vpow2.f32 %v3812_v2  ;;  %v4345_v28 = vpop.eup %4344 }
  0x37   : > { %4364 = vpow2.f32 %v3813_v4  ;;  %v702_v32 = vadd.f32 1.0, %v4345_v28 }
  0x38   : > { %4366 = vpow2.f32 %v3814_v5 }
  0x39   : > { %4368 = vpow2.f32 %v3796_v13 }
  0x3a   : > { %4370 = vpow2.f32 %v3798_v20 }
  0x3b   : > { %v4347_v30 = vpop.eup %4346  ;;  %4372 = vrcp.f32 %v702_v32 }
  0x3c   : > { %v4349_v35 = vpop.eup %4348  ;;  %v806_v36 = vmul.f32 %v4347_v30, %v4609_v16  ;;  %4374 = vpow2.f32 %v3800_v29 }
  0x3d   : > { %v4351_v37 = vpop.eup %4350  ;;  %v805_v38 = vmul.f32 %v4349_v35, %v4612_v17  ;;  %4376 = vpow2.f32 %v3801_v33 }
  0x3e   : > { %v4353_v1 = vpop.eup %4352  ;;  %v838_v39 = vpack.c.bf16 %v806_v36, %v806_v36  ;;  %v808_v40 = vmul.f32 %v4351_v37, %v4615_v18  ;;  %4378 = vpow2.f32 %v3802_v41 }
  0x3f   : > { %v4355_v45 = vpop.eup %4354  ;;  %v837_v46 = vpack.c.bf16 %v805_v38, %v805_v38  ;;  %v807_v16 = vmul.f32 %v4353_v1, %v4621_v21  ;;  %4380 = vpow2.f32 %v4811_v53 }
  0x40   : > { %v4357_v55 = vpop.eup %4356  ;;  %v925_v56 = vshrl.u32 %v838_v39, 16  ;;  %v928_v60 = vshll.u32 %v838_v39, 16  ;;  %v1158_v17 = vrot.slane %v838_v39, 7  ;;  %v840_v61 = vpack.c.bf16 %v808_v40, %v808_v40 }
  0x41   : > { %v4359_v2 = vpop.eup %4358  ;;  %v918_v3 = vshrl.u32 %v837_v46, 16  ;;  %v921_v4 = vshll.u32 %v837_v46, 16  ;;  %v1157_v18 = vrot.slane %v837_v46, 7  ;;  %v839_v5 = vpack.c.bf16 %v807_v16, %v807_v16 }
  0x42   : > { %v4361_v7 = vpop.eup %4360  ;;  %v927_v9 = vrot.slane %v925_v56, 7  ;;  %v939_v10 = vshrl.u32 %v840_v61, 16  ;;  %v942_v12 = vshll.u32 %v840_v61, 16  ;;  %v1160_v13 = vrot.slane %v840_v61, 7 }
  0x43   : > { %v920_v19 = vrot.slane %v918_v3, 7  ;;  %v932_v20 = vshrl.u32 %v839_v5, 16  ;;  %v935_v28 = vshll.u32 %v839_v5, 16  ;;  %v1159_v29 = vrot.slane %v839_v5, 7  ;;  %v4827_v37 = vpop.eup %4362 }
  0x44   : > { %v930_v30 = vor.u32 %v928_v60, %v927_v9  ;;  %v941_v33 = vrot.slane %v939_v10, 7  ;;  %v811_v35 = vmul.f32 %v4355_v45, %v4624_v22  ;;  %v809_v36 = vmul.f32 %v4357_v55, %v4627_v23  ;;  %v4830_v56 = vpop.eup %4364 }
  0x45   : > { %v923_v38 = vor.u32 %v921_v4, %v920_v19  ;;  %v934_v1 = vrot.slane %v932_v20, 7  ;;  %v810_v40 = vmul.f32 %v4359_v2, %v4639_v31  ;;  %v704_v16 = vadd.f32 1.0, %v4361_v7  ;;  %v4834_v10 = vpop.eup %4366 }
  0x46   : > { %v1225_v60 = vsel %vm4815_vm4, %v838_v39, %v930_v30  ;;  %v944_v3 = vor.u32 %v942_v12, %v941_v33  ;;  %v843_v9 = vpack.c.bf16 %v811_v35, %v811_v35  ;;  %v841_v27 = vpack.c.bf16 %v809_v36, %v809_v36  ;;  %v4369_v55 = vpop.eup %4368 }
  0x47   : > { %v4838_v22 = vsel %vm4821_vm5, %v1225_v60, %v1158_v17  ;;  %v1224_v23 = vsel %vm4815_vm4, %v837_v46, %v923_v38  ;;  %v937_v45 = vor.u32 %v935_v28, %v934_v1  ;;  %v842_v31 = vpack.c.bf16 %v810_v40, %v810_v40  ;;  %v4371_v12 = vpop.eup %4370 }
  0x48   : > { %5955 = vst [vmem:[#allocation6_spill] sm:$0xff] %v4838_v22  ;;  %v1612_v2 = vrot.slane %v4838_v22, 1  ;;  %v4845_v39 = vsel %vm4821_vm5, %v1224_v23, %v1157_v18  ;;  %v1227_v4 = vsel %vm4815_vm4, %v840_v61, %v944_v3  ;;  %v960_v7 = vshrl.u32 %v843_v9, 16  ;;  %v4373_v28 = vpop.eup %4372 }
  0x49   : > { %5956 = vst [vmem:[#allocation7_spill] sm:$0xff] %v4845_v39  ;;  %v1611_v17 = vrot.slane %v4845_v39, 1  ;;  %v4852_v19 = vsel %vm4821_vm5, %v1227_v4, %v1160_v13  ;;  %v1226_v46 = vsel %vm4815_vm4, %v839_v5, %v937_v45  ;;  %v963_v20 = vshll.u32 %v843_v9, 16  ;;  %v4375_v33 = vpop.eup %4374 }
  0x4a   : > { %5957 = vst [vmem:[#allocation8_spill] sm:$0xff] %v4852_v19  ;;  %1653 = vrot.lane.b32.xlu0 %v1612_v2, %s4496_s21  ;;  %v1614_v18 = vrot.slane %v4852_v19, 1  ;;  %v4860_v61 = vsel %vm4821_vm5, %v1226_v46, %v1159_v29  ;;  %v962_v30 = vrot.slane %v960_v7, 7  ;;  %v1163_v35 = vrot.slane %v843_v9, 7  ;;  %v4377_v38 = vpop.eup %4376 }
  0x4b   : > { %5958 = vst [vmem:[#allocation9_spill] sm:$0xff] %v4860_v61  ;;  %1651 = vrot.lane.b32.xlu1 %v1611_v17, %s4496_s21  ;;  %v1613_v13 = vrot.slane %v4860_v61, 1  ;;  %v946_v5 = vshrl.u32 %v841_v27, 16  ;;  %v949_v36 = vshll.u32 %v841_v27, 16  ;;  %v953_v40 = vshrl.u32 %v842_v31, 16 }
  0x4c   : > { %v965_v1 = vor.u32 %v963_v20, %v962_v30  ;;  %v956_v60 = vshll.u32 %v842_v31, 16  ;;  %v798_v29 = vmul.f32 %v4373_v28, %v4714_v63  ;;  %4382 = vrcp.f32 %v704_v16 }
  0x4d   : > { %v948_v3 = vrot.slane %v946_v5, 7  ;;  %v701_v23 = vadd.f32 1.0, %v4369_v55  ;;  %v1161_v45 = vrot.slane %v841_v27, 7  ;;  %v955_v2 = vrot.slane %v953_v40, 7 }
  0x4e   : > { %1657 = vrot.lane.b32.xlu0 %v1614_v18, %s4496_s21  ;;  %v1230_v41 = vsel %vm4815_vm4, %v843_v9, %v965_v1  ;;  %v1162_v4 = vrot.slane %v842_v31, 7  ;;  %v830_v17 = vpack.c.bf16 %v798_v29, %v798_v29  ;;  %v703_v55 = vadd.f32 1.0, %v4371_v12  ;;  %v4379_v1 = vpop.eup %4378 }
  0x4f   : > { %1655 = vrot.lane.b32.xlu1 %v1613_v13, %s4496_s21  ;;  %v4872_v7 = vsel %vm4821_vm5, %v1230_v41, %v1163_v35  ;;  %v951_v53 = vor.u32 %v949_v36, %v948_v3  ;;  %4384 = vrcp.f32 %v701_v23  ;;  %v958_v16 = vor.u32 %v956_v60, %v955_v2 }
  0x50   : > { %v1617_v63 = vrot.slane %v4872_v7, 1  ;;  %v869_v9 = vshrl.u32 %v830_v17, 16  ;;  %v872_v20 = vshll.u32 %v830_v17, 16  ;;  %v716_v28 = vadd.f32 1.0, %v4795_v26 }
  0x51   : > { %v1228_v46 = vsel %vm4815_vm4, %v841_v27, %v951_v53  ;;  %v1229_v30 = vsel %vm4815_vm4, %v842_v31, %v958_v16  ;;  %4386 = vrcp.f32 %v703_v55  ;;  %v1150_v35 = vrot.slane %v830_v17, 7 }
  0x52   : > { %1663 = vrot.lane.b32.xlu0 %v1617_v63, %s4496_s21  ;;  %v4881_v18 = vsel %vm4821_vm5, %v1228_v46, %v1161_v45  ;;  %v4888_v12 = vsel %vm4821_vm5, %v1229_v30, %v1162_v4  ;;  %v871_v27 = vrot.slane %v869_v9, 7  ;;  %v705_v5 = vadd.f32 1.0, %v4375_v33  ;;  %v4381_v33 = vpop.eup %4380 }
  0x53   : > { %5959 = vst [vmem:[#allocation10_spill] sm:$0xff] %v4881_v18  ;;  %v1615_v13 = vrot.slane %v4881_v18, 1  ;;  %5960 = vst [vmem:[#allocation11_spill] sm:$0xff] %v4888_v12  ;;  %v1616_v26 = vrot.slane %v4888_v12, 1  ;;  %4388 = vrcp.f32 %v716_v28  ;;  %v1342_v60 = vshll.u32 %v4845_v39, 16 }
  0x54   : > { %v874_v36 = vor.u32 %v872_v20, %v871_v27  ;;  %4390 = vrcp.f32 %v705_v5  ;;  %v717_v3 = vadd.f32 1.0, %v4827_v37  ;;  %v4903_v23 = vmul.f32 -1.442695, %v4677_v48 }
  0x55   : > { %1659 = vrot.lane.b32.xlu1 %v1615_v13, %s4496_s21  ;;  %v4906_v41 = vmul.f32 -1.442695, %v4686_v51  ;;  %v4909_v2 = vmul.f32 -1.442695, %v4690_v52  ;;  %v4912_v4 = vmul.f32 -1.442695, %v4702_v57 }
  0x56   : > { %v1217_v31 = vsel %vm4815_vm4, %v830_v17, %v874_v36  ;;  %v4915_v37 = vmul.f32 -1.442695, %v4705_v58  ;;  %v706_v17 = vadd.f32 1.0, %v4377_v38  ;;  %v707_v63 = vadd.f32 1.0, %v4379_v1 }
  0x57   : > { %v4896_v40 = vsel %vm4821_vm5, %v1217_v31, %v1150_v35  ;;  %v718_v16 = vadd.f32 1.0, %v4830_v56  ;;  %v1340_v46 = vshrl.u32 %v4845_v39, 16  ;;  %v1344_v9 = vrot.slane %v1342_v60, 1 }
  0x58   : > { %v1604_v29 = vrot.slane %v4896_v40, 1  ;;  %v708_v20 = vadd.f32 1.0, %v4381_v33  ;;  %4392 = vrcp.f32 %v717_v3  ;;  %v4923_v13 = vmul.f32 -1.442695, %v4746_v42 }
  0x59   : > { %1661 = vrot.lane.b32.xlu1 %v1616_v26, %s4496_s21  ;;  %v4383_v45 = vpop.eup %4382  ;;  %4394 = vrcp.f32 %v706_v17  ;;  %v4929_v38 = vmul.f32 -1.442695, %v4750_v49  ;;  %v4932_v56 = vmul.f32 -1.442695, %v4753_v50  ;;  %v1347_v1 = vshrl.u32 %v4838_v22, 16 }
  0x5a   : > { %1637 = vrot.lane.b32.xlu0 %v1604_v29, %s4496_s21  ;;  %v800_v53 = vmul.f32 %v4383_v45, %v4721_v6  ;;  %4396 = vrcp.f32 %v707_v63  ;;  %v4926_v6 = vadd.f32 1.0, %v4834_v10  ;;  %v1349_v3 = vshll.u32 %v4838_v22, 16 }
  0x5b   : > { %4398 = vrcp.f32 %v718_v16  ;;  %v1363_v17 = vshll.u32 %v4852_v19, 16  ;;  %v1377_v39 = vshll.u32 %v4888_v12, 16 }
  0x5c   : > { %v4385_v55 = vpop.eup %4384  ;;  %v832_v28 = vpack.c.bf16 %v800_v53, %v800_v53  ;;  %4400 = vrcp.f32 %v708_v20  ;;  %v1361_v53 = vshrl.u32 %v4852_v19, 16  ;;  %v1351_v22 = vrot.slane %v1349_v3, 1 }
  0x5d   : > { %v797_v30 = vmul.f32 %v4385_v55, %v4757_v54  ;;  %v1345_v54 = vor.u32 %v1344_v9, %v1340_v46  ;;  %v1356_v46 = vshll.u32 %v4860_v61, 16  ;;  %v1365_v50 = vrot.slane %v1363_v17, 1 }
  0x5e   : > { %v4387_v27 = vpop.eup %4386  ;;  %v883_v35 = vshrl.u32 %v832_v28, 16  ;;  %v886_v5 = vshll.u32 %v832_v28, 16  ;;  %v1152_v29 = vrot.slane %v832_v28, 7  ;;  %4402 = vrcp.f32 %v4926_v6 }
  0x5f   : > { %v829_v26 = vpack.c.bf16 %v797_v30, %v797_v30  ;;  %v799_v36 = vmul.f32 %v4387_v27, %v4767_v62  ;;  %v1354_v62 = vshrl.u32 %v4860_v61, 16  ;;  %4404 = vpow2.f32 %v4903_v23 }
  0x60   : > { %v885_v31 = vrot.slane %v883_v35, 7  ;;  %v4389_v33 = vpop.eup %4388  ;;  %4406 = vpow2.f32 %v4906_v41  ;;  %v4311_v41 = vld [vmem:[%s5934_s4] sm:$0xff]  }
  0x61   : > { %v862_v10 = vshrl.u32 %v829_v26, 16  ;;  %v865_v60 = vshll.u32 %v829_v26, 16  ;;  %v831_v45 = vpack.c.bf16 %v799_v36, %v799_v36  ;;  %v4391_v63 = vpop.eup %4390  ;;  %v1149_v9 = vrot.slane %v829_v26, 7 }
  0x62   : > { %v888_v16 = vor.u32 %v886_v5, %v885_v31  ;;  %v801_v27 = vmul.f32 %v4391_v63, %v4775_v8  ;;  %v812_v19 = vmul.f32 %v4389_v33, %v4644_v34  ;;  %v1358_v34 = vrot.slane %v1356_v46, 1 }
  0x63   : > { %v864_v55 = vrot.slane %v862_v10, 7  ;;  %v876_v20 = vshrl.u32 %v831_v45, 16  ;;  %v879_v30 = vshll.u32 %v831_v45, 16  ;;  %v1151_v63 = vrot.slane %v831_v45, 7 }
  0x64   : > { %v1219_v35 = vsel %vm4815_vm4, %v832_v28, %v888_v16  ;;  %v833_v10 = vpack.c.bf16 %v801_v27, %v801_v27  ;;  %v1375_v33 = vshrl.u32 %v4888_v12, 16  ;;  %v1352_v46 = vor.u32 %v1351_v22, %v1347_v1 }
  0x65   : > { %v867_v36 = vor.u32 %v865_v60, %v864_v55  ;;  %v4947_v5 = vsel %vm4821_vm5, %v1219_v35, %v1152_v29  ;;  %v878_v31 = vrot.slane %v876_v20, 7  ;;  %v4393_v29 = vpop.eup %4392  ;;  %v1368_v20 = vshrl.u32 %v4881_v18, 16 }
  0x66   : > { %v1606_v61 = vrot.slane %v4947_v5, 1  ;;  %v890_v3 = vshrl.u32 %v833_v10, 16  ;;  %v893_v16 = vshll.u32 %v833_v10, 16  ;;  %4408 = vpow2.f32 %v4909_v2 }
  0x67   : > { %v1216_v8 = vsel %vm4815_vm4, %v829_v26, %v867_v36  ;;  %v881_v60 = vor.u32 %v879_v30, %v878_v31  ;;  %v4395_v26 = vpop.eup %4394  ;;  %v4964_v30 = vpack.c.bf16 %v812_v19, %v812_v19  ;;  %v1153_v36 = vrot.slane %v833_v10, 7 }
  0x68   : > { %v4955_v28 = vsel %vm4821_vm5, %v1216_v8, %v1149_v9  ;;  %1641 = vrot.lane.b32.xlu0 %v1606_v61, %s4496_s21  ;;  %v892_v27 = vrot.slane %v890_v3, 7  ;;  %v1370_v9 = vshll.u32 %v4881_v18, 16  ;;  %v4397_v35 = vpop.eup %4396  ;;  %v802_v31 = vmul.f32 %v4395_v26, %v4782_v14 }
  0x69   : > { %v1603_v55 = vrot.slane %v4955_v28, 1  ;;  %v1218_v17 = vsel %vm4815_vm4, %v831_v45, %v881_v60  ;;  %v4399_v8 = vpop.eup %4398  ;;  %v1366_v60 = vor.u32 %v1365_v50, %v1361_v53  ;;  %v1379_v3 = vrot.slane %v1377_v39, 1 }
  0x6a   : > { %v4969_v61 = vsel %vm4821_vm5, %v1218_v17, %v1151_v63  ;;  %v895_v45 = vor.u32 %v893_v16, %v892_v27  ;;  %v4401_v18 = vpop.eup %4400  ;;  %v1359_v19 = vor.u32 %v1358_v34, %v1354_v62  ;;  %v4975_v49 = vpack.c.bf16 %v802_v31, %v802_v31 }
  0x6b   : > { %1635 = vrot.lane.b32.xlu1 %v1603_v55, %s4496_s21  ;;  %v1605_v12 = vrot.slane %v4969_v61, 1  ;;  %v1382_v55 = vshrl.u32 %v4872_v7, 16  ;;  %v803_v22 = vmul.f32 %v4397_v35, %v4802_v0  ;;  %v1372_v1 = vrot.slane %v1370_v9, 1 }
  0x6c   : > { %1523 = vrot.lane.b32.xlu0 %v1345_v54, %s4497_s22  ;;  %v1220_v14 = vsel %vm4815_vm4, %v833_v10, %v895_v45  ;;  %v804_v63 = vmul.f32 %v4401_v18, %v4731_v11  ;;  %v967_v50 = vshrl.u32 %v4964_v30, 16  ;;  %v1384_v54 = vshll.u32 %v4872_v7, 16 }
  0x6d   : > { %v4985_v39 = vsel %vm4821_vm5, %v1220_v14, %v1153_v36  ;;  %v1293_v53 = vshll.u32 %v4896_v40, 16  ;;  %v897_v0 = vshrl.u32 %v4975_v49, 16  ;;  %v1380_v10 = vor.u32 %v1379_v3, %v1375_v33 }
  0x6e   : > { %v1607_v62 = vrot.slane %v4985_v39, 1  ;;  %v1286_v16 = vshll.u32 %v4955_v28, 16  ;;  %v813_v11 = vmul.f32 %v4393_v29, %v4666_v43  ;;  %v835_v34 = vpack.c.bf16 %v803_v22, %v803_v22 }
  0x6f   : > { %1639 = vrot.lane.b32.xlu1 %v1605_v12, %s4496_s21  ;;  %v899_v18 = vrot.slane %v897_v0, 7  ;;  %v900_v12 = vshll.u32 %v4975_v49, 16  ;;  %v4995_v26 = vpack.c.bf16 %v804_v63, %v804_v63  ;;  %v1373_v17 = vor.u32 %v1372_v1, %v1368_v20 }
  0x70   : > { %1525 = vrot.lane.b32.xlu0 %v1352_v46, %s4497_s22  ;;  %v1291_v27 = vshrl.u32 %v4896_v40, 16  ;;  %v969_v9 = vrot.slane %v967_v50, 7  ;;  %v970_v35 = vshll.u32 %v4964_v30, 16  ;;  %v1386_v33 = vrot.slane %v1384_v54, 1 }
  0x71   : > { %v1295_v36 = vrot.slane %v1293_v53, 1  ;;  %v904_v31 = vshrl.u32 %v835_v34, 16  ;;  %v907_v43 = vshll.u32 %v835_v34, 16  ;;  %v1284_v29 = vshrl.u32 %v4955_v28, 16 }
  0x72   : > { %v1288_v46 = vrot.slane %v1286_v16, 1  ;;  %v911_v45 = vshrl.u32 %v4995_v26, 16  ;;  %v5002_v3 = vpack.c.bf16 %v813_v11, %v813_v11  ;;  %v1300_v20 = vshll.u32 %v4969_v61, 16 }
  0x73   : > { %1643 = vrot.lane.b32.xlu1 %v1607_v62, %s4496_s21  ;;  %v902_v22 = vor.u32 %v900_v12, %v899_v18  ;;  %v906_v14 = vrot.slane %v904_v31, 7  ;;  %v814_v1 = vmul.f32 %v4399_v8, %v4669_v44  ;;  %v1155_v63 = vrot.slane %v835_v34, 7 }
  0x74   : > { %1529 = vrot.lane.b32.xlu0 %v1366_v60, %s4497_s22  ;;  %v972_v50 = vor.u32 %v970_v35, %v969_v9  ;;  %v1164_v54 = vrot.slane %v4964_v30, 7  ;;  %v1307_v53 = vshll.u32 %v4947_v5, 16  ;;  %v913_v62 = vrot.slane %v911_v45, 7 }
  0x75   : > { %v909_v0 = vor.u32 %v907_v43, %v906_v14  ;;  %v914_v60 = vshll.u32 %v4995_v26, 16  ;;  %v1289_v16 = vor.u32 %v1288_v46, %v1284_v29  ;;  %v1298_v11 = vshrl.u32 %v4969_v61, 16 }
  0x76   : > { %v1154_v18 = vrot.slane %v4975_v49, 7  ;;  %v974_v44 = vshrl.u32 %v5002_v3, 16  ;;  %v1302_v8 = vrot.slane %v1300_v20, 1  ;;  %v1221_v6 = vsel %vm4815_vm4, %v4975_v49, %v902_v22 }
  0x77   : > { %1527 = vrot.lane.b32.xlu1 %v1359_v19, %s4497_s22  ;;  %v1222_v19 = vsel %vm4815_vm4, %v835_v34, %v909_v0  ;;  %v5021_v12 = vpack.c.bf16 %v814_v1, %v814_v1  ;;  %v1314_v9 = vshll.u32 %v4985_v39, 16  ;;  %v5032_v31 = vmul.f32 -1.442695, %v4762_v59 }
  0x78   : > { %1533 = vrot.lane.b32.xlu0 %v1380_v10, %s4497_s22  ;;  %v5026_v35 = vsel %vm4821_vm5, %v1222_v19, %v1155_v63  ;;  %v1231_v10 = vsel %vm4815_vm4, %v4964_v30, %v972_v50  ;;  %v1387_v49 = vor.u32 %v1386_v33, %v1382_v55  ;;  %v1305_v34 = vshrl.u32 %v4947_v5, 16 }
  0x79   : > { %v1309_v43 = vrot.slane %v1307_v53, 1  ;;  %v916_v29 = vor.u32 %v914_v60, %v913_v62  ;;  %v1296_v46 = vor.u32 %v1295_v36, %v1291_v27  ;;  %v5038_v45 = vsel %vm4821_vm5, %v1221_v6, %v1154_v18  ;;  %v4310_v27 = vld [vmem:[%s5934_s4 + $0x8] ss:$0 sps:$4 sm:$0xff]  }
  0x7a   : > { %v976_v20 = vrot.slane %v974_v44, 7  ;;  %v977_v22 = vshll.u32 %v5002_v3, 16  ;;  %v1303_v30 = vor.u32 %v1302_v8, %v1298_v11  ;;  %v1328_v14 = vshll.u32 %v5026_v35, 16  ;;  %4258 = vmatprep.subr.msk.bf16.mxu1 %vm1934_vm6, %v4310_v27  ;;  %4257 = vmatprep.subr.msk.bf16.mxu0 %vm1934_vm6, %v4310_v27  ;;  %v4403_v11 = vpop.eup %4402 }
  0x7b   : > { %1531 = vrot.lane.b32.xlu1 %v1373_v17, %s4497_s22  ;;  %v5045_v55 = vsel %vm4821_vm5, %v1231_v10, %v1164_v54  ;;  %v981_v17 = vshrl.u32 %v5021_v12, 16  ;;  %v1312_v33 = vshrl.u32 %v4985_v39, 16  ;;  %v1316_v36 = vrot.slane %v1314_v9, 1 }
  0x7c   : > { %1507 = vrot.lane.b32.xlu0 %v1289_v16, %s4497_s22  ;;  %v1156_v1 = vrot.slane %v4995_v26, 7  ;;  %v1310_v63 = vor.u32 %v1309_v43, %v1305_v34  ;;  %v1321_v50 = vshll.u32 %v5038_v45, 16  ;;  %v1223_v54 = vsel %vm4815_vm4, %v4995_v26, %v916_v29  ;;  %v5099_v34 = vld [vmem:[%s5934_s4 + $0x20] ss:$0 sps:$4 sm:$0xff]  }
  0x7d   : > { %v979_v53 = vor.u32 %v977_v22, %v976_v20  ;;  %v984_v0 = vshll.u32 %v5021_v12, 16  ;;  %v1326_v23 = vshrl.u32 %v5026_v35, 16  ;;  %v1330_v62 = vrot.slane %v1328_v14, 1  ;;  %v5961_v20 = vld [vmem:[#allocation5_spill] sm:$0xff] }
  0x7e   : > { %v983_v60 = vrot.slane %v981_v17, 7  ;;  %4410 = vpow2.f32 %v4912_v4  ;;  %v1317_v26 = vor.u32 %v1316_v36, %v1312_v33  ;;  %v5071_v16 = vsel %vm4821_vm5, %v1223_v54, %v1156_v1 }
  0x7f   : > { %1535 = vrot.lane.b32.xlu1 %v1387_v49, %s4497_s22  ;;  %v1165_v2 = vrot.slane %v5002_v3, 7  ;;  %4412 = vpow2.f32 %v4915_v37  ;;  %v1319_v4 = vshrl.u32 %v5038_v45, 16  ;;  %v1323_v18 = vrot.slane %v1321_v50, 1  ;;  %v4405_v50 = vpop.eup %4404 }
  0x80   : > { %1511 = vrot.lane.b32.xlu0 %v1303_v30, %s4497_s22  ;;  %4414 = vpow2.f32 %v4923_v13  ;;  %v1936_v44 = vsel %vm1934_vm6, %v4310_v27, 0  ;;  %v1232_v8 = vsel %vm4815_vm4, %v5002_v3, %v979_v53  ;;  %v815_v6 = vmul.f32 %v4403_v11, %v4674_v47  ;;  %v5092_v3 = vld [vmem:[%s5934_s4 + $0x14] ss:$0 sps:$4 sm:$0xff]  }
  0x81   : > { %4416 = vpow2.f32 %v4929_v38  ;;  %v3824_v37 = vmul.f32 -1.442695, %v4785_v15  ;;  %4255 = vmatpush3.bf16.msra.mxu1 %v1936_v44  ;;  %4074 = vmatpush3.bf16.msra.mxu0 %v1936_v44  ;;  %v1331_v19 = vor.u32 %v1330_v62, %v1326_v23  ;;  %v1335_v9 = vshll.u32 %v5071_v16, 16 }
  0x82   : > { %v986_v13 = vor.u32 %v984_v0, %v983_v60  ;;  %v3825_v10 = vmul.f32 -1.442695, %v4790_v24  ;;  %4254 = vmatprep.subr.bf16.mxu1 %v4311_v41  ;;  %v1391_v47 = vshll.u32 %v5045_v55, 16  ;;  %v847_v38 = vpack.c.bf16 %v815_v6, %v815_v6  ;;  %4075 = vmatprep.subr.bf16.mxu0 %v4311_v41 }
  0x83   : > { %1509 = vrot.lane.b32.xlu1 %v1296_v46, %s4497_s22  ;;  %v3826_v49 = vmul.f32 -1.442695, %v4793_v25  ;;  %v1324_v43 = vor.u32 %v1323_v18, %v1319_v4  ;;  %v1608_v29 = vrot.slane %v5038_v45, 1  ;;  %v5105_v46 = vsel %vm4821_vm5, %v1232_v8, %v1165_v2 }
  0x84   : > { %1513 = vrot.lane.b32.xlu0 %v1310_v63, %s4497_s22  ;;  %v3827_v22 = vmul.f32 -1.442695, %v5961_v20  ;;  %v1166_v30 = vrot.slane %v5021_v12, 7  ;;  %v988_v14 = vshrl.u32 %v847_v38, 16  ;;  %v991_v17 = vshll.u32 %v847_v38, 16 }
  0x85   : > { %4418 = vpow2.f32 %v4932_v56  ;;  %4256 = vmatpush3.bf16.msra.mxu1 %v4311_v41  ;;  %4076 = vmatpush3.bf16.msra.mxu0 %v4311_v41  ;;  %v1333_v27 = vshrl.u32 %v5071_v16, 16  ;;  %v1337_v33 = vrot.slane %v1335_v9, 1  ;;  %v1233_v36 = vsel %vm4815_vm4, %v5021_v12, %v986_v13 }
  0x86   : > { %4420 = vpow2.f32 %v5032_v31  ;;  %4259 = vmatprep.subr.msk.bf16.mxu1 %vm1934_vm6, %v5092_v3  ;;  %v1389_v1 = vshrl.u32 %v5045_v55, 16  ;;  %v1393_v63 = vrot.slane %v1391_v47, 1  ;;  %v990_v56 = vrot.slane %v988_v14, 7  ;;  %4260 = vmatprep.subr.msk.bf16.mxu0 %vm1934_vm6, %v5099_v34  ;;  %v4407_v31 = vpop.eup %4406 }
  0x87   : > { %1515 = vrot.lane.b32.xlu1 %v1317_v26, %s4497_s22  ;;  %4422 = vpow2.f32 %v3824_v37  ;;  %v1609_v54 = vrot.slane %v5026_v35, 1  ;;  %v1398_v12 = vshll.u32 %v5105_v46, 16  ;;  %v1167_v53 = vrot.slane %v847_v38, 7  ;;  %v4409_v60 = vpop.eup %4408 }
  0x88   : > { %1519 = vrot.lane.b32.xlu0 %v1331_v19, %s4497_s22  ;;  %4424 = vpow2.f32 %v3825_v10  ;;  %v5126_v0 = vsel %vm4821_vm5, %v1233_v36, %v1166_v30  ;;  %v993_v23 = vor.u32 %v991_v17, %v990_v56  ;;  %v720_v62 = vadd.f32 1.0, %v4405_v50 }
  0x89   : > { %4426 = vpow2.f32 %v3826_v49  ;;  %v1338_v41 = vor.u32 %v1337_v33, %v1333_v27  ;;  %v721_v26 = vadd.f32 1.0, %v4407_v31  ;;  %v1610_v11 = vrot.slane %v5071_v16, 1 }
  0x8a   : > { %4428 = vpow2.f32 %v3827_v22  ;;  %v1234_v4 = vsel %vm4815_vm4, %v847_v38, %v993_v23  ;;  %v722_v18 = vadd.f32 1.0, %v4409_v60  ;;  %v1405_v8 = vshll.u32 %v5126_v0, 16 }
  0x8b   : > { %1517 = vrot.lane.b32.xlu1 %v1324_v43, %s4497_s22  ;;  %v4411_v2 = vpop.eup %4410  ;;  %4430 = vrcp.f32 %v720_v62  ;;  %v5136_v6 = vsel %vm4821_vm5, %v1234_v4, %v1167_v53  ;;  %v1394_v9 = vor.u32 %v1393_v63, %v1389_v1  ;;  %v1396_v13 = vshrl.u32 %v5105_v46, 16 }
  0x8c   : > { %1645 = vrot.lane.b32.xlu0 %v1608_v29, %s4496_s21  ;;  %v4413_v44 = vpop.eup %4412  ;;  %4432 = vrcp.f32 %v721_v26  ;;  %v723_v37 = vadd.f32 1.0, %v4411_v2  ;;  %v1400_v10 = vrot.slane %v1398_v12, 1  ;;  %v1412_v38 = vshll.u32 %v5136_v6, 16 }
  0x8d   : > { %v4415_v19 = vpop.eup %4414  ;;  %4434 = vrcp.f32 %v722_v18  ;;  %v724_v49 = vadd.f32 1.0, %v4413_v44  ;;  %v1618_v22 = vrot.slane %v5045_v55, 1  ;;  %v1403_v30 = vshrl.u32 %v5126_v0, 16 }
  0x8e   : > { %v4417_v47 = vpop.eup %4416  ;;  %4436 = vrcp.f32 %v723_v37  ;;  %v725_v43 = vadd.f32 1.0, %v4415_v19  ;;  %v1407_v14 = vrot.slane %v1405_v8, 1  ;;  %v1401_v27 = vor.u32 %v1400_v10, %v1396_v13 }
  0x8f   : > { %1647 = vrot.lane.b32.xlu1 %v1609_v54, %s4496_s21  ;;  %v726_v29 = vadd.f32 1.0, %v4417_v47  ;;  %4438 = vrcp.f32 %v724_v49  ;;  %v1410_v33 = vshrl.u32 %v5136_v6, 16  ;;  %v1414_v36 = vrot.slane %v1412_v38, 1 }
  0x90   : > { %1521 = vrot.lane.b32.xlu0 %v1338_v41, %s4497_s22  ;;  %4440 = vrcp.f32 %v725_v43  ;;  %v1408_v56 = vor.u32 %v1407_v14, %v1403_v30  ;;  %v1619_v60 = vrot.slane %v5105_v46, 1  ;;  %v1620_v4 = vrot.slane %v5126_v0, 1 }
  0x91   : > { %4442 = vrcp.f32 %v726_v29  ;;  %v1415_v12 = vor.u32 %v1414_v36, %v1410_v33  ;;  %v1621_v37 = vrot.slane %v5136_v6, 1 }
  0x92   : > { %v4419_v17 = vpop.eup %4418 }
  0x93   : > { %1649 = vrot.lane.b32.xlu1 %v1610_v11, %s4496_s21  ;;  %v4421_v1 = vpop.eup %4420  ;;  %v727_v53 = vadd.f32 1.0, %v4419_v17 }
  0x94   : > { %1537 = vrot.lane.b32.xlu0 %v1394_v9, %s4497_s22  ;;  %v4423_v63 = vpop.eup %4422  ;;  %v728_v23 = vadd.f32 1.0, %v4421_v1 }
  0x95   : > { %v4425_v50 = vpop.eup %4424  ;;  %v729_v41 = vadd.f32 1.0, %v4423_v63  ;;  %4444 = vrcp.f32 %v727_v53 }
  0x96   : > { %v4427_v54 = vpop.eup %4426  ;;  %v730_v44 = vadd.f32 1.0, %v4425_v50  ;;  %4446 = vrcp.f32 %v728_v23 }
  0x97   : > { %1665 = vrot.lane.b32.xlu1 %v1618_v22, %s4496_s21  ;;  %v4429_v31 = vpop.eup %4428  ;;  %4448 = vrcp.f32 %v729_v41  ;;  %v731_v10 = vadd.f32 1.0, %v4427_v54 }
  0x98   : > { %1539 = vrot.lane.b32.xlu0 %v1401_v27, %s4497_s22  ;;  %v4431_v62 = vpop.eup %4430  ;;  %v732_v43 = vadd.f32 1.0, %v4429_v31  ;;  %4450 = vrcp.f32 %v730_v44 }
  0x99   : > { %v4433_v26 = vpop.eup %4432  ;;  %v816_v2 = vmul.f32 %v4431_v62, %v4677_v48  ;;  %4452 = vrcp.f32 %v731_v10 }
  0x9a   : > { %v4435_v11 = vpop.eup %4434  ;;  %v817_v18 = vmul.f32 %v4433_v26, %v4686_v51  ;;  %4454 = vrcp.f32 %v732_v43 }
  0x9b   : > { %1541 = vrot.lane.b32.xlu1 %v1408_v56, %s4497_s22  ;;  %v4437_v8 = vpop.eup %4436  ;;  %v848_v19 = vpack.c.bf16 %v816_v2, %v816_v2  ;;  %v818_v9 = vmul.f32 %v4435_v11, %v4690_v52  ;;  %v5962_v11 = vld [vmem:[#allocation3_spill] sm:$0xff] }
  0x9c   : > { %1543 = vrot.lane.b32.xlu0 %v1415_v12, %s4497_s22  ;;  %v849_v13 = vpack.c.bf16 %v817_v18, %v817_v18  ;;  %v819_v48 = vmul.f32 %v4437_v8, %v4702_v57  ;;  %v4439_v47 = vpop.eup %4438 }
  0x9d   : > { %v995_v38 = vshrl.u32 %v848_v19, 16  ;;  %v998_v49 = vshll.u32 %v848_v19, 16  ;;  %v850_v51 = vpack.c.bf16 %v818_v9, %v818_v9  ;;  %v4441_v29 = vpop.eup %4440  ;;  %v1168_v17 = vrot.slane %v848_v19, 7 }
  0x9e   : > { %v1002_v22 = vshrl.u32 %v849_v13, 16  ;;  %v1005_v30 = vshll.u32 %v849_v13, 16  ;;  %v851_v14 = vpack.c.bf16 %v819_v48, %v819_v48  ;;  %v4443_v36 = vpop.eup %4442  ;;  %v1169_v1 = vrot.slane %v849_v13, 7 }
  0x9f   : > { %1667 = vrot.lane.b32.xlu1 %v1619_v60, %s4496_s21  ;;  %v997_v52 = vrot.slane %v995_v38, 7  ;;  %v1009_v27 = vshrl.u32 %v850_v51, 16  ;;  %v1012_v33 = vshll.u32 %v850_v51, 16  ;;  %v820_v12 = vmul.f32 %v4439_v47, %v4705_v58 }
  0xa0   : > { %1669 = vrot.lane.b32.xlu0 %v1620_v4, %s4496_s21  ;;  %v1004_v57 = vrot.slane %v1002_v22, 7  ;;  %v1016_v63 = vshrl.u32 %v851_v14, 16  ;;  %v1019_v56 = vshll.u32 %v851_v14, 16  ;;  %v821_v53 = vmul.f32 %v4441_v29, %v4746_v42 }
  0xa1   : > { %v1000_v50 = vor.u32 %v998_v49, %v997_v52  ;;  %v1011_v54 = vrot.slane %v1009_v27, 7  ;;  %v1170_v23 = vrot.slane %v850_v51, 7  ;;  %v1171_v60 = vrot.slane %v851_v14, 7 }
  0xa2   : > { %v1007_v31 = vor.u32 %v1005_v30, %v1004_v57  ;;  %v1018_v62 = vrot.slane %v1016_v63, 7  ;;  %v5164_v2 = vpack.c.bf16 %v820_v12, %v820_v12  ;;  %v822_v4 = vmul.f32 %v4443_v36, %v5962_v11  ;;  %v4445_v49 = vpop.eup %4444 }
  0xa3   : > { %1671 = vrot.lane.b32.xlu1 %v1621_v37, %s4496_s21  ;;  %v1235_v41 = vsel %vm4815_vm4, %v848_v19, %v1000_v50  ;;  %v1014_v26 = vor.u32 %v1012_v33, %v1011_v54  ;;  %v5173_v44 = vpack.c.bf16 %v821_v53, %v821_v53  ;;  %v4447_v52 = vpop.eup %4446  ;;  %v5963_v54 = vld [vmem:[#allocation4_spill] sm:$0xff] }
  0xa4   : > { %v5169_v18 = vsel %vm4821_vm5, %v1235_v41, %v1168_v17  ;;  %v1236_v58 = vsel %vm4815_vm4, %v849_v13, %v1007_v31  ;;  %v1021_v42 = vor.u32 %v1019_v56, %v1018_v62  ;;  %v4449_v36 = vpop.eup %4448  ;;  %v1023_v50 = vshrl.u32 %v5164_v2, 16 }
  0xa5   : > { %v1417_v8 = vshrl.u32 %v5169_v18, 16  ;;  %v1419_v37 = vshll.u32 %v5169_v18, 16  ;;  %v5179_v19 = vsel %vm4821_vm5, %v1236_v58, %v1169_v1  ;;  %v1237_v9 = vsel %vm4815_vm4, %v850_v51, %v1014_v26  ;;  %v4451_v53 = vpop.eup %4450 }
  0xa6   : > { %v1424_v48 = vshrl.u32 %v5179_v19, 16  ;;  %v1426_v47 = vshll.u32 %v5179_v19, 16  ;;  %v5187_v13 = vsel %vm4821_vm5, %v1237_v9, %v1170_v23  ;;  %v1238_v38 = vsel %vm4815_vm4, %v851_v14, %v1021_v42 }
  0xa7   : > { %v1421_v29 = vrot.slane %v1419_v37, 1  ;;  %v1431_v22 = vshrl.u32 %v5187_v13, 16  ;;  %v1433_v30 = vshll.u32 %v5187_v13, 16  ;;  %v5195_v51 = vsel %vm4821_vm5, %v1238_v38, %v1171_v60 }
  0xa8   : > { %v1428_v17 = vrot.slane %v1426_v47, 1  ;;  %v1438_v27 = vshrl.u32 %v5195_v51, 16  ;;  %v1440_v33 = vshll.u32 %v5195_v51, 16  ;;  %v854_v1 = vpack.c.bf16 %v822_v4, %v822_v4 }
  0xa9   : > { %v1422_v57 = vor.u32 %v1421_v29, %v1417_v8  ;;  %v1435_v14 = vrot.slane %v1433_v30, 1  ;;  %v823_v12 = vmul.f32 %v4445_v49, %v5963_v54  ;;  %v1622_v23 = vrot.slane %v5169_v18, 1 }
  0xaa   : > { %v1429_v63 = vor.u32 %v1428_v17, %v1424_v48  ;;  %v1442_v56 = vrot.slane %v1440_v33, 1  ;;  %v1026_v62 = vshll.u32 %v5164_v2, 16  ;;  %v1030_v10 = vshrl.u32 %v5173_v44, 16 }
  0xab   : > { %1545 = vrot.lane.b32.xlu0 %v1422_v57, %s4497_s22  ;;  %v1436_v31 = vor.u32 %v1435_v14, %v1431_v22  ;;  %v1623_v43 = vrot.slane %v5179_v19, 1  ;;  %v1025_v41 = vrot.slane %v1023_v50, 7  ;;  %v1033_v26 = vshll.u32 %v5173_v44, 16 }
  0xac   : > { %1547 = vrot.lane.b32.xlu1 %v1429_v63, %s4497_s22  ;;  %v1443_v60 = vor.u32 %v1442_v56, %v1438_v27  ;;  %v1172_v11 = vrot.slane %v5164_v2, 7  ;;  %v1032_v4 = vrot.slane %v1030_v10, 7  ;;  %v1037_v58 = vshrl.u32 %v854_v1, 16 }
  0xad   : > { %v1040_v42 = vshll.u32 %v854_v1, 16  ;;  %v1028_v8 = vor.u32 %v1026_v62, %v1025_v41  ;;  %v1173_v37 = vrot.slane %v5173_v44, 7  ;;  %v855_v9 = vpack.c.bf16 %v823_v12, %v823_v12 }
  0xae   : > { %v824_v48 = vmul.f32 %v4447_v52, %v4762_v59  ;;  %v1624_v47 = vrot.slane %v5187_v13, 1  ;;  %v1625_v38 = vrot.slane %v5195_v51, 1  ;;  %v1035_v49 = vor.u32 %v1033_v26, %v1032_v4 }
  0xaf   : > { %1549 = vrot.lane.b32.xlu0 %v1436_v31, %s4497_s22  ;;  %v1039_v29 = vrot.slane %v1037_v58, 7  ;;  %v1239_v22 = vsel %vm4815_vm4, %v5164_v2, %v1028_v8  ;;  %v1174_v30 = vrot.slane %v854_v1, 7  ;;  %v1044_v17 = vshrl.u32 %v855_v9, 16 }
  0xb0   : > { %1551 = vrot.lane.b32.xlu1 %v1443_v60, %s4497_s22  ;;  %v1047_v27 = vshll.u32 %v855_v9, 16  ;;  %v5220_v59 = vsel %vm4821_vm5, %v1239_v22, %v1172_v11  ;;  %v1240_v52 = vsel %vm4815_vm4, %v5173_v44, %v1035_v49  ;;  %v856_v57 = vpack.c.bf16 %v824_v48, %v824_v48 }
  0xb1   : > { %v1042_v33 = vor.u32 %v1040_v42, %v1039_v29  ;;  %v1447_v14 = vshll.u32 %v5220_v59, 16  ;;  %v5228_v63 = vsel %vm4821_vm5, %v1240_v52, %v1173_v37  ;;  %v825_v2 = vmul.f32 %v4449_v36, %v4785_v15 }
  0xb2   : > { %v826_v56 = vmul.f32 %v4451_v53, %v4790_v24  ;;  %v1445_v50 = vshrl.u32 %v5220_v59, 16  ;;  %v1454_v54 = vshll.u32 %v5228_v63, 16  ;;  %v1046_v12 = vrot.slane %v1044_v17, 7  ;;  %v4453_v24 = vpop.eup %4452 }
  0xb3   : > { %1673 = vrot.lane.b32.xlu0 %v1622_v23, %s4496_s21  ;;  %v1241_v44 = vsel %vm4815_vm4, %v854_v1, %v1042_v33  ;;  %v1449_v31 = vrot.slane %v1447_v14, 1  ;;  %v1175_v15 = vrot.slane %v855_v9, 7  ;;  %v1051_v36 = vshrl.u32 %v856_v57, 16  ;;  %v4455_v41 = vpop.eup %4454 }
  0xb4   : > { %1675 = vrot.lane.b32.xlu1 %v1623_v43, %s4496_s21  ;;  %v5240_v62 = vsel %vm4821_vm5, %v1241_v44, %v1174_v30  ;;  %v1452_v53 = vshrl.u32 %v5228_v63, 16  ;;  %v1456_v23 = vrot.slane %v1454_v54, 1  ;;  %v1049_v60 = vor.u32 %v1047_v27, %v1046_v12 }
  0xb5   : > { %v1461_v10 = vshll.u32 %v5240_v62, 16  ;;  %v1626_v1 = vrot.slane %v5220_v59, 1  ;;  %v1459_v26 = vshrl.u32 %v5240_v62, 16  ;;  %v1053_v43 = vrot.slane %v1051_v36, 7 }
  0xb6   : > { %v1054_v11 = vshll.u32 %v856_v57, 16  ;;  %v1450_v4 = vor.u32 %v1449_v31, %v1445_v50  ;;  %v1242_v42 = vsel %vm4815_vm4, %v855_v9, %v1049_v60  ;;  %v1176_v8 = vrot.slane %v856_v57, 7 }
  0xb7   : > { %1677 = vrot.lane.b32.xlu0 %v1624_v47, %s4496_s21  ;;  %v1463_v58 = vrot.slane %v1461_v10, 1  ;;  %v5252_v37 = vsel %vm4821_vm5, %v1242_v42, %v1175_v15  ;;  %v857_v49 = vpack.c.bf16 %v825_v2, %v825_v2  ;;  %v858_v29 = vpack.c.bf16 %v826_v56, %v826_v56 }
  0xb8   : > { %1679 = vrot.lane.b32.xlu1 %v1625_v38, %s4496_s21  ;;  %v1056_v48 = vor.u32 %v1054_v11, %v1053_v43  ;;  %v1457_v22 = vor.u32 %v1456_v23, %v1452_v53  ;;  %v1468_v30 = vshll.u32 %v5252_v37, 16  ;;  %v827_v47 = vmul.f32 %v4453_v24, %v4793_v25 }
  0xb9   : > { %v1466_v17 = vshrl.u32 %v5252_v37, 16  ;;  %v1058_v27 = vshrl.u32 %v857_v49, 16  ;;  %v1061_v52 = vshll.u32 %v857_v49, 16  ;;  %v1065_v14 = vshrl.u32 %v858_v29, 16 }
  0xba   : > { %v1243_v9 = vsel %vm4815_vm4, %v856_v57, %v1056_v48  ;;  %v1470_v38 = vrot.slane %v1468_v30, 1  ;;  %v1068_v2 = vshll.u32 %v858_v29, 16  ;;  %v1464_v56 = vor.u32 %v1463_v58, %v1459_v26 }
  0xbb   : > { %1553 = vrot.lane.b32.xlu0 %v1450_v4, %s4497_s22  ;;  %v5262_v33 = vsel %vm4821_vm5, %v1243_v9, %v1176_v8  ;;  %v1060_v25 = vrot.slane %v1058_v27, 7  ;;  %v1177_v50 = vrot.slane %v857_v49, 7  ;;  %v1067_v54 = vrot.slane %v1065_v14, 7 }
  0xbc   : > { %1681 = vrot.lane.b32.xlu1 %v1626_v1, %s4496_s21  ;;  %v859_v44 = vpack.c.bf16 %v827_v47, %v827_v47  ;;  %v1475_v57 = vshll.u32 %v5262_v33, 16  ;;  %v1178_v31 = vrot.slane %v858_v29, 7  ;;  %v828_v15 = vmul.f32 %v4455_v41, %v5961_v20  ;;  %v5269_v10 = vpop.permute.xlu0 %1653 }
  0xbd   : > { %v1063_v12 = vor.u32 %v1061_v52, %v1060_v25  ;;  %v1471_v36 = vor.u32 %v1470_v38, %v1466_v17  ;;  %v1070_v24 = vor.u32 %v1068_v2, %v1067_v54  ;;  %v1627_v60 = vrot.slane %v5228_v63, 1  ;;  %v5281_v4 = vpop.permute.xlu1 %1651 }
  0xbe   : > { %v1072_v53 = vshrl.u32 %v859_v44, 16  ;;  %v1075_v23 = vshll.u32 %v859_v44, 16  ;;  %v860_v26 = vpack.c.bf16 %v828_v15, %v828_v15  ;;  %v1628_v43 = vrot.slane %v5240_v62, 1 }
  0xbf   : > { %1555 = vrot.lane.b32.xlu0 %v1457_v22, %s4497_s22  ;;  %v1244_v1 = vsel %vm4815_vm4, %v857_v49, %v1063_v12  ;;  %v1245_v41 = vsel %vm4815_vm4, %v858_v29, %v1070_v24  ;;  %v1629_v58 = vrot.slane %v5252_v37, 1  ;;  %v1179_v48 = vrot.slane %v859_v44, 7 }
  0xc0   : > { %1557 = vrot.lane.b32.xlu1 %v1464_v56, %s4497_s22  ;;  %v5277_v20 = vsel %vm4821_vm5, %v1244_v1, %v1177_v50  ;;  %v1074_v11 = vrot.slane %v1072_v53, 7  ;;  %v5287_v8 = vsel %vm4821_vm5, %v1245_v41, %v1178_v31  ;;  %v1473_v49 = vshrl.u32 %v5262_v33, 16  ;;  %v5296_v38 = vpop.permute.xlu0 %1657 }
  0xc1   : > { %v1482_v42 = vshll.u32 %v5277_v20, 16  ;;  %v1477_v22 = vrot.slane %v1475_v57, 1  ;;  %v1489_v30 = vshll.u32 %v5287_v8, 16  ;;  %v1480_v47 = vshrl.u32 %v5277_v20, 16  ;;  %v1656_v57 = vpop.permute.xlu1 %1655 }
  0xc2   : > { %v1077_v29 = vor.u32 %v1075_v23, %v1074_v11  ;;  %v1079_v9 = vshrl.u32 %v860_v26, 16  ;;  %v1082_v27 = vshll.u32 %v860_v26, 16  ;;  %v1487_v25 = vshrl.u32 %v5287_v8, 16 }
  0xc3   : > { %1559 = vrot.lane.b32.xlu0 %v1471_v36, %s4497_s22  ;;  %v1484_v17 = vrot.slane %v1482_v42, 1  ;;  %v1478_v56 = vor.u32 %v1477_v22, %v1473_v49  ;;  %v1491_v50 = vrot.slane %v1489_v30, 1  ;;  %v1180_v15 = vrot.slane %v860_v26, 7 }
  0xc4   : > { %1683 = vrot.lane.b32.xlu1 %v1627_v60, %s4496_s21  ;;  %v1246_v52 = vsel %vm4815_vm4, %v859_v44, %v1077_v29  ;;  %v1081_v2 = vrot.slane %v1079_v9, 7  ;;  %v5310_v23 = vpop.permute.xlu0 %1663  ;;  %v1630_v41 = vrot.slane %v5262_v33, 1  ;;  %v5964_v9 = vld [vmem:[#allocation7_spill] sm:$0xff] }
  0xc5   : > { %v5300_v14 = vsel %vm4821_vm5, %v1246_v52, %v1179_v48  ;;  %v1485_v12 = vor.u32 %v1484_v17, %v1480_v47  ;;  %v1492_v53 = vor.u32 %v1491_v50, %v1487_v25 }
  0xc6   : > { %v1496_v54 = vshll.u32 %v5300_v14, 16  ;;  %v1494_v44 = vshrl.u32 %v5300_v14, 16  ;;  %v1084_v31 = vor.u32 %v1082_v27, %v1081_v2  ;;  %v1633_v49 = vrot.slane %v5300_v14, 1 }
  0xc7   : > { %1685 = vrot.lane.b32.xlu0 %v1628_v43, %s4496_s21  ;;  %v1660_v43 = vpop.permute.xlu1 %1659 }
  0xc8   : > { %1687 = vrot.lane.b32.xlu1 %v1629_v58, %s4496_s21  ;;  %v1498_v36 = vrot.slane %v1496_v54, 1  ;;  %v1247_v24 = vsel %vm4815_vm4, %v860_v26, %v1084_v31  ;;  %v1631_v26 = vrot.slane %v5277_v20, 1  ;;  %v1632_v58 = vrot.slane %v5287_v8, 1 }
  0xc9   : > { %v5315_v1 = vsel %vm4821_vm5, %v1247_v24, %v1180_v15  ;;  %v5966_v15 = vld [vmem:[#allocation9_spill] sm:$0xff] }
  0xca   : > { %v1499_v60 = vor.u32 %v1498_v36, %v1494_v44  ;;  %v1503_v21 = vshll.u32 %v5315_v1, 16  ;;  %v1501_v32 = vshrl.u32 %v5315_v1, 16  ;;  %v1634_v29 = vrot.slane %v5315_v1, 1 }
  0xcb   : > { %1561 = vrot.lane.b32.xlu0 %v1478_v56, %s4497_s22  ;;  %v1662_v48 = vpop.permute.xlu1 %1661 }
  0xcc   : > { %1563 = vrot.lane.b32.xlu1 %v1485_v12, %s4497_s22  ;;  %v5322_v11 = vpop.permute.xlu0 %1637  ;;  %v1505_v42 = vrot.slane %v1503_v21, 1  ;;  %v5965_v12 = vld [vmem:[#allocation6_spill] sm:$0xff] }
  0xce   : > { %v1506_v22 = vor.u32 %v1505_v42, %v1501_v32  ;;  %v5968_v32 = vld [vmem:[#allocation10_spill] sm:$0xff] }
  0xcf   : > { %1565 = vrot.lane.b32.xlu0 %v1492_v53, %s4497_s22 }
  0xd0   : > { %1567 = vrot.lane.b32.xlu1 %v1499_v60, %s4497_s22  ;;  %v5967_v60 = vld [vmem:[#allocation8_spill] sm:$0xff] }
  0xd3   : > { %1689 = vrot.lane.b32.xlu0 %v1630_v41, %s4496_s21 }
  0xd4   : > { %1691 = vrot.lane.b32.xlu1 %v1631_v26, %s4496_s21  ;;  %v2133_v26 = vsel %vm1934_vm6, %v5092_v3, 0  ;;  %v5969_v3 = vld [vmem:[#allocation11_spill] sm:$0xff] }
  0xd7   : > { %1693 = vrot.lane.b32.xlu0 %v1632_v58, %s4496_s21  ;;  %v4313_v58 = vld [vmem:[%s5934_s4 + $0xc] sm:$0xff]  }
  0xd8   : > { %1695 = vrot.lane.b32.xlu1 %v1633_v49, %s4496_s21 }
  0xda   : > { %v5330_v30 = vpop.permute.xlu0 %1641 }
  0xdb   : > { %1569 = vrot.lane.b32.xlu0 %v1506_v22, %s4497_s22 }
  0xdc   : > { %1697 = vrot.lane.b32.xlu1 %v1634_v29, %s4496_s21 }
  0xdd   : > { %v1636_v47 = vpop.permute.xlu1 %1635 }
  0xde   : > { %v1524_v17 = vpop.permute.xlu0 %1523 }
  0xdf   : > { %v1717_v27 = vsel %vm1699_vm7, %v5964_v9, %v1524_v17 }
  0xe0   : > { %v5340_v2 = vsel %vm1764_vm8, %v1717_v27, %v5281_v4 }
  0xe1   : > { %v1640_v52 = vpop.permute.xlu1 %1639  ;;  %v5344_v56 = vcombine.low %v5340_v2, %v5340_v2 }
  0xe2   : > { %v1526_v25 = vpop.permute.xlu0 %1525 }
  0xe3   : > { %4085 = vmatprep.mubr.msk.bf16.mxu1 %vm1909_vm9, %v5344_v56  ;;  %v1719_v44 = vsel %vm1699_vm7, %v5965_v12, %v1526_v25 }
  0xe4   : > { %v5354_v4 = vsel %vm1764_vm8, %v1719_v44, %v5269_v10 }
  0xe5   : > { %v1644_v50 = vpop.permute.xlu1 %1643 }
  0xe6   : > { %v1530_v54 = vpop.permute.xlu0 %1529 }
  0xe7   : > { %v1723_v41 = vsel %vm1699_vm7, %v5967_v60, %v1530_v54 }
  0xe8   : > { %v5376_v42 = vsel %vm1764_vm8, %v1723_v41, %v5296_v38  ;;  %v4315_v38 = vld [vmem:[%s5934_s4 + $0x2c] ss:$0 sps:$4 sm:$0xff]   ;;  %v2302_v41 = vsel %vm1934_vm6, %v5099_v34, 0 }
  0xe9   : > { %v1528_v31 = vpop.permute.xlu1 %1527 }
  0xea   : > { %v1721_v36 = vsel %vm1699_vm7, %v5966_v15, %v1528_v31  ;;  %v1534_v53 = vpop.permute.xlu0 %1533 }
  0xeb   : > { %v5357_v24 = vsel %vm1764_vm8, %v1721_v36, %v1656_v57  ;;  %v1727_v29 = vsel %vm1699_vm7, %v5969_v3, %v1534_v53 }
  0xec   : > { %v5363_v21 = vcombine.low %v5354_v4, %v5357_v24  ;;  %v5398_v12 = vsel %vm1764_vm8, %v1727_v29, %v1662_v48  ;;  %v5449_v29 = vld [vmem:[%s5934_s4 + $0x44] ss:$0 sps:$4 sm:$0xff]  }
  0xed   : > { %v1532_v10 = vpop.permute.xlu1 %1531 }
  0xee   : > { %v1725_v57 = vsel %vm1699_vm7, %v5968_v32, %v1532_v10  ;;  %4086 = vmatmul.mubr.msk.bf16.vlgmr.msra.gmra.mxu1 %vm1909_vm9, %v5363_v21  ;;  %v1508_v22 = vpop.permute.xlu0 %1507  ;;  %v2493_v32 = vsel %vm1934_vm6, %v4315_v38, 0 }
  0xef   : > { %v5379_v49 = vsel %vm1764_vm8, %v1725_v57, %v1660_v43  ;;  %4094 = vmatpush3.bf16.msra.mxu1 %v2133_v26  ;;  %v1701_v9 = vsel %vm1699_vm7, %v4955_v28, %v1508_v22 }
  0xf0   : > { %v5385_v17 = vcombine.low %v5376_v42, %v5379_v49  ;;  %4095 = vmatprep.subr.bf16.mxu1 %v4313_v58  ;;  %v1766_v43 = vsel %vm1764_vm8, %v1701_v9, %v1636_v47 }
  0xf1   : > { %v1536_v27 = vpop.permute.xlu1 %1535  ;;  %v3828_v54 = vcombine.low %v1766_v43, %v1766_v43 }
  0xf2   : > { %v1729_v25 = vsel %vm1699_vm7, %v4872_v7, %v1536_v27  ;;  %4089 = vmatprep.mubr.msk.bf16.mxu1 %vm1909_vm9, %v5385_v17  ;;  %v1512_v44 = vpop.permute.xlu0 %1511 }
  0xf3   : > { %v5402_v28 = vsel %vm1764_vm8, %v1729_v25, %v5310_v23  ;;  %4096 = vmatpush3.bf16.msra.mxu1 %v4313_v58  ;;  %v1705_v7 = vsel %vm1699_vm7, %v4969_v61, %v1512_v44  ;;  %4077 = vmatprep.mubr.msk.bf16.mxu0 %vm1909_vm9, %v3828_v54 }
  0xf4   : > { %v5406_v31 = vcombine.low %v5398_v12, %v5402_v28  ;;  %4261 = vmatprep.subr.msk.bf16.mxu1 %vm1934_vm6, %v4315_v38  ;;  %v1770_v48 = vsel %vm1764_vm8, %v1705_v7, %v1640_v52  ;;  %v4316_v52 = vld [vmem:[%s5934_s4 + $0x18] sm:$0xff]   ;;  %v4498_v7 = vmov 0.0  }
  0xf5   : > { %v1510_v47 = vpop.permute.xlu1 %1509  ;;  %1839 = vst.msk [vmem:[#allocation2 + $0x50] sm:$0xff] %vm1699_vm7, %v4498_v7  ;;  %1829 = vst.msk [vmem:[#allocation2] sm:$0xff] %vm1699_vm7, %v4498_v7 }
  0xf6   : > { %v1703_v23 = vsel %vm1699_vm7, %v4896_v40, %v1510_v47  ;;  %4090 = vmatmul.mubr.msk.bf16.gmra.mxu1 %vm1909_vm9, %v5406_v31  ;;  %v1514_v36 = vpop.permute.xlu0 %1513  ;;  %1830 = vst.msk [vmem:[#allocation2 + $0x8] sm:$0xff] %vm1699_vm7, %v4498_v7  ;;  %1831 = vst.msk [vmem:[#allocation2 + $0x10] sm:$0xff] %vm1699_vm7, %v4498_v7  ;;  %v3853_v47 = vcombine.low %v5340_v2, %v5354_v4  ;;  %v3854_v2 = vcombine.low %v5357_v24, %v5376_v42 }
  0xf7   : > { %v1768_v15 = vsel %vm1764_vm8, %v1703_v23, %v5322_v11  ;;  %v1707_v61 = vsel %vm1699_vm7, %v4947_v5, %v1514_v36  ;;  %1832 = vst.msk [vmem:[#allocation2 + $0x18] sm:$0xff] %vm1699_vm7, %v4498_v7  ;;  %1833 = vst.msk [vmem:[#allocation2 + $0x20] sm:$0xff] %vm1699_vm7, %v4498_v7  ;;  %v4319_v36 = vld [vmem:[%s5934_s4 + $0x30] sm:$0xff]  }
  0xf8   : > { %v3829_v53 = vcombine.low %v1768_v15, %v1770_v48  ;;  %v3849_v60 = vcombine.low %v1766_v43, %v1768_v15  ;;  %v1772_v26 = vsel %vm1764_vm8, %v1707_v61, %v5330_v30  ;;  %v4317_v30 = vld [vmem:[%s5934_s4 + $0x38] ss:$0 sps:$4 sm:$0xff]   ;;  %1834 = vst.msk [vmem:[#allocation2 + $0x28] sm:$0xff] %vm1699_vm7, %v4498_v7  ;;  %1835 = vst.msk [vmem:[#allocation2 + $0x30] sm:$0xff] %vm1699_vm7, %v4498_v7 }
  0xf9   : > { %v1516_v40 = vpop.permute.xlu1 %1515  ;;  %v3850_v58 = vcombine.low %v1770_v48, %v1772_v26  ;;  %1836 = vst.msk [vmem:[#allocation2 + $0x38] sm:$0xff] %vm1699_vm7, %v4498_v7  ;;  %1837 = vst.msk [vmem:[#allocation2 + $0x40] sm:$0xff] %vm1699_vm7, %v4498_v7  ;;  %v2672_v15 = vsel %vm1934_vm6, %v4317_v30, 0  ;;  %v3855_v61 = vcombine.low %v5379_v49, %v5398_v12 }
  0xfa   : > { %v1709_v11 = vsel %vm1699_vm7, %v4985_v39, %v1516_v40  ;;  %4078 = vmatmul.mubr.msk.bf16.vlgmr.msra.gmra.mxu0 %vm1909_vm9, %v3829_v53  ;;  %4097 = vmatprep.mubr.msk.bf16.mxu1 %vm1909_vm9, %v3849_v60  ;;  %v1520_v34 = vpop.permute.xlu0 %1519  ;;  %v4318_v39 = vld [vmem:[%s5934_s4 + $0x24] sm:$0xff]   ;;  %1838 = vst.msk [vmem:[#allocation2 + $0x48] sm:$0xff] %vm1699_vm7, %v4498_v7  ;;  %1840 = vst.msk [vmem:[#allocation2 + $0x58] sm:$0xff] %vm1699_vm7, %v4498_v7  ;;  %v4321_v60 = vld [vmem:[%s5934_s4 + $0x50] ss:$0 sps:$4 sm:$0xff]  }
  0xfb   : > { %v1774_v5 = vsel %vm1764_vm8, %v1709_v11, %v1644_v50  ;;  %4114 = vmatpush3.bf16.msra.mxu0 %v2302_v41  ;;  %v1713_v9 = vsel %vm1699_vm7, %v5026_v35, %v1520_v34  ;;  %1841 = vst.msk [vmem:[#allocation2 + $0x60] sm:$0xff] %vm1699_vm7, %v4498_v7  ;;  %1842 = vst.msk [vmem:[#allocation2 + $0x68] sm:$0xff] %vm1699_vm7, %v4498_v7  ;;  %v4324_v34 = vld [vmem:[%s5934_s4 + $0x5c] ss:$0 sps:$4 sm:$0xff]  }
  0xfc   : > { %v3830_v10 = vcombine.low %v1772_v26, %v1774_v5  ;;  %4115 = vmatprep.subr.bf16.mxu0 %v4316_v52  ;;  %1843 = vst.msk [vmem:[#allocation2 + $0x70] sm:$0xff] %vm1699_vm7, %v4498_v7  ;;  %1844 = vst.msk [vmem:[#allocation2 + $0x78] sm:$0xff] %vm1699_vm7, %v4498_v7  ;;  %v2837_v26 = vsel %vm1934_vm6, %v5449_v29, 0 }
  0xfd   : > { %v1518_v57 = vpop.permute.xlu1 %1517 }
  0xfe   : > { %4081 = vmatprep.mubr.msk.bf16.mxu0 %vm1909_vm9, %v3830_v10  ;;  %4098 = vmatmul.mubr.msk.bf16.vlgmr.msra.gmra.mxu1 %vm1909_vm9, %v3850_v58  ;;  %v1711_v50 = vsel %vm1699_vm7, %v5038_v45, %v1518_v57  ;;  %v1646_v22 = vpop.permute.xlu0 %1645 }
  0xff   : > { %4134 = vmatpush3.bf16.msra.mxu1 %v2493_v32  ;;  %4116 = vmatpush3.bf16.msra.mxu0 %v4316_v52  ;;  %v1776_v3 = vsel %vm1764_vm8, %v1711_v50, %v1646_v22 }
 0x100   : > { %4262 = vmatprep.subr.msk.bf16.mxu0 %vm1934_vm6, %v4317_v30  ;;  %4135 = vmatprep.subr.bf16.mxu1 %v4318_v39  ;;  %v3851_v27 = vcombine.low %v1774_v5, %v1776_v3 }
 0x101   : > { %v1648_v38 = vpop.permute.xlu1 %1647 }
 0x102   : > { %v1778_v45 = vsel %vm1764_vm8, %v1713_v9, %v1648_v38  ;;  %4101 = vmatprep.mubr.msk.bf16.mxu1 %vm1909_vm9, %v3851_v27  ;;  %v1522_v25 = vpop.permute.xlu0 %1521 }
 0x103   : > { %v3831_v43 = vcombine.low %v1776_v3, %v1778_v45  ;;  %4136 = vmatpush3.bf16.msra.mxu1 %v4318_v39  ;;  %v1715_v54 = vsel %vm1699_vm7, %v5071_v16, %v1522_v25  ;;  %v3028_v3 = vsel %vm1934_vm6, %v4321_v60, 0 }
 0x104   : > { %4263 = vmatprep.subr.msk.bf16.mxu1 %vm1934_vm6, %v5449_v29  ;;  %v4323_v29 = vld [vmem:[%s5934_s4 + $0x48] sm:$0xff]  }
 0x105   : > { %4082 = vmatmul.mubr.msk.bf16.gmra.mxu0 %vm1909_vm9, %v3831_v43  ;;  %v1650_v44 = vpop.permute.xlu1 %1649 }
 0x106   : > { %v1780_v35 = vsel %vm1764_vm8, %v1715_v54, %v1650_v44  ;;  %4117 = vmatprep.mubr.msk.bf16.mxu0 %vm1909_vm9, %v3829_v53  ;;  %v1538_v48 = vpop.permute.xlu0 %1537 }
 0x107   : > { %v3852_v16 = vcombine.low %v1778_v45, %v1780_v35  ;;  %v1731_v41 = vsel %vm1699_vm7, %v5045_v55, %v1538_v48  ;;  %v3870_v52 = vcombine.low %v1780_v35, %v1780_v35 }
 0x109   : > { %4102 = vmatmul.mubr.msk.bf16.gmra.mxu1 %vm1909_vm9, %v3852_v16  ;;  %v1666_v23 = vpop.permute.xlu1 %1665 }
 0x10a   : > { %4105 = vmatprep.mubr.msk.bf16.mxu1 %vm1909_vm9, %v3853_v47  ;;  %v1540_v53 = vpop.permute.xlu0 %1539  ;;  %v1796_v24 = vsel %vm1764_vm8, %v1731_v41, %v1666_v23 }
 0x10b   : > { %v3856_v49 = vcombine.low %v5402_v28, %v1796_v24  ;;  %v4322_v28 = vld [vmem:[%s5934_s4 + $0x3c] sm:$0xff]   ;;  %v5523_v5 = vcombine.low %v1796_v24, %v1796_v24 }
 0x10d   : > { %4118 = vmatmul.mubr.msk.bf16.vlgmr.msra.gmra.mxu0 %vm1909_vm9, %v3830_v10  ;;  %v1542_v4 = vpop.permute.xlu1 %1541 }
 0x10e   : > { %4154 = vmatpush3.bf16.msra.mxu0 %v2672_v15  ;;  %4121 = vmatprep.mubr.msk.bf16.mxu0 %vm1909_vm9, %v3831_v43  ;;  %v1544_v42 = vpop.permute.xlu0 %1543  ;;  %v1735_v39 = vsel %vm1699_vm7, %v5126_v0, %v1542_v4  ;;  %v4325_v43 = vld [vmem:[%s5934_s4 + $0x68] ss:$0 sps:$4 sm:$0xff]   ;;  %v3207_v4 = vsel %vm1934_vm6, %v4324_v34, 0 }
 0x10f   : > { %4155 = vmatprep.subr.bf16.mxu0 %v4319_v36  ;;  %v1737_v57 = vsel %vm1699_vm7, %v5136_v6, %v1544_v42 }
 0x111   : > { %4106 = vmatmul.mubr.msk.bf16.gmra.mxu1 %vm1909_vm9, %v3854_v2  ;;  %v1668_v40 = vpop.permute.xlu1 %1667 }
 0x112   : > { %4109 = vmatprep.mubr.msk.bf16.mxu1 %vm1909_vm9, %v3855_v61  ;;  %4156 = vmatpush3.bf16.msra.mxu0 %v4319_v36  ;;  %v1670_v55 = vpop.permute.xlu0 %1669 }
 0x113   : > { %4264 = vmatprep.subr.msk.bf16.mxu0 %vm1934_vm6, %v4321_v60  ;;  %v1800_v0 = vsel %vm1764_vm8, %v1735_v39, %v1670_v55 }
 0x115   : > { %4122 = vmatmul.mubr.msk.bf16.gmra.mxu0 %vm1909_vm9, %v3870_v52  ;;  %v1672_v12 = vpop.permute.xlu1 %1671 }
 0x116   : > { %4125 = vmatprep.mubr.msk.bf16.mxu0 %vm1909_vm9, %v5363_v21  ;;  %v1802_v9 = vsel %vm1764_vm8, %v1737_v57, %v1672_v12 }
 0x119   : > { %4110 = vmatmul.mubr.msk.bf16.gmra.mxu1 %vm1909_vm9, %v3856_v49 }
 0x11a   : > { %4137 = vmatprep.mubr.msk.bf16.mxu1 %vm1909_vm9, %v5344_v56  ;;  %v1733_v56 = vsel %vm1699_vm7, %v5105_v46, %v1540_v53 }
 0x11b   : > { %v1798_v10 = vsel %vm1764_vm8, %v1733_v56, %v1668_v40 }
 0x11c   : > { %v3885_v46 = vcombine.low %v1798_v10, %v1798_v10  ;;  %v5570_v7 = vcombine.low %v1798_v10, %v1800_v0 }
 0x11d   : > { %4126 = vmatmul.mubr.msk.bf16.gmra.mxu0 %vm1909_vm9, %v5385_v17  ;;  %v1546_v11 = vpop.permute.xlu0 %1545 }
 0x11e   : > { %4129 = vmatprep.mubr.msk.bf16.mxu0 %vm1909_vm9, %v5406_v31  ;;  %v1548_v58 = vpop.permute.xlu1 %1547  ;;  %v1739_v6 = vsel %vm1699_vm7, %v5169_v18, %v1546_v11 }
 0x11f   : > { %v1741_v50 = vsel %vm1699_vm7, %v5179_v19, %v1548_v58  ;;  %v5553_v19 = vcombine.low %v1800_v0, %v1802_v9 }
 0x121   : > { %4138 = vmatmul.mubr.msk.bf16.vlgmr.msra.gmra.mxu1 %vm1909_vm9, %v5363_v21  ;;  %v1550_v30 = vpop.permute.xlu0 %1549 }
 0x122   : > { %4141 = vmatprep.mubr.msk.bf16.mxu1 %vm1909_vm9, %v5385_v17  ;;  %4174 = vmatpush3.bf16.msra.mxu1 %v2837_v26  ;;  %v1552_v32 = vpop.permute.xlu1 %1551  ;;  %v1743_v35 = vsel %vm1699_vm7, %v5187_v13, %v1550_v30 }
 0x123   : > { %4175 = vmatprep.subr.bf16.mxu1 %v4322_v28  ;;  %v1745_v44 = vsel %vm1699_vm7, %v5195_v51, %v1552_v32 }
 0x125   : > { %4130 = vmatmul.mubr.msk.bf16.gmra.mxu0 %vm1909_vm9, %v5523_v5  ;;  %v1674_v38 = vpop.permute.xlu0 %1673 }
 0x126   : > { %4157 = vmatprep.mubr.msk.bf16.mxu0 %vm1909_vm9, %v3853_v47  ;;  %4176 = vmatpush3.bf16.msra.mxu1 %v4322_v28  ;;  %v1676_v22 = vpop.permute.xlu1 %1675  ;;  %v1804_v45 = vsel %vm1764_vm8, %v1739_v6, %v1674_v38 }
 0x127   : > { %4265 = vmatprep.subr.msk.bf16.mxu1 %vm1934_vm6, %v4324_v34  ;;  %v1806_v27 = vsel %vm1764_vm8, %v1741_v50, %v1676_v22  ;;  %v5583_v36 = vcombine.low %v1802_v9, %v1804_v45 }
 0x128   : > { %v5559_v25 = vcombine.low %v1804_v45, %v1806_v27 }
 0x129   : > { %4142 = vmatmul.mubr.msk.bf16.gmra.mxu1 %vm1909_vm9, %v5406_v31  ;;  %v1678_v18 = vpop.permute.xlu0 %1677 }
 0x12a   : > { %4145 = vmatprep.mubr.msk.bf16.mxu1 %vm1909_vm9, %v3885_v46  ;;  %v1680_v54 = vpop.permute.xlu1 %1679  ;;  %v1808_v51 = vsel %vm1764_vm8, %v1743_v35, %v1678_v18 }
 0x12b   : > { %v1810_v16 = vsel %vm1764_vm8, %v1745_v44, %v1680_v54  ;;  %v5585_v53 = vcombine.low %v1806_v27, %v1808_v51  ;;  %v1856_v44 = vld [vmem:[#allocation2 + $0x58] sm:$0xff] }
 0x12c   : > { %v5577_v23 = vcombine.low %v1808_v51, %v1810_v16 }
 0x12d   : > { %4158 = vmatmul.mubr.msk.bf16.vlgmr.msra.gmra.mxu0 %vm1909_vm9, %v3854_v2  ;;  %v1554_v47 = vpop.permute.xlu0 %1553 }
 0x12e   : > { %4194 = vmatpush3.bf16.msra.mxu0 %v3028_v3  ;;  %4161 = vmatprep.mubr.msk.bf16.mxu0 %vm1909_vm9, %v3855_v61  ;;  %v1682_v48 = vpop.permute.xlu1 %1681  ;;  %v1747_v2 = vsel %vm1699_vm7, %v5220_v59, %v1554_v47 }
 0x12f   : > { %4195 = vmatprep.subr.bf16.mxu0 %v4323_v29  ;;  %v1812_v60 = vsel %vm1764_vm8, %v1747_v2, %v1682_v48  ;;  %v1859_v48 = vld [vmem:[#allocation2 + $0x70] sm:$0xff] }
 0x130   : > { %v3905_v59 = vcombine.low %v1810_v16, %v1812_v60  ;;  %v3919_v56 = vcombine.low %v1812_v60, %v1812_v60  ;;  %v1854_v16 = vld [vmem:[#allocation2 + $0x48] sm:$0xff]  ;;  %v1847_v2 = vld [vmem:[#allocation2 + $0x10] sm:$0xff] }
 0x131   : > { %4146 = vmatmul.mubr.msk.bf16.gmra.mxu1 %vm1909_vm9, %v5553_v19  ;;  %v1556_v13 = vpop.permute.xlu0 %1555 }
 0x132   : > { %4149 = vmatprep.mubr.msk.bf16.mxu1 %vm1909_vm9, %v5559_v25  ;;  %4196 = vmatpush3.bf16.msra.mxu0 %v4323_v29  ;;  %v1558_v15 = vpop.permute.xlu1 %1557 }
 0x133   : > { %4266 = vmatprep.subr.msk.bf16.mxu0 %vm1934_vm6, %v4325_v43 }
 0x135   : > { %4162 = vmatmul.mubr.msk.bf16.gmra.mxu0 %vm1909_vm9, %v3856_v49  ;;  %v1560_v61 = vpop.permute.xlu0 %1559  ;;  %v1749_v49 = vsel %vm1699_vm7, %v5228_v63, %v1556_v13  ;;  %v1751_v63 = vsel %vm1699_vm7, %v5240_v62, %v1558_v15  ;;  %v1857_v15 = vld [vmem:[#allocation2 + $0x60] sm:$0xff] }
 0x136   : > { %4165 = vmatprep.mubr.msk.bf16.mxu0 %vm1909_vm9, %v5570_v7  ;;  %v1684_v41 = vpop.permute.xlu1 %1683  ;;  %v1753_v11 = vsel %vm1699_vm7, %v5252_v37, %v1560_v61 }
 0x137   : > { %v1814_v55 = vsel %vm1764_vm8, %v1749_v49, %v1684_v41  ;;  %v1845_v41 = vld [vmem:[#allocation2] sm:$0xff] }
 0x138   : > { %v3933_v28 = vcombine.low %v1814_v55, %v1814_v55 }
 0x139   : > { %4150 = vmatmul.mubr.msk.bf16.gmra.mxu1 %vm1909_vm9, %v5577_v23  ;;  %v1686_v52 = vpop.permute.xlu0 %1685 }
 0x13a   : > { %4177 = vmatprep.mubr.msk.bf16.mxu1 %vm1909_vm9, %v5363_v21  ;;  %v4326_v21 = vld [vmem:[%s5934_s4 + $0x54] sm:$0xff]   ;;  %v1688_v24 = vpop.permute.xlu1 %1687 }
 0x13b   : > { %v1818_v34 = vsel %vm1764_vm8, %v1753_v11, %v1688_v24 }
 0x13d   : > { %4166 = vmatmul.mubr.msk.bf16.gmra.mxu0 %vm1909_vm9, %v5583_v36  ;;  %v1562_v42 = vpop.permute.xlu0 %1561 }
 0x13e   : > { %4169 = vmatprep.mubr.msk.bf16.mxu0 %vm1909_vm9, %v5585_v53  ;;  %v1564_v40 = vpop.permute.xlu1 %1563  ;;  %v1755_v10 = vsel %vm1699_vm7, %v5262_v33, %v1562_v42  ;;  %v1848_v42 = vld [vmem:[#allocation2 + $0x18] sm:$0xff] }
 0x13f   : > { %v1757_v58 = vsel %vm1699_vm7, %v5277_v20, %v1564_v40 }
 0x141   : > { %4178 = vmatmul.mubr.msk.bf16.vlgmr.msra.gmra.mxu1 %vm1909_vm9, %v5385_v17  ;;  %v3372_v17 = vsel %vm1934_vm6, %v4325_v43, 0  ;;  %v1566_v12 = vpop.permute.xlu0 %1565 }
 0x142   : > { %4181 = vmatprep.mubr.msk.bf16.mxu1 %vm1909_vm9, %v5406_v31  ;;  %4214 = vmatpush3.bf16.msra.mxu1 %v3207_v4  ;;  %v4327_v31 = vld [vmem:[%s5934_s4 + $0x60] sm:$0xff]   ;;  %v1568_v26 = vpop.permute.xlu1 %1567  ;;  %v1759_v33 = vsel %vm1699_vm7, %v5287_v8, %v1566_v12  ;;  %v1860_v4 = vld [vmem:[#allocation2 + $0x78] sm:$0xff] }
 0x143   : > { %4215 = vmatprep.subr.bf16.mxu1 %v4326_v21  ;;  %v1761_v39 = vsel %vm1699_vm7, %v5300_v14, %v1568_v26  ;;  %v1846_v26 = vld [vmem:[#allocation2 + $0x8] sm:$0xff] }
 0x145   : > { %4170 = vmatmul.mubr.msk.bf16.gmra.mxu0 %vm1909_vm9, %v3905_v59  ;;  %v1690_v62 = vpop.permute.xlu0 %1689 }
 0x146   : > { %4197 = vmatprep.mubr.msk.bf16.mxu0 %vm1909_vm9, %v3885_v46  ;;  %4216 = vmatpush3.bf16.msra.mxu1 %v4326_v21  ;;  %v1692_v32 = vpop.permute.xlu1 %1691  ;;  %v1820_v30 = vsel %vm1764_vm8, %v1755_v10, %v1690_v62 }
 0x147   : > { %v1822_v37 = vsel %vm1764_vm8, %v1757_v58, %v1692_v32  ;;  %v3951_v0 = vcombine.low %v1818_v34, %v1820_v30  ;;  %v1849_v32 = vld [vmem:[#allocation2 + $0x20] sm:$0xff] }
 0x148   : > { %v3935_v46 = vcombine.low %v1820_v30, %v1822_v37 }
 0x149   : > { %4182 = vmatmul.mubr.msk.bf16.gmra.mxu1 %vm1909_vm9, %v5523_v5  ;;  %v1816_v5 = vsel %vm1764_vm8, %v1751_v63, %v1686_v52  ;;  %v1694_v57 = vpop.permute.xlu0 %1693 }
 0x14a   : > { %4185 = vmatprep.mubr.msk.bf16.mxu1 %vm1909_vm9, %v5553_v19  ;;  %v3934_v20 = vcombine.low %v1816_v5, %v1818_v34  ;;  %v1696_v50 = vpop.permute.xlu1 %1695  ;;  %v1824_v3 = vsel %vm1764_vm8, %v1759_v33, %v1694_v57  ;;  %v3950_v29 = vcombine.low %v1814_v55, %v1816_v5  ;;  %v1851_v5 = vld [vmem:[#allocation2 + $0x30] sm:$0xff]  ;;  %v1852_v33 = vld [vmem:[#allocation2 + $0x38] sm:$0xff] }
 0x14b   : > { %v1826_v22 = vsel %vm1764_vm8, %v1761_v39, %v1696_v50  ;;  %v3952_v9 = vcombine.low %v1822_v37, %v1824_v3 }
 0x14c   : > { %v3936_v14 = vcombine.low %v1824_v3, %v1826_v22 }
 0x14d   : > { %4198 = vmatmul.mubr.msk.bf16.vlgmr.msra.gmra.mxu0 %vm1909_vm9, %v5553_v19  ;;  %v1570_v8 = vpop.permute.xlu0 %1569 }
 0x14e   : > { %4234 = vmatpush3.bf16.msra.mxu0 %v3372_v17  ;;  %4201 = vmatprep.mubr.msk.bf16.mxu0 %vm1909_vm9, %v5559_v25  ;;  %v1763_v6 = vsel %vm1699_vm7, %v5315_v1, %v1570_v8  ;;  %v1698_v38 = vpop.permute.xlu1 %1697  ;;  %v1855_v1 = vld [vmem:[#allocation2 + $0x50] sm:$0xff] }
 0x14f   : > { %4235 = vmatprep.subr.bf16.mxu0 %v4327_v31  ;;  %v1828_v27 = vsel %vm1764_vm8, %v1763_v6, %v1698_v38 }
 0x150   : > { %v3967_v45 = vcombine.low %v1828_v27, %v1828_v27 }
 0x151   : > { %4186 = vmatmul.mubr.msk.bf16.gmra.mxu1 %vm1909_vm9, %v5559_v25 }
 0x152   : > { %4189 = vmatprep.mubr.msk.bf16.mxu1 %vm1909_vm9, %v5577_v23  ;;  %4236 = vmatpush3.bf16.msra.mxu0 %v4327_v31 }
 0x155   : > { %4202 = vmatmul.mubr.msk.bf16.gmra.mxu0 %vm1909_vm9, %v5577_v23 }
 0x156   : > { %4205 = vmatprep.mubr.msk.bf16.mxu0 %vm1909_vm9, %v3933_v28 }
 0x159   : > { %4190 = vmatmul.mubr.msk.bf16.gmra.mxu1 %vm1909_vm9, %v3919_v56 }
 0x15a   : > { %4217 = vmatprep.mubr.msk.bf16.mxu1 %vm1909_vm9, %v5570_v7 }
 0x15d   : > { %4206 = vmatmul.mubr.msk.bf16.gmra.mxu0 %vm1909_vm9, %v3934_v20 }
 0x15e   : > { %4209 = vmatprep.mubr.msk.bf16.mxu0 %vm1909_vm9, %v3935_v46 }
 0x161   : > { %4218 = vmatmul.mubr.msk.bf16.vlgmr.msra.gmra.mxu1 %vm1909_vm9, %v5583_v36 }
 0x162   : > { %4221 = vmatprep.mubr.msk.bf16.mxu1 %vm1909_vm9, %v5585_v53 }
 0x165   : > { %4210 = vmatmul.mubr.msk.bf16.gmra.mxu0 %vm1909_vm9, %v3936_v14 }
 0x166   : > { %4237 = vmatprep.mubr.msk.bf16.mxu0 %vm1909_vm9, %v5553_v19  ;;  %v3953_v19 = vcombine.low %v1826_v22, %v1828_v27 }
 0x169   : > { %4222 = vmatmul.mubr.msk.bf16.gmra.mxu1 %vm1909_vm9, %v3905_v59  ;;  %v1858_v59 = vld [vmem:[#allocation2 + $0x68] sm:$0xff] }
 0x16a   : > { %4225 = vmatprep.mubr.msk.bf16.mxu1 %vm1909_vm9, %v3950_v29  ;;  %v1850_v29 = vld [vmem:[#allocation2 + $0x28] sm:$0xff] }
 0x16d   : > { %4238 = vmatmul.mubr.msk.bf16.vlgmr.msra.gmra.mxu0 %vm1909_vm9, %v5559_v25  ;;  %v1853_v25 = vld [vmem:[#allocation2 + $0x40] sm:$0xff] }
 0x16e   : > { %4241 = vmatprep.mubr.msk.bf16.mxu0 %vm1909_vm9, %v5577_v23 }
 0x171   : > { %4226 = vmatmul.mubr.msk.bf16.gmra.mxu1 %vm1909_vm9, %v3951_v0 }
 0x172   : > { %4229 = vmatprep.mubr.msk.bf16.mxu1 %vm1909_vm9, %v3952_v9 }
 0x175   : > { %4242 = vmatmul.mubr.msk.bf16.gmra.mxu0 %vm1909_vm9, %v3919_v56 }
 0x176   : > { %4245 = vmatprep.mubr.msk.bf16.mxu0 %vm1909_vm9, %v3934_v20 }
 0x179   : > { %4230 = vmatmul.mubr.msk.bf16.gmra.mxu1 %vm1909_vm9, %v3953_v19 }
 0x17d   : > { %4246 = vmatmul.mubr.msk.bf16.gmra.mxu0 %vm1909_vm9, %v3935_v46 }
 0x17e   : > { %4249 = vmatprep.mubr.msk.bf16.mxu0 %vm1909_vm9, %v3936_v14 }
 0x185   : > { %4250 = vmatmul.mubr.msk.bf16.gmra.mxu0 %vm1909_vm9, %v3967_v45 }
 0x1ae   : > { %v4087_v43 = vpop.f32.mrf.mxu1 }
 0x1af   : > { %v2045_v18 = vadd.f32 %v4087_v43, %v1855_v1 }
 0x1b0   : > { %v2004_v54 = vpop.f32.mrf.mxu1 }
 0x1b1   : > { %2061 = vst.msk [vmem:[#allocation2 + $0x50] sm:$0xff] %vm1699_vm7, %v2045_v18  ;;  %v2043_v35 = vadd.f32 %v2004_v54, %v1853_v25 }
 0x1b2   : > { %v4088_v7 = vpop.f32.mrf.mxu1 }
 0x1b3   : > { %2059 = vst.msk [vmem:[#allocation2 + $0x40] sm:$0xff] %vm1699_vm7, %v2043_v35  ;;  %v2046_v51 = vadd.f32 %v4088_v7, %v1856_v44 }
 0x1b4   : > { %v2007_v47 = vpop.f32.mrf.mxu1 }
 0x1b5   : > { %2062 = vst.msk [vmem:[#allocation2 + $0x58] sm:$0xff] %vm1699_vm7, %v2046_v51  ;;  %v2044_v23 = vadd.f32 %v2007_v47, %v1854_v16 }
 0x1b6   : > { %v4091_v13 = vpop.f32.mrf.mxu1 }
 0x1b7   : > { %2060 = vst.msk [vmem:[#allocation2 + $0x48] sm:$0xff] %vm1699_vm7, %v2044_v23  ;;  %v2049_v36 = vadd.f32 %v4091_v13, %v1859_v48 }
 0x1b8   : > { %v2020_v53 = vpop.f32.mrf.mxu1  ;;  %v2077_v47 = vld [vmem:[#allocation2 + $0x50] sm:$0xff] }
 0x1b9   : > { %2065 = vst.msk [vmem:[#allocation2 + $0x70] sm:$0xff] %vm1699_vm7, %v2049_v36  ;;  %v2047_v21 = vadd.f32 %v2020_v53, %v1857_v15 }
 0x1ba   : > { %v4079_v60 = vpop.f32.mrf.mxu0  ;;  %v4092_v61 = vpop.f32.mrf.mxu1 }
 0x1bb   : > { %2063 = vst.msk [vmem:[#allocation2 + $0x60] sm:$0xff] %vm1699_vm7, %v2047_v21  ;;  %v2037_v52 = vadd.f32 %v4079_v60, %v1847_v2  ;;  %v2050_v24 = vadd.f32 %v4092_v61, %v1860_v4  ;;  %v2075_v4 = vld [vmem:[#allocation2 + $0x40] sm:$0xff] }
 0x1bc   : > { %v1972_v17 = vpop.f32.mrf.mxu0  ;;  %v2023_v31 = vpop.f32.mrf.mxu1 }
 0x1bd   : > { %2053 = vst.msk [vmem:[#allocation2 + $0x10] sm:$0xff] %vm1699_vm7, %v2037_v52  ;;  %2066 = vst.msk [vmem:[#allocation2 + $0x78] sm:$0xff] %vm1699_vm7, %v2050_v24  ;;  %v2035_v40 = vadd.f32 %v1972_v17, %v1845_v41  ;;  %v2048_v49 = vadd.f32 %v2023_v31, %v1858_v59  ;;  %v2078_v17 = vld [vmem:[#allocation2 + $0x58] sm:$0xff] }
 0x1be   : > { %v4080_v55 = vpop.f32.mrf.mxu0  ;;  %v4099_v12 = vpop.f32.mrf.mxu1 }
 0x1bf   : > { %2051 = vst.msk [vmem:[#allocation2] sm:$0xff] %vm1699_vm7, %v2035_v40  ;;  %2064 = vst.msk [vmem:[#allocation2 + $0x68] sm:$0xff] %vm1699_vm7, %v2048_v49  ;;  %v2038_v28 = vadd.f32 %v4080_v55, %v1848_v42  ;;  %v2076_v55 = vld [vmem:[#allocation2 + $0x48] sm:$0xff] }
 0x1c0   : > { %v1975_v63 = vpop.f32.mrf.mxu0  ;;  %v2169_v11 = vpop.f32.mrf.mxu1 }
 0x1c1   : > { %2054 = vst.msk [vmem:[#allocation2 + $0x18] sm:$0xff] %vm1699_vm7, %v2038_v28  ;;  %v2036_v58 = vadd.f32 %v1975_v63, %v1846_v26 }
 0x1c2   : > { %v4100_v56 = vpop.f32.mrf.mxu1 }
 0x1c3   : > { %2052 = vst.msk [vmem:[#allocation2 + $0x8] sm:$0xff] %vm1699_vm7, %v2036_v58 }
 0x1c4   : > { %v2069_v34 = vld [vmem:[#allocation2 + $0x10] sm:$0xff]  ;;  %v2172_v46 = vpop.f32.mrf.mxu1 }
 0x1c5   : > { %v2234_v10 = vadd.f32 %v4099_v12, %v2069_v34  ;;  %v4083_v62 = vpop.f32.mrf.mxu0 }
 0x1c6   : > { %v2067_v37 = vld [vmem:[#allocation2] sm:$0xff]  ;;  %v2041_v20 = vadd.f32 %v4083_v62, %v1851_v5 }
 0x1c7   : > { %2250 = vst.msk [vmem:[#allocation2 + $0x10] sm:$0xff] %vm1699_vm7, %v2234_v10  ;;  %v2232_v30 = vadd.f32 %v2169_v11, %v2067_v37  ;;  %v1988_v39 = vpop.f32.mrf.mxu0  ;;  %v2081_v11 = vld [vmem:[#allocation2 + $0x70] sm:$0xff]  ;;  %v2079_v62 = vld [vmem:[#allocation2 + $0x60] sm:$0xff] }
 0x1c8   : > { %v2070_v57 = vld [vmem:[#allocation2 + $0x18] sm:$0xff]  ;;  %2057 = vst.msk [vmem:[#allocation2 + $0x30] sm:$0xff] %vm1699_vm7, %v2041_v20  ;;  %v2039_v50 = vadd.f32 %v1988_v39, %v1849_v32 }
 0x1c9   : > { %2248 = vst.msk [vmem:[#allocation2] sm:$0xff] %vm1699_vm7, %v2232_v30  ;;  %v2235_v22 = vadd.f32 %v4100_v56, %v2070_v57  ;;  %v4084_v3 = vpop.f32.mrf.mxu0  ;;  %v4103_v14 = vpop.f32.mrf.mxu1 }
 0x1ca   : > { %v2068_v8 = vld [vmem:[#allocation2 + $0x8] sm:$0xff]  ;;  %2055 = vst.msk [vmem:[#allocation2 + $0x20] sm:$0xff] %vm1699_vm7, %v2039_v50  ;;  %v2042_v0 = vadd.f32 %v4084_v3, %v1852_v33  ;;  %v2082_v33 = vld [vmem:[#allocation2 + $0x78] sm:$0xff] }
 0x1cb   : > { %2251 = vst.msk [vmem:[#allocation2 + $0x18] sm:$0xff] %vm1699_vm7, %v2235_v22  ;;  %v2233_v9 = vadd.f32 %v2172_v46, %v2068_v8  ;;  %v1991_v6 = vpop.f32.mrf.mxu0  ;;  %v2185_v38 = vpop.f32.mrf.mxu1 }
 0x1cc   : > { %2058 = vst.msk [vmem:[#allocation2 + $0x38] sm:$0xff] %vm1699_vm7, %v2042_v0  ;;  %v2040_v27 = vadd.f32 %v1991_v6, %v1850_v29  ;;  %v2080_v0 = vld [vmem:[#allocation2 + $0x68] sm:$0xff] }
 0x1cd   : > { %2249 = vst.msk [vmem:[#allocation2 + $0x8] sm:$0xff] %vm1699_vm7, %v2233_v9  ;;  %v4119_v19 = vpop.f32.mrf.mxu0  ;;  %v4104_v45 = vpop.f32.mrf.mxu1 }
 0x1ce   : > { %2056 = vst.msk [vmem:[#allocation2 + $0x28] sm:$0xff] %vm1699_vm7, %v2040_v27  ;;  %v2266_v1 = vld [vmem:[#allocation2 + $0x10] sm:$0xff] }
 0x1cf   : > { %v2073_v43 = vld [vmem:[#allocation2 + $0x30] sm:$0xff]  ;;  %v2403_v25 = vadd.f32 %v4119_v19, %v2266_v1  ;;  %v2338_v18 = vpop.f32.mrf.mxu0  ;;  %v2188_v54 = vpop.f32.mrf.mxu1 }
 0x1d0   : > { %v2238_v44 = vadd.f32 %v4103_v14, %v2073_v43  ;;  %v2264_v35 = vld [vmem:[#allocation2] sm:$0xff] }
 0x1d1   : > { %v2071_v7 = vld [vmem:[#allocation2 + $0x20] sm:$0xff]  ;;  %2419 = vst.msk [vmem:[#allocation2 + $0x10] sm:$0xff] %vm1699_vm7, %v2403_v25  ;;  %v2401_v16 = vadd.f32 %v2338_v18, %v2264_v35  ;;  %v4120_v51 = vpop.f32.mrf.mxu0  ;;  %v4107_v48 = vpop.f32.mrf.mxu1 }
 0x1d2   : > { %2254 = vst.msk [vmem:[#allocation2 + $0x30] sm:$0xff] %vm1699_vm7, %v2238_v44  ;;  %v2236_v23 = vadd.f32 %v2185_v38, %v2071_v7  ;;  %v2267_v13 = vld [vmem:[#allocation2 + $0x18] sm:$0xff]  ;;  %v2242_v15 = vadd.f32 %v4107_v48, %v2077_v47 }
 0x1d3   : > { %v2074_v36 = vld [vmem:[#allocation2 + $0x38] sm:$0xff]  ;;  %2417 = vst.msk [vmem:[#allocation2] sm:$0xff] %vm1699_vm7, %v2401_v16  ;;  %v2404_v53 = vadd.f32 %v4120_v51, %v2267_v13  ;;  %v2341_v2 = vpop.f32.mrf.mxu0  ;;  %v2201_v21 = vpop.f32.mrf.mxu1 }
 0x1d4   : > { %2252 = vst.msk [vmem:[#allocation2 + $0x20] sm:$0xff] %vm1699_vm7, %v2236_v23  ;;  %v2239_v60 = vadd.f32 %v4104_v45, %v2074_v36  ;;  %2258 = vst.msk [vmem:[#allocation2 + $0x50] sm:$0xff] %vm1699_vm7, %v2242_v15  ;;  %v2265_v61 = vld [vmem:[#allocation2 + $0x8] sm:$0xff]  ;;  %v2240_v41 = vadd.f32 %v2201_v21, %v2075_v4 }
 0x1d5   : > { %v2072_v59 = vld [vmem:[#allocation2 + $0x28] sm:$0xff]  ;;  %2420 = vst.msk [vmem:[#allocation2 + $0x18] sm:$0xff] %vm1699_vm7, %v2404_v53  ;;  %v2402_v52 = vadd.f32 %v2341_v2, %v2265_v61  ;;  %v4123_v24 = vpop.f32.mrf.mxu0  ;;  %v4108_v31 = vpop.f32.mrf.mxu1 }
 0x1d6   : > { %2255 = vst.msk [vmem:[#allocation2 + $0x38] sm:$0xff] %vm1699_vm7, %v2239_v60  ;;  %v2237_v42 = vadd.f32 %v2188_v54, %v2072_v59  ;;  %2256 = vst.msk [vmem:[#allocation2 + $0x40] sm:$0xff] %vm1699_vm7, %v2240_v41  ;;  %v2243_v40 = vadd.f32 %v4108_v31, %v2078_v17 }
 0x1d7   : > { %2418 = vst.msk [vmem:[#allocation2 + $0x8] sm:$0xff] %vm1699_vm7, %v2402_v52  ;;  %v2354_v49 = vpop.f32.mrf.mxu0  ;;  %v2204_v12 = vpop.f32.mrf.mxu1 }
 0x1d8   : > { %2253 = vst.msk [vmem:[#allocation2 + $0x28] sm:$0xff] %vm1699_vm7, %v2237_v42  ;;  %2259 = vst.msk [vmem:[#allocation2 + $0x58] sm:$0xff] %vm1699_vm7, %v2243_v40  ;;  %v2241_v26 = vadd.f32 %v2204_v12, %v2076_v55  ;;  %v2435_v1 = vld [vmem:[#allocation2 + $0x10] sm:$0xff] }
 0x1d9   : > { %v2270_v28 = vld [vmem:[#allocation2 + $0x30] sm:$0xff]  ;;  %v4124_v63 = vpop.f32.mrf.mxu0  ;;  %v4111_v58 = vpop.f32.mrf.mxu1 }
 0x1da   : > { %v2407_v56 = vadd.f32 %v4123_v24, %v2270_v28  ;;  %2257 = vst.msk [vmem:[#allocation2 + $0x48] sm:$0xff] %vm1699_vm7, %v2241_v26  ;;  %v2246_v5 = vadd.f32 %v4111_v58, %v2081_v11  ;;  %v2433_v35 = vld [vmem:[#allocation2] sm:$0xff] }
 0x1db   : > { %v2268_v34 = vld [vmem:[#allocation2 + $0x20] sm:$0xff]  ;;  %v2357_v10 = vpop.f32.mrf.mxu0  ;;  %v2217_v32 = vpop.f32.mrf.mxu1  ;;  %v2274_v37 = vld [vmem:[#allocation2 + $0x50] sm:$0xff] }
 0x1dc   : > { %2423 = vst.msk [vmem:[#allocation2 + $0x30] sm:$0xff] %vm1699_vm7, %v2407_v56  ;;  %v2405_v20 = vadd.f32 %v2354_v49, %v2268_v34  ;;  %2262 = vst.msk [vmem:[#allocation2 + $0x70] sm:$0xff] %vm1699_vm7, %v2246_v5  ;;  %v2244_v30 = vadd.f32 %v2217_v32, %v2079_v62  ;;  %v2436_v23 = vld [vmem:[#allocation2 + $0x18] sm:$0xff] }
 0x1dd   : > { %v2271_v46 = vld [vmem:[#allocation2 + $0x38] sm:$0xff]  ;;  %v4127_v39 = vpop.f32.mrf.mxu0  ;;  %v4112_v57 = vpop.f32.mrf.mxu1  ;;  %v2272_v50 = vld [vmem:[#allocation2 + $0x40] sm:$0xff] }
 0x1de   : > { %2421 = vst.msk [vmem:[#allocation2 + $0x20] sm:$0xff] %vm1699_vm7, %v2405_v20  ;;  %v2408_v22 = vadd.f32 %v4124_v63, %v2271_v46  ;;  %2260 = vst.msk [vmem:[#allocation2 + $0x60] sm:$0xff] %vm1699_vm7, %v2244_v30  ;;  %v2411_v3 = vadd.f32 %v4127_v39, %v2274_v37  ;;  %v2247_v14 = vadd.f32 %v4112_v57, %v2082_v33  ;;  %v2434_v4 = vld [vmem:[#allocation2 + $0x8] sm:$0xff] }
 0x1df   : > { %v2269_v29 = vld [vmem:[#allocation2 + $0x28] sm:$0xff]  ;;  %v2370_v8 = vpop.f32.mrf.mxu0  ;;  %v2220_v9 = vpop.f32.mrf.mxu1  ;;  %v2275_v6 = vld [vmem:[#allocation2 + $0x58] sm:$0xff] }
 0x1e0   : > { %2424 = vst.msk [vmem:[#allocation2 + $0x38] sm:$0xff] %vm1699_vm7, %v2408_v22  ;;  %v2406_v38 = vadd.f32 %v2357_v10, %v2269_v29  ;;  %2427 = vst.msk [vmem:[#allocation2 + $0x50] sm:$0xff] %vm1699_vm7, %v2411_v3  ;;  %v2409_v27 = vadd.f32 %v2370_v8, %v2272_v50  ;;  %v2245_v19 = vadd.f32 %v2220_v9, %v2080_v0 }
 0x1e1   : > { %2263 = vst.msk [vmem:[#allocation2 + $0x78] sm:$0xff] %vm1699_vm7, %v2247_v14  ;;  %v4128_v45 = vpop.f32.mrf.mxu0  ;;  %v4139_v43 = vpop.f32.mrf.mxu1  ;;  %v2273_v25 = vld [vmem:[#allocation2 + $0x48] sm:$0xff] }
 0x1e2   : > { %2422 = vst.msk [vmem:[#allocation2 + $0x28] sm:$0xff] %vm1699_vm7, %v2406_v38  ;;  %2425 = vst.msk [vmem:[#allocation2 + $0x40] sm:$0xff] %vm1699_vm7, %v2409_v27  ;;  %v2412_v18 = vadd.f32 %v4128_v45, %v2275_v6  ;;  %v2594_v54 = vadd.f32 %v4139_v43, %v2435_v1 }
 0x1e3   : > { %2261 = vst.msk [vmem:[#allocation2 + $0x68] sm:$0xff] %vm1699_vm7, %v2245_v19  ;;  %v2373_v44 = vpop.f32.mrf.mxu0  ;;  %v2529_v7 = vpop.f32.mrf.mxu1  ;;  %v2278_v16 = vld [vmem:[#allocation2 + $0x70] sm:$0xff] }
 0x1e4   : > { %2428 = vst.msk [vmem:[#allocation2 + $0x58] sm:$0xff] %vm1699_vm7, %v2412_v18  ;;  %2610 = vst.msk [vmem:[#allocation2 + $0x10] sm:$0xff] %vm1699_vm7, %v2594_v54  ;;  %v2410_v51 = vadd.f32 %v2373_v44, %v2273_v25  ;;  %v2592_v47 = vadd.f32 %v2529_v7, %v2433_v35  ;;  %v2439_v52 = vld [vmem:[#allocation2 + $0x30] sm:$0xff] }
 0x1e5   : > { %v4131_v48 = vpop.f32.mrf.mxu0  ;;  %v4140_v13 = vpop.f32.mrf.mxu1  ;;  %v2276_v15 = vld [vmem:[#allocation2 + $0x60] sm:$0xff] }
 0x1e6   : > { %2426 = vst.msk [vmem:[#allocation2 + $0x48] sm:$0xff] %vm1699_vm7, %v2410_v51  ;;  %2608 = vst.msk [vmem:[#allocation2] sm:$0xff] %vm1699_vm7, %v2592_v47  ;;  %v2415_v36 = vadd.f32 %v4131_v48, %v2278_v16  ;;  %v2595_v53 = vadd.f32 %v4140_v13, %v2436_v23  ;;  %v2437_v49 = vld [vmem:[#allocation2 + $0x20] sm:$0xff] }
 0x1e7   : > { %v2386_v2 = vpop.f32.mrf.mxu0  ;;  %v2532_v21 = vpop.f32.mrf.mxu1  ;;  %v2440_v11 = vld [vmem:[#allocation2 + $0x38] sm:$0xff]  ;;  %v2443_v39 = vld [vmem:[#allocation2 + $0x50] sm:$0xff] }
 0x1e8   : > { %v2279_v60 = vld [vmem:[#allocation2 + $0x78] sm:$0xff]  ;;  %2431 = vst.msk [vmem:[#allocation2 + $0x70] sm:$0xff] %vm1699_vm7, %v2415_v36  ;;  %2611 = vst.msk [vmem:[#allocation2 + $0x18] sm:$0xff] %vm1699_vm7, %v2595_v53  ;;  %v2413_v61 = vadd.f32 %v2386_v2, %v2276_v15  ;;  %v2593_v41 = vadd.f32 %v2532_v21, %v2434_v4 }
 0x1e9   : > { %v4132_v59 = vpop.f32.mrf.mxu0  ;;  %v4143_v24 = vpop.f32.mrf.mxu1  ;;  %v2438_v62 = vld [vmem:[#allocation2 + $0x28] sm:$0xff]  ;;  %v2441_v14 = vld [vmem:[#allocation2 + $0x40] sm:$0xff] }
 0x1ea   : > { %v2277_v17 = vld [vmem:[#allocation2 + $0x68] sm:$0xff]  ;;  %2429 = vst.msk [vmem:[#allocation2 + $0x60] sm:$0xff] %vm1699_vm7, %v2413_v61  ;;  %2609 = vst.msk [vmem:[#allocation2 + $0x8] sm:$0xff] %vm1699_vm7, %v2593_v41  ;;  %v2416_v31 = vadd.f32 %v4132_v59, %v2279_v60  ;;  %v2598_v42 = vadd.f32 %v4143_v24, %v2439_v52 }
 0x1eb   : > { %v2389_v40 = vpop.f32.mrf.mxu0  ;;  %v2545_v55 = vpop.f32.mrf.mxu1  ;;  %v2626_v12 = vld [vmem:[#allocation2 + $0x10] sm:$0xff]  ;;  %v2444_v38 = vld [vmem:[#allocation2 + $0x58] sm:$0xff] }
 0x1ec   : > { %2432 = vst.msk [vmem:[#allocation2 + $0x78] sm:$0xff] %vm1699_vm7, %v2416_v31  ;;  %2614 = vst.msk [vmem:[#allocation2 + $0x30] sm:$0xff] %vm1699_vm7, %v2598_v42  ;;  %v2414_v26 = vadd.f32 %v2389_v40, %v2277_v17  ;;  %v2596_v28 = vadd.f32 %v2545_v55, %v2437_v49 }
 0x1ed   : > { %v4159_v63 = vpop.f32.mrf.mxu0  ;;  %v4144_v58 = vpop.f32.mrf.mxu1  ;;  %v2624_v56 = vld [vmem:[#allocation2] sm:$0xff]  ;;  %v2442_v25 = vld [vmem:[#allocation2 + $0x48] sm:$0xff] }
 0x1ee   : > { %2430 = vst.msk [vmem:[#allocation2 + $0x68] sm:$0xff] %vm1699_vm7, %v2414_v26  ;;  %2612 = vst.msk [vmem:[#allocation2 + $0x20] sm:$0xff] %vm1699_vm7, %v2596_v28  ;;  %v2773_v5 = vadd.f32 %v4159_v63, %v2626_v12  ;;  %v2599_v34 = vadd.f32 %v4144_v58, %v2440_v11 }
 0x1ef   : > { %v2708_v10 = vpop.f32.mrf.mxu0  ;;  %v2548_v32 = vpop.f32.mrf.mxu1  ;;  %v2627_v37 = vld [vmem:[#allocation2 + $0x18] sm:$0xff]  ;;  %v2447_v16 = vld [vmem:[#allocation2 + $0x70] sm:$0xff] }
 0x1f0   : > { %2789 = vst.msk [vmem:[#allocation2 + $0x10] sm:$0xff] %vm1699_vm7, %v2773_v5  ;;  %2615 = vst.msk [vmem:[#allocation2 + $0x38] sm:$0xff] %vm1699_vm7, %v2599_v34  ;;  %v2771_v20 = vadd.f32 %v2708_v10, %v2624_v56  ;;  %v2597_v30 = vadd.f32 %v2548_v32, %v2438_v62 }
 0x1f1   : > { %v4160_v46 = vpop.f32.mrf.mxu0  ;;  %v4147_v33 = vpop.f32.mrf.mxu1  ;;  %v2625_v57 = vld [vmem:[#allocation2 + $0x8] sm:$0xff]  ;;  %v2445_v15 = vld [vmem:[#allocation2 + $0x60] sm:$0xff] }
 0x1f2   : > { %2787 = vst.msk [vmem:[#allocation2] sm:$0xff] %vm1699_vm7, %v2771_v20  ;;  %2613 = vst.msk [vmem:[#allocation2 + $0x28] sm:$0xff] %vm1699_vm7, %v2597_v30  ;;  %v2774_v50 = vadd.f32 %v4160_v46, %v2627_v37  ;;  %v2602_v22 = vadd.f32 %v4147_v33, %v2443_v39 }
 0x1f3   : > { %v2711_v3 = vpop.f32.mrf.mxu0  ;;  %v2561_v29 = vpop.f32.mrf.mxu1  ;;  %v2630_v8 = vld [vmem:[#allocation2 + $0x30] sm:$0xff]  ;;  %v2448_v60 = vld [vmem:[#allocation2 + $0x78] sm:$0xff] }
 0x1f4   : > { %2790 = vst.msk [vmem:[#allocation2 + $0x18] sm:$0xff] %vm1699_vm7, %v2774_v50  ;;  %2618 = vst.msk [vmem:[#allocation2 + $0x50] sm:$0xff] %vm1699_vm7, %v2602_v22  ;;  %v2772_v0 = vadd.f32 %v2711_v3, %v2625_v57  ;;  %v2600_v9 = vadd.f32 %v2561_v29, %v2441_v14 }
 0x1f5   : > { %v4163_v6 = vpop.f32.mrf.mxu0  ;;  %v4148_v27 = vpop.f32.mrf.mxu1  ;;  %v2628_v19 = vld [vmem:[#allocation2 + $0x20] sm:$0xff]  ;;  %v2446_v17 = vld [vmem:[#allocation2 + $0x68] sm:$0xff] }
 0x1f6   : > { %2788 = vst.msk [vmem:[#allocation2 + $0x8] sm:$0xff] %vm1699_vm7, %v2772_v0  ;;  %2616 = vst.msk [vmem:[#allocation2 + $0x40] sm:$0xff] %vm1699_vm7, %v2600_v9  ;;  %v2777_v45 = vadd.f32 %v4163_v6, %v2630_v8  ;;  %v2603_v1 = vadd.f32 %v4148_v27, %v2444_v38 }
 0x1f7   : > { %v2724_v43 = vpop.f32.mrf.mxu0  ;;  %v2564_v18 = vpop.f32.mrf.mxu1  ;;  %v2631_v54 = vld [vmem:[#allocation2 + $0x38] sm:$0xff]  ;;  %v2805_v12 = vld [vmem:[#allocation2 + $0x10] sm:$0xff] }
 0x1f8   : > { %2793 = vst.msk [vmem:[#allocation2 + $0x30] sm:$0xff] %vm1699_vm7, %v2777_v45  ;;  %2619 = vst.msk [vmem:[#allocation2 + $0x58] sm:$0xff] %vm1699_vm7, %v2603_v1  ;;  %v2775_v44 = vadd.f32 %v2724_v43, %v2628_v19  ;;  %v2601_v35 = vadd.f32 %v2564_v18, %v2442_v25 }
 0x1f9   : > { %v4164_v7 = vpop.f32.mrf.mxu0  ;;  %v4151_v51 = vpop.f32.mrf.mxu1  ;;  %v2629_v47 = vld [vmem:[#allocation2 + $0x28] sm:$0xff]  ;;  %v2803_v56 = vld [vmem:[#allocation2] sm:$0xff] }
 0x1fa   : > { %2791 = vst.msk [vmem:[#allocation2 + $0x20] sm:$0xff] %vm1699_vm7, %v2775_v44  ;;  %2617 = vst.msk [vmem:[#allocation2 + $0x48] sm:$0xff] %vm1699_vm7, %v2601_v35  ;;  %v2778_v48 = vadd.f32 %v4164_v7, %v2631_v54  ;;  %v2606_v23 = vadd.f32 %v4151_v51, %v2447_v16 }
 0x1fb   : > { %v2727_v13 = vpop.f32.mrf.mxu0  ;;  %v2577_v36 = vpop.f32.mrf.mxu1  ;;  %v2634_v53 = vld [vmem:[#allocation2 + $0x50] sm:$0xff]  ;;  %v2806_v37 = vld [vmem:[#allocation2 + $0x18] sm:$0xff] }
 0x1fc   : > { %2794 = vst.msk [vmem:[#allocation2 + $0x38] sm:$0xff] %vm1699_vm7, %v2778_v48  ;;  %2622 = vst.msk [vmem:[#allocation2 + $0x70] sm:$0xff] %vm1699_vm7, %v2606_v23  ;;  %v2776_v2 = vadd.f32 %v2727_v13, %v2629_v47  ;;  %v2604_v4 = vadd.f32 %v2577_v36, %v2445_v15 }
 0x1fd   : > { %v4167_v21 = vpop.f32.mrf.mxu0  ;;  %v4152_v61 = vpop.f32.mrf.mxu1  ;;  %v2632_v41 = vld [vmem:[#allocation2 + $0x40] sm:$0xff]  ;;  %v2804_v57 = vld [vmem:[#allocation2 + $0x8] sm:$0xff] }
 0x1fe   : > { %2792 = vst.msk [vmem:[#allocation2 + $0x28] sm:$0xff] %vm1699_vm7, %v2776_v2  ;;  %2620 = vst.msk [vmem:[#allocation2 + $0x60] sm:$0xff] %vm1699_vm7, %v2604_v4  ;;  %v2781_v59 = vadd.f32 %v4167_v21, %v2634_v53  ;;  %v2607_v52 = vadd.f32 %v4152_v61, %v2448_v60 }
 0x1ff   : > { %v2740_v24 = vpop.f32.mrf.mxu0  ;;  %v2580_v31 = vpop.f32.mrf.mxu1  ;;  %v2635_v42 = vld [vmem:[#allocation2 + $0x58] sm:$0xff]  ;;  %v2809_v8 = vld [vmem:[#allocation2 + $0x30] sm:$0xff] }
 0x200   : > { %2797 = vst.msk [vmem:[#allocation2 + $0x50] sm:$0xff] %vm1699_vm7, %v2781_v59  ;;  %2623 = vst.msk [vmem:[#allocation2 + $0x78] sm:$0xff] %vm1699_vm7, %v2607_v52  ;;  %v2779_v40 = vadd.f32 %v2740_v24, %v2632_v41  ;;  %v2605_v49 = vadd.f32 %v2580_v31, %v2446_v17 }
 0x201   : > { %v4168_v55 = vpop.f32.mrf.mxu0  ;;  %v4179_v26 = vpop.f32.mrf.mxu1  ;;  %v2633_v28 = vld [vmem:[#allocation2 + $0x48] sm:$0xff]  ;;  %v2807_v19 = vld [vmem:[#allocation2 + $0x20] sm:$0xff] }
 0x202   : > { %2795 = vst.msk [vmem:[#allocation2 + $0x40] sm:$0xff] %vm1699_vm7, %v2779_v40  ;;  %2621 = vst.msk [vmem:[#allocation2 + $0x68] sm:$0xff] %vm1699_vm7, %v2605_v49  ;;  %v2782_v63 = vadd.f32 %v4168_v55, %v2635_v42  ;;  %v2938_v11 = vadd.f32 %v4179_v26, %v2805_v12 }
 0x203   : > { %v2743_v58 = vpop.f32.mrf.mxu0  ;;  %v2873_v5 = vpop.f32.mrf.mxu1  ;;  %v2638_v34 = vld [vmem:[#allocation2 + $0x70] sm:$0xff]  ;;  %v2810_v54 = vld [vmem:[#allocation2 + $0x38] sm:$0xff] }
 0x204   : > { %2798 = vst.msk [vmem:[#allocation2 + $0x58] sm:$0xff] %vm1699_vm7, %v2782_v63  ;;  %2954 = vst.msk [vmem:[#allocation2 + $0x10] sm:$0xff] %vm1699_vm7, %v2938_v11  ;;  %v2780_v10 = vadd.f32 %v2743_v58, %v2633_v28  ;;  %v2936_v62 = vadd.f32 %v2873_v5, %v2803_v56 }
 0x205   : > { %v4171_v32 = vpop.f32.mrf.mxu0  ;;  %v4180_v20 = vpop.f32.mrf.mxu1  ;;  %v2636_v30 = vld [vmem:[#allocation2 + $0x60] sm:$0xff]  ;;  %v2808_v47 = vld [vmem:[#allocation2 + $0x28] sm:$0xff] }
 0x206   : > { %2796 = vst.msk [vmem:[#allocation2 + $0x48] sm:$0xff] %vm1699_vm7, %v2780_v10  ;;  %2952 = vst.msk [vmem:[#allocation2] sm:$0xff] %vm1699_vm7, %v2936_v62  ;;  %v2785_v46 = vadd.f32 %v4171_v32, %v2638_v34  ;;  %v2939_v39 = vadd.f32 %v4180_v20, %v2806_v37 }
 0x207   : > { %v2756_v33 = vpop.f32.mrf.mxu0  ;;  %v2876_v50 = vpop.f32.mrf.mxu1  ;;  %v2639_v22 = vld [vmem:[#allocation2 + $0x78] sm:$0xff]  ;;  %v2813_v53 = vld [vmem:[#allocation2 + $0x50] sm:$0xff] }
 0x208   : > { %2801 = vst.msk [vmem:[#allocation2 + $0x70] sm:$0xff] %vm1699_vm7, %v2785_v46  ;;  %2955 = vst.msk [vmem:[#allocation2 + $0x18] sm:$0xff] %vm1699_vm7, %v2939_v39  ;;  %v2783_v3 = vadd.f32 %v2756_v33, %v2636_v30  ;;  %v2937_v14 = vadd.f32 %v2876_v50, %v2804_v57 }
 0x209   : > { %v4172_v29 = vpop.f32.mrf.mxu0  ;;  %v4183_v0 = vpop.f32.mrf.mxu1  ;;  %v2637_v9 = vld [vmem:[#allocation2 + $0x68] sm:$0xff]  ;;  %v2811_v41 = vld [vmem:[#allocation2 + $0x40] sm:$0xff] }
 0x20a   : > { %2799 = vst.msk [vmem:[#allocation2 + $0x60] sm:$0xff] %vm1699_vm7, %v2783_v3  ;;  %2953 = vst.msk [vmem:[#allocation2 + $0x8] sm:$0xff] %vm1699_vm7, %v2937_v14  ;;  %v2786_v6 = vadd.f32 %v4172_v29, %v2639_v22  ;;  %v2942_v38 = vadd.f32 %v4183_v0, %v2809_v8 }
 0x20b   : > { %v2759_v27 = vpop.f32.mrf.mxu0  ;;  %v2889_v45 = vpop.f32.mrf.mxu1  ;;  %v2970_v1 = vld [vmem:[#allocation2 + $0x10] sm:$0xff]  ;;  %v2814_v42 = vld [vmem:[#allocation2 + $0x58] sm:$0xff] }
 0x20c   : > { %2802 = vst.msk [vmem:[#allocation2 + $0x78] sm:$0xff] %vm1699_vm7, %v2786_v6  ;;  %2958 = vst.msk [vmem:[#allocation2 + $0x30] sm:$0xff] %vm1699_vm7, %v2942_v38  ;;  %v2784_v43 = vadd.f32 %v2759_v27, %v2637_v9  ;;  %v2940_v25 = vadd.f32 %v2889_v45, %v2807_v19 }
 0x20d   : > { %v4199_v18 = vpop.f32.mrf.mxu0  ;;  %v4184_v44 = vpop.f32.mrf.mxu1  ;;  %v2968_v35 = vld [vmem:[#allocation2] sm:$0xff]  ;;  %v2812_v28 = vld [vmem:[#allocation2 + $0x48] sm:$0xff] }
 0x20e   : > { %2800 = vst.msk [vmem:[#allocation2 + $0x68] sm:$0xff] %vm1699_vm7, %v2784_v43  ;;  %2956 = vst.msk [vmem:[#allocation2 + $0x20] sm:$0xff] %vm1699_vm7, %v2940_v25  ;;  %v3129_v7 = vadd.f32 %v4199_v18, %v2970_v1  ;;  %v2943_v16 = vadd.f32 %v4184_v44, %v2810_v54 }
 0x20f   : > { %v3064_v51 = vpop.f32.mrf.mxu0  ;;  %v2892_v48 = vpop.f32.mrf.mxu1  ;;  %v2971_v23 = vld [vmem:[#allocation2 + $0x18] sm:$0xff]  ;;  %v2817_v34 = vld [vmem:[#allocation2 + $0x70] sm:$0xff] }
 0x210   : > { %3145 = vst.msk [vmem:[#allocation2 + $0x10] sm:$0xff] %vm1699_vm7, %v3129_v7  ;;  %2959 = vst.msk [vmem:[#allocation2 + $0x38] sm:$0xff] %vm1699_vm7, %v2943_v16  ;;  %v3127_v13 = vadd.f32 %v3064_v51, %v2968_v35  ;;  %v2941_v15 = vadd.f32 %v2892_v48, %v2808_v47 }
 0x211   : > { %v4200_v36 = vpop.f32.mrf.mxu0  ;;  %v4187_v2 = vpop.f32.mrf.mxu1  ;;  %v2969_v4 = vld [vmem:[#allocation2 + $0x8] sm:$0xff]  ;;  %v2815_v30 = vld [vmem:[#allocation2 + $0x60] sm:$0xff] }
 0x212   : > { %3143 = vst.msk [vmem:[#allocation2] sm:$0xff] %vm1699_vm7, %v3127_v13  ;;  %2957 = vst.msk [vmem:[#allocation2 + $0x28] sm:$0xff] %vm1699_vm7, %v2941_v15  ;;  %v3130_v21 = vadd.f32 %v4200_v36, %v2971_v23  ;;  %v2946_v60 = vadd.f32 %v4187_v2, %v2813_v53 }
 0x213   : > { %v3067_v61 = vpop.f32.mrf.mxu0  ;;  %v2905_v59 = vpop.f32.mrf.mxu1  ;;  %v2974_v52 = vld [vmem:[#allocation2 + $0x30] sm:$0xff]  ;;  %v2818_v22 = vld [vmem:[#allocation2 + $0x78] sm:$0xff] }
 0x214   : > { %3146 = vst.msk [vmem:[#allocation2 + $0x18] sm:$0xff] %vm1699_vm7, %v3130_v21  ;;  %2962 = vst.msk [vmem:[#allocation2 + $0x50] sm:$0xff] %vm1699_vm7, %v2946_v60  ;;  %v3128_v24 = vadd.f32 %v3067_v61, %v2969_v4  ;;  %v2944_v17 = vadd.f32 %v2905_v59, %v2811_v41 }
 0x215   : > { %v4203_v31 = vpop.f32.mrf.mxu0  ;;  %v4188_v40 = vpop.f32.mrf.mxu1  ;;  %v2972_v49 = vld [vmem:[#allocation2 + $0x20] sm:$0xff]  ;;  %v2816_v9 = vld [vmem:[#allocation2 + $0x68] sm:$0xff] }
 0x216   : > { %3144 = vst.msk [vmem:[#allocation2 + $0x8] sm:$0xff] %vm1699_vm7, %v3128_v24  ;;  %2960 = vst.msk [vmem:[#allocation2 + $0x40] sm:$0xff] %vm1699_vm7, %v2944_v17  ;;  %v3133_v55 = vadd.f32 %v4203_v31, %v2974_v52  ;;  %v2947_v12 = vadd.f32 %v4188_v40, %v2814_v42 }
 0x217   : > { %v3080_v26 = vpop.f32.mrf.mxu0  ;;  %v2908_v63 = vpop.f32.mrf.mxu1  ;;  %v2975_v11 = vld [vmem:[#allocation2 + $0x38] sm:$0xff]  ;;  %v3161_v1 = vld [vmem:[#allocation2 + $0x10] sm:$0xff] }
 0x218   : > { %3149 = vst.msk [vmem:[#allocation2 + $0x30] sm:$0xff] %vm1699_vm7, %v3133_v55  ;;  %2963 = vst.msk [vmem:[#allocation2 + $0x58] sm:$0xff] %vm1699_vm7, %v2947_v12  ;;  %v3131_v58 = vadd.f32 %v3080_v26, %v2972_v49  ;;  %v2945_v56 = vadd.f32 %v2908_v63, %v2812_v28 }
 0x219   : > { %v4204_v5 = vpop.f32.mrf.mxu0  ;;  %v4191_v10 = vpop.f32.mrf.mxu1  ;;  %v2973_v62 = vld [vmem:[#allocation2 + $0x28] sm:$0xff]  ;;  %v3159_v35 = vld [vmem:[#allocation2] sm:$0xff] }
 0x21a   : > { %3147 = vst.msk [vmem:[#allocation2 + $0x20] sm:$0xff] %vm1699_vm7, %v3131_v58  ;;  %2961 = vst.msk [vmem:[#allocation2 + $0x48] sm:$0xff] %vm1699_vm7, %v2945_v56  ;;  %v3134_v32 = vadd.f32 %v4204_v5, %v2975_v11  ;;  %v2950_v37 = vadd.f32 %v4191_v10, %v2817_v34 }
 0x21b   : > { %v3083_v20 = vpop.f32.mrf.mxu0  ;;  %v2921_v46 = vpop.f32.mrf.mxu1  ;;  %v2978_v39 = vld [vmem:[#allocation2 + $0x50] sm:$0xff]  ;;  %v3162_v23 = vld [vmem:[#allocation2 + $0x18] sm:$0xff] }
 0x21c   : > { %3150 = vst.msk [vmem:[#allocation2 + $0x38] sm:$0xff] %vm1699_vm7, %v3134_v32  ;;  %2966 = vst.msk [vmem:[#allocation2 + $0x70] sm:$0xff] %vm1699_vm7, %v2950_v37  ;;  %v3132_v33 = vadd.f32 %v3083_v20, %v2973_v62  ;;  %v2948_v57 = vadd.f32 %v2921_v46, %v2815_v30 }
 0x21d   : > { %v4207_v50 = vpop.f32.mrf.mxu0  ;;  %v4192_v3 = vpop.f32.mrf.mxu1  ;;  %v2976_v14 = vld [vmem:[#allocation2 + $0x40] sm:$0xff]  ;;  %v3160_v4 = vld [vmem:[#allocation2 + $0x8] sm:$0xff] }
 0x21e   : > { %3148 = vst.msk [vmem:[#allocation2 + $0x28] sm:$0xff] %vm1699_vm7, %v3132_v33  ;;  %2964 = vst.msk [vmem:[#allocation2 + $0x60] sm:$0xff] %vm1699_vm7, %v2948_v57  ;;  %v3137_v29 = vadd.f32 %v4207_v50, %v2978_v39  ;;  %v2951_v8 = vadd.f32 %v4192_v3, %v2818_v22 }
 0x21f   : > { %v3096_v0 = vpop.f32.mrf.mxu0  ;;  %v2924_v6 = vpop.f32.mrf.mxu1  ;;  %v2979_v38 = vld [vmem:[#allocation2 + $0x58] sm:$0xff]  ;;  %v3165_v52 = vld [vmem:[#allocation2 + $0x30] sm:$0xff] }
 0x220   : > { %3153 = vst.msk [vmem:[#allocation2 + $0x50] sm:$0xff] %vm1699_vm7, %v3137_v29  ;;  %2967 = vst.msk [vmem:[#allocation2 + $0x78] sm:$0xff] %vm1699_vm7, %v2951_v8  ;;  %v3135_v27 = vadd.f32 %v3096_v0, %v2976_v14  ;;  %v2949_v19 = vadd.f32 %v2924_v6, %v2816_v9  ;;  %v5823_v6 = vld [vmem:[%s5935_s5] ss:$0 sm:$0xff] }
 0x221   : > { %v4208_v45 = vpop.f32.mrf.mxu0  ;;  %v4219_v43 = vpop.f32.mrf.mxu1  ;;  %v2977_v25 = vld [vmem:[#allocation2 + $0x48] sm:$0xff]  ;;  %v3163_v49 = vld [vmem:[#allocation2 + $0x20] sm:$0xff] }
 0x222   : > { %3151 = vst.msk [vmem:[#allocation2 + $0x40] sm:$0xff] %vm1699_vm7, %v3135_v27  ;;  %2965 = vst.msk [vmem:[#allocation2 + $0x68] sm:$0xff] %vm1699_vm7, %v2949_v19  ;;  %v3138_v18 = vadd.f32 %v4208_v45, %v2979_v38  ;;  %v3308_v54 = vadd.f32 %v4219_v43, %v3161_v1  ;;  %v3544_v1 = vld [vmem:[%s5816_s15 + $0x10] sm:$0xff] }
 0x223   : > { %v3099_v44 = vpop.f32.mrf.mxu0  ;;  %v3243_v7 = vpop.f32.mrf.mxu1  ;;  %v2982_v16 = vld [vmem:[#allocation2 + $0x70] sm:$0xff]  ;;  %v3166_v11 = vld [vmem:[#allocation2 + $0x38] sm:$0xff] }
 0x224   : > { %3154 = vst.msk [vmem:[#allocation2 + $0x58] sm:$0xff] %vm1699_vm7, %v3138_v18  ;;  %3324 = vst.msk [vmem:[#allocation2 + $0x10] sm:$0xff] %vm1699_vm7, %v3308_v54  ;;  %v3136_v51 = vadd.f32 %v3099_v44, %v2977_v25  ;;  %v3306_v47 = vadd.f32 %v3243_v7, %v3159_v35 }
 0x225   : > { %v4211_v48 = vpop.f32.mrf.mxu0  ;;  %v4220_v13 = vpop.f32.mrf.mxu1  ;;  %v2980_v15 = vld [vmem:[#allocation2 + $0x60] sm:$0xff]  ;;  %v3164_v62 = vld [vmem:[#allocation2 + $0x28] sm:$0xff] }
 0x226   : > { %3152 = vst.msk [vmem:[#allocation2 + $0x48] sm:$0xff] %vm1699_vm7, %v3136_v51  ;;  %3322 = vst.msk [vmem:[#allocation2] sm:$0xff] %vm1699_vm7, %v3306_v47  ;;  %v3141_v36 = vadd.f32 %v4211_v48, %v2982_v16  ;;  %v3309_v53 = vadd.f32 %v4220_v13, %v3162_v23  ;;  %v3542_v51 = vld [vmem:[%s5816_s15] sm:$0xff] }
 0x227   : > { %v3112_v2 = vpop.f32.mrf.mxu0  ;;  %v3246_v21 = vpop.f32.mrf.mxu1  ;;  %v2983_v60 = vld [vmem:[#allocation2 + $0x78] sm:$0xff]  ;;  %v3169_v39 = vld [vmem:[#allocation2 + $0x50] sm:$0xff] }
 0x228   : > { %3157 = vst.msk [vmem:[#allocation2 + $0x70] sm:$0xff] %vm1699_vm7, %v3141_v36  ;;  %3325 = vst.msk [vmem:[#allocation2 + $0x18] sm:$0xff] %vm1699_vm7, %v3309_v53  ;;  %v3139_v61 = vadd.f32 %v3112_v2, %v2980_v15  ;;  %v3307_v41 = vadd.f32 %v3246_v21, %v3160_v4  ;;  %v3545_v21 = vld [vmem:[%s5816_s15 + $0x18] sm:$0xff] }
 0x229   : > { %v4212_v59 = vpop.f32.mrf.mxu0  ;;  %v4223_v24 = vpop.f32.mrf.mxu1  ;;  %v2981_v17 = vld [vmem:[#allocation2 + $0x68] sm:$0xff]  ;;  %v3167_v14 = vld [vmem:[#allocation2 + $0x40] sm:$0xff] }
 0x22a   : > { %3155 = vst.msk [vmem:[#allocation2 + $0x60] sm:$0xff] %vm1699_vm7, %v3139_v61  ;;  %3323 = vst.msk [vmem:[#allocation2 + $0x8] sm:$0xff] %vm1699_vm7, %v3307_v41  ;;  %v3142_v31 = vadd.f32 %v4212_v59, %v2983_v60  ;;  %v3312_v42 = vadd.f32 %v4223_v24, %v3165_v52 }
 0x22b   : > { %v3115_v40 = vpop.f32.mrf.mxu0  ;;  %v3259_v55 = vpop.f32.mrf.mxu1  ;;  %v3340_v12 = vld [vmem:[#allocation2 + $0x10] sm:$0xff]  ;;  %v3170_v27 = vld [vmem:[#allocation2 + $0x58] sm:$0xff] }
 0x22c   : > { %3158 = vst.msk [vmem:[#allocation2 + $0x78] sm:$0xff] %vm1699_vm7, %v3142_v31  ;;  %3328 = vst.msk [vmem:[#allocation2 + $0x30] sm:$0xff] %vm1699_vm7, %v3312_v42  ;;  %v3140_v26 = vadd.f32 %v3115_v40, %v2981_v17  ;;  %v3310_v28 = vadd.f32 %v3259_v55, %v3163_v49  ;;  %v3543_v40 = vld [vmem:[%s5816_s15 + $0x8] sm:$0xff] }
 0x22d   : > { %v4239_v63 = vpop.f32.mrf.mxu0  ;;  %v4224_v58 = vpop.f32.mrf.mxu1  ;;  %v3338_v56 = vld [vmem:[#allocation2] sm:$0xff]  ;;  %v3168_v44 = vld [vmem:[#allocation2 + $0x48] sm:$0xff] }
 0x22e   : > { %3156 = vst.msk [vmem:[#allocation2 + $0x68] sm:$0xff] %vm1699_vm7, %v3140_v26  ;;  %3326 = vst.msk [vmem:[#allocation2 + $0x20] sm:$0xff] %vm1699_vm7, %v3310_v28  ;;  %v3473_v5 = vadd.f32 %v4239_v63, %v3340_v12  ;;  %v3313_v34 = vadd.f32 %v4224_v58, %v3166_v11 }
 0x22f   : > { %v3408_v10 = vpop.f32.mrf.mxu0  ;;  %v3262_v32 = vpop.f32.mrf.mxu1  ;;  %v3341_v37 = vld [vmem:[#allocation2 + $0x18] sm:$0xff]  ;;  %v3173_v15 = vld [vmem:[#allocation2 + $0x70] sm:$0xff] }
 0x230   : > { %3489 = vst.msk [vmem:[#allocation2 + $0x10] sm:$0xff] %vm1699_vm7, %v3473_v5  ;;  %3329 = vst.msk [vmem:[#allocation2 + $0x38] sm:$0xff] %vm1699_vm7, %v3313_v34  ;;  %v3471_v20 = vadd.f32 %v3408_v10, %v3338_v56  ;;  %v3311_v30 = vadd.f32 %v3262_v32, %v3164_v62  ;;  %v3548_v5 = vld [vmem:[%s5816_s15 + $0x30] sm:$0xff] }
 0x231   : > { %v4240_v46 = vpop.f32.mrf.mxu0  ;;  %v4227_v33 = vpop.f32.mrf.mxu1  ;;  %v3339_v57 = vld [vmem:[#allocation2 + $0x8] sm:$0xff]  ;;  %v3171_v52 = vld [vmem:[#allocation2 + $0x60] sm:$0xff] }
 0x232   : > { %3487 = vst.msk [vmem:[#allocation2] sm:$0xff] %vm1699_vm7, %v3471_v20  ;;  %3327 = vst.msk [vmem:[#allocation2 + $0x28] sm:$0xff] %vm1699_vm7, %v3311_v30  ;;  %v3474_v50 = vadd.f32 %v4240_v46, %v3341_v37  ;;  %v3316_v22 = vadd.f32 %v4227_v33, %v3169_v39 }
 0x233   : > { %v3411_v3 = vpop.f32.mrf.mxu0  ;;  %v3275_v29 = vpop.f32.mrf.mxu1  ;;  %v3344_v8 = vld [vmem:[#allocation2 + $0x30] sm:$0xff]  ;;  %v3174_v28 = vld [vmem:[#allocation2 + $0x78] sm:$0xff] }
 0x234   : > { %3490 = vst.msk [vmem:[#allocation2 + $0x18] sm:$0xff] %vm1699_vm7, %v3474_v50  ;;  %3332 = vst.msk [vmem:[#allocation2 + $0x50] sm:$0xff] %vm1699_vm7, %v3316_v22  ;;  %v3472_v0 = vadd.f32 %v3411_v3, %v3339_v57  ;;  %v3314_v9 = vadd.f32 %v3275_v29, %v3167_v14  ;;  %v3546_v22 = vld [vmem:[%s5816_s15 + $0x20] sm:$0xff] }
 0x235   : > { %v4243_v38 = vpop.f32.mrf.mxu0  ;;  %v4228_v19 = vpop.f32.mrf.mxu1  ;;  %v3342_v45 = vld [vmem:[#allocation2 + $0x20] sm:$0xff]  ;;  %v3172_v37 = vld [vmem:[#allocation2 + $0x68] sm:$0xff] }
 0x236   : > { %3488 = vst.msk [vmem:[#allocation2 + $0x8] sm:$0xff] %vm1699_vm7, %v3472_v0  ;;  %3330 = vst.msk [vmem:[#allocation2 + $0x40] sm:$0xff] %vm1699_vm7, %v3314_v9  ;;  %v3477_v43 = vadd.f32 %v4243_v38, %v3344_v8  ;;  %v3317_v25 = vadd.f32 %v4228_v19, %v3170_v27  ;;  %v3549_v38 = vld [vmem:[%s5816_s15 + $0x38] sm:$0xff] }
 0x237   : > { %v3505_v18 = vld [vmem:[#allocation2 + $0x10] sm:$0xff]  ;;  %v3424_v54 = vpop.f32.mrf.mxu0  ;;  %v3278_v35 = vpop.f32.mrf.mxu1  ;;  %v3345_v7 = vld [vmem:[#allocation2 + $0x38] sm:$0xff] }
 0x238   : > { %v3528_v16 = vadd.f32 %v5823_v6, %v3505_v18  ;;  %3493 = vst.msk [vmem:[#allocation2 + $0x30] sm:$0xff] %vm1699_vm7, %v3477_v43  ;;  %3333 = vst.msk [vmem:[#allocation2 + $0x58] sm:$0xff] %vm1699_vm7, %v3317_v25  ;;  %v3475_v47 = vadd.f32 %v3424_v54, %v3342_v45  ;;  %v3315_v48 = vadd.f32 %v3278_v35, %v3168_v44  ;;  %v3547_v18 = vld [vmem:[%s5816_s15 + $0x28] sm:$0xff] }
 0x239   : > { %v3503_v23 = vld [vmem:[#allocation2] sm:$0xff]  ;;  %v4244_v13 = vpop.f32.mrf.mxu0  ;;  %v4231_v36 = vpop.f32.mrf.mxu1  ;;  %v3343_v53 = vld [vmem:[#allocation2 + $0x28] sm:$0xff] }
 0x23a   : > { %v3560_v2 = vadd.f32 %v3544_v1, %v3528_v16  ;;  %v3526_v4 = vadd.f32 %v5823_v6, %v3503_v23  ;;  %3491 = vst.msk [vmem:[#allocation2 + $0x20] sm:$0xff] %vm1699_vm7, %v3475_v47  ;;  %3331 = vst.msk [vmem:[#allocation2 + $0x48] sm:$0xff] %vm1699_vm7, %v3315_v48  ;;  %v3478_v60 = vadd.f32 %v4244_v13, %v3345_v7  ;;  %v3552_v47 = vld [vmem:[%s5816_s15 + $0x50] sm:$0xff] }
 0x23b   : > { %v3320_v61 = vadd.f32 %v4231_v36, %v3173_v15  ;;  %v3506_v41 = vld [vmem:[#allocation2 + $0x18] sm:$0xff]  ;;  %v3427_v59 = vpop.f32.mrf.mxu0  ;;  %v3291_v24 = vpop.f32.mrf.mxu1  ;;  %v3348_v17 = vld [vmem:[#allocation2 + $0x50] sm:$0xff] }
 0x23c   : > { %3576 = vst.msk [vmem:[%s5836_s20 + $0x10] sm:$0xff] %vm1699_vm7, %v3560_v2  ;;  %v3558_v31 = vadd.f32 %v3542_v51, %v3526_v4  ;;  %v3529_v42 = vadd.f32 %v5823_v6, %v3506_v41  ;;  %3494 = vst.msk [vmem:[#allocation2 + $0x38] sm:$0xff] %vm1699_vm7, %v3478_v60  ;;  %v3476_v49 = vadd.f32 %v3427_v59, %v3343_v53  ;;  %v3550_v2 = vld [vmem:[%s5816_s15 + $0x40] sm:$0xff] }
 0x23d   : > { %3336 = vst.msk [vmem:[#allocation2 + $0x70] sm:$0xff] %vm1699_vm7, %v3320_v61  ;;  %v3318_v55 = vadd.f32 %v3291_v24, %v3171_v52  ;;  %v3504_v12 = vld [vmem:[#allocation2 + $0x8] sm:$0xff]  ;;  %v4247_v26 = vpop.f32.mrf.mxu0  ;;  %v4232_v63 = vpop.f32.mrf.mxu1  ;;  %v3346_v11 = vld [vmem:[#allocation2 + $0x40] sm:$0xff]  ;;  %v3553_v52 = vld [vmem:[%s5816_s15 + $0x58] sm:$0xff] }
 0x23e   : > { %3574 = vst.msk [vmem:[%s5836_s20] sm:$0xff] %vm1699_vm7, %v3558_v31  ;;  %v3561_v58 = vadd.f32 %v3545_v21, %v3529_v42  ;;  %v3527_v56 = vadd.f32 %v5823_v6, %v3504_v12  ;;  %3492 = vst.msk [vmem:[#allocation2 + $0x28] sm:$0xff] %vm1699_vm7, %v3476_v49  ;;  %v3481_v34 = vadd.f32 %v4247_v26, %v3348_v17  ;;  %v3551_v49 = vld [vmem:[%s5816_s15 + $0x48] sm:$0xff] }
 0x23f   : > { %3334 = vst.msk [vmem:[#allocation2 + $0x60] sm:$0xff] %vm1699_vm7, %v3318_v55  ;;  %v3321_v10 = vadd.f32 %v4232_v63, %v3174_v28  ;;  %v3509_v62 = vld [vmem:[#allocation2 + $0x30] sm:$0xff]  ;;  %v3440_v32 = vpop.f32.mrf.mxu0  ;;  %v3294_v20 = vpop.f32.mrf.mxu1  ;;  %v3349_v30 = vld [vmem:[#allocation2 + $0x58] sm:$0xff] }
 0x240   : > { %3577 = vst.msk [vmem:[%s5836_s20 + $0x18] sm:$0xff] %vm1699_vm7, %v3561_v58  ;;  %v3559_v46 = vadd.f32 %v3543_v40, %v3527_v56  ;;  %v3532_v39 = vadd.f32 %v5823_v6, %v3509_v62  ;;  %3497 = vst.msk [vmem:[#allocation2 + $0x50] sm:$0xff] %vm1699_vm7, %v3481_v34  ;;  %v3479_v33 = vadd.f32 %v3440_v32, %v3346_v11  ;;  %v3556_v28 = vld [vmem:[%s5816_s15 + $0x70] sm:$0xff]  ;;  %v3554_v56 = vld [vmem:[%s5816_s15 + $0x60] sm:$0xff] }
 0x241   : > { %3337 = vst.msk [vmem:[#allocation2 + $0x78] sm:$0xff] %vm1699_vm7, %v3321_v10  ;;  %v3319_v57 = vadd.f32 %v3294_v20, %v3172_v37  ;;  %v3507_v50 = vld [vmem:[#allocation2 + $0x20] sm:$0xff]  ;;  %v4248_v3 = vpop.f32.mrf.mxu0  ;;  %v3347_v14 = vld [vmem:[#allocation2 + $0x48] sm:$0xff]  ;;  %v3557_v62 = vld [vmem:[%s5816_s15 + $0x78] sm:$0xff] }
 0x242   : > { %3575 = vst.msk [vmem:[%s5836_s20 + $0x8] sm:$0xff] %vm1699_vm7, %v3559_v46  ;;  %v3564_v29 = vadd.f32 %v3548_v5, %v3532_v39  ;;  %v3530_v8 = vadd.f32 %v5823_v6, %v3507_v50  ;;  %3495 = vst.msk [vmem:[#allocation2 + $0x40] sm:$0xff] %vm1699_vm7, %v3479_v33  ;;  %v3482_v0 = vadd.f32 %v4248_v3, %v3349_v30  ;;  %v3555_v30 = vld [vmem:[%s5816_s15 + $0x68] sm:$0xff] }
 0x243   : > { %3335 = vst.msk [vmem:[#allocation2 + $0x68] sm:$0xff] %vm1699_vm7, %v3319_v57  ;;  %v3510_v9 = vld [vmem:[#allocation2 + $0x38] sm:$0xff]  ;;  %v3443_v27 = vpop.f32.mrf.mxu0 }
 0x244   : > { %v3352_v19 = vld [vmem:[#allocation2 + $0x70] sm:$0xff]  ;;  %3580 = vst.msk [vmem:[%s5836_s20 + $0x30] sm:$0xff] %vm1699_vm7, %v3564_v29  ;;  %v3562_v45 = vadd.f32 %v3546_v22, %v3530_v8  ;;  %v3533_v1 = vadd.f32 %v5823_v6, %v3510_v9  ;;  %3498 = vst.msk [vmem:[#allocation2 + $0x58] sm:$0xff] %vm1699_vm7, %v3482_v0  ;;  %v3480_v43 = vadd.f32 %v3443_v27, %v3347_v14 }
 0x245   : > { %v3508_v25 = vld [vmem:[#allocation2 + $0x28] sm:$0xff]  ;;  %v4251_v54 = vpop.f32.mrf.mxu0 }
 0x246   : > { %v3350_v44 = vld [vmem:[#allocation2 + $0x60] sm:$0xff]  ;;  %3578 = vst.msk [vmem:[%s5836_s20 + $0x20] sm:$0xff] %vm1699_vm7, %v3562_v45  ;;  %v3565_v35 = vadd.f32 %v3549_v38, %v3533_v1  ;;  %v3531_v7 = vadd.f32 %v5823_v6, %v3508_v25  ;;  %3496 = vst.msk [vmem:[#allocation2 + $0x48] sm:$0xff] %vm1699_vm7, %v3480_v43  ;;  %v3485_v16 = vadd.f32 %v4251_v54, %v3352_v19 }
 0x247   : > { %v3513_v51 = vld [vmem:[#allocation2 + $0x50] sm:$0xff]  ;;  %v3456_v48 = vpop.f32.mrf.mxu0 }
 0x248   : > { %v3353_v23 = vld [vmem:[#allocation2 + $0x78] sm:$0xff]  ;;  %3581 = vst.msk [vmem:[%s5836_s20 + $0x38] sm:$0xff] %vm1699_vm7, %v3565_v35  ;;  %v3563_v13 = vadd.f32 %v3547_v18, %v3531_v7  ;;  %v3536_v15 = vadd.f32 %v5823_v6, %v3513_v51  ;;  %3501 = vst.msk [vmem:[#allocation2 + $0x70] sm:$0xff] %vm1699_vm7, %v3485_v16  ;;  %v3483_v36 = vadd.f32 %v3456_v48, %v3350_v44 }
 0x249   : > { %v3511_v53 = vld [vmem:[#allocation2 + $0x40] sm:$0xff]  ;;  %v4252_v4 = vpop.f32.mrf.mxu0 }
 0x24a   : > { %v3351_v21 = vld [vmem:[#allocation2 + $0x68] sm:$0xff]  ;;  %3579 = vst.msk [vmem:[%s5836_s20 + $0x28] sm:$0xff] %vm1699_vm7, %v3563_v13  ;;  %v3568_v60 = vadd.f32 %v3552_v47, %v3536_v15  ;;  %v3534_v61 = vadd.f32 %v5823_v6, %v3511_v53  ;;  %3499 = vst.msk [vmem:[#allocation2 + $0x60] sm:$0xff] %vm1699_vm7, %v3483_v36  ;;  %v3486_v41 = vadd.f32 %v4252_v4, %v3353_v23 }
 0x24b   : > { %v3514_v59 = vld [vmem:[#allocation2 + $0x58] sm:$0xff]  ;;  %v3459_v24 = vpop.f32.mrf.mxu0 }
 0x24c   : > { %3584 = vst.msk [vmem:[%s5836_s20 + $0x50] sm:$0xff] %vm1699_vm7, %v3568_v60  ;;  %v3566_v17 = vadd.f32 %v3550_v2, %v3534_v61  ;;  %v3537_v31 = vadd.f32 %v5823_v6, %v3514_v59  ;;  %3502 = vst.msk [vmem:[#allocation2 + $0x78] sm:$0xff] %vm1699_vm7, %v3486_v41  ;;  %v3484_v42 = vadd.f32 %v3459_v24, %v3351_v21 }
 0x24d   : > { %v3512_v40 = vld [vmem:[#allocation2 + $0x48] sm:$0xff] }
 0x24e   : > { %3582 = vst.msk [vmem:[%s5836_s20 + $0x40] sm:$0xff] %vm1699_vm7, %v3566_v17  ;;  %v3569_v55 = vadd.f32 %v3553_v52, %v3537_v31  ;;  %v3535_v12 = vadd.f32 %v5823_v6, %v3512_v40  ;;  %3500 = vst.msk [vmem:[#allocation2 + $0x68] sm:$0xff] %vm1699_vm7, %v3484_v42 }
 0x24f   : > { %v3517_v26 = vld [vmem:[#allocation2 + $0x70] sm:$0xff] }
 0x250   : > { %3585 = vst.msk [vmem:[%s5836_s20 + $0x58] sm:$0xff] %vm1699_vm7, %v3569_v55  ;;  %v3567_v63 = vadd.f32 %v3551_v49, %v3535_v12  ;;  %v3540_v11 = vadd.f32 %v5823_v6, %v3517_v26 }
 0x251   : > { %v3515_v58 = vld [vmem:[#allocation2 + $0x60] sm:$0xff] }
 0x252   : > { %3583 = vst.msk [vmem:[%s5836_s20 + $0x48] sm:$0xff] %vm1699_vm7, %v3567_v63  ;;  %v3572_v5 = vadd.f32 %v3556_v28, %v3540_v11  ;;  %v3538_v34 = vadd.f32 %v5823_v6, %v3515_v58 }
 0x253   : > { %v3518_v10 = vld [vmem:[#allocation2 + $0x78] sm:$0xff] }
 0x254   : > { %3588 = vst.msk [vmem:[%s5836_s20 + $0x70] sm:$0xff] %vm1699_vm7, %v3572_v5  ;;  %v3570_v32 = vadd.f32 %v3554_v56, %v3538_v34  ;;  %v3541_v37 = vadd.f32 %v5823_v6, %v3518_v10 }
 0x255   : > { %v3516_v20 = vld [vmem:[#allocation2 + $0x68] sm:$0xff] }
 0x256   : > { %3586 = vst.msk [vmem:[%s5836_s20 + $0x60] sm:$0xff] %vm1699_vm7, %v3570_v32  ;;  %v3573_v46 = vadd.f32 %v3557_v62, %v3541_v37  ;;  %v3539_v39 = vadd.f32 %v5823_v6, %v3516_v20 }
 0x258   : > { %3589 = vst.msk [vmem:[%s5836_s20 + $0x78] sm:$0xff] %vm1699_vm7, %v3573_v46  ;;  %v3571_v33 = vadd.f32 %v3555_v30, %v3539_v39 }
 0x25a   : > { %3587 = vst.msk [vmem:[%s5836_s20 + $0x68] sm:$0xff] %vm1699_vm7, %v3571_v33 }
 0x25b PF: > { %s17_s28 = sadd.s32 1, %s4494_s28   ;;  %s5971_s24 = smov %s4486_s26 }
 0x25c   : > { %p14_p11 = scmp.ge.s32.totalorder %s17_s28, 6   ;;  %s5972_s25 = smov %s4490_s27 }
 0x25d   : > { %s5973_s26 = smov %s5976_s29  ;;  %s5974_s27 = smov %s5980_s30 }
 0x25e   :  { %16 = sbr.rel (!%p14_p11) target bundleno = 3 (0x3), region = 98 }

</bundles_post_ra>
